<compile_context>
chip_gen: v7x
topology: tpu7x:2x2x1
jax: 0.10.0
libtpu: 0.0.40
codegen_flags: <defaults>
</compile_context>

<pallas_src>
import jax
import jax.numpy as jnp
from jax.experimental import pallas as pl
from jax.experimental.pallas import tpu as pltpu


def _make_kernel(H, W, Wpad, Cin, Cout, G, cpg, eps=1e-5):
    LW = Wpad * Cout
    inv_n = 1.0 / float(H * W * cpg)

    def stack2(a, b):
        # stack two (1, K) rows into a (2, K) value (VPU-only, no concatenate needed)
        r = jax.lax.broadcasted_iota(jnp.int32, (2, a.shape[1]), 0)
        return jnp.where(r == 0, a, b)

    def kernel(x_ref, film_ref, w1_ref, w2_ref, sh_ref, bias_ref,
               gn1_ref, gn2_ref, lmask_ref, gm_ref, gmt_ref, o_ref):
        f32 = jnp.float32

        def group_norm(h, gamma, beta):
            csum = jnp.sum(h, axis=0, keepdims=True)           # (1, LW)
            css = jnp.sum(h * h, axis=0, keepdims=True)        # (1, LW)
            stats = stack2(csum, css)                          # (2, LW)
            g = jnp.dot(stats, gm_ref[...], preferred_element_type=f32)   # (2, G)
            mean = g[0:1, :] * inv_n
            # clamp: single-pass E[x^2]-mean^2 can cancel to a tiny negative
            var = jnp.maximum(g[1:2, :] * inv_n - mean * mean, 0.0)
            inv = jax.lax.rsqrt(var + eps)
            mi = stack2(mean, inv)                             # (2, G)
            mil = jnp.dot(mi, gmt_ref[...], preferred_element_type=f32)   # (2, LW)
            return (h - mil[0:1, :]) * mil[1:2, :] * gamma + beta

        # ---- conv1: 3 banded block-Toeplitz matmuls (dy = row-shifted input slices) ----
        h = (jnp.dot(x_ref[0:H, :], w1_ref[0], preferred_element_type=f32)
             + jnp.dot(x_ref[1:H + 1, :], w1_ref[1], preferred_element_type=f32)
             + jnp.dot(x_ref[2:H + 2, :], w1_ref[2], preferred_element_type=f32)
             + bias_ref[0:1, :])
        h = group_norm(h, gn1_ref[0:1, :], gn1_ref[1:2, :])
        h = h * jax.nn.sigmoid(h)                              # SiLU

        # ---- FiLM (scale/shift precomputed in wrapper), then zero the lane-padding
        # ---- columns so conv2's right-edge zero padding is honoured.
        h = (h * film_ref[0:1, :] + film_ref[1:2, :]) * lmask_ref[...]

        # ---- conv2: one stacked matmul over the 3 dy taps; tiny (H,H) shift matmuls
        # ---- supply the vertical zero padding (no scratch, no zero-fill).
        p = jnp.dot(h, w2_ref[...], preferred_element_type=f32)           # (H, 3*LW)
        h2 = (jnp.dot(sh_ref[0], p[:, 0:LW], preferred_element_type=f32)
              + p[:, LW:2 * LW]
              + jnp.dot(sh_ref[1], p[:, 2 * LW:3 * LW], preferred_element_type=f32)
              + bias_ref[1:2, :])
        h2 = group_norm(h2, gn2_ref[0:1, :], gn2_ref[1:2, :])
        h2 = h2 * jax.nn.sigmoid(h2)
        o_ref[...] = h2.astype(o_ref.dtype)                    # lane-dense (H, LW) store

    return kernel


def conditional_conv_block(x, t_emb, params):
    """x: (N, Cin, H, W) f32, t_emb: (N, T) f32  ->  (N, Cout, H, W) f32."""
    N, Cin, H, W = x.shape
    Cout = params["w1"].shape[-1]

    # num_groups exactly as in the PyTorch __init__
    G = min(8, Cout)
    while Cout % G != 0:
        G -= 1
    cpg = Cout // G

    Wpad = ((W + 2 + 7) // 8) * 8        # padded row stride; LW becomes a multiple of 128
    Hp = H + 2
    LW = Wpad * Cout
    WCin = Wpad * Cin
    f32 = jnp.float32

    # ---- glue: input layout NCHW -> zero-padded (N, Hp, Wpad*Cin), block xi = pixel xi-1
    xn = jnp.transpose(x, (0, 2, 3, 1)).astype(f32)
    xp = jnp.pad(xn, ((0, 0), (1, 1), (1, Wpad - W - 1), (0, 0)))
    x_flat = xp.reshape(N, Hp, WCin)

    # ---- banded block-Toeplitz conv weights (built once; VMEM-resident via const index map)
    w1 = params["w1"].astype(f32)        # (3, 3, Cin, Cout) HWIO
    w2 = params["w2"].astype(f32)        # (3, 3, Cout, Cout)
    xi = jnp.arange(Wpad)
    xo = jnp.arange(Wpad)
    col_valid = xo < W

    dx1 = xi[:, None] - xo[None, :]                              # conv1 input: block xi = pixel xi-1
    band1 = (dx1 >= 0) & (dx1 <= 2) & col_valid[None, :]
    B1 = w1[:, jnp.clip(dx1, 0, 2), :, :] * band1[None, :, :, None, None].astype(f32)
    B1 = jnp.transpose(B1, (0, 1, 3, 2, 4)).reshape(3, WCin, LW)  # rows xi*Cin+ci, cols xo*Cout+co

    dx2 = xi[:, None] - xo[None, :] + 1                          # conv2 input: block xi = pixel xi
    band2 = (dx2 >= 0) & (dx2 <= 2) & col_valid[None, :]
    B2 = w2[:, jnp.clip(dx2, 0, 2), :, :] * band2[None, :, :, None, None].astype(f32)
    B2 = jnp.transpose(B2, (0, 1, 3, 2, 4)).reshape(3, LW, LW)
    B2s = jnp.concatenate([B2[0], B2[1], B2[2]], axis=1)         # (LW, 3*LW), [dy0|dy1|dy2]

    # vertical-shift matrices for conv2's dy=0 / dy=2 taps
    yy = jnp.arange(H)
    S_dn = (yy[:, None] - 1 == yy[None, :]).astype(f32)          # out[y] += P0[y-1]
    S_up = (yy[:, None] + 1 == yy[None, :]).astype(f32)          # out[y] += P2[y+1]
    shifts = jnp.stack([S_dn, S_up], axis=0)                     # (2, H, H)

    # lane-tiled per-channel constants
    cvf = col_valid.astype(f32)

    def tile_c(v):                                               # (Cout,) -> (1, LW)
        return jnp.tile(v.reshape(1, Cout), (Wpad, 1)).reshape(1, LW)

    def tile_c_masked(v):                                        # zero on lane-padding columns
        return (cvf[:, None] * v.reshape(1, Cout)).reshape(1, LW)

    biases = jnp.concatenate([tile_c_masked(params["b1"].astype(f32)),
                              tile_c_masked(params["b2"].astype(f32))], axis=0)    # (2, LW)
    gn1 = jnp.concatenate([tile_c(params["gamma1"].astype(f32)),
                           tile_c(params["beta1"].astype(f32))], axis=0)           # (2, LW)
    gn2 = jnp.concatenate([tile_c(params["gamma2"].astype(f32)),
                           tile_c(params["beta2"].astype(f32))], axis=0)           # (2, LW)
    lmask = jnp.tile(cvf[:, None], (1, Cout)).reshape(1, LW)                       # (1, LW)

    # GroupNorm group-selection (stats, pad columns excluded) and broadcast matrices
    grp = jnp.arange(Cout) // cpg
    gm_c = (grp[:, None] == jnp.arange(G)[None, :]).astype(f32)                    # (Cout, G)
    Gm = (cvf[:, None, None] * gm_c[None, :, :]).reshape(LW, G)                    # (LW, G)
    GmT = jnp.tile(gm_c.T, (1, Wpad))                                              # (G, LW)

    # FiLM: silu(t_emb) @ wt + bt done once in XLA, lane-tiled, per-image block
    ts = jax.nn.silu(t_emb.astype(f32)) @ params["wt"].astype(f32) + params["bt"].astype(f32)
    scale, shift = ts[:, :Cout], ts[:, Cout:]
    film = jnp.concatenate(
        [jnp.tile((1.0 + scale)[:, None, :], (1, Wpad, 1)).reshape(N, 1, LW),
         jnp.tile(shift[:, None, :], (1, Wpad, 1)).reshape(N, 1, LW)], axis=1)     # (N, 2, LW)

    kernel = _make_kernel(H, W, Wpad, Cin, Cout, G, cpg)

    in_specs = [
        pl.BlockSpec((None, Hp, WCin), lambda b: (b, 0, 0)),      # x (per image)
        pl.BlockSpec((None, 2, LW), lambda b: (b, 0, 0)),         # FiLM (per image)
        pl.BlockSpec((3, WCin, LW), lambda b: (0, 0, 0)),         # conv1 Toeplitz weights
        pl.BlockSpec((LW, 3 * LW), lambda b: (0, 0)),             # conv2 stacked Toeplitz weights
        pl.BlockSpec((2, H, H), lambda b: (0, 0, 0)),             # row-shift matrices
        pl.BlockSpec((2, LW), lambda b: (0, 0)),                  # conv biases (lane-tiled)
        pl.BlockSpec((2, LW), lambda b: (0, 0)),                  # gamma1 / beta1
        pl.BlockSpec((2, LW), lambda b: (0, 0)),                  # gamma2 / beta2
        pl.BlockSpec((1, LW), lambda b: (0, 0)),                  # valid-column lane mask
        pl.BlockSpec((LW, G), lambda b: (0, 0)),                  # group selection
        pl.BlockSpec((G, LW), lambda b: (0, 0)),                  # group broadcast
    ]

    # Grid over batch, shardable across TensorCores (megacore / v7x).  Total VMEM use
    # (Toeplitz weights + blocks) is only a few MiB, well inside every chip's scoped limit.
    # For large N, a batch-block > 1 per grid step would amortize per-step overhead further.
    out_flat = pl.pallas_call(
        kernel,
        out_shape=jax.ShapeDtypeStruct((N, H, LW), jnp.float32),
        grid=(N,),
        in_specs=in_specs,
        out_specs=pl.BlockSpec((None, H, LW), lambda b: (b, 0, 0)),   # lane-dense output
        compiler_params=pltpu.CompilerParams(dimension_semantics=("parallel",)),
    )(x_flat, film, B1, B2s, shifts, biases, gn1, gn2, lmask, Gm, GmT)

    # glue: drop the lane-padding columns, back to NCHW
    out = out_flat.reshape(N, H, Wpad, Cout)[:, :, :W, :]
    return jnp.transpose(out, (0, 3, 1, 2))


# ---------------- pure-JAX reference (for correctness check) ----------------
def _group_norm_ref(h, G, gamma, beta, eps=1e-5):
    N, H, W, C = h.shape
    hg = h.reshape(N, H, W, G, C // G)
    mean = hg.mean(axis=(1, 2, 4), keepdims=True)
    var = hg.var(axis=(1, 2, 4), keepdims=True)
    hg = (hg - mean) * jax.lax.rsqrt(var + eps)
    return hg.reshape(N, H, W, C) * gamma + beta


def reference_forward(x, t_emb, params):
    Cout = params["w1"].shape[-1]
    G = min(8, Cout)
    while Cout % G != 0:
        G -= 1
    h = jnp.transpose(x, (0, 2, 3, 1))
    h = jax.lax.conv_general_dilated(
        h, params["w1"], (1, 1), ((1, 1), (1, 1)),
        dimension_numbers=("NHWC", "HWIO", "NHWC")) + params["b1"]
    h = _group_norm_ref(h, G, params["gamma1"], params["beta1"])
    h = jax.nn.silu(h)
    ts = jax.nn.silu(t_emb) @ params["wt"] + params["bt"]
    scale, shift = ts[:, :Cout], ts[:, Cout:]
    h = h * (1.0 + scale[:, None, None, :]) + shift[:, None, None, :]
    h = jax.lax.conv_general_dilated(
        h, params["w2"], (1, 1), ((1, 1), (1, 1)),
        dimension_numbers=("NHWC", "HWIO", "NHWC")) + params["b2"]
    h = _group_norm_ref(h, G, params["gamma2"], params["beta2"])
    h = jax.nn.silu(h)
    return jnp.transpose(h, (0, 3, 1, 2))


if __name__ == "__main__":
    key = jax.random.PRNGKey(0)
    N, Cin, Cout, H, W, T = 2, 4, 16, 16, 16, 32
    ks = jax.random.split(key, 12)
    params = dict(
        w1=0.3 * jax.random.normal(ks[0], (3, 3, Cin, Cout), jnp.float32),    # HWIO
        b1=0.1 * jax.random.normal(ks[1], (Cout,), jnp.float32),
        gamma1=1.0 + 0.1 * jax.random.normal(ks[2], (Cout,), jnp.float32),
        beta1=0.1 * jax.random.normal(ks[3], (Cout,), jnp.float32),
        w2=0.2 * jax.random.normal(ks[4], (3, 3, Cout, Cout), jnp.float32),   # HWIO
        b2=0.1 * jax.random.normal(ks[5], (Cout,), jnp.float32),
        gamma2=1.0 + 0.1 * jax.random.normal(ks[6], (Cout,), jnp.float32),
        beta2=0.1 * jax.random.normal(ks[7], (Cout,), jnp.float32),
        wt=0.3 * jax.random.normal(ks[8], (T, 2 * Cout), jnp.float32),        # (T, 2*Cout)
        bt=0.1 * jax.random.normal(ks[9], (2 * Cout,), jnp.float32),
    )
    x = jax.random.normal(ks[10], (N, Cin, H, W), jnp.float32)
    t_emb = jax.random.normal(ks[11], (N, T), jnp.float32)

    fwd = jax.jit(conditional_conv_block)
    out = jax.block_until_ready(fwd(x, t_emb, params))
    ref = jax.block_until_ready(reference_forward(x, t_emb, params))
    assert out.shape == (N, Cout, H, W), out.shape
    max_err = float(jnp.max(jnp.abs(out - ref)))
    assert max_err < 1e-2, f"max abs err vs reference = {max_err}"
    print("KERNEL_OK")
</pallas_src>

<mosaic_0001>
module attributes {stable_mosaic.version = 11 : i64} {
  func.func @kernel(%arg0: i32, %arg1: memref<1x18x96xf32, #tpu.memory_space<vmem>>, %arg2: memref<1x2x384xf32, #tpu.memory_space<vmem>>, %arg3: memref<3x96x384xf32, #tpu.memory_space<vmem>>, %arg4: memref<384x1152xf32, #tpu.memory_space<vmem>>, %arg5: memref<2x16x16xf32, #tpu.memory_space<vmem>>, %arg6: memref<2x384xf32, #tpu.memory_space<vmem>>, %arg7: memref<2x384xf32, #tpu.memory_space<vmem>>, %arg8: memref<2x384xf32, #tpu.memory_space<vmem>>, %arg9: memref<1x384xf32, #tpu.memory_space<vmem>>, %arg10: memref<384x8xf32, #tpu.memory_space<vmem>>, %arg11: memref<8x384xf32, #tpu.memory_space<vmem>>, %arg12: memref<1x16x384xf32, #tpu.memory_space<vmem>>) attributes {dimension_semantics = [#tpu.dimension_semantics<parallel>], iteration_bounds = array<i64: 2>, scalar_prefetch = 0 : i64, scratch_operands = 0 : i64, tpu.core_type = #tpu.core_type<tc>, window_params = [{transform_indices = @transform_0, window_bounds = array<i64: 1, 18, 96>}, {transform_indices = @transform_1, window_bounds = array<i64: 1, 2, 384>}, {pipeline_mode = #tpu.pipeline_mode<synchronous>, transform_indices = @transform_2, window_bounds = array<i64: 3, 96, 384>}, {pipeline_mode = #tpu.pipeline_mode<synchronous>, transform_indices = @transform_3, window_bounds = array<i64: 384, 1152>}, {pipeline_mode = #tpu.pipeline_mode<synchronous>, transform_indices = @transform_4, window_bounds = array<i64: 2, 16, 16>}, {pipeline_mode = #tpu.pipeline_mode<synchronous>, transform_indices = @transform_5, window_bounds = array<i64: 2, 384>}, {pipeline_mode = #tpu.pipeline_mode<synchronous>, transform_indices = @transform_6, window_bounds = array<i64: 2, 384>}, {pipeline_mode = #tpu.pipeline_mode<synchronous>, transform_indices = @transform_7, window_bounds = array<i64: 2, 384>}, {pipeline_mode = #tpu.pipeline_mode<synchronous>, transform_indices = @transform_8, window_bounds = array<i64: 1, 384>}, {pipeline_mode = #tpu.pipeline_mode<synchronous>, transform_indices = @transform_9, window_bounds = array<i64: 384, 8>}, {pipeline_mode = #tpu.pipeline_mode<synchronous>, transform_indices = @transform_10, window_bounds = array<i64: 8, 384>}, {transform_indices = @transform_11, window_bounds = array<i64: 1, 16, 384>}]} {
    %c0 = arith.constant 0 : index
    %c0_0 = arith.constant 0 : index
    %c0_1 = arith.constant 0 : index
    %0 = vector.load %arg1[%c0, %c0_0, %c0_1] : memref<1x18x96xf32, #tpu.memory_space<vmem>>, vector<1x16x96xf32>
    %1 = vector.shape_cast %0 : vector<1x16x96xf32> to vector<16x96xf32>
    %c0_2 = arith.constant 0 : index
    %c0_3 = arith.constant 0 : index
    %c0_4 = arith.constant 0 : index
    %2 = vector.load %arg3[%c0_2, %c0_3, %c0_4] : memref<3x96x384xf32, #tpu.memory_space<vmem>>, vector<1x96x384xf32>
    %3 = vector.shape_cast %2 : vector<1x96x384xf32> to vector<96x384xf32>
    %cst = arith.constant dense<0.000000e+00> : vector<16x384xf32>
    %4 = tpu.matmul %1, %3, %cst {dimension_numbers = #tpu.dot_dimension_numbers<[1], [0], [0], [1], [0, 0, 1, 1], [], []>} : vector<16x96xf32>, vector<96x384xf32>, vector<16x384xf32> -> vector<16x384xf32>
    %c0_5 = arith.constant 0 : index
    %c1 = arith.constant 1 : index
    %c0_6 = arith.constant 0 : index
    %5 = vector.load %arg1[%c0_5, %c1, %c0_6] : memref<1x18x96xf32, #tpu.memory_space<vmem>>, vector<1x16x96xf32>
    %6 = vector.shape_cast %5 : vector<1x16x96xf32> to vector<16x96xf32>
    %c1_7 = arith.constant 1 : index
    %c0_8 = arith.constant 0 : index
    %c0_9 = arith.constant 0 : index
    %7 = vector.load %arg3[%c1_7, %c0_8, %c0_9] : memref<3x96x384xf32, #tpu.memory_space<vmem>>, vector<1x96x384xf32>
    %8 = vector.shape_cast %7 : vector<1x96x384xf32> to vector<96x384xf32>
    %cst_10 = arith.constant dense<0.000000e+00> : vector<16x384xf32>
    %9 = tpu.matmul %6, %8, %cst_10 {dimension_numbers = #tpu.dot_dimension_numbers<[1], [0], [0], [1], [0, 0, 1, 1], [], []>} : vector<16x96xf32>, vector<96x384xf32>, vector<16x384xf32> -> vector<16x384xf32>
    %10 = arith.addf %4, %9 : vector<16x384xf32>
    %c0_11 = arith.constant 0 : index
    %c2 = arith.constant 2 : index
    %c0_12 = arith.constant 0 : index
    %11 = vector.load %arg1[%c0_11, %c2, %c0_12] : memref<1x18x96xf32, #tpu.memory_space<vmem>>, vector<1x16x96xf32>
    %12 = vector.shape_cast %11 : vector<1x16x96xf32> to vector<16x96xf32>
    %c2_13 = arith.constant 2 : index
    %c0_14 = arith.constant 0 : index
    %c0_15 = arith.constant 0 : index
    %13 = vector.load %arg3[%c2_13, %c0_14, %c0_15] : memref<3x96x384xf32, #tpu.memory_space<vmem>>, vector<1x96x384xf32>
    %14 = vector.shape_cast %13 : vector<1x96x384xf32> to vector<96x384xf32>
    %cst_16 = arith.constant dense<0.000000e+00> : vector<16x384xf32>
    %15 = tpu.matmul %12, %14, %cst_16 {dimension_numbers = #tpu.dot_dimension_numbers<[1], [0], [0], [1], [0, 0, 1, 1], [], []>} : vector<16x96xf32>, vector<96x384xf32>, vector<16x384xf32> -> vector<16x384xf32>
    %16 = arith.addf %10, %15 : vector<16x384xf32>
    %c0_17 = arith.constant 0 : index
    %c0_18 = arith.constant 0 : index
    %17 = vector.load %arg6[%c0_17, %c0_18] : memref<2x384xf32, #tpu.memory_space<vmem>>, vector<1x384xf32>
    %18 = vector.broadcast %17 : vector<1x384xf32> to vector<16x384xf32>
    %19 = arith.addf %16, %18 : vector<16x384xf32>
    %c0_19 = arith.constant 0 : index
    %c0_20 = arith.constant 0 : index
    %20 = vector.load %arg7[%c0_19, %c0_20] : memref<2x384xf32, #tpu.memory_space<vmem>>, vector<1x384xf32>
    %c1_21 = arith.constant 1 : index
    %c0_22 = arith.constant 0 : index
    %21 = vector.load %arg7[%c1_21, %c0_22] : memref<2x384xf32, #tpu.memory_space<vmem>>, vector<1x384xf32>
    %cst_23 = arith.constant dense<0.000000e+00> : vector<384xf32>
    %22 = vector.multi_reduction <add>, %19, %cst_23 [0] : vector<16x384xf32> to vector<384xf32>
    %23 = vector.shape_cast %22 : vector<384xf32> to vector<1x384xf32>
    %24 = arith.mulf %19, %19 : vector<16x384xf32>
    %cst_24 = arith.constant dense<0.000000e+00> : vector<384xf32>
    %25 = vector.multi_reduction <add>, %24, %cst_24 [0] : vector<16x384xf32> to vector<384xf32>
    %26 = vector.shape_cast %25 : vector<384xf32> to vector<1x384xf32>
    %27 = tpu.iota {dimensions = array<i32: 0>} : vector<2x384xi32>
    %c0_i32 = arith.constant 0 : i32
    %28 = vector.broadcast %c0_i32 : i32 to vector<2x384xi32>
    %29 = arith.cmpi eq, %27, %28 : vector<2x384xi32>
    %30 = vector.shape_cast %23 : vector<1x384xf32> to vector<1x384xf32>
    %31 = vector.broadcast %30 : vector<1x384xf32> to vector<2x384xf32>
    %32 = vector.shape_cast %26 : vector<1x384xf32> to vector<1x384xf32>
    %33 = vector.broadcast %32 : vector<1x384xf32> to vector<2x384xf32>
    %34 = arith.select %29, %31, %33 : vector<2x384xi1>, vector<2x384xf32>
    %c0_25 = arith.constant 0 : index
    %c0_26 = arith.constant 0 : index
    %35 = vector.load %arg10[%c0_25, %c0_26] : memref<384x8xf32, #tpu.memory_space<vmem>>, vector<384x8xf32>
    %cst_27 = arith.constant dense<0.000000e+00> : vector<2x8xf32>
    %36 = tpu.matmul %34, %35, %cst_27 {dimension_numbers = #tpu.dot_dimension_numbers<[1], [0], [0], [1], [0, 0, 1, 1], [], []>} : vector<2x384xf32>, vector<384x8xf32>, vector<2x8xf32> -> vector<2x8xf32>
    %37 = vector.extract_strided_slice %36 {offsets = [0, 0], sizes = [1, 8], strides = [1, 1]} : vector<2x8xf32> to vector<1x8xf32>
    %cst_28 = arith.constant 0.001953125 : f32
    %38 = vector.broadcast %cst_28 : f32 to vector<1x8xf32>
    %39 = arith.mulf %37, %38 : vector<1x8xf32>
    %40 = vector.extract_strided_slice %36 {offsets = [1, 0], sizes = [1, 8], strides = [1, 1]} : vector<2x8xf32> to vector<1x8xf32>
    %cst_29 = arith.constant 0.001953125 : f32
    %41 = vector.broadcast %cst_29 : f32 to vector<1x8xf32>
    %42 = arith.mulf %40, %41 : vector<1x8xf32>
    %43 = arith.mulf %39, %39 : vector<1x8xf32>
    %44 = arith.subf %42, %43 : vector<1x8xf32>
    %cst_30 = arith.constant 0.000000e+00 : f32
    %45 = vector.broadcast %cst_30 : f32 to vector<1x8xf32>
    %46 = arith.maximumf %44, %45 : vector<1x8xf32>
    %cst_31 = arith.constant 9.99999974E-6 : f32
    %47 = vector.broadcast %cst_31 : f32 to vector<1x8xf32>
    %48 = arith.addf %46, %47 : vector<1x8xf32>
    %49 = math.rsqrt %48 : vector<1x8xf32>
    %50 = tpu.iota {dimensions = array<i32: 0>} : vector<2x8xi32>
    %c0_i32_32 = arith.constant 0 : i32
    %51 = vector.broadcast %c0_i32_32 : i32 to vector<2x8xi32>
    %52 = arith.cmpi eq, %50, %51 : vector<2x8xi32>
    %53 = vector.shape_cast %39 : vector<1x8xf32> to vector<1x8xf32>
    %54 = vector.broadcast %53 : vector<1x8xf32> to vector<2x8xf32>
    %55 = vector.shape_cast %49 : vector<1x8xf32> to vector<1x8xf32>
    %56 = vector.broadcast %55 : vector<1x8xf32> to vector<2x8xf32>
    %57 = arith.select %52, %54, %56 : vector<2x8xi1>, vector<2x8xf32>
    %c0_33 = arith.constant 0 : index
    %c0_34 = arith.constant 0 : index
    %58 = vector.load %arg11[%c0_33, %c0_34] : memref<8x384xf32, #tpu.memory_space<vmem>>, vector<8x384xf32>
    %cst_35 = arith.constant dense<0.000000e+00> : vector<2x384xf32>
    %59 = tpu.matmul %57, %58, %cst_35 {dimension_numbers = #tpu.dot_dimension_numbers<[1], [0], [0], [1], [0, 0, 1, 1], [], []>} : vector<2x8xf32>, vector<8x384xf32>, vector<2x384xf32> -> vector<2x384xf32>
    %60 = vector.extract_strided_slice %59 {offsets = [0, 0], sizes = [1, 384], strides = [1, 1]} : vector<2x384xf32> to vector<1x384xf32>
    %61 = vector.broadcast %60 : vector<1x384xf32> to vector<16x384xf32>
    %62 = arith.subf %19, %61 : vector<16x384xf32>
    %63 = vector.extract_strided_slice %59 {offsets = [1, 0], sizes = [1, 384], strides = [1, 1]} : vector<2x384xf32> to vector<1x384xf32>
    %64 = vector.broadcast %63 : vector<1x384xf32> to vector<16x384xf32>
    %65 = arith.mulf %62, %64 : vector<16x384xf32>
    %66 = vector.broadcast %20 : vector<1x384xf32> to vector<16x384xf32>
    %67 = arith.mulf %65, %66 : vector<16x384xf32>
    %68 = vector.broadcast %21 : vector<1x384xf32> to vector<16x384xf32>
    %69 = arith.addf %67, %68 : vector<16x384xf32>
    %70 = arith.negf %69 : vector<16x384xf32>
    %71 = math.exp %70 : vector<16x384xf32>
    %cst_36 = arith.constant 1.000000e+00 : f32
    %72 = vector.broadcast %cst_36 : f32 to vector<16x384xf32>
    %73 = arith.addf %72, %71 : vector<16x384xf32>
    %74 = arith.divf %72, %73 : vector<16x384xf32>
    %75 = arith.mulf %69, %74 : vector<16x384xf32>
    %c0_37 = arith.constant 0 : index
    %c0_38 = arith.constant 0 : index
    %c0_39 = arith.constant 0 : index
    %76 = vector.load %arg2[%c0_37, %c0_38, %c0_39] : memref<1x2x384xf32, #tpu.memory_space<vmem>>, vector<1x1x384xf32>
    %77 = vector.shape_cast %76 : vector<1x1x384xf32> to vector<1x384xf32>
    %78 = vector.broadcast %77 : vector<1x384xf32> to vector<16x384xf32>
    %79 = arith.mulf %75, %78 : vector<16x384xf32>
    %c0_40 = arith.constant 0 : index
    %c1_41 = arith.constant 1 : index
    %c0_42 = arith.constant 0 : index
    %80 = vector.load %arg2[%c0_40, %c1_41, %c0_42] : memref<1x2x384xf32, #tpu.memory_space<vmem>>, vector<1x1x384xf32>
    %81 = vector.shape_cast %80 : vector<1x1x384xf32> to vector<1x384xf32>
    %82 = vector.broadcast %81 : vector<1x384xf32> to vector<16x384xf32>
    %83 = arith.addf %79, %82 : vector<16x384xf32>
    %c0_43 = arith.constant 0 : index
    %c0_44 = arith.constant 0 : index
    %84 = vector.load %arg9[%c0_43, %c0_44] : memref<1x384xf32, #tpu.memory_space<vmem>>, vector<1x384xf32>
    %85 = vector.broadcast %84 : vector<1x384xf32> to vector<16x384xf32>
    %86 = arith.mulf %83, %85 : vector<16x384xf32>
    %c0_45 = arith.constant 0 : index
    %c0_46 = arith.constant 0 : index
    %87 = vector.load %arg4[%c0_45, %c0_46] : memref<384x1152xf32, #tpu.memory_space<vmem>>, vector<384x1152xf32>
    %cst_47 = arith.constant dense<0.000000e+00> : vector<16x1152xf32>
    %88 = tpu.matmul %86, %87, %cst_47 {dimension_numbers = #tpu.dot_dimension_numbers<[1], [0], [0], [1], [0, 0, 1, 1], [], []>} : vector<16x384xf32>, vector<384x1152xf32>, vector<16x1152xf32> -> vector<16x1152xf32>
    %c0_48 = arith.constant 0 : index
    %c0_49 = arith.constant 0 : index
    %c0_50 = arith.constant 0 : index
    %89 = vector.load %arg5[%c0_48, %c0_49, %c0_50] : memref<2x16x16xf32, #tpu.memory_space<vmem>>, vector<1x16x16xf32>
    %90 = vector.shape_cast %89 : vector<1x16x16xf32> to vector<16x16xf32>
    %91 = vector.extract_strided_slice %88 {offsets = [0, 0], sizes = [16, 384], strides = [1, 1]} : vector<16x1152xf32> to vector<16x384xf32>
    %cst_51 = arith.constant dense<0.000000e+00> : vector<16x384xf32>
    %92 = tpu.matmul %90, %91, %cst_51 {dimension_numbers = #tpu.dot_dimension_numbers<[1], [0], [0], [1], [0, 0, 1, 1], [], []>} : vector<16x16xf32>, vector<16x384xf32>, vector<16x384xf32> -> vector<16x384xf32>
    %93 = vector.extract_strided_slice %88 {offsets = [0, 384], sizes = [16, 384], strides = [1, 1]} : vector<16x1152xf32> to vector<16x384xf32>
    %94 = arith.addf %92, %93 : vector<16x384xf32>
    %c1_52 = arith.constant 1 : index
    %c0_53 = arith.constant 0 : index
    %c0_54 = arith.constant 0 : index
    %95 = vector.load %arg5[%c1_52, %c0_53, %c0_54] : memref<2x16x16xf32, #tpu.memory_space<vmem>>, vector<1x16x16xf32>
    %96 = vector.shape_cast %95 : vector<1x16x16xf32> to vector<16x16xf32>
    %97 = vector.extract_strided_slice %88 {offsets = [0, 768], sizes = [16, 384], strides = [1, 1]} : vector<16x1152xf32> to vector<16x384xf32>
    %cst_55 = arith.constant dense<0.000000e+00> : vector<16x384xf32>
    %98 = tpu.matmul %96, %97, %cst_55 {dimension_numbers = #tpu.dot_dimension_numbers<[1], [0], [0], [1], [0, 0, 1, 1], [], []>} : vector<16x16xf32>, vector<16x384xf32>, vector<16x384xf32> -> vector<16x384xf32>
    %99 = arith.addf %94, %98 : vector<16x384xf32>
    %c1_56 = arith.constant 1 : index
    %c0_57 = arith.constant 0 : index
    %100 = vector.load %arg6[%c1_56, %c0_57] : memref<2x384xf32, #tpu.memory_space<vmem>>, vector<1x384xf32>
    %101 = vector.broadcast %100 : vector<1x384xf32> to vector<16x384xf32>
    %102 = arith.addf %99, %101 : vector<16x384xf32>
    %c0_58 = arith.constant 0 : index
    %c0_59 = arith.constant 0 : index
    %103 = vector.load %arg8[%c0_58, %c0_59] : memref<2x384xf32, #tpu.memory_space<vmem>>, vector<1x384xf32>
    %c1_60 = arith.constant 1 : index
    %c0_61 = arith.constant 0 : index
    %104 = vector.load %arg8[%c1_60, %c0_61] : memref<2x384xf32, #tpu.memory_space<vmem>>, vector<1x384xf32>
    %cst_62 = arith.constant dense<0.000000e+00> : vector<384xf32>
    %105 = vector.multi_reduction <add>, %102, %cst_62 [0] : vector<16x384xf32> to vector<384xf32>
    %106 = vector.shape_cast %105 : vector<384xf32> to vector<1x384xf32>
    %107 = arith.mulf %102, %102 : vector<16x384xf32>
    %cst_63 = arith.constant dense<0.000000e+00> : vector<384xf32>
    %108 = vector.multi_reduction <add>, %107, %cst_63 [0] : vector<16x384xf32> to vector<384xf32>
    %109 = vector.shape_cast %108 : vector<384xf32> to vector<1x384xf32>
    %110 = tpu.iota {dimensions = array<i32: 0>} : vector<2x384xi32>
    %c0_i32_64 = arith.constant 0 : i32
    %111 = vector.broadcast %c0_i32_64 : i32 to vector<2x384xi32>
    %112 = arith.cmpi eq, %110, %111 : vector<2x384xi32>
    %113 = vector.shape_cast %106 : vector<1x384xf32> to vector<1x384xf32>
    %114 = vector.broadcast %113 : vector<1x384xf32> to vector<2x384xf32>
    %115 = vector.shape_cast %109 : vector<1x384xf32> to vector<1x384xf32>
    %116 = vector.broadcast %115 : vector<1x384xf32> to vector<2x384xf32>
    %117 = arith.select %112, %114, %116 : vector<2x384xi1>, vector<2x384xf32>
    %c0_65 = arith.constant 0 : index
    %c0_66 = arith.constant 0 : index
    %118 = vector.load %arg10[%c0_65, %c0_66] : memref<384x8xf32, #tpu.memory_space<vmem>>, vector<384x8xf32>
    %cst_67 = arith.constant dense<0.000000e+00> : vector<2x8xf32>
    %119 = tpu.matmul %117, %118, %cst_67 {dimension_numbers = #tpu.dot_dimension_numbers<[1], [0], [0], [1], [0, 0, 1, 1], [], []>} : vector<2x384xf32>, vector<384x8xf32>, vector<2x8xf32> -> vector<2x8xf32>
    %120 = vector.extract_strided_slice %119 {offsets = [0, 0], sizes = [1, 8], strides = [1, 1]} : vector<2x8xf32> to vector<1x8xf32>
    %cst_68 = arith.constant 0.001953125 : f32
    %121 = vector.broadcast %cst_68 : f32 to vector<1x8xf32>
    %122 = arith.mulf %120, %121 : vector<1x8xf32>
    %123 = vector.extract_strided_slice %119 {offsets = [1, 0], sizes = [1, 8], strides = [1, 1]} : vector<2x8xf32> to vector<1x8xf32>
    %cst_69 = arith.constant 0.001953125 : f32
    %124 = vector.broadcast %cst_69 : f32 to vector<1x8xf32>
    %125 = arith.mulf %123, %124 : vector<1x8xf32>
    %126 = arith.mulf %122, %122 : vector<1x8xf32>
    %127 = arith.subf %125, %126 : vector<1x8xf32>
    %cst_70 = arith.constant 0.000000e+00 : f32
    %128 = vector.broadcast %cst_70 : f32 to vector<1x8xf32>
    %129 = arith.maximumf %127, %128 : vector<1x8xf32>
    %cst_71 = arith.constant 9.99999974E-6 : f32
    %130 = vector.broadcast %cst_71 : f32 to vector<1x8xf32>
    %131 = arith.addf %129, %130 : vector<1x8xf32>
    %132 = math.rsqrt %131 : vector<1x8xf32>
    %133 = tpu.iota {dimensions = array<i32: 0>} : vector<2x8xi32>
    %c0_i32_72 = arith.constant 0 : i32
    %134 = vector.broadcast %c0_i32_72 : i32 to vector<2x8xi32>
    %135 = arith.cmpi eq, %133, %134 : vector<2x8xi32>
    %136 = vector.shape_cast %122 : vector<1x8xf32> to vector<1x8xf32>
    %137 = vector.broadcast %136 : vector<1x8xf32> to vector<2x8xf32>
    %138 = vector.shape_cast %132 : vector<1x8xf32> to vector<1x8xf32>
    %139 = vector.broadcast %138 : vector<1x8xf32> to vector<2x8xf32>
    %140 = arith.select %135, %137, %139 : vector<2x8xi1>, vector<2x8xf32>
    %c0_73 = arith.constant 0 : index
    %c0_74 = arith.constant 0 : index
    %141 = vector.load %arg11[%c0_73, %c0_74] : memref<8x384xf32, #tpu.memory_space<vmem>>, vector<8x384xf32>
    %cst_75 = arith.constant dense<0.000000e+00> : vector<2x384xf32>
    %142 = tpu.matmul %140, %141, %cst_75 {dimension_numbers = #tpu.dot_dimension_numbers<[1], [0], [0], [1], [0, 0, 1, 1], [], []>} : vector<2x8xf32>, vector<8x384xf32>, vector<2x384xf32> -> vector<2x384xf32>
    %143 = vector.extract_strided_slice %142 {offsets = [0, 0], sizes = [1, 384], strides = [1, 1]} : vector<2x384xf32> to vector<1x384xf32>
    %144 = vector.broadcast %143 : vector<1x384xf32> to vector<16x384xf32>
    %145 = arith.subf %102, %144 : vector<16x384xf32>
    %146 = vector.extract_strided_slice %142 {offsets = [1, 0], sizes = [1, 384], strides = [1, 1]} : vector<2x384xf32> to vector<1x384xf32>
    %147 = vector.broadcast %146 : vector<1x384xf32> to vector<16x384xf32>
    %148 = arith.mulf %145, %147 : vector<16x384xf32>
    %149 = vector.broadcast %103 : vector<1x384xf32> to vector<16x384xf32>
    %150 = arith.mulf %148, %149 : vector<16x384xf32>
    %151 = vector.broadcast %104 : vector<1x384xf32> to vector<16x384xf32>
    %152 = arith.addf %150, %151 : vector<16x384xf32>
    %153 = arith.negf %152 : vector<16x384xf32>
    %154 = math.exp %153 : vector<16x384xf32>
    %cst_76 = arith.constant 1.000000e+00 : f32
    %155 = vector.broadcast %cst_76 : f32 to vector<16x384xf32>
    %156 = arith.addf %155, %154 : vector<16x384xf32>
    %157 = arith.divf %155, %156 : vector<16x384xf32>
    %158 = arith.mulf %152, %157 : vector<16x384xf32>
    %c0_77 = arith.constant 0 : index
    %c0_78 = arith.constant 0 : index
    %c0_79 = arith.constant 0 : index
    %159 = vector.load %arg12[%c0_77, %c0_78, %c0_79] : memref<1x16x384xf32, #tpu.memory_space<vmem>>, vector<1x16x384xf32>
    %160 = vector.shape_cast %159 : vector<1x16x384xf32> to vector<16x384xf32>
    %161 = vector.shape_cast %158 : vector<16x384xf32> to vector<1x16x384xf32>
    tpu.vector_store %arg12[%c0_77, %c0_78, %c0_79], %161 {strides = array<i32>} : memref<1x16x384xf32, #tpu.memory_space<vmem>>, vector<1x16x384xf32>,
    return
  }
  func.func @transform_0(%arg0: i32) -> (i32, i32, i32) {
    %c0_i32 = arith.constant 0 : i32
    %c0_i32_0 = arith.constant 0 : i32
    %c0_i32_1 = arith.constant 0 : i32
    return %arg0, %c0_i32, %c0_i32_0 : i32, i32, i32
  }
  func.func @transform_1(%arg0: i32) -> (i32, i32, i32) {
    %c0_i32 = arith.constant 0 : i32
    %c0_i32_0 = arith.constant 0 : i32
    %c0_i32_1 = arith.constant 0 : i32
    return %arg0, %c0_i32, %c0_i32_0 : i32, i32, i32
  }
  func.func @transform_2(%arg0: i32) -> (i32, i32, i32) {
    %c0_i32 = arith.constant 0 : i32
    %c0_i32_0 = arith.constant 0 : i32
    %c0_i32_1 = arith.constant 0 : i32
    %c0_i32_2 = arith.constant 0 : i32
    return %c0_i32, %c0_i32_0, %c0_i32_1 : i32, i32, i32
  }
  func.func @transform_3(%arg0: i32) -> (i32, i32) {
    %c0_i32 = arith.constant 0 : i32
    %c0_i32_0 = arith.constant 0 : i32
    %c0_i32_1 = arith.constant 0 : i32
    return %c0_i32, %c0_i32_0 : i32, i32
  }
  func.func @transform_4(%arg0: i32) -> (i32, i32, i32) {
    %c0_i32 = arith.constant 0 : i32
    %c0_i32_0 = arith.constant 0 : i32
    %c0_i32_1 = arith.constant 0 : i32
    %c0_i32_2 = arith.constant 0 : i32
    return %c0_i32, %c0_i32_0, %c0_i32_1 : i32, i32, i32
  }
  func.func @transform_5(%arg0: i32) -> (i32, i32) {
    %c0_i32 = arith.constant 0 : i32
    %c0_i32_0 = arith.constant 0 : i32
    %c0_i32_1 = arith.constant 0 : i32
    return %c0_i32, %c0_i32_0 : i32, i32
  }
  func.func @transform_6(%arg0: i32) -> (i32, i32) {
    %c0_i32 = arith.constant 0 : i32
    %c0_i32_0 = arith.constant 0 : i32
    %c0_i32_1 = arith.constant 0 : i32
    return %c0_i32, %c0_i32_0 : i32, i32
  }
  func.func @transform_7(%arg0: i32) -> (i32, i32) {
    %c0_i32 = arith.constant 0 : i32
    %c0_i32_0 = arith.constant 0 : i32
    %c0_i32_1 = arith.constant 0 : i32
    return %c0_i32, %c0_i32_0 : i32, i32
  }
  func.func @transform_8(%arg0: i32) -> (i32, i32) {
    %c0_i32 = arith.constant 0 : i32
    %c0_i32_0 = arith.constant 0 : i32
    %c0_i32_1 = arith.constant 0 : i32
    return %c0_i32, %c0_i32_0 : i32, i32
  }
  func.func @transform_9(%arg0: i32) -> (i32, i32) {
    %c0_i32 = arith.constant 0 : i32
    %c0_i32_0 = arith.constant 0 : i32
    %c0_i32_1 = arith.constant 0 : i32
    return %c0_i32, %c0_i32_0 : i32, i32
  }
  func.func @transform_10(%arg0: i32) -> (i32, i32) {
    %c0_i32 = arith.constant 0 : i32
    %c0_i32_0 = arith.constant 0 : i32
    %c0_i32_1 = arith.constant 0 : i32
    return %c0_i32, %c0_i32_0 : i32, i32
  }
  func.func @transform_11(%arg0: i32) -> (i32, i32, i32) {
    %c0_i32 = arith.constant 0 : i32
    %c0_i32_0 = arith.constant 0 : i32
    %c0_i32_1 = arith.constant 0 : i32
    return %arg0, %c0_i32, %c0_i32_0 : i32, i32, i32
  }
}

</mosaic_0001>

<bundles_post_ra>
// kernel: squeeze.3
= control target key start
LH: loop header
LB: loop body
LE: loop exit
PB: predicated region body
PF: predicated region fallthrough
CT: control target
= control target key end

     0   :  { %s8530_s6 = smov 0   ;;  %s12378_s0 = inlined_call_operand.vmem [shape: f32[1,24,16,24,16], index: 0, kind: input, shape index: {}]   ;;  %s12379_s1 = inlined_call_operand.vmem [shape: f32[384,384], index: 1, kind: output, shape index: {}]  }
   0x1 LB: > { %s6598_s7 = sadd.s32 4294967295, %s8511_s6   ;;  %p6601_p0 = scmp.ge.s32.totalorder %s8511_s6, 1  ;;  %s8511_s6 = sphi %s8530_s6, %s7_s6  }
   0x2   : > { %p28_p1 = scmp.lt.s32.totalorder %s8511_s6, 3 }
   0x4   : > { %p29_p2 = pnand %p6601_p0, %p28_p1 }
   0x5   : > { %s47_s8 = smul.u32 (!%p29_p2), 4608, %s6598_s7  ;;  %vm56_vm0 = vcmask (!%p29_p2), 1047556   ;;  %s8513_s12 = smov (!%p29_p2), 112   ;;  %vm58_vm1 = vcmask (!%p29_p2), 130048   ;;  %vm1043_vm2 = vcmask (!%p29_p2), 1048448   ;;  %vm1834_vm3 = vcmask (!%p29_p2), 917248  }
   0x6   : > { %32 = sbr.rel (%p29_p2) target bundleno = 1280 (0x500), region = 20  ;;  %s8514_s17 = smov (!%p29_p2), 96   ;;  %vm2625_vm4 = vcmask (!%p29_p2), 786048   ;;  %vm3416_vm5 = vcmask (!%p29_p2), 654848   ;;  %vm4207_vm6 = vcmask (!%p29_p2), 523648   ;;  %vm4998_vm7 = vcmask (!%p29_p2), 392448  }
   0x7   : > { %p48_p3 = scmp.lt.s32.totalorder (!%p29_p2), %s47_s8, 9215  ;;  %s42_s13 = smul.u32 (!%p29_p2), 576, %s6598_s7  ;;  %vm5789_vm8 = vcmask (!%p29_p2), 261248  }
   0x8   : > { %s8515_s18 = smov (!%p29_p2), 80   ;;  %s8516_s19 = smov (!%p29_p2), 64  }
   0x9   : > { %p43_p4 = scmp.lt.s32.totalorder (!%p29_p2), %s42_s13, 1151  ;;  %s8517_s20 = smov (!%p29_p2), 48  }
   0xa   : > { %s8518_s21 = smov (!%p29_p2), 32   ;;  %s8519_s22 = smov (!%p29_p2), 16  }
   0xd   : > { %s12381_s8 = smov (!%p48_p3, %s47_s8), 9215  ;;  %s12383_s13 = smov (!%p43_p4, %s42_s13), 1151 }
   0xe   : > { %s8543_s11 = scalar_lea.vmem %s12378_s0, %s12381_s8  ;;  %s8845_s16 = scalar_lea.vmem %s12379_s1, %s12383_s13 }
   0xf   : > { %v6988_v0 = vld [vmem:[%s8543_s11 + $0x197] ss:$24 sm:$0xf]  }
  0x10   : > { %v6989_v1 = vld [vmem:[%s8543_s11 + $0x197] ss:$24 sm:$0xf0]  }
  0x11   : > { %v1061_v2 = vsel %vm56_vm0, %v6989_v1, %v6988_v0  ;;  %v6983_v3 = vld [vmem:[%s8543_s11 + $0x7] ss:$24 sm:$0xf]  }
  0x12   : > { %v6984_v4 = vld [vmem:[%s8543_s11 + $0x7] ss:$24 sm:$0xf0]   ;;  %1062 = vrot.lane.b32.xlu1 %v1061_v2, %s8513_s12 }
  0x13   : > { %v1040_v5 = vsel %vm56_vm0, %v6984_v4, %v6983_v3  ;;  %v6991_v6 = vld [vmem:[%s8543_s11 + $0x307] ss:$24 sm:$0xf]  }
  0x14   : > { %v6992_v7 = vld [vmem:[%s8543_s11 + $0x307] ss:$24 sm:$0xf0]   ;;  %1041 = vrot.lane.b32.xlu0 %v1040_v5, %s8513_s12 }
  0x15   : > { %v1072_v8 = vsel %vm56_vm0, %v6992_v7, %v6991_v6  ;;  %v6985_v9 = vld [vmem:[%s8543_s11 + $0xcf] ss:$24 sm:$0xf]  }
  0x16   : > { %v6986_v10 = vld [vmem:[%s8543_s11 + $0xcf] ss:$24 sm:$0xf0]   ;;  %1073 = vrot.lane.b32.xlu1 %v1072_v8, %s8513_s12 }
  0x17   : > { %v1050_v11 = vsel %vm56_vm0, %v6986_v10, %v6985_v9  ;;  %v6997_v12 = vld [vmem:[%s8543_s11 + $0x497] ss:$24 sm:$0xf]  }
  0x18   : > { %v6998_v13 = vld [vmem:[%s8543_s11 + $0x497] ss:$24 sm:$0xf0]   ;;  %1051 = vrot.lane.b32.xlu0 %v1050_v11, %s8513_s12 }
  0x19   : > { %v6994_v14 = vld [vmem:[%s8543_s11 + $0x3cf] ss:$24 sm:$0xf]   ;;  %v1094_v16 = vsel %vm56_vm0, %v6998_v13, %v6997_v12 }
  0x1a   : > { %v6995_v15 = vld [vmem:[%s8543_s11 + $0x3cf] ss:$24 sm:$0xf0]   ;;  %1095 = vrot.lane.b32.xlu1 %v1094_v16, %s8513_s12 }
  0x1b   : > { %v1083_v17 = vsel %vm56_vm0, %v6995_v15, %v6994_v14  ;;  %v7003_v18 = vld [vmem:[%s8543_s11 + $0x6cf] ss:$24 sm:$0xf]  }
  0x1c   : > { %v7004_v19 = vld [vmem:[%s8543_s11 + $0x6cf] ss:$24 sm:$0xf0]   ;;  %1084 = vrot.lane.b32.xlu0 %v1083_v17, %s8513_s12 }
  0x1d   : > { %v7000_v20 = vld [vmem:[%s8543_s11 + $0x607] ss:$24 sm:$0xf]   ;;  %v1116_v22 = vsel %vm56_vm0, %v7004_v19, %v7003_v18 }
  0x1e   : > { %v7001_v21 = vld [vmem:[%s8543_s11 + $0x607] ss:$24 sm:$0xf0]   ;;  %1117 = vrot.lane.b32.xlu1 %v1116_v22, %s8513_s12 }
  0x1f   : > { %v1105_v23 = vsel %vm56_vm0, %v7001_v21, %v7000_v20  ;;  %v7009_v24 = vld [vmem:[%s8543_s11 + $0x907] ss:$24 sm:$0xf]  }
  0x20   : > { %v7010_v25 = vld [vmem:[%s8543_s11 + $0x907] ss:$24 sm:$0xf0]   ;;  %1106 = vrot.lane.b32.xlu0 %v1105_v23, %s8513_s12 }
  0x21   : > { %v7006_v26 = vld [vmem:[%s8543_s11 + $0x797] ss:$24 sm:$0xf]   ;;  %v1138_v28 = vsel %vm56_vm0, %v7010_v25, %v7009_v24 }
  0x22   : > { %v7007_v27 = vld [vmem:[%s8543_s11 + $0x797] ss:$24 sm:$0xf0]   ;;  %1139 = vrot.lane.b32.xlu1 %v1138_v28, %s8513_s12 }
  0x23   : > { %v1127_v29 = vsel %vm56_vm0, %v7007_v27, %v7006_v26  ;;  %v7015_v30 = vld [vmem:[%s8543_s11 + $0xa97] ss:$24 sm:$0xf]  }
  0x24   : > { %v7016_v31 = vld [vmem:[%s8543_s11 + $0xa97] ss:$24 sm:$0xf0]   ;;  %1128 = vrot.lane.b32.xlu0 %v1127_v29, %s8513_s12 }
  0x25   : > { %v7012_v32 = vld [vmem:[%s8543_s11 + $0x9cf] ss:$24 sm:$0xf]   ;;  %v1160_v34 = vsel %vm56_vm0, %v7016_v31, %v7015_v30 }
  0x26   : > { %v7013_v33 = vld [vmem:[%s8543_s11 + $0x9cf] ss:$24 sm:$0xf0]   ;;  %1161 = vrot.lane.b32.xlu1 %v1160_v34, %s8513_s12 }
  0x27   : > { %v1149_v35 = vsel %vm56_vm0, %v7013_v33, %v7012_v32  ;;  %v7021_v36 = vld [vmem:[%s8543_s11 + $0xccf] ss:$24 sm:$0xf]  }
  0x28   : > { %v7022_v37 = vld [vmem:[%s8543_s11 + $0xccf] ss:$24 sm:$0xf0]   ;;  %1150 = vrot.lane.b32.xlu0 %v1149_v35, %s8513_s12 }
  0x29   : > { %v7018_v38 = vld [vmem:[%s8543_s11 + $0xc07] ss:$24 sm:$0xf]   ;;  %v1182_v40 = vsel %vm56_vm0, %v7022_v37, %v7021_v36 }
  0x2a   : > { %v7019_v39 = vld [vmem:[%s8543_s11 + $0xc07] ss:$24 sm:$0xf0]   ;;  %1183 = vrot.lane.b32.xlu1 %v1182_v40, %s8513_s12 }
  0x2b   : > { %v1171_v41 = vsel %vm56_vm0, %v7019_v39, %v7018_v38  ;;  %v7027_v42 = vld [vmem:[%s8543_s11 + $0xf07] ss:$24 sm:$0xf]  }
  0x2c   : > { %v7028_v43 = vld [vmem:[%s8543_s11 + $0xf07] ss:$24 sm:$0xf0]   ;;  %1172 = vrot.lane.b32.xlu0 %v1171_v41, %s8513_s12 }
  0x2d   : > { %v7024_v44 = vld [vmem:[%s8543_s11 + $0xd97] ss:$24 sm:$0xf]   ;;  %v1204_v46 = vsel %vm56_vm0, %v7028_v43, %v7027_v42 }
  0x2e   : > { %v7025_v45 = vld [vmem:[%s8543_s11 + $0xd97] ss:$24 sm:$0xf0]   ;;  %1205 = vrot.lane.b32.xlu1 %v1204_v46, %s8513_s12 }
  0x2f   : > { %v1193_v47 = vsel %vm56_vm0, %v7025_v45, %v7024_v44  ;;  %v7033_v48 = vld [vmem:[%s8543_s11 + $0x1097] ss:$24 sm:$0xf]  }
  0x30   : > { %v7034_v49 = vld [vmem:[%s8543_s11 + $0x1097] ss:$24 sm:$0xf0]   ;;  %1194 = vrot.lane.b32.xlu0 %v1193_v47, %s8513_s12 }
  0x31   : > { %v7030_v50 = vld [vmem:[%s8543_s11 + $0xfcf] ss:$24 sm:$0xf]   ;;  %v1226_v52 = vsel %vm56_vm0, %v7034_v49, %v7033_v48 }
  0x32   : > { %v7031_v51 = vld [vmem:[%s8543_s11 + $0xfcf] ss:$24 sm:$0xf0]   ;;  %1227 = vrot.lane.b32.xlu1 %v1226_v52, %s8513_s12 }
  0x33   : > { %v1215_v53 = vsel %vm56_vm0, %v7031_v51, %v7030_v50  ;;  %v7039_v54 = vld [vmem:[%s8543_s11 + $0xd7] ss:$24 sm:$0xf]  }
  0x34   : > { %v7040_v55 = vld [vmem:[%s8543_s11 + $0xd7] ss:$24 sm:$0xf0]   ;;  %1216 = vrot.lane.b32.xlu0 %v1215_v53, %s8513_s12 }
  0x35   : > { %v7036_v56 = vld [vmem:[%s8543_s11 + $0xf] ss:$24 sm:$0xf]   ;;  %v1248_v58 = vsel %vm56_vm0, %v7040_v55, %v7039_v54 }
  0x36   : > { %v7037_v57 = vld [vmem:[%s8543_s11 + $0xf] ss:$24 sm:$0xf0]   ;;  %1249 = vrot.lane.b32.xlu1 %v1248_v58, %s8513_s12 }
  0x37   : > { %v1237_v59 = vsel %vm56_vm0, %v7037_v57, %v7036_v56  ;;  %v7045_v60 = vld [vmem:[%s8543_s11 + $0x30f] ss:$24 sm:$0xf]  }
  0x38   : > { %v7046_v61 = vld [vmem:[%s8543_s11 + $0x30f] ss:$24 sm:$0xf0]   ;;  %1238 = vrot.lane.b32.xlu0 %v1237_v59, %s8513_s12 }
  0x39   : > { %v7042_v62 = vld [vmem:[%s8543_s11 + $0x247] ss:$24 sm:$0xf]   ;;  %v1270_v0 = vsel %vm56_vm0, %v7046_v61, %v7045_v60 }
  0x3a   : > { %v7043_v63 = vld [vmem:[%s8543_s11 + $0x247] ss:$24 sm:$0xf0]   ;;  %1271 = vrot.lane.b32.xlu1 %v1270_v0, %s8513_s12 }
  0x3b   : > { %v1259_v1 = vsel %vm56_vm0, %v7043_v63, %v7042_v62  ;;  %v7051_v2 = vld [vmem:[%s8543_s11 + $0x547] ss:$24 sm:$0xf]  }
  0x3c   : > { %v7052_v3 = vld [vmem:[%s8543_s11 + $0x547] ss:$24 sm:$0xf0]   ;;  %1260 = vrot.lane.b32.xlu0 %v1259_v1, %s8513_s12 }
  0x3d   : > { %v7048_v4 = vld [vmem:[%s8543_s11 + $0x3d7] ss:$24 sm:$0xf]   ;;  %v1292_v6 = vsel %vm56_vm0, %v7052_v3, %v7051_v2 }
  0x3e   : > { %v7049_v5 = vld [vmem:[%s8543_s11 + $0x3d7] ss:$24 sm:$0xf0]   ;;  %1293 = vrot.lane.b32.xlu1 %v1292_v6, %s8513_s12 }
  0x3f   : > { %v1281_v7 = vsel %vm56_vm0, %v7049_v5, %v7048_v4  ;;  %v7057_v8 = vld [vmem:[%s8543_s11 + $0x6d7] ss:$24 sm:$0xf]  }
  0x40   : > { %v7058_v9 = vld [vmem:[%s8543_s11 + $0x6d7] ss:$24 sm:$0xf0]   ;;  %1282 = vrot.lane.b32.xlu0 %v1281_v7, %s8513_s12 }
  0x41   : > { %v7054_v10 = vld [vmem:[%s8543_s11 + $0x60f] ss:$24 sm:$0xf]   ;;  %v1314_v12 = vsel %vm56_vm0, %v7058_v9, %v7057_v8 }
  0x42   : > { %v7055_v11 = vld [vmem:[%s8543_s11 + $0x60f] ss:$24 sm:$0xf0]   ;;  %1315 = vrot.lane.b32.xlu1 %v1314_v12, %s8513_s12 }
  0x43   : > { %v1303_v13 = vsel %vm56_vm0, %v7055_v11, %v7054_v10  ;;  %v7063_v14 = vld [vmem:[%s8543_s11 + $0x90f] ss:$24 sm:$0xf]  }
  0x44   : > { %v7064_v15 = vld [vmem:[%s8543_s11 + $0x90f] ss:$24 sm:$0xf0]   ;;  %1304 = vrot.lane.b32.xlu0 %v1303_v13, %s8513_s12 }
  0x45   : > { %v7060_v16 = vld [vmem:[%s8543_s11 + $0x847] ss:$24 sm:$0xf]   ;;  %v1336_v18 = vsel %vm56_vm0, %v7064_v15, %v7063_v14 }
  0x46   : > { %v7061_v17 = vld [vmem:[%s8543_s11 + $0x847] ss:$24 sm:$0xf0]   ;;  %1337 = vrot.lane.b32.xlu1 %v1336_v18, %s8513_s12 }
  0x47   : > { %v1325_v19 = vsel %vm56_vm0, %v7061_v17, %v7060_v16  ;;  %v7069_v20 = vld [vmem:[%s8543_s11 + $0xb47] ss:$24 sm:$0xf]  }
  0x48   : > { %v7070_v21 = vld [vmem:[%s8543_s11 + $0xb47] ss:$24 sm:$0xf0]   ;;  %1326 = vrot.lane.b32.xlu0 %v1325_v19, %s8513_s12 }
  0x49   : > { %v7066_v22 = vld [vmem:[%s8543_s11 + $0x9d7] ss:$24 sm:$0xf]   ;;  %v1358_v24 = vsel %vm56_vm0, %v7070_v21, %v7069_v20 }
  0x4a   : > { %v7067_v23 = vld [vmem:[%s8543_s11 + $0x9d7] ss:$24 sm:$0xf0]   ;;  %1359 = vrot.lane.b32.xlu1 %v1358_v24, %s8513_s12 }
  0x4b   : > { %v1347_v25 = vsel %vm56_vm0, %v7067_v23, %v7066_v22  ;;  %v7075_v26 = vld [vmem:[%s8543_s11 + $0xcd7] ss:$24 sm:$0xf]  }
  0x4c   : > { %v7076_v27 = vld [vmem:[%s8543_s11 + $0xcd7] ss:$24 sm:$0xf0]   ;;  %1348 = vrot.lane.b32.xlu0 %v1347_v25, %s8513_s12 }
  0x4d   : > { %v7072_v28 = vld [vmem:[%s8543_s11 + $0xc0f] ss:$24 sm:$0xf]   ;;  %v1380_v30 = vsel %vm56_vm0, %v7076_v27, %v7075_v26 }
  0x4e   : > { %v7073_v29 = vld [vmem:[%s8543_s11 + $0xc0f] ss:$24 sm:$0xf0]   ;;  %1381 = vrot.lane.b32.xlu1 %v1380_v30, %s8513_s12 }
  0x4f   : > { %v1369_v31 = vsel %vm56_vm0, %v7073_v29, %v7072_v28  ;;  %v7081_v32 = vld [vmem:[%s8543_s11 + $0xf0f] ss:$24 sm:$0xf]  }
  0x50   : > { %v7082_v33 = vld [vmem:[%s8543_s11 + $0xf0f] ss:$24 sm:$0xf0]   ;;  %1370 = vrot.lane.b32.xlu0 %v1369_v31, %s8513_s12 }
  0x51   : > { %v7078_v34 = vld [vmem:[%s8543_s11 + $0xe47] ss:$24 sm:$0xf]   ;;  %v1402_v36 = vsel %vm56_vm0, %v7082_v33, %v7081_v32 }
  0x52   : > { %v7079_v35 = vld [vmem:[%s8543_s11 + $0xe47] ss:$24 sm:$0xf0]   ;;  %1403 = vrot.lane.b32.xlu1 %v1402_v36, %s8513_s12 }
  0x53   : > { %v1391_v37 = vsel %vm56_vm0, %v7079_v35, %v7078_v34  ;;  %v7087_v38 = vld [vmem:[%s8543_s11 + $0x1147] ss:$24 sm:$0xf]  }
  0x54   : > { %v7088_v39 = vld [vmem:[%s8543_s11 + $0x1147] ss:$24 sm:$0xf0]   ;;  %1392 = vrot.lane.b32.xlu0 %v1391_v37, %s8513_s12 }
  0x55   : > { %v7084_v40 = vld [vmem:[%s8543_s11 + $0xfd7] ss:$24 sm:$0xf]   ;;  %v1424_v42 = vsel %vm56_vm0, %v7088_v39, %v7087_v38 }
  0x56   : > { %v7085_v41 = vld [vmem:[%s8543_s11 + $0xfd7] ss:$24 sm:$0xf0]   ;;  %1425 = vrot.lane.b32.xlu1 %v1424_v42, %s8513_s12 }
  0x57   : > { %v1413_v43 = vsel %vm56_vm0, %v7085_v41, %v7084_v40  ;;  %v7093_v44 = vld [vmem:[%s8543_s11 + $0x187] ss:$24 sm:$0xf]  }
  0x58   : > { %v7094_v45 = vld [vmem:[%s8543_s11 + $0x187] ss:$24 sm:$0xf0]   ;;  %1414 = vrot.lane.b32.xlu0 %v1413_v43, %s8513_s12 }
  0x59   : > { %v7090_v46 = vld [vmem:[%s8543_s11 + $0x17] ss:$24 sm:$0xf]   ;;  %v1446_v48 = vsel %vm56_vm0, %v7094_v45, %v7093_v44 }
  0x5a   : > { %v7091_v47 = vld [vmem:[%s8543_s11 + $0x17] ss:$24 sm:$0xf0]   ;;  %1447 = vrot.lane.b32.xlu1 %v1446_v48, %s8513_s12 }
  0x5b   : > { %v1435_v49 = vsel %vm56_vm0, %v7091_v47, %v7090_v46  ;;  %v7099_v50 = vld [vmem:[%s8543_s11 + $0x317] ss:$24 sm:$0xf]  }
  0x5c   : > { %v7100_v51 = vld [vmem:[%s8543_s11 + $0x317] ss:$24 sm:$0xf0]   ;;  %1436 = vrot.lane.b32.xlu0 %v1435_v49, %s8513_s12 }
  0x5d   : > { %v7096_v52 = vld [vmem:[%s8543_s11 + $0x24f] ss:$24 sm:$0xf]   ;;  %v1468_v54 = vsel %vm56_vm0, %v7100_v51, %v7099_v50 }
  0x5e   : > { %v7097_v53 = vld [vmem:[%s8543_s11 + $0x24f] ss:$24 sm:$0xf0]   ;;  %1469 = vrot.lane.b32.xlu1 %v1468_v54, %s8513_s12 }
  0x5f   : > { %v1457_v55 = vsel %vm56_vm0, %v7097_v53, %v7096_v52  ;;  %v7105_v56 = vld [vmem:[%s8543_s11 + $0x54f] ss:$24 sm:$0xf]  }
  0x60   : > { %v7106_v57 = vld [vmem:[%s8543_s11 + $0x54f] ss:$24 sm:$0xf0]   ;;  %1458 = vrot.lane.b32.xlu0 %v1457_v55, %s8513_s12 }
  0x61   : > { %v7102_v58 = vld [vmem:[%s8543_s11 + $0x487] ss:$24 sm:$0xf]   ;;  %v1490_v60 = vsel %vm56_vm0, %v7106_v57, %v7105_v56 }
  0x62   : > { %v7103_v59 = vld [vmem:[%s8543_s11 + $0x487] ss:$24 sm:$0xf0]   ;;  %1491 = vrot.lane.b32.xlu1 %v1490_v60, %s8513_s12 }
  0x63   : > { %v1479_v61 = vsel %vm56_vm0, %v7103_v59, %v7102_v58  ;;  %v7111_v62 = vld [vmem:[%s8543_s11 + $0x787] ss:$24 sm:$0xf]  }
  0x64   : > { %v7112_v63 = vld [vmem:[%s8543_s11 + $0x787] ss:$24 sm:$0xf0]   ;;  %1480 = vrot.lane.b32.xlu0 %v1479_v61, %s8513_s12 }
  0x65   : > { %v7108_v0 = vld [vmem:[%s8543_s11 + $0x617] ss:$24 sm:$0xf]   ;;  %v1512_v2 = vsel %vm56_vm0, %v7112_v63, %v7111_v62 }
  0x66   : > { %v7109_v1 = vld [vmem:[%s8543_s11 + $0x617] ss:$24 sm:$0xf0]   ;;  %1513 = vrot.lane.b32.xlu1 %v1512_v2, %s8513_s12 }
  0x67   : > { %v1501_v3 = vsel %vm56_vm0, %v7109_v1, %v7108_v0  ;;  %v7117_v4 = vld [vmem:[%s8543_s11 + $0x917] ss:$24 sm:$0xf]  }
  0x68   : > { %v7118_v5 = vld [vmem:[%s8543_s11 + $0x917] ss:$24 sm:$0xf0]   ;;  %1502 = vrot.lane.b32.xlu0 %v1501_v3, %s8513_s12 }
  0x69   : > { %v7114_v6 = vld [vmem:[%s8543_s11 + $0x84f] ss:$24 sm:$0xf]   ;;  %v1534_v8 = vsel %vm56_vm0, %v7118_v5, %v7117_v4 }
  0x6a   : > { %v7115_v7 = vld [vmem:[%s8543_s11 + $0x84f] ss:$24 sm:$0xf0]   ;;  %1535 = vrot.lane.b32.xlu1 %v1534_v8, %s8513_s12 }
  0x6b   : > { %v1523_v9 = vsel %vm56_vm0, %v7115_v7, %v7114_v6  ;;  %v7123_v10 = vld [vmem:[%s8543_s11 + $0xb4f] ss:$24 sm:$0xf]  }
  0x6c   : > { %v7124_v11 = vld [vmem:[%s8543_s11 + $0xb4f] ss:$24 sm:$0xf0]   ;;  %1524 = vrot.lane.b32.xlu0 %v1523_v9, %s8513_s12 }
  0x6d   : > { %v7120_v12 = vld [vmem:[%s8543_s11 + $0xa87] ss:$24 sm:$0xf]   ;;  %v1556_v14 = vsel %vm56_vm0, %v7124_v11, %v7123_v10 }
  0x6e   : > { %v7121_v13 = vld [vmem:[%s8543_s11 + $0xa87] ss:$24 sm:$0xf0]   ;;  %1557 = vrot.lane.b32.xlu1 %v1556_v14, %s8513_s12 }
  0x6f   : > { %v1545_v15 = vsel %vm56_vm0, %v7121_v13, %v7120_v12  ;;  %v7129_v16 = vld [vmem:[%s8543_s11 + $0xd87] ss:$24 sm:$0xf]  }
  0x70   : > { %v7130_v17 = vld [vmem:[%s8543_s11 + $0xd87] ss:$24 sm:$0xf0]   ;;  %1546 = vrot.lane.b32.xlu0 %v1545_v15, %s8513_s12 }
  0x71   : > { %v7126_v18 = vld [vmem:[%s8543_s11 + $0xc17] ss:$24 sm:$0xf]   ;;  %v1578_v20 = vsel %vm56_vm0, %v7130_v17, %v7129_v16 }
  0x72   : > { %v7127_v19 = vld [vmem:[%s8543_s11 + $0xc17] ss:$24 sm:$0xf0]   ;;  %1579 = vrot.lane.b32.xlu1 %v1578_v20, %s8513_s12 }
  0x73   : > { %v1567_v21 = vsel %vm56_vm0, %v7127_v19, %v7126_v18  ;;  %v7135_v22 = vld [vmem:[%s8543_s11 + $0xf17] ss:$24 sm:$0xf]   ;;  %v6615_v18 = vld [vmem:[%s8543_s11 + $0xc0] ss:$8 sm:$0xf]  }
  0x74   : > { %v7136_v23 = vld [vmem:[%s8543_s11 + $0xf17] ss:$24 sm:$0xf0]   ;;  %1568 = vrot.lane.b32.xlu0 %v1567_v21, %s8513_s12 }
  0x75   : > { %v7132_v24 = vld [vmem:[%s8543_s11 + $0xe4f] ss:$24 sm:$0xf]   ;;  %v1600_v26 = vsel %vm56_vm0, %v7136_v23, %v7135_v22 }
  0x76   : > { %v7133_v25 = vld [vmem:[%s8543_s11 + $0xe4f] ss:$24 sm:$0xf0]   ;;  %1601 = vrot.lane.b32.xlu1 %v1600_v26, %s8513_s12 }
  0x77   : > { %v1589_v27 = vsel %vm56_vm0, %v7133_v25, %v7132_v24  ;;  %v7141_v28 = vld [vmem:[%s8543_s11 + $0x114f] ss:$24 sm:$0xf]   ;;  %v6616_v24 = vld [vmem:[%s8543_s11 + $0xc0] ss:$8 sm:$0xf0]  }
  0x78   : > { %v7142_v29 = vld [vmem:[%s8543_s11 + $0x114f] ss:$24 sm:$0xf0]   ;;  %1590 = vrot.lane.b32.xlu0 %v1589_v27, %s8513_s12  ;;  %v97_v27 = vsel %vm56_vm0, %v6616_v24, %v6615_v18  ;;  %v6637_v18 = vld [vmem:[%s8543_s11 + $0x1c0] ss:$8 sm:$0xf0]  }
  0x79   : > { %v7138_v30 = vld [vmem:[%s8543_s11 + $0x1087] ss:$24 sm:$0xf]   ;;  %v1622_v32 = vsel %vm56_vm0, %v7142_v29, %v7141_v28  ;;  %v6620_v28 = vld [vmem:[%s8543_s11 + $0x100] ss:$8 sm:$0xf]  }
  0x7a   : > { %v7139_v31 = vld [vmem:[%s8543_s11 + $0x1087] ss:$24 sm:$0xf0]   ;;  %1623 = vrot.lane.b32.xlu1 %v1622_v32, %s8513_s12  ;;  %v6621_v29 = vld [vmem:[%s8543_s11 + $0x100] ss:$8 sm:$0xf0]  }
  0x7b   : > { %v1611_v33 = vsel %vm56_vm0, %v7139_v31, %v7138_v30  ;;  %v7147_v34 = vld [vmem:[%s8543_s11 + $0x18f] ss:$24 sm:$0xf]   ;;  %6617 = vst.msk [vmem:[%s8845_s16 + $0x18] ss:$8 sm:$0x7] %vm58_vm1, %v97_v27   ;;  %v110_v31 = vsel %vm56_vm0, %v6621_v29, %v6620_v28 }
  0x7c   : > { %v7148_v35 = vld [vmem:[%s8543_s11 + $0x18f] ss:$24 sm:$0xf0]   ;;  %1612 = vrot.lane.b32.xlu0 %v1611_v33, %s8513_s12  ;;  %6618 = vst.msk [vmem:[%s8845_s16 + $0x1] ss:$8 sm:$0x38] %vm58_vm1, %v97_v27  }
  0x7d   : > { %v7144_v36 = vld [vmem:[%s8543_s11 + $0xc7] ss:$24 sm:$0xf]   ;;  %v1644_v38 = vsel %vm56_vm0, %v7148_v35, %v7147_v34  ;;  %6619 = vst.msk [vmem:[%s8845_s16 - $0x16] ss:$8 sm:$0xc0] %vm58_vm1, %v97_v27  }
  0x7e   : > { %v7145_v37 = vld [vmem:[%s8543_s11 + $0xc7] ss:$24 sm:$0xf0]   ;;  %1645 = vrot.lane.b32.xlu1 %v1644_v38, %s8513_s12  ;;  %v6626_v32 = vld [vmem:[%s8543_s11 + $0x140] ss:$8 sm:$0xf]  }
  0x7f   : > { %v1633_v39 = vsel %vm56_vm0, %v7145_v37, %v7144_v36  ;;  %v7153_v40 = vld [vmem:[%s8543_s11 + $0x3c7] ss:$24 sm:$0xf]   ;;  %v6627_v33 = vld [vmem:[%s8543_s11 + $0x140] ss:$8 sm:$0xf0]  }
  0x80   : > { %v7154_v41 = vld [vmem:[%s8543_s11 + $0x3c7] ss:$24 sm:$0xf0]   ;;  %1634 = vrot.lane.b32.xlu0 %v1633_v39, %s8513_s12  ;;  %6623 = vst.msk [vmem:[%s8845_s16 + $0x13] ss:$8 sm:$0xc] %vm58_vm1, %v110_v31   ;;  %v125_v36 = vsel %vm56_vm0, %v6627_v33, %v6626_v32 }
  0x81   : > { %v7150_v42 = vld [vmem:[%s8543_s11 + $0x257] ss:$24 sm:$0xf]   ;;  %v1666_v44 = vsel %vm56_vm0, %v7154_v41, %v7153_v40  ;;  %6624 = vst.msk [vmem:[%s8845_s16 - $0x4] ss:$8 sm:$0x70] %vm58_vm1, %v110_v31  }
  0x82   : > { %v7151_v43 = vld [vmem:[%s8543_s11 + $0x257] ss:$24 sm:$0xf0]   ;;  %1667 = vrot.lane.b32.xlu1 %v1666_v44, %s8513_s12  ;;  %6622 = vst.msk [vmem:[%s8845_s16 + $0x2a] ss:$-15 sm:$0x3] %vm58_vm1, %v110_v31  }
  0x83   : > { %v1655_v45 = vsel %vm56_vm0, %v7151_v43, %v7150_v42  ;;  %v7159_v46 = vld [vmem:[%s8543_s11 + $0x557] ss:$24 sm:$0xf]   ;;  %6625 = vst.msk [vmem:[%s8845_s16 + $0x16] sm:$0x80] %vm58_vm1, %v110_v31  }
  0x84   : > { %v7160_v47 = vld [vmem:[%s8543_s11 + $0x557] ss:$24 sm:$0xf0]   ;;  %1656 = vrot.lane.b32.xlu0 %v1655_v45, %s8513_s12  ;;  %v8782_v51 = vpop.permute.xlu1 %1062   ;;  %v54_v37 = vld [vmem:[%s8543_s11] ss:$8 sm:$0xf]  }
  0x85   : > { %v7156_v48 = vld [vmem:[%s8543_s11 + $0x48f] ss:$24 sm:$0xf]   ;;  %v1688_v50 = vsel %vm56_vm0, %v7160_v47, %v7159_v46  ;;  %v55_v38 = vld [vmem:[%s8543_s11] ss:$8 sm:$0xf0]  }
  0x86   : > { %v7157_v49 = vld [vmem:[%s8543_s11 + $0x48f] ss:$24 sm:$0xf0]   ;;  %v8787_v55 = vpop.permute.xlu0 %1041   ;;  %1689 = vrot.lane.b32.xlu1 %v1688_v50, %s8513_s12  ;;  %6628 = vst.msk [vmem:[%s8845_s16 + $0x25] ss:$8 sm:$0x3] %vm58_vm1, %v125_v36   ;;  %v57_v41 = vsel %vm56_vm0, %v55_v38, %v54_v37 }
  0x87   : > { %v1677_v52 = vsel %vm56_vm0, %v7157_v49, %v7156_v48  ;;  %v7165_v53 = vld [vmem:[%s8543_s11 + $0x78f] ss:$24 sm:$0xf]   ;;  %6629 = vst.msk [vmem:[%s8845_s16 + $0xe] ss:$8 sm:$0x1c] %vm58_vm1, %v125_v36  }
  0x88   : > { %v7166_v54 = vld [vmem:[%s8543_s11 + $0x78f] ss:$24 sm:$0xf0]   ;;  %1678 = vrot.lane.b32.xlu0 %v1677_v52, %s8513_s12  ;;  %v8796_v59 = vpop.permute.xlu1 %1073   ;;  %6630 = vst.msk [vmem:[%s8845_s16 - $0x9] ss:$8 sm:$0xe0] %vm58_vm1, %v125_v36  }
  0x89   : > { %v7162_v56 = vld [vmem:[%s8543_s11 + $0x6c7] ss:$24 sm:$0xf]   ;;  %v1710_v58 = vsel %vm56_vm0, %v7166_v54, %v7165_v53  ;;  %v6604_v42 = vld [vmem:[%s8543_s11 + $0x40] ss:$8 sm:$0xf]  }
  0x8a   : > { %v7163_v57 = vld [vmem:[%s8543_s11 + $0x6c7] ss:$24 sm:$0xf0]   ;;  %v8801_v63 = vpop.permute.xlu0 %1051   ;;  %1711 = vrot.lane.b32.xlu1 %v1710_v58, %s8513_s12  ;;  %v6605_v43 = vld [vmem:[%s8543_s11 + $0x40] ss:$8 sm:$0xf0]  }
  0x8b   : > { %v1699_v60 = vsel %vm56_vm0, %v7163_v57, %v7162_v56  ;;  %v7171_v61 = vld [vmem:[%s8543_s11 + $0x9c7] ss:$24 sm:$0xf]   ;;  %6987 = vst.msk [vmem:[%s8845_s16 + $0x20] sm:$0xff] %vm1043_vm2, %v8801_v63   ;;  %v69_v46 = vsel %vm56_vm0, %v6605_v43, %v6604_v42 }
  0x8c   : > { %v7172_v62 = vld [vmem:[%s8543_s11 + $0x9c7] ss:$24 sm:$0xf0]   ;;  %1700 = vrot.lane.b32.xlu0 %v1699_v60, %s8513_s12  ;;  %v8808_v3 = vpop.permute.xlu1 %1095   ;;  %59 = vst.msk [vmem:[%s8845_s16] ss:$8 sm:$0x7] %vm58_vm1, %v57_v41  }
  0x8d   : > { %v7168_v0 = vld [vmem:[%s8543_s11 + $0x857] ss:$24 sm:$0xf]   ;;  %v1732_v2 = vsel %vm56_vm0, %v7172_v62, %v7171_v61  ;;  %6602 = vst.msk [vmem:[%s8845_s16 - $0x17] ss:$8 sm:$0x38] %vm58_vm1, %v57_v41  }
  0x8e   : > { %v7169_v1 = vld [vmem:[%s8543_s11 + $0x857] ss:$24 sm:$0xf0]   ;;  %v8813_v7 = vpop.permute.xlu0 %1084   ;;  %1733 = vrot.lane.b32.xlu1 %v1732_v2, %s8513_s12  ;;  %6603 = vst.msk [vmem:[%s8845_s16 - $0x2e] ss:$8 sm:$0xc0] %vm58_vm1, %v57_v41  }
  0x8f   : > { %v1721_v4 = vsel %vm56_vm0, %v7169_v1, %v7168_v0  ;;  %v7177_v5 = vld [vmem:[%s8543_s11 + $0xb57] ss:$24 sm:$0xf]   ;;  %v6610_v47 = vld [vmem:[%s8543_s11 + $0x80] ss:$8 sm:$0xf]  }
  0x90   : > { %v7178_v6 = vld [vmem:[%s8543_s11 + $0xb57] ss:$24 sm:$0xf0]   ;;  %1722 = vrot.lane.b32.xlu0 %v1721_v4, %s8513_s12  ;;  %v8822_v12 = vpop.permute.xlu1 %1117   ;;  %v6611_v48 = vld [vmem:[%s8543_s11 + $0x80] ss:$8 sm:$0xf0]  }
  0x91   : > { %v7174_v8 = vld [vmem:[%s8543_s11 + $0xa8f] ss:$24 sm:$0xf]   ;;  %v1754_v10 = vsel %vm56_vm0, %v7178_v6, %v7177_v5  ;;  %6606 = vst.msk [vmem:[%s8845_s16 + $0x12] ss:$-15 sm:$0x3] %vm58_vm1, %v69_v46   ;;  %v84_v52 = vsel %vm56_vm0, %v6611_v48, %v6610_v47 }
  0x92   : > { %v7175_v9 = vld [vmem:[%s8543_s11 + $0xa8f] ss:$24 sm:$0xf0]   ;;  %v8827_v16 = vpop.permute.xlu0 %1106   ;;  %1755 = vrot.lane.b32.xlu1 %v1754_v10, %s8513_s12  ;;  %6608 = vst.msk [vmem:[%s8845_s16 - $0x1c] ss:$8 sm:$0x70] %vm58_vm1, %v69_v46  }
  0x93   : > { %v7183_v11 = vld [vmem:[%s8543_s11 + $0xd8f] ss:$24 sm:$0xf]   ;;  %v1743_v13 = vsel %vm56_vm0, %v7175_v9, %v7174_v8  ;;  %6609 = vst.msk [vmem:[%s8845_s16 - $0x2] sm:$0x80] %vm58_vm1, %v69_v46  }
  0x94   : > { %v7184_v14 = vld [vmem:[%s8543_s11 + $0xd8f] ss:$24 sm:$0xf0]   ;;  %1744 = vrot.lane.b32.xlu0 %v1743_v13, %s8513_s12  ;;  %v8839_v25 = vpop.permute.xlu1 %1139   ;;  %6607 = vst.msk [vmem:[%s8845_s16 - $0x5] ss:$8 sm:$0xc] %vm58_vm1, %v69_v46  }
  0x95   : > { %v7180_v15 = vld [vmem:[%s8543_s11 + $0xcc7] ss:$24 sm:$0xf]   ;;  %v1776_v21 = vsel %vm56_vm0, %v7184_v14, %v7183_v11  ;;  %v7200_v53 = vld [vmem:[%s8543_s11 + $0xce] ss:$24 sm:$0xf]  }
  0x96   : > { %v7181_v17 = vld [vmem:[%s8543_s11 + $0xcc7] ss:$24 sm:$0xf0]   ;;  %v8850_v30 = vpop.permute.xlu0 %1128   ;;  %1777 = vrot.lane.b32.xlu1 %v1776_v21, %s8513_s12  ;;  %v7201_v54 = vld [vmem:[%s8543_s11 + $0xce] ss:$24 sm:$0xf0]  }
  0x97   : > { %v7189_v19 = vld [vmem:[%s8543_s11 + $0xfc7] ss:$24 sm:$0xf]   ;;  %v1765_v26 = vsel %vm56_vm0, %v7181_v17, %v7180_v15  ;;  %6613 = vst.msk [vmem:[%s8845_s16 - $0xa] ss:$8 sm:$0x1c] %vm58_vm1, %v84_v52   ;;  %v1841_v14 = vsel %vm56_vm0, %v7201_v54, %v7200_v53 }
  0x98   : > { %v7190_v20 = vld [vmem:[%s8543_s11 + $0xfc7] ss:$24 sm:$0xf0]   ;;  %1766 = vrot.lane.b32.xlu0 %v1765_v26, %s8513_s12  ;;  %v8887_v44 = vpop.permute.xlu1 %1161   ;;  %6614 = vst.msk [vmem:[%s8845_s16 - $0x21] ss:$8 sm:$0xe0] %vm58_vm1, %v84_v52  }
  0x99   : > { %v7186_v22 = vld [vmem:[%s8543_s11 + $0xe57] ss:$24 sm:$0xf]   ;;  %v1798_v39 = vsel %vm56_vm0, %v7190_v20, %v7189_v19  ;;  %6612 = vst.msk [vmem:[%s8845_s16 + $0xd] ss:$8 sm:$0x3] %vm58_vm1, %v84_v52  }
  0x9a   : > { %v7187_v23 = vld [vmem:[%s8543_s11 + $0xe57] ss:$24 sm:$0xf0]   ;;  %v8902_v49 = vpop.permute.xlu0 %1150   ;;  %1799 = vrot.lane.b32.xlu1 %v1798_v39, %s8513_s12  ;;  %v7198_v57 = vld [vmem:[%s8543_s11 + $0x6] ss:$24 sm:$0xf]  }
  0x9b   : > { %v7195_v34 = vld [vmem:[%s8543_s11 + $0x1157] ss:$24 sm:$0xf]   ;;  %v1787_v45 = vsel %vm56_vm0, %v7187_v23, %v7186_v22  ;;  %v7199_v58 = vld [vmem:[%s8543_s11 + $0x6] ss:$24 sm:$0xf0]  }
  0x9c   : > { %v7196_v35 = vld [vmem:[%s8543_s11 + $0x1157] ss:$24 sm:$0xf0]   ;;  %1788 = vrot.lane.b32.xlu0 %v1787_v45, %s8513_s12  ;;  %1044 = vst.msk [vmem:[%s8845_s16] sm:$0xff] %vm1043_vm2, %v8787_v55   ;;  %v8932_v61 = vpop.permute.xlu1 %1183   ;;  %v1831_v20 = vsel %vm56_vm0, %v7199_v58, %v7198_v57 }
  0x9d   : > { %v7192_v40 = vld [vmem:[%s8543_s11 + $0x108f] ss:$24 sm:$0xf]   ;;  %v1820_v56 = vsel %vm56_vm0, %v7196_v35, %v7195_v34  ;;  %v6663_v55 = vld [vmem:[%s8543_s11 + $0x300] ss:$8 sm:$0xf]  }
  0x9e   : > { %v7193_v50 = vld [vmem:[%s8543_s11 + $0x108f] ss:$24 sm:$0xf0]   ;;  %v6664_v60 = vld [vmem:[%s8543_s11 + $0x300] ss:$8 sm:$0xf0]   ;;  %v8938_v2 = vpop.permute.xlu0 %1172   ;;  %1821 = vrot.lane.b32.xlu1 %v1820_v56, %s8513_s12 }
  0x9f   : > { %v1809_v62 = vsel %vm56_vm0, %v7193_v50, %v7192_v40  ;;  %v220_v63 = vsel %vm56_vm0, %v6664_v60, %v6663_v55  ;;  %v6668_v0 = vld [vmem:[%s8543_s11 + $0x340] ss:$8 sm:$0xf]   ;;  %v7206_v8 = vld [vmem:[%s8543_s11 + $0x306] ss:$24 sm:$0xf]  }
  0xa0   : > { %v6669_v1 = vld [vmem:[%s8543_s11 + $0x340] ss:$8 sm:$0xf0]   ;;  %6665 = vst.msk [vmem:[%s8845_s16 + $0x60] ss:$8 sm:$0x7] %vm58_vm1, %v220_v63   ;;  %1810 = vrot.lane.b32.xlu0 %v1809_v62, %s8513_s12  ;;  %v8974_v19 = vpop.permute.xlu1 %1205  }
  0xa1   : > { %6666 = vst.msk [vmem:[%s8845_s16 + $0x49] ss:$8 sm:$0x38] %vm58_vm1, %v220_v63   ;;  %6667 = vst.msk [vmem:[%s8845_s16 + $0x32] ss:$8 sm:$0xc0] %vm58_vm1, %v220_v63   ;;  %v233_v4 = vsel %vm56_vm0, %v6669_v1, %v6668_v0 }
  0xa2   : > { %v6674_v5 = vld [vmem:[%s8543_s11 + $0x380] ss:$8 sm:$0xf]   ;;  %v7207_v9 = vld [vmem:[%s8543_s11 + $0x306] ss:$24 sm:$0xf0]   ;;  %v8989_v23 = vpop.permute.xlu0 %1194   ;;  %1842 = vrot.lane.b32.xlu1 %v1841_v14, %s8514_s17 }
  0xa3   : > { %v6675_v6 = vld [vmem:[%s8543_s11 + $0x380] ss:$8 sm:$0xf0]   ;;  %6670 = vst.msk [vmem:[%s8845_s16 + $0x72] ss:$-15 sm:$0x3] %vm58_vm1, %v233_v4   ;;  %v1863_v31 = vsel %vm56_vm0, %v7207_v9, %v7206_v8 }
  0xa4   : > { %6672 = vst.msk [vmem:[%s8845_s16 + $0x44] ss:$8 sm:$0x70] %vm58_vm1, %v233_v4   ;;  %6673 = vst.msk [vmem:[%s8845_s16 + $0x5e] sm:$0x80] %vm58_vm1, %v233_v4   ;;  %v248_v10 = vsel %vm56_vm0, %v6675_v6, %v6674_v5  ;;  %1832 = vrot.lane.b32.xlu0 %v1831_v20, %s8514_s17  ;;  %v9020_v35 = vpop.permute.xlu1 %1227  }
  0xa5   : > { %6671 = vst.msk [vmem:[%s8845_s16 + $0x5b] ss:$8 sm:$0xc] %vm58_vm1, %v233_v4   ;;  %v6631_v11 = vld [vmem:[%s8543_s11 + $0x180] ss:$8 sm:$0xf]  }
  0xa6   : > { %v6632_v13 = vld [vmem:[%s8543_s11 + $0x180] ss:$8 sm:$0xf0]   ;;  %6677 = vst.msk [vmem:[%s8845_s16 + $0x56] ss:$8 sm:$0x1c] %vm58_vm1, %v248_v10   ;;  %v9026_v40 = vpop.permute.xlu0 %1216   ;;  %1864 = vrot.lane.b32.xlu1 %v1863_v31, %s8514_s17 }
  0xa7   : > { %6678 = vst.msk [vmem:[%s8845_s16 + $0x3f] ss:$8 sm:$0xe0] %vm58_vm1, %v248_v10   ;;  %6676 = vst.msk [vmem:[%s8845_s16 + $0x6d] ss:$8 sm:$0x3] %vm58_vm1, %v248_v10   ;;  %v138_v15 = vsel %vm56_vm0, %v6632_v13, %v6631_v11 }
  0xa8   : > { %v6636_v17 = vld [vmem:[%s8543_s11 + $0x1c0] ss:$8 sm:$0xf]   ;;  %6993 = vst.msk [vmem:[%s8845_s16 + $0x60] sm:$0xff] %vm1043_vm2, %v8796_v59   ;;  %v1250_v57 = vpop.permute.xlu1 %1249  }
  0xa9   : > { %6633 = vst.msk [vmem:[%s8845_s16 + $0x30] ss:$8 sm:$0x7] %vm58_vm1, %v138_v15   ;;  %6634 = vst.msk [vmem:[%s8845_s16 + $0x19] ss:$8 sm:$0x38] %vm58_vm1, %v138_v15   ;;  %v151_v59 = vsel %vm56_vm0, %v6637_v18, %v6636_v17 }
  0xaa   : > { %v6642_v21 = vld [vmem:[%s8543_s11 + $0x200] ss:$8 sm:$0xf]   ;;  %6635 = vst.msk [vmem:[%s8845_s16 + $0x2] ss:$8 sm:$0xc0] %vm58_vm1, %v138_v15   ;;  %v1239_v62 = vpop.permute.xlu0 %1238  }
  0xab   : > { %v6643_v22 = vld [vmem:[%s8543_s11 + $0x200] ss:$8 sm:$0xf0]   ;;  %v7203_v24 = vld [vmem:[%s8543_s11 + $0x196] ss:$24 sm:$0xf]  }
  0xac   : > { %v7204_v26 = vld [vmem:[%s8543_s11 + $0x196] ss:$24 sm:$0xf0]   ;;  %6638 = vst.msk [vmem:[%s8845_s16 + $0x42] ss:$-15 sm:$0x3] %vm58_vm1, %v151_v59   ;;  %v166_v27 = vsel %vm56_vm0, %v6643_v22, %v6642_v21  ;;  %v1272_v11 = vpop.permute.xlu1 %1271  }
  0xad   : > { %6639 = vst.msk [vmem:[%s8845_s16 + $0x2b] ss:$8 sm:$0xc] %vm58_vm1, %v151_v59   ;;  %6640 = vst.msk [vmem:[%s8845_s16 + $0x14] ss:$8 sm:$0x70] %vm58_vm1, %v151_v59   ;;  %v1852_v36 = vsel %vm56_vm0, %v7204_v26, %v7203_v24 }
  0xae   : > { %6641 = vst.msk [vmem:[%s8845_s16 + $0x2e] sm:$0x80] %vm58_vm1, %v151_v59   ;;  %v7212_v28 = vld [vmem:[%s8543_s11 + $0x496] ss:$24 sm:$0xf]   ;;  %1853 = vrot.lane.b32.xlu0 %v1852_v36, %s8514_s17  ;;  %v9112_v18 = vpop.permute.xlu0 %1260  }
  0xaf   : > { %v7213_v29 = vld [vmem:[%s8543_s11 + $0x496] ss:$24 sm:$0xf0]   ;;  %6644 = vst.msk [vmem:[%s8845_s16 + $0x3d] ss:$8 sm:$0x3] %vm58_vm1, %v166_v27  }
  0xb0   : > { %6645 = vst.msk [vmem:[%s8845_s16 + $0x26] ss:$8 sm:$0x1c] %vm58_vm1, %v166_v27   ;;  %6646 = vst.msk [vmem:[%s8845_s16 + $0xf] ss:$8 sm:$0xe0] %vm58_vm1, %v166_v27   ;;  %v1885_v52 = vsel %vm56_vm0, %v7213_v29, %v7212_v28 }
  0xb1   : > { %v7209_v32 = vld [vmem:[%s8543_s11 + $0x3ce] ss:$24 sm:$0xf]   ;;  %6990 = vst.msk [vmem:[%s8845_s16 + $0x40] sm:$0xff] %vm1043_vm2, %v8782_v51   ;;  %7041 = vst.msk [vmem:[%s8845_s16 + $0x28] sm:$0xff] %vm1043_vm2, %v1250_v57   ;;  %1886 = vrot.lane.b32.xlu1 %v1885_v52, %s8514_s17 }
  0xb2   : > { %v7210_v33 = vld [vmem:[%s8543_s11 + $0x3ce] ss:$24 sm:$0xf0]   ;;  %v6695_v51 = vld [vmem:[%s8543_s11 + $0x480] ss:$8 sm:$0xf]  }
  0xb3   : > { %v6696_v34 = vld [vmem:[%s8543_s11 + $0x480] ss:$8 sm:$0xf0]   ;;  %v7218_v45 = vld [vmem:[%s8543_s11 + $0x6ce] ss:$24 sm:$0xf]   ;;  %v1874_v58 = vsel %vm56_vm0, %v7210_v33, %v7209_v32 }
  0xb4   : > { %v302_v37 = vsel %vm56_vm0, %v6696_v34, %v6695_v51  ;;  %v6700_v38 = vld [vmem:[%s8543_s11 + $0x4c0] ss:$8 sm:$0xf]   ;;  %v7219_v46 = vld [vmem:[%s8543_s11 + $0x6ce] ss:$24 sm:$0xf0]   ;;  %1875 = vrot.lane.b32.xlu0 %v1874_v58, %s8514_s17  ;;  %v9150_v51 = vpop.permute.xlu1 %1293  }
  0xb5   : > { %v6701_v39 = vld [vmem:[%s8543_s11 + $0x4c0] ss:$8 sm:$0xf0]   ;;  %6697 = vst.msk [vmem:[%s8845_s16 + $0x90] ss:$8 sm:$0x7] %vm58_vm1, %v302_v37   ;;  %v1907_v6 = vsel %vm56_vm0, %v7219_v46, %v7218_v45 }
  0xb6   : > { %6698 = vst.msk [vmem:[%s8845_s16 + $0x79] ss:$8 sm:$0x38] %vm58_vm1, %v302_v37   ;;  %v315_v41 = vsel %vm56_vm0, %v6701_v39, %v6700_v38  ;;  %v6706_v42 = vld [vmem:[%s8543_s11 + $0x500] ss:$8 sm:$0xf]   ;;  %1908 = vrot.lane.b32.xlu1 %v1907_v6, %s8514_s17  ;;  %v1283_v38 = vpop.permute.xlu0 %1282  }
  0xb7   : > { %v6707_v43 = vld [vmem:[%s8543_s11 + $0x500] ss:$8 sm:$0xf0]   ;;  %6699 = vst.msk [vmem:[%s8845_s16 + $0x62] ss:$8 sm:$0xc0] %vm58_vm1, %v302_v37  }
  0xb8   : > { %6702 = vst.msk [vmem:[%s8845_s16 + $0xa2] ss:$-15 sm:$0x3] %vm58_vm1, %v315_v41   ;;  %6703 = vst.msk [vmem:[%s8845_s16 + $0x8b] ss:$8 sm:$0xc] %vm58_vm1, %v315_v41   ;;  %v330_v47 = vsel %vm56_vm0, %v6707_v43, %v6706_v42  ;;  %v1316_v52 = vpop.permute.xlu1 %1315  }
  0xb9   : > { %6704 = vst.msk [vmem:[%s8845_s16 + $0x74] ss:$8 sm:$0x70] %vm58_vm1, %v315_v41   ;;  %6705 = vst.msk [vmem:[%s8845_s16 + $0x8e] sm:$0x80] %vm58_vm1, %v315_v41  }
  0xba   : > { %v6679_v48 = vld [vmem:[%s8543_s11 + $0x3c0] ss:$8 sm:$0xf]   ;;  %6708 = vst.msk [vmem:[%s8845_s16 + $0x9d] ss:$8 sm:$0x3] %vm58_vm1, %v330_v47   ;;  %v1305_v58 = vpop.permute.xlu0 %1304  }
  0xbb   : > { %v6680_v50 = vld [vmem:[%s8543_s11 + $0x3c0] ss:$8 sm:$0xf0]   ;;  %6709 = vst.msk [vmem:[%s8845_s16 + $0x86] ss:$8 sm:$0x1c] %vm58_vm1, %v330_v47  }
  0xbc   : > { %6710 = vst.msk [vmem:[%s8845_s16 + $0x6f] ss:$8 sm:$0xe0] %vm58_vm1, %v330_v47   ;;  %v261_v53 = vsel %vm56_vm0, %v6680_v50, %v6679_v48  ;;  %v6684_v54 = vld [vmem:[%s8543_s11 + $0x400] ss:$8 sm:$0xf]  }
  0xbd   : > { %v6685_v56 = vld [vmem:[%s8543_s11 + $0x400] ss:$8 sm:$0xf0]   ;;  %6999 = vst.msk [vmem:[%s8845_s16 + $0xa0] sm:$0xff] %vm1043_vm2, %v8808_v3   ;;  %7038 = vst.msk [vmem:[%s8845_s16 + $0x8] sm:$0xff] %vm1043_vm2, %v1239_v62  }
  0xbe   : > { %6681 = vst.msk [vmem:[%s8845_s16 + $0x78] ss:$8 sm:$0x7] %vm58_vm1, %v261_v53   ;;  %6682 = vst.msk [vmem:[%s8845_s16 + $0x61] ss:$8 sm:$0x38] %vm58_vm1, %v261_v53   ;;  %v274_v3 = vsel %vm56_vm0, %v6685_v56, %v6684_v54 }
  0xbf   : > { %6683 = vst.msk [vmem:[%s8845_s16 + $0x4a] ss:$8 sm:$0xc0] %vm58_vm1, %v261_v53   ;;  %v6690_v55 = vld [vmem:[%s8543_s11 + $0x440] ss:$8 sm:$0xf]  }
  0xc0   : > { %v6691_v60 = vld [vmem:[%s8543_s11 + $0x440] ss:$8 sm:$0xf0]   ;;  %v7215_v63 = vld [vmem:[%s8543_s11 + $0x606] ss:$24 sm:$0xf]  }
  0xc1   : > { %v7216_v0 = vld [vmem:[%s8543_s11 + $0x606] ss:$24 sm:$0xf0]   ;;  %6687 = vst.msk [vmem:[%s8845_s16 + $0x73] ss:$8 sm:$0xc] %vm58_vm1, %v274_v3   ;;  %v289_v1 = vsel %vm56_vm0, %v6691_v60, %v6690_v55 }
  0xc2   : > { %6688 = vst.msk [vmem:[%s8845_s16 + $0x5c] ss:$8 sm:$0x70] %vm58_vm1, %v274_v3   ;;  %6686 = vst.msk [vmem:[%s8845_s16 + $0x8a] ss:$-15 sm:$0x3] %vm58_vm1, %v274_v3   ;;  %v1896_v13 = vsel %vm56_vm0, %v7216_v0, %v7215_v63 }
  0xc3   : > { %6689 = vst.msk [vmem:[%s8845_s16 + $0x76] sm:$0x80] %vm58_vm1, %v274_v3   ;;  %v7224_v4 = vld [vmem:[%s8543_s11 + $0x906] ss:$24 sm:$0xf]   ;;  %1897 = vrot.lane.b32.xlu0 %v1896_v13, %s8514_s17 }
  0xc4   : > { %v7225_v5 = vld [vmem:[%s8543_s11 + $0x906] ss:$24 sm:$0xf0]   ;;  %6692 = vst.msk [vmem:[%s8845_s16 + $0x85] ss:$8 sm:$0x3] %vm58_vm1, %v289_v1  }
  0xc5   : > { %6693 = vst.msk [vmem:[%s8845_s16 + $0x6e] ss:$8 sm:$0x1c] %vm58_vm1, %v289_v1   ;;  %6694 = vst.msk [vmem:[%s8845_s16 + $0x57] ss:$8 sm:$0xe0] %vm58_vm1, %v289_v1   ;;  %v1929_v29 = vsel %vm56_vm0, %v7225_v5, %v7224_v4 }
  0xc6   : > { %v7221_v8 = vld [vmem:[%s8543_s11 + $0x796] ss:$24 sm:$0xf]   ;;  %6996 = vst.msk [vmem:[%s8845_s16 + $0x80] sm:$0xff] %vm1043_vm2, %v8813_v7   ;;  %7047 = vst.msk [vmem:[%s8845_s16 + $0x68] sm:$0xff] %vm1043_vm2, %v1272_v11   ;;  %1930 = vrot.lane.b32.xlu1 %v1929_v29, %s8514_s17 }
  0xc7   : > { %v7222_v9 = vld [vmem:[%s8543_s11 + $0x796] ss:$24 sm:$0xf0]   ;;  %v6743_v7 = vld [vmem:[%s8543_s11 + $0x6c0] ss:$8 sm:$0xf]  }
  0xc8   : > { %v6744_v10 = vld [vmem:[%s8543_s11 + $0x6c0] ss:$8 sm:$0xf0]   ;;  %v7230_v22 = vld [vmem:[%s8543_s11 + $0xa96] ss:$24 sm:$0xf]   ;;  %v1918_v34 = vsel %vm56_vm0, %v7222_v9, %v7221_v8 }
  0xc9   : > { %v425_v14 = vsel %vm56_vm0, %v6744_v10, %v6743_v7  ;;  %v6748_v15 = vld [vmem:[%s8543_s11 + $0x700] ss:$8 sm:$0xf]   ;;  %v7231_v24 = vld [vmem:[%s8543_s11 + $0xa96] ss:$24 sm:$0xf0]   ;;  %1919 = vrot.lane.b32.xlu0 %v1918_v34, %s8514_s17  ;;  %v1338_v7 = vpop.permute.xlu1 %1337  }
  0xca   : > { %v6749_v17 = vld [vmem:[%s8543_s11 + $0x700] ss:$8 sm:$0xf0]   ;;  %6745 = vst.msk [vmem:[%s8845_s16 + $0xd8] ss:$8 sm:$0x7] %vm58_vm1, %v425_v14   ;;  %v1951_v46 = vsel %vm56_vm0, %v7231_v24, %v7230_v22 }
  0xcb   : > { %6746 = vst.msk [vmem:[%s8845_s16 + $0xc1] ss:$8 sm:$0x38] %vm58_vm1, %v425_v14   ;;  %6747 = vst.msk [vmem:[%s8845_s16 + $0xaa] ss:$8 sm:$0xc0] %vm58_vm1, %v425_v14   ;;  %v438_v20 = vsel %vm56_vm0, %v6749_v17, %v6748_v15  ;;  %1952 = vrot.lane.b32.xlu1 %v1951_v46, %s8514_s17  ;;  %v9251_v14 = vpop.permute.xlu0 %1326  }
  0xcc   : > { %v6754_v59 = vld [vmem:[%s8543_s11 + $0x740] ss:$8 sm:$0xf]   ;;  %6751 = vst.msk [vmem:[%s8845_s16 + $0xd3] ss:$8 sm:$0xc] %vm58_vm1, %v438_v20  }
  0xcd   : > { %v6755_v21 = vld [vmem:[%s8543_s11 + $0x740] ss:$8 sm:$0xf0]   ;;  %6752 = vst.msk [vmem:[%s8845_s16 + $0xbc] ss:$8 sm:$0x70] %vm58_vm1, %v438_v20  }
  0xce   : > { %v453_v26 = vsel %vm56_vm0, %v6755_v21, %v6754_v59  ;;  %6750 = vst.msk [vmem:[%s8845_s16 + $0xea] ss:$-15 sm:$0x3] %vm58_vm1, %v438_v20   ;;  %6753 = vst.msk [vmem:[%s8845_s16 + $0xd6] sm:$0x80] %vm58_vm1, %v438_v20  }
  0xcf   : > { %v6727_v27 = vld [vmem:[%s8543_s11 + $0x600] ss:$8 sm:$0xf]   ;;  %6756 = vst.msk [vmem:[%s8845_s16 + $0xe5] ss:$8 sm:$0x3] %vm58_vm1, %v453_v26   ;;  %v1349_v34 = vpop.permute.xlu0 %1348  }
  0xd0   : > { %v6728_v28 = vld [vmem:[%s8543_s11 + $0x600] ss:$8 sm:$0xf0]   ;;  %6757 = vst.msk [vmem:[%s8845_s16 + $0xce] ss:$8 sm:$0x1c] %vm58_vm1, %v453_v26  }
  0xd1   : > { %6758 = vst.msk [vmem:[%s8845_s16 + $0xb7] ss:$8 sm:$0xe0] %vm58_vm1, %v453_v26   ;;  %v384_v31 = vsel %vm56_vm0, %v6728_v28, %v6727_v27  ;;  %v6732_v32 = vld [vmem:[%s8543_s11 + $0x640] ss:$8 sm:$0xf]   ;;  %v9284_v28 = vpop.permute.xlu1 %1359  }
  0xd2   : > { %v6733_v33 = vld [vmem:[%s8543_s11 + $0x640] ss:$8 sm:$0xf0]   ;;  %7005 = vst.msk [vmem:[%s8845_s16 + $0xe0] sm:$0xff] %vm1043_vm2, %v8822_v12   ;;  %7050 = vst.msk [vmem:[%s8845_s16 + $0x88] sm:$0xff] %vm1043_vm2, %v1283_v38  }
  0xd3   : > { %6729 = vst.msk [vmem:[%s8845_s16 + $0xc0] ss:$8 sm:$0x7] %vm58_vm1, %v384_v31   ;;  %6730 = vst.msk [vmem:[%s8845_s16 + $0xa9] ss:$8 sm:$0x38] %vm58_vm1, %v384_v31   ;;  %v397_v12 = vsel %vm56_vm0, %v6733_v33, %v6732_v32 }
  0xd4   : > { %6731 = vst.msk [vmem:[%s8845_s16 + $0x92] ss:$8 sm:$0xc0] %vm58_vm1, %v384_v31   ;;  %v6738_v36 = vld [vmem:[%s8543_s11 + $0x680] ss:$8 sm:$0xf]  }
  0xd5   : > { %v6739_v37 = vld [vmem:[%s8543_s11 + $0x680] ss:$8 sm:$0xf0]   ;;  %v7227_v39 = vld [vmem:[%s8543_s11 + $0x9ce] ss:$24 sm:$0xf]  }
  0xd6   : > { %v7228_v41 = vld [vmem:[%s8543_s11 + $0x9ce] ss:$24 sm:$0xf0]   ;;  %6734 = vst.msk [vmem:[%s8845_s16 + $0xd2] ss:$-15 sm:$0x3] %vm58_vm1, %v397_v12   ;;  %v412_v42 = vsel %vm56_vm0, %v6739_v37, %v6738_v36 }
  0xd7   : > { %6736 = vst.msk [vmem:[%s8845_s16 + $0xa4] ss:$8 sm:$0x70] %vm58_vm1, %v397_v12   ;;  %6737 = vst.msk [vmem:[%s8845_s16 + $0xbe] sm:$0x80] %vm58_vm1, %v397_v12   ;;  %v1940_v53 = vsel %vm56_vm0, %v7228_v41, %v7227_v39 }
  0xd8   : > { %6735 = vst.msk [vmem:[%s8845_s16 + $0xbb] ss:$8 sm:$0xc] %vm58_vm1, %v397_v12   ;;  %v7236_v43 = vld [vmem:[%s8543_s11 + $0xcce] ss:$24 sm:$0xf]   ;;  %1941 = vrot.lane.b32.xlu0 %v1940_v53, %s8514_s17 }
  0xd9   : > { %v7237_v45 = vld [vmem:[%s8543_s11 + $0xcce] ss:$24 sm:$0xf0]   ;;  %6741 = vst.msk [vmem:[%s8845_s16 + $0xb6] ss:$8 sm:$0x1c] %vm58_vm1, %v412_v42  }
  0xda   : > { %6742 = vst.msk [vmem:[%s8845_s16 + $0x9f] ss:$8 sm:$0xe0] %vm58_vm1, %v412_v42   ;;  %6740 = vst.msk [vmem:[%s8845_s16 + $0xcd] ss:$8 sm:$0x3] %vm58_vm1, %v412_v42   ;;  %v1973_v5 = vsel %vm56_vm0, %v7237_v45, %v7236_v43 }
  0xdb   : > { %v7233_v47 = vld [vmem:[%s8543_s11 + $0xc06] ss:$24 sm:$0xf]   ;;  %7002 = vst.msk [vmem:[%s8845_s16 + $0xc0] sm:$0xff] %vm1043_vm2, %v8827_v16   ;;  %7059 = vst.msk [vmem:[%s8845_s16 + $0xe8] sm:$0xff] %vm1043_vm2, %v1316_v52   ;;  %1974 = vrot.lane.b32.xlu1 %v1973_v5, %s8514_s17 }
  0xdc   : > { %v7234_v48 = vld [vmem:[%s8543_s11 + $0xc06] ss:$24 sm:$0xf0]   ;;  %v6791_v16 = vld [vmem:[%s8543_s11 + $0x900] ss:$8 sm:$0xf]  }
  0xdd   : > { %v6792_v50 = vld [vmem:[%s8543_s11 + $0x900] ss:$8 sm:$0xf0]   ;;  %v7242_v62 = vld [vmem:[%s8543_s11 + $0xf06] ss:$24 sm:$0xf]   ;;  %v1962_v10 = vsel %vm56_vm0, %v7234_v48, %v7233_v47 }
  0xde   : > { %v548_v54 = vsel %vm56_vm0, %v6792_v50, %v6791_v16  ;;  %v6796_v56 = vld [vmem:[%s8543_s11 + $0x940] ss:$8 sm:$0xf]   ;;  %v7243_v63 = vld [vmem:[%s8543_s11 + $0xf06] ss:$24 sm:$0xf0]   ;;  %1963 = vrot.lane.b32.xlu0 %v1962_v10, %s8514_s17  ;;  %v9324_v16 = vpop.permute.xlu1 %1381  }
  0xdf   : > { %v6797_v57 = vld [vmem:[%s8543_s11 + $0x940] ss:$8 sm:$0xf0]   ;;  %6793 = vst.msk [vmem:[%s8845_s16 + $0x120] ss:$8 sm:$0x7] %vm58_vm1, %v548_v54   ;;  %v1995_v22 = vsel %vm56_vm0, %v7243_v63, %v7242_v62 }
  0xe0   : > { %6794 = vst.msk [vmem:[%s8845_s16 + $0x109] ss:$8 sm:$0x38] %vm58_vm1, %v548_v54   ;;  %6795 = vst.msk [vmem:[%s8845_s16 + $0xf2] ss:$8 sm:$0xc0] %vm58_vm1, %v548_v54   ;;  %v561_v3 = vsel %vm56_vm0, %v6797_v57, %v6796_v56  ;;  %1996 = vrot.lane.b32.xlu1 %v1995_v22, %s8514_s17  ;;  %v9339_v54 = vpop.permute.xlu0 %1370  }
  0xe1   : > { %v6802_v55 = vld [vmem:[%s8543_s11 + $0x980] ss:$8 sm:$0xf]   ;;  %7056 = vst.msk [vmem:[%s8845_s16 + $0xc8] sm:$0xff] %vm1043_vm2, %v1305_v58  }
  0xe2   : > { %v6803_v60 = vld [vmem:[%s8543_s11 + $0x980] ss:$8 sm:$0xf0]   ;;  %6798 = vst.msk [vmem:[%s8845_s16 + $0x132] ss:$-15 sm:$0x3] %vm58_vm1, %v561_v3  }
  0xe3   : > { %6800 = vst.msk [vmem:[%s8845_s16 + $0x104] ss:$8 sm:$0x70] %vm58_vm1, %v561_v3   ;;  %6801 = vst.msk [vmem:[%s8845_s16 + $0x11e] sm:$0x80] %vm58_vm1, %v561_v3   ;;  %v576_v0 = vsel %vm56_vm0, %v6803_v60, %v6802_v55 }
  0xe4   : > { %6799 = vst.msk [vmem:[%s8845_s16 + $0x11b] ss:$8 sm:$0xc] %vm58_vm1, %v561_v3   ;;  %v6759_v1 = vld [vmem:[%s8543_s11 + $0x780] ss:$8 sm:$0xf]  }
  0xe5   : > { %v6760_v4 = vld [vmem:[%s8543_s11 + $0x780] ss:$8 sm:$0xf0]   ;;  %6805 = vst.msk [vmem:[%s8845_s16 + $0x116] ss:$8 sm:$0x1c] %vm58_vm1, %v576_v0  }
  0xe6   : > { %6806 = vst.msk [vmem:[%s8845_s16 + $0xff] ss:$8 sm:$0xe0] %vm58_vm1, %v576_v0   ;;  %6804 = vst.msk [vmem:[%s8845_s16 + $0x12d] ss:$8 sm:$0x3] %vm58_vm1, %v576_v0   ;;  %v466_v6 = vsel %vm56_vm0, %v6760_v4, %v6759_v1  ;;  %v9372_v1 = vpop.permute.xlu1 %1403  }
  0xe7   : > { %v6764_v8 = vld [vmem:[%s8543_s11 + $0x7c0] ss:$8 sm:$0xf]   ;;  %7011 = vst.msk [vmem:[%s8845_s16 + $0x120] sm:$0xff] %vm1043_vm2, %v8839_v25   ;;  %7065 = vst.msk [vmem:[%s8845_s16 + $0x128] sm:$0xff] %vm1043_vm2, %v1338_v7  }
  0xe8   : > { %v6765_v9 = vld [vmem:[%s8543_s11 + $0x7c0] ss:$8 sm:$0xf0]   ;;  %6761 = vst.msk [vmem:[%s8845_s16 + $0xf0] ss:$8 sm:$0x7] %vm58_vm1, %v466_v6  }
  0xe9   : > { %6762 = vst.msk [vmem:[%s8845_s16 + $0xd9] ss:$8 sm:$0x38] %vm58_vm1, %v466_v6   ;;  %v479_v25 = vsel %vm56_vm0, %v6765_v9, %v6764_v8  ;;  %v6770_v11 = vld [vmem:[%s8543_s11 + $0x800] ss:$8 sm:$0xf]   ;;  %v9378_v9 = vpop.permute.xlu0 %1392  }
  0xea   : > { %v6771_v13 = vld [vmem:[%s8543_s11 + $0x800] ss:$8 sm:$0xf0]   ;;  %6763 = vst.msk [vmem:[%s8845_s16 + $0xc2] ss:$8 sm:$0xc0] %vm58_vm1, %v466_v6  }
  0xeb   : > { %v7239_v15 = vld [vmem:[%s8543_s11 + $0xd96] ss:$24 sm:$0xf]   ;;  %6766 = vst.msk [vmem:[%s8845_s16 + $0x102] ss:$-15 sm:$0x3] %vm58_vm1, %v479_v25   ;;  %v494_v20 = vsel %vm56_vm0, %v6771_v13, %v6770_v11 }
  0xec   : > { %v7240_v17 = vld [vmem:[%s8543_s11 + $0xd96] ss:$24 sm:$0xf0]   ;;  %6767 = vst.msk [vmem:[%s8845_s16 + $0xeb] ss:$8 sm:$0xc] %vm58_vm1, %v479_v25  }
  0xed   : > { %6768 = vst.msk [vmem:[%s8845_s16 + $0xd4] ss:$8 sm:$0x70] %vm58_vm1, %v479_v25   ;;  %6769 = vst.msk [vmem:[%s8845_s16 + $0xee] sm:$0x80] %vm58_vm1, %v479_v25   ;;  %v1984_v29 = vsel %vm56_vm0, %v7240_v17, %v7239_v15 }
  0xee   : > { %v7248_v59 = vld [vmem:[%s8543_s11 + $0x1096] ss:$24 sm:$0xf]   ;;  %6772 = vst.msk [vmem:[%s8845_s16 + $0xfd] ss:$8 sm:$0x3] %vm58_vm1, %v494_v20   ;;  %1985 = vrot.lane.b32.xlu0 %v1984_v29, %s8514_s17 }
  0xef   : > { %v7249_v21 = vld [vmem:[%s8543_s11 + $0x1096] ss:$24 sm:$0xf0]   ;;  %6773 = vst.msk [vmem:[%s8845_s16 + $0xe6] ss:$8 sm:$0x1c] %vm58_vm1, %v494_v20  }
  0xf0   : > { %6774 = vst.msk [vmem:[%s8845_s16 + $0xcf] ss:$8 sm:$0xe0] %vm58_vm1, %v494_v20   ;;  %v7245_v24 = vld [vmem:[%s8543_s11 + $0xfce] ss:$24 sm:$0xf]   ;;  %v2017_v45 = vsel %vm56_vm0, %v7249_v21, %v7248_v59 }
  0xf1   : > { %v7246_v26 = vld [vmem:[%s8543_s11 + $0xfce] ss:$24 sm:$0xf0]   ;;  %7008 = vst.msk [vmem:[%s8845_s16 + $0x100] sm:$0xff] %vm1043_vm2, %v8850_v30   ;;  %2018 = vrot.lane.b32.xlu1 %v2017_v45, %s8514_s17 }
  0xf2   : > { %v6823_v30 = vld [vmem:[%s8543_s11 + $0xa80] ss:$8 sm:$0xf]   ;;  %v7254_v38 = vld [vmem:[%s8543_s11 + $0xd6] ss:$24 sm:$0xf]   ;;  %v2006_v50 = vsel %vm56_vm0, %v7246_v26, %v7245_v24  ;;  %v9414_v26 = vpop.permute.xlu1 %1425  }
  0xf3   : > { %v6824_v27 = vld [vmem:[%s8543_s11 + $0xa80] ss:$8 sm:$0xf0]   ;;  %v7255_v39 = vld [vmem:[%s8543_s11 + $0xd6] ss:$24 sm:$0xf0]   ;;  %2007 = vrot.lane.b32.xlu0 %v2006_v50, %s8514_s17 }
  0xf4   : > { %v630_v31 = vsel %vm56_vm0, %v6824_v27, %v6823_v30  ;;  %v6828_v32 = vld [vmem:[%s8543_s11 + $0xac0] ss:$8 sm:$0xf]   ;;  %v7251_v56 = vld [vmem:[%s8543_s11 + $0xe] ss:$24 sm:$0xf]   ;;  %v2039_v60 = vsel %vm56_vm0, %v7255_v39, %v7254_v38 }
  0xf5   : > { %v6829_v33 = vld [vmem:[%s8543_s11 + $0xac0] ss:$8 sm:$0xf0]   ;;  %6825 = vst.msk [vmem:[%s8845_s16 + $0x150] ss:$8 sm:$0x7] %vm58_vm1, %v630_v31   ;;  %2040 = vrot.lane.b32.xlu1 %v2039_v60, %s8514_s17 }
  0xf6   : > { %6826 = vst.msk [vmem:[%s8845_s16 + $0x139] ss:$8 sm:$0x38] %vm58_vm1, %v630_v31   ;;  %v643_v12 = vsel %vm56_vm0, %v6829_v33, %v6828_v32  ;;  %v6834_v36 = vld [vmem:[%s8543_s11 + $0xb00] ss:$8 sm:$0xf]  }
  0xf7   : > { %v6835_v37 = vld [vmem:[%s8543_s11 + $0xb00] ss:$8 sm:$0xf0]   ;;  %6827 = vst.msk [vmem:[%s8845_s16 + $0x122] ss:$8 sm:$0xc0] %vm58_vm1, %v630_v31   ;;  %v9432_v31 = vpop.permute.xlu0 %1414  }
  0xf8   : > { %6830 = vst.msk [vmem:[%s8845_s16 + $0x162] ss:$-15 sm:$0x3] %vm58_vm1, %v643_v12   ;;  %6831 = vst.msk [vmem:[%s8845_s16 + $0x14b] ss:$8 sm:$0xc] %vm58_vm1, %v643_v12   ;;  %v658_v41 = vsel %vm56_vm0, %v6835_v37, %v6834_v36 }
  0xf9   : > { %6832 = vst.msk [vmem:[%s8845_s16 + $0x134] ss:$8 sm:$0x70] %vm58_vm1, %v643_v12   ;;  %6833 = vst.msk [vmem:[%s8845_s16 + $0x14e] sm:$0x80] %vm58_vm1, %v643_v12  }
  0xfa   : > { %v6807_v42 = vld [vmem:[%s8543_s11 + $0x9c0] ss:$8 sm:$0xf]   ;;  %6836 = vst.msk [vmem:[%s8845_s16 + $0x15d] ss:$8 sm:$0x3] %vm58_vm1, %v658_v41  }
  0xfb   : > { %v6808_v43 = vld [vmem:[%s8543_s11 + $0x9c0] ss:$8 sm:$0xf0]   ;;  %6837 = vst.msk [vmem:[%s8845_s16 + $0x146] ss:$8 sm:$0x1c] %vm58_vm1, %v658_v41  }
  0xfc   : > { %6838 = vst.msk [vmem:[%s8845_s16 + $0x12f] ss:$8 sm:$0xe0] %vm58_vm1, %v658_v41   ;;  %v589_v46 = vsel %vm56_vm0, %v6808_v43, %v6807_v42  ;;  %v6812_v47 = vld [vmem:[%s8543_s11 + $0xa00] ss:$8 sm:$0xf]   ;;  %v1448_v42 = vpop.permute.xlu1 %1447  }
  0xfd   : > { %v6813_v48 = vld [vmem:[%s8543_s11 + $0xa00] ss:$8 sm:$0xf0]   ;;  %7017 = vst.msk [vmem:[%s8845_s16 + $0x160] sm:$0xff] %vm1043_vm2, %v8887_v44   ;;  %7095 = vst.msk [vmem:[%s8845_s16 + $0x30] sm:$0xff] %vm1043_vm2, %v1448_v42  }
  0xfe   : > { %6809 = vst.msk [vmem:[%s8845_s16 + $0x138] ss:$8 sm:$0x7] %vm58_vm1, %v589_v46   ;;  %6810 = vst.msk [vmem:[%s8845_s16 + $0x121] ss:$8 sm:$0x38] %vm58_vm1, %v589_v46   ;;  %v602_v44 = vsel %vm56_vm0, %v6813_v48, %v6812_v47  ;;  %v1437_v48 = vpop.permute.xlu0 %1436  }
  0xff   : > { %6811 = vst.msk [vmem:[%s8845_s16 + $0x10a] ss:$8 sm:$0xc0] %vm58_vm1, %v589_v46   ;;  %v6818_v52 = vld [vmem:[%s8543_s11 + $0xa40] ss:$8 sm:$0xf]  }
 0x100   : > { %v6819_v53 = vld [vmem:[%s8543_s11 + $0xa40] ss:$8 sm:$0xf0]   ;;  %v7252_v57 = vld [vmem:[%s8543_s11 + $0xe] ss:$24 sm:$0xf0]  }
 0x101   : > { %6815 = vst.msk [vmem:[%s8845_s16 + $0x133] ss:$8 sm:$0xc] %vm58_vm1, %v602_v44   ;;  %6816 = vst.msk [vmem:[%s8845_s16 + $0x11c] ss:$8 sm:$0x70] %vm58_vm1, %v602_v44   ;;  %v617_v58 = vsel %vm56_vm0, %v6819_v53, %v6818_v52  ;;  %v2028_v4 = vsel %vm56_vm0, %v7252_v57, %v7251_v56 }
 0x102   : > { %6814 = vst.msk [vmem:[%s8845_s16 + $0x14a] ss:$-15 sm:$0x3] %vm58_vm1, %v602_v44   ;;  %6817 = vst.msk [vmem:[%s8845_s16 + $0x136] sm:$0x80] %vm58_vm1, %v602_v44   ;;  %2029 = vrot.lane.b32.xlu0 %v2028_v4, %s8514_s17 }
 0x103   : > { %v7260_v3 = vld [vmem:[%s8543_s11 + $0x30e] ss:$24 sm:$0xf]   ;;  %6820 = vst.msk [vmem:[%s8845_s16 + $0x145] ss:$8 sm:$0x3] %vm58_vm1, %v617_v58  }
 0x104   : > { %v7261_v55 = vld [vmem:[%s8543_s11 + $0x30e] ss:$24 sm:$0xf0]   ;;  %6821 = vst.msk [vmem:[%s8845_s16 + $0x12e] ss:$8 sm:$0x1c] %vm58_vm1, %v617_v58  }
 0x105   : > { %6822 = vst.msk [vmem:[%s8845_s16 + $0x117] ss:$8 sm:$0xe0] %vm58_vm1, %v617_v58   ;;  %v7257_v62 = vld [vmem:[%s8543_s11 + $0x246] ss:$24 sm:$0xf]   ;;  %v2061_v59 = vsel %vm56_vm0, %v7261_v55, %v7260_v3 }
 0x106   : > { %v7258_v63 = vld [vmem:[%s8543_s11 + $0x246] ss:$24 sm:$0xf0]   ;;  %7014 = vst.msk [vmem:[%s8845_s16 + $0x140] sm:$0xff] %vm1043_vm2, %v8902_v49   ;;  %7068 = vst.msk [vmem:[%s8845_s16 + $0x148] sm:$0xff] %vm1043_vm2, %v1349_v34   ;;  %2062 = vrot.lane.b32.xlu1 %v2061_v59, %s8514_s17 }
 0x107   : > { %v6871_v49 = vld [vmem:[%s8543_s11 + $0xcc0] ss:$8 sm:$0xf]   ;;  %v7266_v11 = vld [vmem:[%s8543_s11 + $0x546] ss:$24 sm:$0xf]   ;;  %v2050_v30 = vsel %vm56_vm0, %v7258_v63, %v7257_v62  ;;  %v1470_v62 = vpop.permute.xlu1 %1469  }
 0x108   : > { %v6872_v0 = vld [vmem:[%s8543_s11 + $0xcc0] ss:$8 sm:$0xf0]   ;;  %v7267_v13 = vld [vmem:[%s8543_s11 + $0x546] ss:$24 sm:$0xf0]   ;;  %2051 = vrot.lane.b32.xlu0 %v2050_v30, %s8514_s17 }
 0x109   : > { %v753_v5 = vsel %vm56_vm0, %v6872_v0, %v6871_v49  ;;  %v6876_v6 = vld [vmem:[%s8543_s11 + $0xd00] ss:$8 sm:$0xf]   ;;  %v7263_v32 = vld [vmem:[%s8543_s11 + $0x3d6] ss:$24 sm:$0xf]   ;;  %v2083_v37 = vsel %vm56_vm0, %v7267_v13, %v7266_v11 }
 0x10a   : > { %v6877_v8 = vld [vmem:[%s8543_s11 + $0xd00] ss:$8 sm:$0xf0]   ;;  %6873 = vst.msk [vmem:[%s8845_s16 + $0x198] ss:$8 sm:$0x7] %vm58_vm1, %v753_v5   ;;  %2084 = vrot.lane.b32.xlu1 %v2083_v37, %s8514_s17 }
 0x10b   : > { %6874 = vst.msk [vmem:[%s8845_s16 + $0x181] ss:$8 sm:$0x38] %vm58_vm1, %v753_v5   ;;  %6875 = vst.msk [vmem:[%s8845_s16 + $0x16a] ss:$8 sm:$0xc0] %vm58_vm1, %v753_v5   ;;  %v766_v7 = vsel %vm56_vm0, %v6877_v8, %v6876_v6  ;;  %v9556_v13 = vpop.permute.xlu1 %1491  }
 0x10c   : > { %v6882_v10 = vld [vmem:[%s8543_s11 + $0xd40] ss:$8 sm:$0xf]   ;;  %6879 = vst.msk [vmem:[%s8845_s16 + $0x193] ss:$8 sm:$0xc] %vm58_vm1, %v766_v7  }
 0x10d   : > { %v6883_v25 = vld [vmem:[%s8543_s11 + $0xd40] ss:$8 sm:$0xf0]   ;;  %6880 = vst.msk [vmem:[%s8845_s16 + $0x17c] ss:$8 sm:$0x70] %vm58_vm1, %v766_v7  }
 0x10e   : > { %v781_v15 = vsel %vm56_vm0, %v6883_v25, %v6882_v10  ;;  %6878 = vst.msk [vmem:[%s8845_s16 + $0x1aa] ss:$-15 sm:$0x3] %vm58_vm1, %v766_v7   ;;  %6881 = vst.msk [vmem:[%s8845_s16 + $0x196] sm:$0x80] %vm58_vm1, %v766_v7  }
 0x10f   : > { %v6855_v17 = vld [vmem:[%s8543_s11 + $0xc00] ss:$8 sm:$0xf]   ;;  %6884 = vst.msk [vmem:[%s8845_s16 + $0x1a5] ss:$8 sm:$0x3] %vm58_vm1, %v781_v15  }
 0x110   : > { %v6856_v20 = vld [vmem:[%s8543_s11 + $0xc00] ss:$8 sm:$0xf0]   ;;  %6885 = vst.msk [vmem:[%s8845_s16 + $0x18e] ss:$8 sm:$0x1c] %vm58_vm1, %v781_v15  }
 0x111   : > { %6886 = vst.msk [vmem:[%s8845_s16 + $0x177] ss:$8 sm:$0xe0] %vm58_vm1, %v781_v15   ;;  %v712_v21 = vsel %vm56_vm0, %v6856_v20, %v6855_v17  ;;  %v6860_v22 = vld [vmem:[%s8543_s11 + $0xc40] ss:$8 sm:$0xf]  }
 0x112   : > { %v6861_v24 = vld [vmem:[%s8543_s11 + $0xc40] ss:$8 sm:$0xf0]   ;;  %7023 = vst.msk [vmem:[%s8845_s16 + $0x1a0] sm:$0xff] %vm1043_vm2, %v8932_v61   ;;  %7077 = vst.msk [vmem:[%s8845_s16 + $0x1a8] sm:$0xff] %vm1043_vm2, %v9324_v16  }
 0x113   : > { %6857 = vst.msk [vmem:[%s8845_s16 + $0x180] ss:$8 sm:$0x7] %vm58_vm1, %v712_v21   ;;  %6858 = vst.msk [vmem:[%s8845_s16 + $0x169] ss:$8 sm:$0x38] %vm58_vm1, %v712_v21   ;;  %v725_v61 = vsel %vm56_vm0, %v6861_v24, %v6860_v22 }
 0x114   : > { %6859 = vst.msk [vmem:[%s8845_s16 + $0x152] ss:$8 sm:$0xc0] %vm58_vm1, %v712_v21   ;;  %v6866_v27 = vld [vmem:[%s8543_s11 + $0xc80] ss:$8 sm:$0xf]  }
 0x115   : > { %v6867_v29 = vld [vmem:[%s8543_s11 + $0xc80] ss:$8 sm:$0xf0]   ;;  %v7264_v33 = vld [vmem:[%s8543_s11 + $0x3d6] ss:$24 sm:$0xf0]  }
 0x116   : > { %6862 = vst.msk [vmem:[%s8845_s16 + $0x192] ss:$-15 sm:$0x3] %vm58_vm1, %v725_v61   ;;  %6864 = vst.msk [vmem:[%s8845_s16 + $0x164] ss:$8 sm:$0x70] %vm58_vm1, %v725_v61   ;;  %v740_v34 = vsel %vm56_vm0, %v6867_v29, %v6866_v27  ;;  %v2072_v43 = vsel %vm56_vm0, %v7264_v33, %v7263_v32 }
 0x117   : > { %6865 = vst.msk [vmem:[%s8845_s16 + $0x17e] sm:$0x80] %vm58_vm1, %v725_v61   ;;  %6863 = vst.msk [vmem:[%s8845_s16 + $0x17b] ss:$8 sm:$0xc] %vm58_vm1, %v725_v61   ;;  %2073 = vrot.lane.b32.xlu0 %v2072_v43, %s8514_s17 }
 0x118   : > { %v7272_v12 = vld [vmem:[%s8543_s11 + $0x6d6] ss:$24 sm:$0xf]   ;;  %6869 = vst.msk [vmem:[%s8845_s16 + $0x176] ss:$8 sm:$0x1c] %vm58_vm1, %v740_v34  }
 0x119   : > { %v7273_v36 = vld [vmem:[%s8543_s11 + $0x6d6] ss:$24 sm:$0xf0]   ;;  %6870 = vst.msk [vmem:[%s8845_s16 + $0x15f] ss:$8 sm:$0xe0] %vm58_vm1, %v740_v34  }
 0x11a   : > { %6868 = vst.msk [vmem:[%s8845_s16 + $0x18d] ss:$8 sm:$0x3] %vm58_vm1, %v740_v34   ;;  %v7269_v38 = vld [vmem:[%s8543_s11 + $0x60e] ss:$24 sm:$0xf]   ;;  %v2105_v58 = vsel %vm56_vm0, %v7273_v36, %v7272_v12 }
 0x11b   : > { %v7270_v39 = vld [vmem:[%s8543_s11 + $0x60e] ss:$24 sm:$0xf0]   ;;  %7020 = vst.msk [vmem:[%s8845_s16 + $0x180] sm:$0xff] %vm1043_vm2, %v8938_v2   ;;  %7074 = vst.msk [vmem:[%s8845_s16 + $0x188] sm:$0xff] %vm1043_vm2, %v9339_v54   ;;  %2106 = vrot.lane.b32.xlu1 %v2105_v58, %s8514_s17 }
 0x11c   : > { %v6919_v2 = vld [vmem:[%s8543_s11 + $0xf00] ss:$8 sm:$0xf]   ;;  %v7278_v52 = vld [vmem:[%s8543_s11 + $0x90e] ss:$24 sm:$0xf]   ;;  %v2094_v63 = vsel %vm56_vm0, %v7270_v39, %v7269_v38  ;;  %v1514_v38 = vpop.permute.xlu1 %1513  }
 0x11d   : > { %v6920_v41 = vld [vmem:[%s8543_s11 + $0xf00] ss:$8 sm:$0xf0]   ;;  %v7279_v53 = vld [vmem:[%s8543_s11 + $0x90e] ss:$24 sm:$0xf0]   ;;  %2095 = vrot.lane.b32.xlu0 %v2094_v63, %s8514_s17 }
 0x11e   : > { %v876_v45 = vsel %vm56_vm0, %v6920_v41, %v6919_v2  ;;  %v6924_v46 = vld [vmem:[%s8543_s11 + $0xf40] ss:$8 sm:$0xf]   ;;  %7092 = vst.msk [vmem:[%s8845_s16 + $0x10] sm:$0xff] %vm1043_vm2, %v1437_v48   ;;  %7101 = vst.msk [vmem:[%s8845_s16 + $0x70] sm:$0xff] %vm1043_vm2, %v1470_v62   ;;  %v2127_v10 = vsel %vm56_vm0, %v7279_v53, %v7278_v52 }
 0x11f   : > { %v6925_v47 = vld [vmem:[%s8543_s11 + $0xf40] ss:$8 sm:$0xf0]   ;;  %6921 = vst.msk [vmem:[%s8845_s16 + $0x1e0] ss:$8 sm:$0x7] %vm58_vm1, %v876_v45   ;;  %2128 = vrot.lane.b32.xlu1 %v2127_v10, %s8514_s17 }
 0x120   : > { %6922 = vst.msk [vmem:[%s8845_s16 + $0x1c9] ss:$8 sm:$0x38] %vm58_vm1, %v876_v45   ;;  %6923 = vst.msk [vmem:[%s8845_s16 + $0x1b2] ss:$8 sm:$0xc0] %vm58_vm1, %v876_v45   ;;  %v889_v16 = vsel %vm56_vm0, %v6925_v47, %v6924_v46 }
 0x121   : > { %v6930_v50 = vld [vmem:[%s8543_s11 + $0xf80] ss:$8 sm:$0xf]   ;;  %6926 = vst.msk [vmem:[%s8845_s16 + $0x1f2] ss:$-15 sm:$0x3] %vm58_vm1, %v889_v16  }
 0x122   : > { %v6931_v44 = vld [vmem:[%s8543_s11 + $0xf80] ss:$8 sm:$0xf0]   ;;  %6928 = vst.msk [vmem:[%s8845_s16 + $0x1c4] ss:$8 sm:$0x70] %vm58_vm1, %v889_v16  }
 0x123   : > { %6929 = vst.msk [vmem:[%s8845_s16 + $0x1de] sm:$0x80] %vm58_vm1, %v889_v16   ;;  %v904_v54 = vsel %vm56_vm0, %v6931_v44, %v6930_v50  ;;  %6927 = vst.msk [vmem:[%s8845_s16 + $0x1db] ss:$8 sm:$0xc] %vm58_vm1, %v889_v16   ;;  %v1536_v50 = vpop.permute.xlu1 %1535  }
 0x124   : > { %v6887_v56 = vld [vmem:[%s8543_s11 + $0xd80] ss:$8 sm:$0xf]   ;;  %6933 = vst.msk [vmem:[%s8845_s16 + $0x1d6] ss:$8 sm:$0x1c] %vm58_vm1, %v904_v54  }
 0x125   : > { %v6888_v57 = vld [vmem:[%s8543_s11 + $0xd80] ss:$8 sm:$0xf0]   ;;  %6934 = vst.msk [vmem:[%s8845_s16 + $0x1bf] ss:$8 sm:$0xe0] %vm58_vm1, %v904_v54  }
 0x126   : > { %6932 = vst.msk [vmem:[%s8845_s16 + $0x1ed] ss:$8 sm:$0x3] %vm58_vm1, %v904_v54   ;;  %v794_v3 = vsel %vm56_vm0, %v6888_v57, %v6887_v56  ;;  %v6892_v55 = vld [vmem:[%s8543_s11 + $0xdc0] ss:$8 sm:$0xf]  }
 0x127   : > { %v6893_v60 = vld [vmem:[%s8543_s11 + $0xdc0] ss:$8 sm:$0xf0]   ;;  %7029 = vst.msk [vmem:[%s8845_s16 + $0x1e0] sm:$0xff] %vm1043_vm2, %v8974_v19   ;;  %7083 = vst.msk [vmem:[%s8845_s16 + $0x1e8] sm:$0xff] %vm1043_vm2, %v9372_v1   ;;  %v9524_v1 = vpop.permute.xlu0 %1458   ;;  %v9661_v63 = vpop.permute.xlu1 %1557  }
 0x128   : > { %6889 = vst.msk [vmem:[%s8845_s16 + $0x1b0] ss:$8 sm:$0x7] %vm58_vm1, %v794_v3   ;;  %6890 = vst.msk [vmem:[%s8845_s16 + $0x199] ss:$8 sm:$0x38] %vm58_vm1, %v794_v3   ;;  %v807_v19 = vsel %vm56_vm0, %v6893_v60, %v6892_v55 }
 0x129   : > { %v6898_v49 = vld [vmem:[%s8543_s11 + $0xe00] ss:$8 sm:$0xf]   ;;  %6891 = vst.msk [vmem:[%s8845_s16 + $0x182] ss:$8 sm:$0xc0] %vm58_vm1, %v794_v3  }
 0x12a   : > { %v6899_v0 = vld [vmem:[%s8543_s11 + $0xe00] ss:$8 sm:$0xf0]   ;;  %v7275_v4 = vld [vmem:[%s8543_s11 + $0x846] ss:$24 sm:$0xf]  }
 0x12b   : > { %v7276_v5 = vld [vmem:[%s8543_s11 + $0x846] ss:$24 sm:$0xf0]   ;;  %6894 = vst.msk [vmem:[%s8845_s16 + $0x1c2] ss:$-15 sm:$0x3] %vm58_vm1, %v807_v19   ;;  %v822_v6 = vsel %vm56_vm0, %v6899_v0, %v6898_v49  ;;  %v1481_v59 = vpop.permute.xlu0 %1480  }
 0x12c   : > { %6895 = vst.msk [vmem:[%s8845_s16 + $0x1ab] ss:$8 sm:$0xc] %vm58_vm1, %v807_v19   ;;  %6896 = vst.msk [vmem:[%s8845_s16 + $0x194] ss:$8 sm:$0x70] %vm58_vm1, %v807_v19   ;;  %v2116_v15 = vsel %vm56_vm0, %v7276_v5, %v7275_v4 }
 0x12d   : > { %6897 = vst.msk [vmem:[%s8845_s16 + $0x1ae] sm:$0x80] %vm58_vm1, %v807_v19   ;;  %v7284_v8 = vld [vmem:[%s8543_s11 + $0xb46] ss:$24 sm:$0xf]   ;;  %2117 = vrot.lane.b32.xlu0 %v2116_v15, %s8514_s17 }
 0x12e   : > { %v7285_v7 = vld [vmem:[%s8543_s11 + $0xb46] ss:$24 sm:$0xf0]   ;;  %6900 = vst.msk [vmem:[%s8845_s16 + $0x1bd] ss:$8 sm:$0x3] %vm58_vm1, %v822_v6  }
 0x12f   : > { %6901 = vst.msk [vmem:[%s8845_s16 + $0x1a6] ss:$8 sm:$0x1c] %vm58_vm1, %v822_v6   ;;  %6902 = vst.msk [vmem:[%s8845_s16 + $0x18f] ss:$8 sm:$0xe0] %vm58_vm1, %v822_v6   ;;  %v2149_v33 = vsel %vm56_vm0, %v7285_v7, %v7284_v8  ;;  %v1503_v43 = vpop.permute.xlu0 %1502  }
 0x130   : > { %v7281_v25 = vld [vmem:[%s8543_s11 + $0x9d6] ss:$24 sm:$0xf]   ;;  %7026 = vst.msk [vmem:[%s8845_s16 + $0x1c0] sm:$0xff] %vm1043_vm2, %v8989_v23   ;;  %7104 = vst.msk [vmem:[%s8845_s16 + $0x90] sm:$0xff] %vm1043_vm2, %v1481_v59   ;;  %2150 = vrot.lane.b32.xlu1 %v2149_v33, %s8514_s17 }
 0x131   : > { %v7282_v11 = vld [vmem:[%s8543_s11 + $0x9d6] ss:$24 sm:$0xf0]   ;;  %v6951_v23 = vld [vmem:[%s8543_s11 + $0x1080] ss:$8 sm:$0xf]  }
 0x132   : > { %v6952_v17 = vld [vmem:[%s8543_s11 + $0x1080] ss:$8 sm:$0xf0]   ;;  %v7290_v30 = vld [vmem:[%s8543_s11 + $0xcd6] ss:$24 sm:$0xf]   ;;  %v2138_v39 = vsel %vm56_vm0, %v7282_v11, %v7281_v25 }
 0x133   : > { %v6956_v20 = vld [vmem:[%s8543_s11 + $0x10c0] ss:$8 sm:$0xf]   ;;  %v958_v21 = vsel %vm56_vm0, %v6952_v17, %v6951_v23  ;;  %v7291_v61 = vld [vmem:[%s8543_s11 + $0xcd6] ss:$24 sm:$0xf0]   ;;  %2139 = vrot.lane.b32.xlu0 %v2138_v39, %s8514_s17  ;;  %v1580_v17 = vpop.permute.xlu1 %1579  }
 0x134   : > { %v6957_v22 = vld [vmem:[%s8543_s11 + $0x10c0] ss:$8 sm:$0xf0]   ;;  %6953 = vst.msk [vmem:[%s8845_s16 + $0x210] ss:$8 sm:$0x7] %vm58_vm1, %v958_v21   ;;  %v2171_v48 = vsel %vm56_vm0, %v7291_v61, %v7290_v30 }
 0x135   : > { %v6962_v24 = vld [vmem:[%s8543_s11 + $0x1100] ss:$8 sm:$0xf]   ;;  %6954 = vst.msk [vmem:[%s8845_s16 + $0x1f9] ss:$8 sm:$0x38] %vm58_vm1, %v958_v21   ;;  %v971_v27 = vsel %vm56_vm0, %v6957_v22, %v6956_v20  ;;  %2172 = vrot.lane.b32.xlu1 %v2171_v48, %s8514_s17 }
 0x136   : > { %v6963_v29 = vld [vmem:[%s8543_s11 + $0x1100] ss:$8 sm:$0xf0]   ;;  %6955 = vst.msk [vmem:[%s8845_s16 + $0x1e2] ss:$8 sm:$0xc0] %vm58_vm1, %v958_v21  }
 0x137   : > { %v6935_v32 = vld [vmem:[%s8543_s11 + $0xfc0] ss:$8 sm:$0xf]   ;;  %v7287_v34 = vld [vmem:[%s8543_s11 + $0xc0e] ss:$24 sm:$0xf]   ;;  %v986_v12 = vsel %vm56_vm0, %v6963_v29, %v6962_v24 }
 0x138   : > { %6958 = vst.msk [vmem:[%s8845_s16 + $0x222] ss:$-15 sm:$0x3] %vm58_vm1, %v971_v27   ;;  %6959 = vst.msk [vmem:[%s8845_s16 + $0x20b] ss:$8 sm:$0xc] %vm58_vm1, %v971_v27  }
 0x139   : > { %6960 = vst.msk [vmem:[%s8845_s16 + $0x1f4] ss:$8 sm:$0x70] %vm58_vm1, %v971_v27   ;;  %6961 = vst.msk [vmem:[%s8845_s16 + $0x20e] sm:$0x80] %vm58_vm1, %v971_v27  }
 0x13a   : > { %v6936_v36 = vld [vmem:[%s8543_s11 + $0xfc0] ss:$8 sm:$0xf0]   ;;  %6964 = vst.msk [vmem:[%s8845_s16 + $0x21d] ss:$8 sm:$0x3] %vm58_vm1, %v986_v12  }
 0x13b   : > { %v6940_v37 = vld [vmem:[%s8543_s11 + $0x1000] ss:$8 sm:$0xf]   ;;  %6965 = vst.msk [vmem:[%s8845_s16 + $0x206] ss:$8 sm:$0x1c] %vm58_vm1, %v986_v12   ;;  %v917_v2 = vsel %vm56_vm0, %v6936_v36, %v6935_v32 }
 0x13c   : > { %6966 = vst.msk [vmem:[%s8845_s16 + $0x1ef] ss:$8 sm:$0xe0] %vm58_vm1, %v986_v12   ;;  %v6941_v41 = vld [vmem:[%s8543_s11 + $0x1000] ss:$8 sm:$0xf0]  }
 0x13d   : > { %v6946_v42 = vld [vmem:[%s8543_s11 + $0x1040] ss:$8 sm:$0xf]   ;;  %v7288_v45 = vld [vmem:[%s8543_s11 + $0xc0e] ss:$24 sm:$0xf0]  }
 0x13e   : > { %7113 = vst.msk [vmem:[%s8845_s16 + $0xf0] sm:$0xff] %vm1043_vm2, %v1514_v38   ;;  %7035 = vst.msk [vmem:[%s8845_s16 + $0x220] sm:$0xff] %vm1043_vm2, %v9020_v35   ;;  %v930_v35 = vsel %vm56_vm0, %v6941_v41, %v6940_v37  ;;  %v6947_v46 = vld [vmem:[%s8543_s11 + $0x1040] ss:$8 sm:$0xf0]   ;;  %v2160_v44 = vsel %vm56_vm0, %v7288_v45, %v7287_v34  ;;  %v1602_v34 = vpop.permute.xlu1 %1601  }
 0x13f   : > { %6937 = vst.msk [vmem:[%s8845_s16 + $0x1f8] ss:$8 sm:$0x7] %vm58_vm1, %v917_v2   ;;  %6938 = vst.msk [vmem:[%s8845_s16 + $0x1e1] ss:$8 sm:$0x38] %vm58_vm1, %v917_v2   ;;  %v945_v47 = vsel %vm56_vm0, %v6947_v46, %v6946_v42  ;;  %2161 = vrot.lane.b32.xlu0 %v2160_v44, %s8514_s17 }
 0x140   : > { %6939 = vst.msk [vmem:[%s8845_s16 + $0x1ca] ss:$8 sm:$0xc0] %vm58_vm1, %v917_v2   ;;  %6943 = vst.msk [vmem:[%s8845_s16 + $0x1f3] ss:$8 sm:$0xc] %vm58_vm1, %v930_v35  }
 0x141   : > { %7110 = vst.msk [vmem:[%s8845_s16 + $0xd0] sm:$0xff] %vm1043_vm2, %v1503_v43   ;;  %v7296_v16 = vld [vmem:[%s8543_s11 + $0xf0e] ss:$24 sm:$0xf]   ;;  %7119 = vst.msk [vmem:[%s8845_s16 + $0x130] sm:$0xff] %vm1043_vm2, %v1536_v50  }
 0x142   : > { %6944 = vst.msk [vmem:[%s8845_s16 + $0x1dc] ss:$8 sm:$0x70] %vm58_vm1, %v930_v35   ;;  %6942 = vst.msk [vmem:[%s8845_s16 + $0x20a] ss:$-15 sm:$0x3] %vm58_vm1, %v930_v35   ;;  %v9767_v46 = vpop.permute.xlu1 %1623  }
 0x143   : > { %6945 = vst.msk [vmem:[%s8845_s16 + $0x1f6] sm:$0x80] %vm58_vm1, %v930_v35   ;;  %6948 = vst.msk [vmem:[%s8845_s16 + $0x205] ss:$8 sm:$0x3] %vm58_vm1, %v945_v47  }
 0x144   : > { %6949 = vst.msk [vmem:[%s8845_s16 + $0x1ee] ss:$8 sm:$0x1c] %vm58_vm1, %v945_v47   ;;  %6950 = vst.msk [vmem:[%s8845_s16 + $0x1d7] ss:$8 sm:$0xe0] %vm58_vm1, %v945_v47  }
 0x145   : > { %v7297_v52 = vld [vmem:[%s8543_s11 + $0xf0e] ss:$24 sm:$0xf0]   ;;  %7032 = vst.msk [vmem:[%s8845_s16 + $0x200] sm:$0xff] %vm1043_vm2, %v9026_v40   ;;  %7086 = vst.msk [vmem:[%s8845_s16 + $0x208] sm:$0xff] %vm1043_vm2, %v9432_v31   ;;  %v9646_v40 = vpop.permute.xlu0 %1524  }
 0x146   : > { %v7293_v53 = vld [vmem:[%s8543_s11 + $0xe46] ss:$24 sm:$0xf]   ;;  %v6647_v54 = vld [vmem:[%s8543_s11 + $0x240] ss:$8 sm:$0xf]   ;;  %v2193_v3 = vsel %vm56_vm0, %v7297_v52, %v7296_v16 }
 0x147   : > { %v7294_v31 = vld [vmem:[%s8543_s11 + $0xe46] ss:$24 sm:$0xf0]   ;;  %v6648_v57 = vld [vmem:[%s8543_s11 + $0x240] ss:$8 sm:$0xf0]   ;;  %2194 = vrot.lane.b32.xlu1 %v2193_v3, %s8514_s17 }
 0x148   : > { %v7302_v56 = vld [vmem:[%s8543_s11 + $0x1146] ss:$24 sm:$0xf]   ;;  %v6652_v58 = vld [vmem:[%s8543_s11 + $0x280] ss:$8 sm:$0xf]   ;;  %v179_v55 = vsel %vm56_vm0, %v6648_v57, %v6647_v54  ;;  %v2182_v19 = vsel %vm56_vm0, %v7294_v31, %v7293_v53 }
 0x149   : > { %v6653_v60 = vld [vmem:[%s8543_s11 + $0x280] ss:$8 sm:$0xf0]   ;;  %v7303_v49 = vld [vmem:[%s8543_s11 + $0x1146] ss:$24 sm:$0xf0]   ;;  %v1547_v5 = vpop.permute.xlu0 %1546   ;;  %2183 = vrot.lane.b32.xlu0 %v2182_v19, %s8514_s17 }
 0x14a   : > { %v6658_v62 = vld [vmem:[%s8543_s11 + $0x2c0] ss:$8 sm:$0xf]   ;;  %6649 = vst.msk [vmem:[%s8845_s16 + $0x48] ss:$8 sm:$0x7] %vm58_vm1, %v179_v55   ;;  %v192_v0 = vsel %vm56_vm0, %v6653_v60, %v6652_v58  ;;  %v2215_v23 = vsel %vm56_vm0, %v7303_v49, %v7302_v56 }
 0x14b   : > { %6650 = vst.msk [vmem:[%s8845_s16 + $0x31] ss:$8 sm:$0x38] %vm58_vm1, %v179_v55   ;;  %6651 = vst.msk [vmem:[%s8845_s16 + $0x1a] ss:$8 sm:$0xc0] %vm58_vm1, %v179_v55   ;;  %2216 = vrot.lane.b32.xlu1 %v2215_v23, %s8514_s17  ;;  %v1646_v55 = vpop.permute.xlu1 %1645  }
 0x14c   : > { %v6659_v4 = vld [vmem:[%s8543_s11 + $0x2c0] ss:$8 sm:$0xf0]   ;;  %v7299_v6 = vld [vmem:[%s8543_s11 + $0xfd6] ss:$24 sm:$0xf]  }
 0x14d   : > { %v7300_v8 = vld [vmem:[%s8543_s11 + $0xfd6] ss:$24 sm:$0xf0]   ;;  %6654 = vst.msk [vmem:[%s8845_s16 + $0x5a] ss:$-15 sm:$0x3] %vm58_vm1, %v192_v0   ;;  %v207_v7 = vsel %vm56_vm0, %v6659_v4, %v6658_v62  ;;  %v1569_v24 = vpop.permute.xlu0 %1568  }
 0x14e   : > { %6656 = vst.msk [vmem:[%s8845_s16 + $0x2c] ss:$8 sm:$0x70] %vm58_vm1, %v192_v0   ;;  %6657 = vst.msk [vmem:[%s8845_s16 + $0x46] sm:$0x80] %vm58_vm1, %v192_v0   ;;  %v2204_v20 = vsel %vm56_vm0, %v7300_v8, %v7299_v6 }
 0x14f   : > { %6655 = vst.msk [vmem:[%s8845_s16 + $0x43] ss:$8 sm:$0xc] %vm58_vm1, %v192_v0   ;;  %v7308_v10 = vld [vmem:[%s8543_s11 + $0x186] ss:$24 sm:$0xf]   ;;  %2205 = vrot.lane.b32.xlu0 %v2204_v20, %s8514_s17 }
 0x150   : > { %v7309_v25 = vld [vmem:[%s8543_s11 + $0x186] ss:$24 sm:$0xf0]   ;;  %7122 = vst.msk [vmem:[%s8845_s16 + $0x150] sm:$0xff] %vm1043_vm2, %v1547_v5   ;;  %7131 = vst.msk [vmem:[%s8845_s16 + $0x1b0] sm:$0xff] %vm1043_vm2, %v1580_v17  }
 0x151   : > { %6661 = vst.msk [vmem:[%s8845_s16 + $0x3e] ss:$8 sm:$0x1c] %vm58_vm1, %v207_v7   ;;  %6662 = vst.msk [vmem:[%s8845_s16 + $0x27] ss:$8 sm:$0xe0] %vm58_vm1, %v207_v7   ;;  %v2237_v32 = vsel %vm56_vm0, %v7309_v25, %v7308_v10  ;;  %v1668_v25 = vpop.permute.xlu1 %1667  }
 0x152   : > { %6660 = vst.msk [vmem:[%s8845_s16 + $0x55] ss:$8 sm:$0x3] %vm58_vm1, %v207_v7   ;;  %v6711_v11 = vld [vmem:[%s8543_s11 + $0x540] ss:$8 sm:$0xf]   ;;  %2238 = vrot.lane.b32.xlu1 %v2237_v32, %s8514_s17 }
 0x153   : > { %v7305_v15 = vld [vmem:[%s8543_s11 + $0x16] ss:$24 sm:$0xf]   ;;  %7044 = vst.msk [vmem:[%s8845_s16 + $0x48] sm:$0xff] %vm1043_vm2, %v9112_v18   ;;  %7098 = vst.msk [vmem:[%s8845_s16 + $0x50] sm:$0xff] %vm1043_vm2, %v9524_v1  }
 0x154   : > { %v6712_v18 = vld [vmem:[%s8543_s11 + $0x540] ss:$8 sm:$0xf0]   ;;  %v7306_v30 = vld [vmem:[%s8543_s11 + $0x16] ss:$24 sm:$0xf0]  }
 0x155   : > { %v6716_v1 = vld [vmem:[%s8543_s11 + $0x580] ss:$8 sm:$0xf]   ;;  %v343_v59 = vsel %vm56_vm0, %v6712_v18, %v6711_v11  ;;  %7128 = vst.msk [vmem:[%s8845_s16 + $0x190] sm:$0xff] %vm1043_vm2, %v1569_v24   ;;  %v2226_v12 = vsel %vm56_vm0, %v7306_v30, %v7305_v15  ;;  %7137 = vst.msk [vmem:[%s8845_s16 + $0x1f0] sm:$0xff] %vm1043_vm2, %v1602_v34   ;;  %v1690_v30 = vpop.permute.xlu1 %1689  }
 0x156   : > { %v6717_v21 = vld [vmem:[%s8543_s11 + $0x580] ss:$8 sm:$0xf0]   ;;  %6713 = vst.msk [vmem:[%s8845_s16 + $0xa8] ss:$8 sm:$0x7] %vm58_vm1, %v343_v59   ;;  %2227 = vrot.lane.b32.xlu0 %v2226_v12, %s8514_s17 }
 0x157   : > { %v6722_v22 = vld [vmem:[%s8543_s11 + $0x5c0] ss:$8 sm:$0xf]   ;;  %6714 = vst.msk [vmem:[%s8845_s16 + $0x91] ss:$8 sm:$0x38] %vm58_vm1, %v343_v59   ;;  %v356_v61 = vsel %vm56_vm0, %v6717_v21, %v6716_v1 }
 0x158   : > { %6715 = vst.msk [vmem:[%s8845_s16 + $0x7a] ss:$8 sm:$0xc0] %vm58_vm1, %v343_v59   ;;  %v6723_v27 = vld [vmem:[%s8543_s11 + $0x5c0] ss:$8 sm:$0xf0]  }
 0x159   : > { %6718 = vst.msk [vmem:[%s8845_s16 + $0xba] ss:$-15 sm:$0x3] %vm58_vm1, %v356_v61   ;;  %6720 = vst.msk [vmem:[%s8845_s16 + $0x8c] ss:$8 sm:$0x70] %vm58_vm1, %v356_v61   ;;  %v371_v29 = vsel %vm56_vm0, %v6723_v27, %v6722_v22 }
 0x15a   : > { %6721 = vst.msk [vmem:[%s8845_s16 + $0xa6] sm:$0x80] %vm58_vm1, %v356_v61   ;;  %6719 = vst.msk [vmem:[%s8845_s16 + $0xa3] ss:$8 sm:$0xc] %vm58_vm1, %v356_v61  }
 0x15b   : > { %v7314_v33 = vld [vmem:[%s8543_s11 + $0x316] ss:$24 sm:$0xf]   ;;  %6725 = vst.msk [vmem:[%s8845_s16 + $0x9e] ss:$8 sm:$0x1c] %vm58_vm1, %v371_v29  }
 0x15c   : > { %6726 = vst.msk [vmem:[%s8845_s16 + $0x87] ss:$8 sm:$0xe0] %vm58_vm1, %v371_v29   ;;  %6724 = vst.msk [vmem:[%s8845_s16 + $0xb5] ss:$8 sm:$0x3] %vm58_vm1, %v371_v29  }
 0x15d   : > { %v7315_v36 = vld [vmem:[%s8543_s11 + $0x316] ss:$24 sm:$0xf0]   ;;  %7053 = vst.msk [vmem:[%s8845_s16 + $0xa8] sm:$0xff] %vm1043_vm2, %v9150_v51   ;;  %7107 = vst.msk [vmem:[%s8845_s16 + $0xb0] sm:$0xff] %vm1043_vm2, %v9556_v13   ;;  %v9752_v51 = vpop.permute.xlu0 %1590  }
 0x15e   : > { %v7311_v37 = vld [vmem:[%s8543_s11 + $0x24e] ss:$24 sm:$0xf]   ;;  %v6775_v38 = vld [vmem:[%s8543_s11 + $0x840] ss:$8 sm:$0xf]   ;;  %v2259_v42 = vsel %vm56_vm0, %v7315_v36, %v7314_v33 }
 0x15f   : > { %v7312_v13 = vld [vmem:[%s8543_s11 + $0x24e] ss:$24 sm:$0xf0]   ;;  %v6776_v2 = vld [vmem:[%s8543_s11 + $0x840] ss:$8 sm:$0xf0]   ;;  %2260 = vrot.lane.b32.xlu1 %v2259_v42, %s8514_s17 }
 0x160   : > { %v7320_v39 = vld [vmem:[%s8543_s11 + $0x54e] ss:$24 sm:$0xf]   ;;  %v6780_v41 = vld [vmem:[%s8543_s11 + $0x880] ss:$8 sm:$0xf]   ;;  %v507_v43 = vsel %vm56_vm0, %v6776_v2, %v6775_v38  ;;  %v2248_v47 = vsel %vm56_vm0, %v7312_v13, %v7311_v37 }
 0x161   : > { %v6781_v45 = vld [vmem:[%s8543_s11 + $0x880] ss:$8 sm:$0xf0]   ;;  %v7321_v48 = vld [vmem:[%s8543_s11 + $0x54e] ss:$24 sm:$0xf0]   ;;  %v1613_v44 = vpop.permute.xlu0 %1612   ;;  %2249 = vrot.lane.b32.xlu0 %v2248_v47, %s8514_s17 }
 0x162   : > { %v6786_v35 = vld [vmem:[%s8543_s11 + $0x8c0] ss:$8 sm:$0xf]   ;;  %6777 = vst.msk [vmem:[%s8845_s16 + $0x108] ss:$8 sm:$0x7] %vm58_vm1, %v507_v43   ;;  %v520_v16 = vsel %vm56_vm0, %v6781_v45, %v6780_v41  ;;  %v2281_v58 = vsel %vm56_vm0, %v7321_v48, %v7320_v39  ;;  %v1712_v41 = vpop.permute.xlu1 %1711  }
 0x163   : > { %6778 = vst.msk [vmem:[%s8845_s16 + $0xf1] ss:$8 sm:$0x38] %vm58_vm1, %v507_v43   ;;  %6779 = vst.msk [vmem:[%s8845_s16 + $0xda] ss:$8 sm:$0xc0] %vm58_vm1, %v507_v43   ;;  %2282 = vrot.lane.b32.xlu1 %v2281_v58, %s8514_s17 }
 0x164   : > { %v6787_v50 = vld [vmem:[%s8543_s11 + $0x8c0] ss:$8 sm:$0xf0]   ;;  %v7317_v52 = vld [vmem:[%s8543_s11 + $0x486] ss:$24 sm:$0xf]  }
 0x165   : > { %v7318_v53 = vld [vmem:[%s8543_s11 + $0x486] ss:$24 sm:$0xf0]   ;;  %6782 = vst.msk [vmem:[%s8845_s16 + $0x11a] ss:$-15 sm:$0x3] %vm58_vm1, %v520_v16   ;;  %v535_v31 = vsel %vm56_vm0, %v6787_v50, %v6786_v35  ;;  %v1635_v0 = vpop.permute.xlu0 %1634  }
 0x166   : > { %6784 = vst.msk [vmem:[%s8845_s16 + $0xec] ss:$8 sm:$0x70] %vm58_vm1, %v520_v16   ;;  %6785 = vst.msk [vmem:[%s8845_s16 + $0x106] sm:$0x80] %vm58_vm1, %v520_v16   ;;  %v2270_v60 = vsel %vm56_vm0, %v7318_v53, %v7317_v52  ;;  %v1734_v53 = vpop.permute.xlu1 %1733  }
 0x167   : > { %6783 = vst.msk [vmem:[%s8845_s16 + $0x103] ss:$8 sm:$0xc] %vm58_vm1, %v520_v16   ;;  %v7326_v54 = vld [vmem:[%s8543_s11 + $0x786] ss:$24 sm:$0xf]   ;;  %2271 = vrot.lane.b32.xlu0 %v2270_v60, %s8514_s17 }
 0x168   : > { %v7327_v56 = vld [vmem:[%s8543_s11 + $0x786] ss:$24 sm:$0xf0]   ;;  %7140 = vst.msk [vmem:[%s8845_s16 + $0x210] sm:$0xff] %vm1043_vm2, %v1613_v44   ;;  %7149 = vst.msk [vmem:[%s8845_s16 + $0x38] sm:$0xff] %vm1043_vm2, %v1646_v55  }
 0x169   : > { %6789 = vst.msk [vmem:[%s8845_s16 + $0xfe] ss:$8 sm:$0x1c] %vm58_vm1, %v535_v31   ;;  %6790 = vst.msk [vmem:[%s8845_s16 + $0xe7] ss:$8 sm:$0xe0] %vm58_vm1, %v535_v31   ;;  %v2303_v7 = vsel %vm56_vm0, %v7327_v56, %v7326_v54 }
 0x16a   : > { %6788 = vst.msk [vmem:[%s8845_s16 + $0x115] ss:$8 sm:$0x3] %vm58_vm1, %v535_v31   ;;  %v6839_v57 = vld [vmem:[%s8543_s11 + $0xb40] ss:$8 sm:$0xf]   ;;  %2304 = vrot.lane.b32.xlu1 %v2303_v7, %s8514_s17 }
 0x16b   : > { %v7323_v3 = vld [vmem:[%s8543_s11 + $0x616] ss:$24 sm:$0xf]   ;;  %7062 = vst.msk [vmem:[%s8845_s16 + $0x108] sm:$0xff] %vm1043_vm2, %v9251_v14   ;;  %7116 = vst.msk [vmem:[%s8845_s16 + $0x110] sm:$0xff] %vm1043_vm2, %v9646_v40  }
 0x16c   : > { %v6840_v14 = vld [vmem:[%s8543_s11 + $0xb40] ss:$8 sm:$0xf0]   ;;  %v7324_v4 = vld [vmem:[%s8543_s11 + $0x616] ss:$24 sm:$0xf0]  }
 0x16d   : > { %v6844_v40 = vld [vmem:[%s8543_s11 + $0xb80] ss:$8 sm:$0xf]   ;;  %v671_v62 = vsel %vm56_vm0, %v6840_v14, %v6839_v57  ;;  %7146 = vst.msk [vmem:[%s8845_s16 + $0x18] sm:$0xff] %vm1043_vm2, %v1635_v0   ;;  %v2292_v11 = vsel %vm56_vm0, %v7324_v4, %v7323_v3  ;;  %7155 = vst.msk [vmem:[%s8845_s16 + $0x78] sm:$0xff] %vm1043_vm2, %v1668_v25   ;;  %v1756_v3 = vpop.permute.xlu1 %1755  }
 0x16e   : > { %v6845_v19 = vld [vmem:[%s8543_s11 + $0xb80] ss:$8 sm:$0xf0]   ;;  %6841 = vst.msk [vmem:[%s8845_s16 + $0x168] ss:$8 sm:$0x7] %vm58_vm1, %v671_v62   ;;  %2293 = vrot.lane.b32.xlu0 %v2292_v11, %s8514_s17 }
 0x16f   : > { %v6850_v49 = vld [vmem:[%s8543_s11 + $0xbc0] ss:$8 sm:$0xf]   ;;  %6842 = vst.msk [vmem:[%s8845_s16 + $0x151] ss:$8 sm:$0x38] %vm58_vm1, %v671_v62   ;;  %v684_v5 = vsel %vm56_vm0, %v6845_v19, %v6844_v40 }
 0x170   : > { %6843 = vst.msk [vmem:[%s8845_s16 + $0x13a] ss:$8 sm:$0xc0] %vm58_vm1, %v671_v62   ;;  %v6851_v6 = vld [vmem:[%s8543_s11 + $0xbc0] ss:$8 sm:$0xf0]  }
 0x171   : > { %6846 = vst.msk [vmem:[%s8845_s16 + $0x17a] ss:$-15 sm:$0x3] %vm58_vm1, %v684_v5   ;;  %6848 = vst.msk [vmem:[%s8845_s16 + $0x14c] ss:$8 sm:$0x70] %vm58_vm1, %v684_v5   ;;  %v699_v8 = vsel %vm56_vm0, %v6851_v6, %v6850_v49  ;;  %v1778_v0 = vpop.permute.xlu1 %1777  }
 0x172   : > { %6849 = vst.msk [vmem:[%s8845_s16 + $0x166] sm:$0x80] %vm58_vm1, %v684_v5   ;;  %6847 = vst.msk [vmem:[%s8845_s16 + $0x163] ss:$8 sm:$0xc] %vm58_vm1, %v684_v5  }
 0x173   : > { %v7332_v10 = vld [vmem:[%s8543_s11 + $0x916] ss:$24 sm:$0xf]   ;;  %6853 = vst.msk [vmem:[%s8845_s16 + $0x15e] ss:$8 sm:$0x1c] %vm58_vm1, %v699_v8  }
 0x174   : > { %6854 = vst.msk [vmem:[%s8845_s16 + $0x147] ss:$8 sm:$0xe0] %vm58_vm1, %v699_v8   ;;  %6852 = vst.msk [vmem:[%s8845_s16 + $0x175] ss:$8 sm:$0x3] %vm58_vm1, %v699_v8  }
 0x175   : > { %v7333_v23 = vld [vmem:[%s8543_s11 + $0x916] ss:$24 sm:$0xf0]   ;;  %7071 = vst.msk [vmem:[%s8845_s16 + $0x168] sm:$0xff] %vm1043_vm2, %v9284_v28   ;;  %7125 = vst.msk [vmem:[%s8845_s16 + $0x170] sm:$0xff] %vm1043_vm2, %v9661_v63   ;;  %v1657_v28 = vpop.permute.xlu0 %1656   ;;  %v1800_v11 = vpop.permute.xlu1 %1799  }
 0x176   : > { %v7329_v15 = vld [vmem:[%s8543_s11 + $0x84e] ss:$24 sm:$0xf]   ;;  %v6903_v18 = vld [vmem:[%s8543_s11 + $0xe40] ss:$8 sm:$0xf]   ;;  %v2325_v59 = vsel %vm56_vm0, %v7333_v23, %v7332_v10 }
 0x177   : > { %v7330_v63 = vld [vmem:[%s8543_s11 + $0x84e] ss:$24 sm:$0xf0]   ;;  %7152 = vst.msk [vmem:[%s8845_s16 + $0x58] sm:$0xff] %vm1043_vm2, %v1657_v28   ;;  %7161 = vst.msk [vmem:[%s8845_s16 + $0xb8] sm:$0xff] %vm1043_vm2, %v1690_v30   ;;  %2326 = vrot.lane.b32.xlu1 %v2325_v59, %s8514_s17 }
 0x178   : > { %v7338_v1 = vld [vmem:[%s8543_s11 + $0xb4e] ss:$24 sm:$0xf]   ;;  %v6904_v17 = vld [vmem:[%s8543_s11 + $0xe40] ss:$8 sm:$0xf0]   ;;  %v2314_v61 = vsel %vm56_vm0, %v7330_v63, %v7329_v15 }
 0x179   : > { %v6908_v20 = vld [vmem:[%s8543_s11 + $0xe80] ss:$8 sm:$0xf]   ;;  %v835_v21 = vsel %vm56_vm0, %v6904_v17, %v6903_v18  ;;  %v7339_v27 = vld [vmem:[%s8543_s11 + $0xb4e] ss:$24 sm:$0xf0]   ;;  %v1679_v33 = vpop.permute.xlu0 %1678   ;;  %2315 = vrot.lane.b32.xlu0 %v2314_v61, %s8514_s17 }
 0x17a   : > { %v6909_v22 = vld [vmem:[%s8543_s11 + $0xe80] ss:$8 sm:$0xf0]   ;;  %6905 = vst.msk [vmem:[%s8845_s16 + $0x1c8] ss:$8 sm:$0x7] %vm58_vm1, %v835_v21   ;;  %v2347_v39 = vsel %vm56_vm0, %v7339_v27, %v7338_v1 }
 0x17b   : > { %v6914_v24 = vld [vmem:[%s8543_s11 + $0xec0] ss:$8 sm:$0xf]   ;;  %6906 = vst.msk [vmem:[%s8845_s16 + $0x1b1] ss:$8 sm:$0x38] %vm58_vm1, %v835_v21   ;;  %v848_v29 = vsel %vm56_vm0, %v6909_v22, %v6908_v20  ;;  %2348 = vrot.lane.b32.xlu1 %v2347_v39, %s8514_s17  ;;  %v1822_v20 = vpop.permute.xlu1 %1821  }
 0x17c   : > { %6907 = vst.msk [vmem:[%s8845_s16 + $0x19a] ss:$8 sm:$0xc0] %vm58_vm1, %v835_v21   ;;  %v6915_v32 = vld [vmem:[%s8543_s11 + $0xec0] ss:$8 sm:$0xf0]  }
 0x17d   : > { %v7335_v34 = vld [vmem:[%s8543_s11 + $0xa86] ss:$24 sm:$0xf]   ;;  %6910 = vst.msk [vmem:[%s8845_s16 + $0x1da] ss:$-15 sm:$0x3] %vm58_vm1, %v848_v29   ;;  %v863_v36 = vsel %vm56_vm0, %v6915_v32, %v6914_v24  ;;  %v1701_v47 = vpop.permute.xlu0 %1700  }
 0x17e   : > { %v7336_v12 = vld [vmem:[%s8543_s11 + $0xa86] ss:$24 sm:$0xf0]   ;;  %6912 = vst.msk [vmem:[%s8845_s16 + $0x1ac] ss:$8 sm:$0x70] %vm58_vm1, %v848_v29  }
 0x17f   : > { %6913 = vst.msk [vmem:[%s8845_s16 + $0x1c6] sm:$0x80] %vm58_vm1, %v848_v29   ;;  %6911 = vst.msk [vmem:[%s8845_s16 + $0x1c3] ss:$8 sm:$0xc] %vm58_vm1, %v848_v29   ;;  %v2336_v42 = vsel %vm56_vm0, %v7336_v12, %v7335_v34  ;;  %v1843_v29 = vpop.permute.xlu1 %1842  }
 0x180   : > { %v7344_v37 = vld [vmem:[%s8543_s11 + $0xd86] ss:$24 sm:$0xf]   ;;  %7158 = vst.msk [vmem:[%s8845_s16 + $0x98] sm:$0xff] %vm1043_vm2, %v1679_v33   ;;  %7167 = vst.msk [vmem:[%s8845_s16 + $0xf8] sm:$0xff] %vm1043_vm2, %v1712_v41   ;;  %2337 = vrot.lane.b32.xlu0 %v2336_v42, %s8514_s17 }
 0x181   : > { %v7345_v13 = vld [vmem:[%s8543_s11 + $0xd86] ss:$24 sm:$0xf0]   ;;  %6917 = vst.msk [vmem:[%s8845_s16 + $0x1be] ss:$8 sm:$0x1c] %vm58_vm1, %v863_v36  }
 0x182   : > { %6918 = vst.msk [vmem:[%s8845_s16 + $0x1a7] ss:$8 sm:$0xe0] %vm58_vm1, %v863_v36   ;;  %6916 = vst.msk [vmem:[%s8845_s16 + $0x1d5] ss:$8 sm:$0x3] %vm58_vm1, %v863_v36   ;;  %v2369_v52 = vsel %vm56_vm0, %v7345_v13, %v7344_v37 }
 0x183   : > { %v6967_v38 = vld [vmem:[%s8543_s11 + $0x1140] ss:$8 sm:$0xf]   ;;  %v7341_v2 = vld [vmem:[%s8543_s11 + $0xc16] ss:$24 sm:$0xf]   ;;  %2370 = vrot.lane.b32.xlu1 %v2369_v52, %s8514_s17 }
 0x184   : > { %7080 = vst.msk [vmem:[%s8845_s16 + $0x1c8] sm:$0xff] %vm1043_vm2, %v9378_v9   ;;  %7134 = vst.msk [vmem:[%s8845_s16 + $0x1d0] sm:$0xff] %vm1043_vm2, %v9752_v51   ;;  %v6968_v9 = vld [vmem:[%s8543_s11 + $0x1140] ss:$8 sm:$0xf0]  }
 0x185   : > { %v6972_v51 = vld [vmem:[%s8543_s11 + $0x1180] ss:$8 sm:$0xf]   ;;  %v999_v43 = vsel %vm56_vm0, %v6968_v9, %v6967_v38  ;;  %v7342_v48 = vld [vmem:[%s8543_s11 + $0xc16] ss:$24 sm:$0xf0]   ;;  %v1865_v38 = vpop.permute.xlu1 %1864  }
 0x186   : > { %v6973_v45 = vld [vmem:[%s8543_s11 + $0x1180] ss:$8 sm:$0xf0]   ;;  %6969 = vst.msk [vmem:[%s8845_s16 + $0x228] ss:$8 sm:$0x7] %vm58_vm1, %v999_v43   ;;  %v2358_v31 = vsel %vm56_vm0, %v7342_v48, %v7341_v2 }
 0x187   : > { %v6978_v35 = vld [vmem:[%s8543_s11 + $0x11c0] ss:$8 sm:$0xf]   ;;  %6970 = vst.msk [vmem:[%s8845_s16 + $0x211] ss:$8 sm:$0x38] %vm58_vm1, %v999_v43   ;;  %v1012_v16 = vsel %vm56_vm0, %v6973_v45, %v6972_v51  ;;  %2359 = vrot.lane.b32.xlu0 %v2358_v31, %s8514_s17 }
 0x188   : > { %6971 = vst.msk [vmem:[%s8845_s16 + $0x1fa] ss:$8 sm:$0xc0] %vm58_vm1, %v999_v43   ;;  %v6979_v50 = vld [vmem:[%s8543_s11 + $0x11c0] ss:$8 sm:$0xf0]  }
 0x189   : > { %7164 = vst.msk [vmem:[%s8845_s16 + $0xd8] sm:$0xff] %vm1043_vm2, %v1701_v47   ;;  %v1027_v44 = vsel %vm56_vm0, %v6979_v50, %v6978_v35  ;;  %v7350_v54 = vld [vmem:[%s8543_s11 + $0xf16] ss:$24 sm:$0xf]   ;;  %7173 = vst.msk [vmem:[%s8845_s16 + $0x138] sm:$0xff] %vm1043_vm2, %v1734_v53   ;;  %v1887_v45 = vpop.permute.xlu1 %1886  }
 0x18a   : > { %6974 = vst.msk [vmem:[%s8845_s16 + $0x23a] ss:$-15 sm:$0x3] %vm58_vm1, %v1012_v16   ;;  %6976 = vst.msk [vmem:[%s8845_s16 + $0x20c] ss:$8 sm:$0x70] %vm58_vm1, %v1012_v16  }
 0x18b   : > { %6977 = vst.msk [vmem:[%s8845_s16 + $0x226] sm:$0x80] %vm58_vm1, %v1012_v16   ;;  %6975 = vst.msk [vmem:[%s8845_s16 + $0x223] ss:$8 sm:$0xc] %vm58_vm1, %v1012_v16  }
 0x18c   : > { %6981 = vst.msk [vmem:[%s8845_s16 + $0x21e] ss:$8 sm:$0x1c] %vm58_vm1, %v1027_v44   ;;  %6982 = vst.msk [vmem:[%s8845_s16 + $0x207] ss:$8 sm:$0xe0] %vm58_vm1, %v1027_v44  }
 0x18d   : > { %6980 = vst.msk [vmem:[%s8845_s16 + $0x235] ss:$8 sm:$0x3] %vm58_vm1, %v1027_v44   ;;  %v7351_v56 = vld [vmem:[%s8543_s11 + $0xf16] ss:$24 sm:$0xf0]   ;;  %v1909_v53 = vpop.permute.xlu1 %1908  }
 0x18e   : > { %7089 = vst.msk [vmem:[%s8845_s16 + $0x228] sm:$0xff] %vm1043_vm2, %v9414_v26   ;;  %7143 = vst.msk [vmem:[%s8845_s16 + $0x230] sm:$0xff] %vm1043_vm2, %v9767_v46   ;;  %v1723_v26 = vpop.permute.xlu0 %1722   ;;  %v7347_v46 = vld [vmem:[%s8543_s11 + $0xe4e] ss:$24 sm:$0xf]   ;;  %v2391_v58 = vsel %vm56_vm0, %v7351_v56, %v7350_v54 }
 0x18f   : > { %v7348_v57 = vld [vmem:[%s8543_s11 + $0xe4e] ss:$24 sm:$0xf0]   ;;  %7170 = vst.msk [vmem:[%s8845_s16 + $0x118] sm:$0xff] %vm1043_vm2, %v1723_v26   ;;  %7179 = vst.msk [vmem:[%s8845_s16 + $0x178] sm:$0xff] %vm1043_vm2, %v1756_v3   ;;  %2392 = vrot.lane.b32.xlu1 %v2391_v58, %s8514_s17 }
 0x190   : > { %v2380_v14 = vsel %vm56_vm0, %v7348_v57, %v7347_v46  ;;  %v7356_v40 = vld [vmem:[%s8543_s11 + $0x114e] ss:$24 sm:$0xf]   ;;  %7185 = vst.msk [vmem:[%s8845_s16 + $0x1b8] sm:$0xff] %vm1043_vm2, %v1778_v0   ;;  %7191 = vst.msk [vmem:[%s8845_s16 + $0x1f8] sm:$0xff] %vm1043_vm2, %v1800_v11  }
 0x191   : > { %v7357_v55 = vld [vmem:[%s8543_s11 + $0x114e] ss:$24 sm:$0xf0]   ;;  %2381 = vrot.lane.b32.xlu0 %v2380_v14, %s8514_s17  ;;  %7197 = vst.msk [vmem:[%s8845_s16 + $0x238] sm:$0xff] %vm1043_vm2, %v1822_v20   ;;  %v1931_v3 = vpop.permute.xlu1 %1930  }
 0x192   : > { %v1745_v60 = vpop.permute.xlu0 %1744   ;;  %v7353_v62 = vld [vmem:[%s8543_s11 + $0x1086] ss:$24 sm:$0xf]   ;;  %v2413_v49 = vsel %vm56_vm0, %v7357_v55, %v7356_v40  ;;  %7202 = vst.msk [vmem:[%s8845_s16 + $0x20] sm:$0xff] %vm1834_vm3, %v1843_v29   ;;  %7208 = vst.msk [vmem:[%s8845_s16 + $0x60] sm:$0xff] %vm1834_vm3, %v1865_v38  }
 0x193   : > { %v7354_v19 = vld [vmem:[%s8543_s11 + $0x1086] ss:$24 sm:$0xf0]   ;;  %7176 = vst.msk [vmem:[%s8845_s16 + $0x158] sm:$0xff] %vm1043_vm2, %v1745_v60   ;;  %2414 = vrot.lane.b32.xlu1 %v2413_v49, %s8514_s17 }
 0x194   : > { %v2402_v4 = vsel %vm56_vm0, %v7354_v19, %v7353_v62  ;;  %v7362_v5 = vld [vmem:[%s8543_s11 + $0x18e] ss:$24 sm:$0xf]   ;;  %7214 = vst.msk [vmem:[%s8845_s16 + $0xa0] sm:$0xff] %vm1834_vm3, %v1887_v45   ;;  %7220 = vst.msk [vmem:[%s8845_s16 + $0xe0] sm:$0xff] %vm1834_vm3, %v1909_v53  }
 0x195   : > { %v7363_v6 = vld [vmem:[%s8543_s11 + $0x18e] ss:$24 sm:$0xf0]   ;;  %2403 = vrot.lane.b32.xlu0 %v2402_v4, %s8514_s17  ;;  %7226 = vst.msk [vmem:[%s8845_s16 + $0x120] sm:$0xff] %vm1834_vm3, %v1931_v3   ;;  %v1953_v0 = vpop.permute.xlu1 %1952  }
 0x196   : > { %v1767_v8 = vpop.permute.xlu0 %1766   ;;  %v7359_v7 = vld [vmem:[%s8543_s11 + $0xc6] ss:$24 sm:$0xf]   ;;  %v2435_v25 = vsel %vm56_vm0, %v7363_v6, %v7362_v5  ;;  %7232 = vst.msk [vmem:[%s8845_s16 + $0x160] sm:$0xff] %vm1834_vm3, %v1953_v0  }
 0x197   : > { %v7360_v10 = vld [vmem:[%s8543_s11 + $0xc6] ss:$24 sm:$0xf0]   ;;  %7182 = vst.msk [vmem:[%s8845_s16 + $0x198] sm:$0xff] %vm1043_vm2, %v1767_v8   ;;  %2436 = vrot.lane.b32.xlu1 %v2435_v25, %s8514_s17 }
 0x198   : > { %v2424_v23 = vsel %vm56_vm0, %v7360_v10, %v7359_v7  ;;  %v7368_v15 = vld [vmem:[%s8543_s11 + $0x3c6] ss:$24 sm:$0xf]  }
 0x199   : > { %v7369_v28 = vld [vmem:[%s8543_s11 + $0x3c6] ss:$24 sm:$0xf0]   ;;  %2425 = vrot.lane.b32.xlu0 %v2424_v23, %s8514_s17  ;;  %v1975_v11 = vpop.permute.xlu1 %1974  }
 0x19a   : > { %v1789_v63 = vpop.permute.xlu0 %1788   ;;  %v7365_v18 = vld [vmem:[%s8543_s11 + $0x256] ss:$24 sm:$0xf]   ;;  %v2457_v17 = vsel %vm56_vm0, %v7369_v28, %v7368_v15  ;;  %v7415_v15 = vld [vmem:[%s8543_s11 + $0xcd] ss:$24 sm:$0xf]  }
 0x19b   : > { %v7366_v1 = vld [vmem:[%s8543_s11 + $0x256] ss:$24 sm:$0xf0]   ;;  %7188 = vst.msk [vmem:[%s8845_s16 + $0x1d8] sm:$0xff] %vm1043_vm2, %v1789_v63   ;;  %2458 = vrot.lane.b32.xlu1 %v2457_v17, %s8514_s17 }
 0x19c   : > { %v2446_v59 = vsel %vm56_vm0, %v7366_v1, %v7365_v18  ;;  %v7374_v21 = vld [vmem:[%s8543_s11 + $0x556] ss:$24 sm:$0xf]   ;;  %v7416_v28 = vld [vmem:[%s8543_s11 + $0xcd] ss:$24 sm:$0xf0]  }
 0x19d   : > { %v7375_v22 = vld [vmem:[%s8543_s11 + $0x556] ss:$24 sm:$0xf0]   ;;  %2447 = vrot.lane.b32.xlu0 %v2446_v59, %s8514_s17  ;;  %7238 = vst.msk [vmem:[%s8845_s16 + $0x1a0] sm:$0xff] %vm1834_vm3, %v1975_v11   ;;  %v2632_v17 = vsel %vm56_vm0, %v7416_v28, %v7415_v15  ;;  %v1997_v20 = vpop.permute.xlu1 %1996  }
 0x19e   : > { %v1811_v24 = vpop.permute.xlu0 %1810   ;;  %v7371_v30 = vld [vmem:[%s8543_s11 + $0x48e] ss:$24 sm:$0xf]   ;;  %v2479_v27 = vsel %vm56_vm0, %v7375_v22, %v7374_v21  ;;  %v7413_v18 = vld [vmem:[%s8543_s11 + $0x5] ss:$24 sm:$0xf]  }
 0x19f   : > { %v7372_v61 = vld [vmem:[%s8543_s11 + $0x48e] ss:$24 sm:$0xf0]   ;;  %7194 = vst.msk [vmem:[%s8845_s16 + $0x218] sm:$0xff] %vm1043_vm2, %v1811_v24   ;;  %2480 = vrot.lane.b32.xlu1 %v2479_v27, %s8514_s17 }
 0x1a0   : > { %v2468_v32 = vsel %vm56_vm0, %v7372_v61, %v7371_v30  ;;  %v7380_v33 = vld [vmem:[%s8543_s11 + $0x78e] ss:$24 sm:$0xf]   ;;  %v7414_v1 = vld [vmem:[%s8543_s11 + $0x5] ss:$24 sm:$0xf0]  }
 0x1a1   : > { %v7381_v34 = vld [vmem:[%s8543_s11 + $0x78e] ss:$24 sm:$0xf0]   ;;  %2469 = vrot.lane.b32.xlu0 %v2468_v32, %s8514_s17  ;;  %v2622_v59 = vsel %vm56_vm0, %v7414_v1, %v7413_v18  ;;  %v7421_v21 = vld [vmem:[%s8543_s11 + $0x305] ss:$24 sm:$0xf]   ;;  %v2019_v29 = vpop.permute.xlu1 %2018  }
 0x1a2   : > { %v1833_v12 = vpop.permute.xlu0 %1832   ;;  %v7377_v36 = vld [vmem:[%s8543_s11 + $0x6c6] ss:$24 sm:$0xf]   ;;  %v2501_v13 = vsel %vm56_vm0, %v7381_v34, %v7380_v33  ;;  %v7422_v22 = vld [vmem:[%s8543_s11 + $0x305] ss:$24 sm:$0xf0]  }
 0x1a3   : > { %v7378_v37 = vld [vmem:[%s8543_s11 + $0x6c6] ss:$24 sm:$0xf0]   ;;  %1835 = vst.msk [vmem:[%s8845_s16] sm:$0xff] %vm1834_vm3, %v1833_v12   ;;  %2502 = vrot.lane.b32.xlu1 %v2501_v13, %s8514_s17  ;;  %7244 = vst.msk [vmem:[%s8845_s16 + $0x1e0] sm:$0xff] %vm1834_vm3, %v1997_v20   ;;  %v2654_v27 = vsel %vm56_vm0, %v7422_v22, %v7421_v21 }
 0x1a4   : > { %v2490_v39 = vsel %vm56_vm0, %v7378_v37, %v7377_v36  ;;  %v7386_v2 = vld [vmem:[%s8543_s11 + $0x9c6] ss:$24 sm:$0xf]   ;;  %v7418_v30 = vld [vmem:[%s8543_s11 + $0x195] ss:$24 sm:$0xf]  }
 0x1a5   : > { %v7387_v9 = vld [vmem:[%s8543_s11 + $0x9c6] ss:$24 sm:$0xf0]   ;;  %2491 = vrot.lane.b32.xlu0 %v2490_v39, %s8514_s17  ;;  %v7419_v61 = vld [vmem:[%s8543_s11 + $0x195] ss:$24 sm:$0xf0]   ;;  %v2041_v38 = vpop.permute.xlu1 %2040  }
 0x1a6   : > { %v1854_v51 = vpop.permute.xlu0 %1853   ;;  %v7383_v41 = vld [vmem:[%s8543_s11 + $0x856] ss:$24 sm:$0xf]   ;;  %v2523_v43 = vsel %vm56_vm0, %v7387_v9, %v7386_v2  ;;  %v2643_v32 = vsel %vm56_vm0, %v7419_v61, %v7418_v30  ;;  %v7427_v33 = vld [vmem:[%s8543_s11 + $0x495] ss:$24 sm:$0xf]  }
 0x1a7   : > { %v7384_v42 = vld [vmem:[%s8543_s11 + $0x856] ss:$24 sm:$0xf0]   ;;  %7205 = vst.msk [vmem:[%s8845_s16 + $0x40] sm:$0xff] %vm1834_vm3, %v1854_v51   ;;  %2524 = vrot.lane.b32.xlu1 %v2523_v43, %s8514_s17  ;;  %7250 = vst.msk [vmem:[%s8845_s16 + $0x220] sm:$0xff] %vm1834_vm3, %v2019_v29  }
 0x1a8   : > { %v2512_v35 = vsel %vm56_vm0, %v7384_v42, %v7383_v41  ;;  %v7392_v47 = vld [vmem:[%s8543_s11 + $0xb56] ss:$24 sm:$0xf]   ;;  %v7428_v34 = vld [vmem:[%s8543_s11 + $0x495] ss:$24 sm:$0xf0]  }
 0x1a9   : > { %v7393_v48 = vld [vmem:[%s8543_s11 + $0xb56] ss:$24 sm:$0xf0]   ;;  %2513 = vrot.lane.b32.xlu0 %v2512_v35, %s8514_s17  ;;  %v7424_v36 = vld [vmem:[%s8543_s11 + $0x3cd] ss:$24 sm:$0xf]   ;;  %v2676_v13 = vsel %vm56_vm0, %v7428_v34, %v7427_v33  ;;  %v2063_v45 = vpop.permute.xlu1 %2062  }
 0x1aa   : > { %v1876_v16 = vpop.permute.xlu0 %1875   ;;  %v7389_v50 = vld [vmem:[%s8543_s11 + $0xa8e] ss:$24 sm:$0xf]   ;;  %v2545_v52 = vsel %vm56_vm0, %v7393_v48, %v7392_v47  ;;  %v7425_v37 = vld [vmem:[%s8543_s11 + $0x3cd] ss:$24 sm:$0xf0]  }
 0x1ab   : > { %v7390_v44 = vld [vmem:[%s8543_s11 + $0xa8e] ss:$24 sm:$0xf0]   ;;  %7211 = vst.msk [vmem:[%s8845_s16 + $0x80] sm:$0xff] %vm1834_vm3, %v1876_v16   ;;  %2546 = vrot.lane.b32.xlu1 %v2545_v52, %s8514_s17  ;;  %v2665_v39 = vsel %vm56_vm0, %v7425_v37, %v7424_v36  ;;  %7256 = vst.msk [vmem:[%s8845_s16 + $0x28] sm:$0xff] %vm1834_vm3, %v2041_v38  }
 0x1ac   : > { %v2534_v31 = vsel %vm56_vm0, %v7390_v44, %v7389_v50  ;;  %v7398_v54 = vld [vmem:[%s8543_s11 + $0xd8e] ss:$24 sm:$0xf]   ;;  %v7433_v2 = vld [vmem:[%s8543_s11 + $0x6cd] ss:$24 sm:$0xf]  }
 0x1ad   : > { %v7399_v56 = vld [vmem:[%s8543_s11 + $0xd8e] ss:$24 sm:$0xf0]   ;;  %2535 = vrot.lane.b32.xlu0 %v2534_v31, %s8514_s17  ;;  %v7434_v9 = vld [vmem:[%s8543_s11 + $0x6cd] ss:$24 sm:$0xf0]   ;;  %v2085_v53 = vpop.permute.xlu1 %2084  }
 0x1ae   : > { %v1898_v26 = vpop.permute.xlu0 %1897   ;;  %v7395_v46 = vld [vmem:[%s8543_s11 + $0xcc6] ss:$24 sm:$0xf]   ;;  %v2567_v58 = vsel %vm56_vm0, %v7399_v56, %v7398_v54  ;;  %v7430_v41 = vld [vmem:[%s8543_s11 + $0x605] ss:$24 sm:$0xf]   ;;  %v2698_v43 = vsel %vm56_vm0, %v7434_v9, %v7433_v2 }
 0x1af   : > { %v7396_v57 = vld [vmem:[%s8543_s11 + $0xcc6] ss:$24 sm:$0xf0]   ;;  %7217 = vst.msk [vmem:[%s8845_s16 + $0xc0] sm:$0xff] %vm1834_vm3, %v1898_v26   ;;  %2568 = vrot.lane.b32.xlu1 %v2567_v58, %s8514_s17  ;;  %7262 = vst.msk [vmem:[%s8845_s16 + $0x68] sm:$0xff] %vm1834_vm3, %v2063_v45  }
 0x1b0   : > { %v2556_v14 = vsel %vm56_vm0, %v7396_v57, %v7395_v46  ;;  %v7404_v40 = vld [vmem:[%s8543_s11 + $0xfc6] ss:$24 sm:$0xf]   ;;  %v7431_v42 = vld [vmem:[%s8543_s11 + $0x605] ss:$24 sm:$0xf0]  }
 0x1b1   : > { %v7405_v55 = vld [vmem:[%s8543_s11 + $0xfc6] ss:$24 sm:$0xf0]   ;;  %2557 = vrot.lane.b32.xlu0 %v2556_v14, %s8514_s17  ;;  %v2687_v35 = vsel %vm56_vm0, %v7431_v42, %v7430_v41  ;;  %v7439_v47 = vld [vmem:[%s8543_s11 + $0x905] ss:$24 sm:$0xf]   ;;  %v2107_v3 = vpop.permute.xlu1 %2106  }
 0x1b2   : > { %v1920_v60 = vpop.permute.xlu0 %1919   ;;  %v7401_v62 = vld [vmem:[%s8543_s11 + $0xe56] ss:$24 sm:$0xf]   ;;  %v2589_v49 = vsel %vm56_vm0, %v7405_v55, %v7404_v40  ;;  %v7440_v48 = vld [vmem:[%s8543_s11 + $0x905] ss:$24 sm:$0xf0]  }
 0x1b3   : > { %v7402_v19 = vld [vmem:[%s8543_s11 + $0xe56] ss:$24 sm:$0xf0]   ;;  %7223 = vst.msk [vmem:[%s8845_s16 + $0x100] sm:$0xff] %vm1834_vm3, %v1920_v60   ;;  %2590 = vrot.lane.b32.xlu1 %v2589_v49, %s8514_s17  ;;  %v2720_v52 = vsel %vm56_vm0, %v7440_v48, %v7439_v47  ;;  %7268 = vst.msk [vmem:[%s8845_s16 + $0xa8] sm:$0xff] %vm1834_vm3, %v2085_v53  }
 0x1b4   : > { %v2578_v4 = vsel %vm56_vm0, %v7402_v19, %v7401_v62  ;;  %v7410_v5 = vld [vmem:[%s8543_s11 + $0x1156] ss:$24 sm:$0xf]   ;;  %v7436_v50 = vld [vmem:[%s8543_s11 + $0x795] ss:$24 sm:$0xf]  }
 0x1b5   : > { %v7411_v6 = vld [vmem:[%s8543_s11 + $0x1156] ss:$24 sm:$0xf0]   ;;  %2579 = vrot.lane.b32.xlu0 %v2578_v4, %s8514_s17  ;;  %v7437_v44 = vld [vmem:[%s8543_s11 + $0x795] ss:$24 sm:$0xf0]   ;;  %v2129_v0 = vpop.permute.xlu1 %2128  }
 0x1b6   : > { %v1942_v8 = vpop.permute.xlu0 %1941   ;;  %v7407_v7 = vld [vmem:[%s8543_s11 + $0x108e] ss:$24 sm:$0xf]   ;;  %v2611_v25 = vsel %vm56_vm0, %v7411_v6, %v7410_v5  ;;  %v2709_v31 = vsel %vm56_vm0, %v7437_v44, %v7436_v50  ;;  %v7445_v54 = vld [vmem:[%s8543_s11 + $0xa95] ss:$24 sm:$0xf]  }
 0x1b7   : > { %v7408_v10 = vld [vmem:[%s8543_s11 + $0x108e] ss:$24 sm:$0xf0]   ;;  %7229 = vst.msk [vmem:[%s8845_s16 + $0x140] sm:$0xff] %vm1834_vm3, %v1942_v8   ;;  %2612 = vrot.lane.b32.xlu1 %v2611_v25, %s8514_s17  ;;  %7274 = vst.msk [vmem:[%s8845_s16 + $0xe8] sm:$0xff] %vm1834_vm3, %v2107_v3  }
 0x1b8   : > { %v2600_v23 = vsel %vm56_vm0, %v7408_v10, %v7407_v7  ;;  %v7446_v56 = vld [vmem:[%s8543_s11 + $0xa95] ss:$24 sm:$0xf0]   ;;  %7280 = vst.msk [vmem:[%s8845_s16 + $0x128] sm:$0xff] %vm1834_vm3, %v2129_v0  }
 0x1b9   : > { %2601 = vrot.lane.b32.xlu0 %v2600_v23, %s8514_s17  ;;  %v7442_v46 = vld [vmem:[%s8543_s11 + $0x9cd] ss:$24 sm:$0xf]   ;;  %v2742_v58 = vsel %vm56_vm0, %v7446_v56, %v7445_v54  ;;  %v2151_v11 = vpop.permute.xlu1 %2150  }
 0x1ba   : > { %v1964_v63 = vpop.permute.xlu0 %1963   ;;  %v7443_v57 = vld [vmem:[%s8543_s11 + $0x9cd] ss:$24 sm:$0xf0]   ;;  %7286 = vst.msk [vmem:[%s8845_s16 + $0x168] sm:$0xff] %vm1834_vm3, %v2151_v11  }
 0x1bb   : > { %7235 = vst.msk [vmem:[%s8845_s16 + $0x180] sm:$0xff] %vm1834_vm3, %v1964_v63   ;;  %2633 = vrot.lane.b32.xlu1 %v2632_v17, %s8515_s18  ;;  %v2731_v14 = vsel %vm56_vm0, %v7443_v57, %v7442_v46  ;;  %v7451_v40 = vld [vmem:[%s8543_s11 + $0xccd] ss:$24 sm:$0xf]  }
 0x1bc   : > { %v7452_v55 = vld [vmem:[%s8543_s11 + $0xccd] ss:$24 sm:$0xf0]  }
 0x1bd   : > { %2623 = vrot.lane.b32.xlu0 %v2622_v59, %s8515_s18  ;;  %v7448_v62 = vld [vmem:[%s8543_s11 + $0xc05] ss:$24 sm:$0xf]   ;;  %v2764_v49 = vsel %vm56_vm0, %v7452_v55, %v7451_v40  ;;  %v2173_v20 = vpop.permute.xlu1 %2172  }
 0x1be   : > { %v1986_v24 = vpop.permute.xlu0 %1985   ;;  %v7449_v19 = vld [vmem:[%s8543_s11 + $0xc05] ss:$24 sm:$0xf0]   ;;  %7292 = vst.msk [vmem:[%s8845_s16 + $0x1a8] sm:$0xff] %vm1834_vm3, %v2173_v20  }
 0x1bf   : > { %7241 = vst.msk [vmem:[%s8845_s16 + $0x1c0] sm:$0xff] %vm1834_vm3, %v1986_v24   ;;  %2655 = vrot.lane.b32.xlu1 %v2654_v27, %s8515_s18  ;;  %v2753_v4 = vsel %vm56_vm0, %v7449_v19, %v7448_v62  ;;  %v7457_v5 = vld [vmem:[%s8543_s11 + $0xf05] ss:$24 sm:$0xf]  }
 0x1c0   : > { %v7458_v6 = vld [vmem:[%s8543_s11 + $0xf05] ss:$24 sm:$0xf0]  }
 0x1c1   : > { %2644 = vrot.lane.b32.xlu0 %v2643_v32, %s8515_s18  ;;  %v7454_v7 = vld [vmem:[%s8543_s11 + $0xd95] ss:$24 sm:$0xf]   ;;  %v2786_v25 = vsel %vm56_vm0, %v7458_v6, %v7457_v5  ;;  %v2195_v29 = vpop.permute.xlu1 %2194  }
 0x1c2   : > { %v2008_v12 = vpop.permute.xlu0 %2007   ;;  %v7455_v10 = vld [vmem:[%s8543_s11 + $0xd95] ss:$24 sm:$0xf0]   ;;  %7298 = vst.msk [vmem:[%s8845_s16 + $0x1e8] sm:$0xff] %vm1834_vm3, %v2195_v29  }
 0x1c3   : > { %7247 = vst.msk [vmem:[%s8845_s16 + $0x200] sm:$0xff] %vm1834_vm3, %v2008_v12   ;;  %2677 = vrot.lane.b32.xlu1 %v2676_v13, %s8515_s18  ;;  %v2775_v23 = vsel %vm56_vm0, %v7455_v10, %v7454_v7  ;;  %v7463_v15 = vld [vmem:[%s8543_s11 + $0x1095] ss:$24 sm:$0xf]  }
 0x1c4   : > { %v7464_v28 = vld [vmem:[%s8543_s11 + $0x1095] ss:$24 sm:$0xf0]  }
 0x1c5   : > { %2666 = vrot.lane.b32.xlu0 %v2665_v39, %s8515_s18  ;;  %v7460_v18 = vld [vmem:[%s8543_s11 + $0xfcd] ss:$24 sm:$0xf]   ;;  %v2808_v17 = vsel %vm56_vm0, %v7464_v28, %v7463_v15  ;;  %v2217_v38 = vpop.permute.xlu1 %2216  }
 0x1c6   : > { %v2030_v51 = vpop.permute.xlu0 %2029   ;;  %v7461_v1 = vld [vmem:[%s8543_s11 + $0xfcd] ss:$24 sm:$0xf0]   ;;  %7304 = vst.msk [vmem:[%s8845_s16 + $0x228] sm:$0xff] %vm1834_vm3, %v2217_v38  }
 0x1c7   : > { %7253 = vst.msk [vmem:[%s8845_s16 + $0x8] sm:$0xff] %vm1834_vm3, %v2030_v51   ;;  %2699 = vrot.lane.b32.xlu1 %v2698_v43, %s8515_s18  ;;  %v2797_v59 = vsel %vm56_vm0, %v7461_v1, %v7460_v18  ;;  %v7469_v21 = vld [vmem:[%s8543_s11 + $0xd5] ss:$24 sm:$0xf]  }
 0x1c8   : > { %v7470_v22 = vld [vmem:[%s8543_s11 + $0xd5] ss:$24 sm:$0xf0]  }
 0x1c9   : > { %2688 = vrot.lane.b32.xlu0 %v2687_v35, %s8515_s18  ;;  %v7466_v30 = vld [vmem:[%s8543_s11 + $0xd] ss:$24 sm:$0xf]   ;;  %v2830_v27 = vsel %vm56_vm0, %v7470_v22, %v7469_v21  ;;  %v2239_v45 = vpop.permute.xlu1 %2238  }
 0x1ca   : > { %v2052_v16 = vpop.permute.xlu0 %2051   ;;  %v7467_v61 = vld [vmem:[%s8543_s11 + $0xd] ss:$24 sm:$0xf0]   ;;  %7310 = vst.msk [vmem:[%s8845_s16 + $0x30] sm:$0xff] %vm1834_vm3, %v2239_v45  }
 0x1cb   : > { %7259 = vst.msk [vmem:[%s8845_s16 + $0x48] sm:$0xff] %vm1834_vm3, %v2052_v16   ;;  %2721 = vrot.lane.b32.xlu1 %v2720_v52, %s8515_s18  ;;  %v2819_v32 = vsel %vm56_vm0, %v7467_v61, %v7466_v30  ;;  %v7475_v33 = vld [vmem:[%s8543_s11 + $0x30d] ss:$24 sm:$0xf]  }
 0x1cc   : > { %v7476_v34 = vld [vmem:[%s8543_s11 + $0x30d] ss:$24 sm:$0xf0]  }
 0x1cd   : > { %2710 = vrot.lane.b32.xlu0 %v2709_v31, %s8515_s18  ;;  %v7472_v36 = vld [vmem:[%s8543_s11 + $0x245] ss:$24 sm:$0xf]   ;;  %v2852_v13 = vsel %vm56_vm0, %v7476_v34, %v7475_v33 }
 0x1ce   : > { %v2074_v26 = vpop.permute.xlu0 %2073   ;;  %v7473_v37 = vld [vmem:[%s8543_s11 + $0x245] ss:$24 sm:$0xf0]  }
 0x1cf   : > { %7265 = vst.msk [vmem:[%s8845_s16 + $0x88] sm:$0xff] %vm1834_vm3, %v2074_v26   ;;  %2743 = vrot.lane.b32.xlu1 %v2742_v58, %s8515_s18  ;;  %v2841_v39 = vsel %vm56_vm0, %v7473_v37, %v7472_v36  ;;  %v7481_v2 = vld [vmem:[%s8543_s11 + $0x545] ss:$24 sm:$0xf]  }
 0x1d0   : > { %v7482_v9 = vld [vmem:[%s8543_s11 + $0x545] ss:$24 sm:$0xf0]  }
 0x1d1   : > { %2732 = vrot.lane.b32.xlu0 %v2731_v14, %s8515_s18  ;;  %v7478_v41 = vld [vmem:[%s8543_s11 + $0x3d5] ss:$24 sm:$0xf]   ;;  %v2874_v43 = vsel %vm56_vm0, %v7482_v9, %v7481_v2  ;;  %v2261_v53 = vpop.permute.xlu1 %2260  }
 0x1d2   : > { %v2096_v60 = vpop.permute.xlu0 %2095   ;;  %v7479_v42 = vld [vmem:[%s8543_s11 + $0x3d5] ss:$24 sm:$0xf0]   ;;  %7316 = vst.msk [vmem:[%s8845_s16 + $0x70] sm:$0xff] %vm1834_vm3, %v2261_v53  }
 0x1d3   : > { %7271 = vst.msk [vmem:[%s8845_s16 + $0xc8] sm:$0xff] %vm1834_vm3, %v2096_v60   ;;  %2765 = vrot.lane.b32.xlu1 %v2764_v49, %s8515_s18  ;;  %v2863_v35 = vsel %vm56_vm0, %v7479_v42, %v7478_v41  ;;  %v7487_v47 = vld [vmem:[%s8543_s11 + $0x6d5] ss:$24 sm:$0xf]  }
 0x1d4   : > { %v7488_v48 = vld [vmem:[%s8543_s11 + $0x6d5] ss:$24 sm:$0xf0]  }
 0x1d5   : > { %2754 = vrot.lane.b32.xlu0 %v2753_v4, %s8515_s18  ;;  %v7484_v50 = vld [vmem:[%s8543_s11 + $0x60d] ss:$24 sm:$0xf]   ;;  %v2896_v52 = vsel %vm56_vm0, %v7488_v48, %v7487_v47  ;;  %v2283_v3 = vpop.permute.xlu1 %2282  }
 0x1d6   : > { %v2118_v8 = vpop.permute.xlu0 %2117   ;;  %v7485_v44 = vld [vmem:[%s8543_s11 + $0x60d] ss:$24 sm:$0xf0]   ;;  %7322 = vst.msk [vmem:[%s8845_s16 + $0xb0] sm:$0xff] %vm1834_vm3, %v2283_v3  }
 0x1d7   : > { %7277 = vst.msk [vmem:[%s8845_s16 + $0x108] sm:$0xff] %vm1834_vm3, %v2118_v8   ;;  %2787 = vrot.lane.b32.xlu1 %v2786_v25, %s8515_s18  ;;  %v2885_v31 = vsel %vm56_vm0, %v7485_v44, %v7484_v50  ;;  %v7493_v54 = vld [vmem:[%s8543_s11 + $0x90d] ss:$24 sm:$0xf]  }
 0x1d8   : > { %v7494_v56 = vld [vmem:[%s8543_s11 + $0x90d] ss:$24 sm:$0xf0]  }
 0x1d9   : > { %2776 = vrot.lane.b32.xlu0 %v2775_v23, %s8515_s18  ;;  %v7490_v46 = vld [vmem:[%s8543_s11 + $0x845] ss:$24 sm:$0xf]   ;;  %v2918_v58 = vsel %vm56_vm0, %v7494_v56, %v7493_v54 }
 0x1da   : > { %v2140_v63 = vpop.permute.xlu0 %2139   ;;  %v7491_v57 = vld [vmem:[%s8543_s11 + $0x845] ss:$24 sm:$0xf0]  }
 0x1db   : > { %7283 = vst.msk [vmem:[%s8845_s16 + $0x148] sm:$0xff] %vm1834_vm3, %v2140_v63   ;;  %2809 = vrot.lane.b32.xlu1 %v2808_v17, %s8515_s18  ;;  %v2907_v14 = vsel %vm56_vm0, %v7491_v57, %v7490_v46  ;;  %v7499_v40 = vld [vmem:[%s8543_s11 + $0xb45] ss:$24 sm:$0xf]  }
 0x1dc   : > { %v7500_v55 = vld [vmem:[%s8543_s11 + $0xb45] ss:$24 sm:$0xf0]   ;;  %v2305_v0 = vpop.permute.xlu1 %2304  }
 0x1dd   : > { %2798 = vrot.lane.b32.xlu0 %v2797_v59, %s8515_s18  ;;  %v7496_v62 = vld [vmem:[%s8543_s11 + $0x9d5] ss:$24 sm:$0xf]   ;;  %v2940_v49 = vsel %vm56_vm0, %v7500_v55, %v7499_v40  ;;  %7328 = vst.msk [vmem:[%s8845_s16 + $0xf0] sm:$0xff] %vm1834_vm3, %v2305_v0  }
 0x1de   : > { %v2162_v24 = vpop.permute.xlu0 %2161   ;;  %v7497_v19 = vld [vmem:[%s8543_s11 + $0x9d5] ss:$24 sm:$0xf0]  }
 0x1df   : > { %7289 = vst.msk [vmem:[%s8845_s16 + $0x188] sm:$0xff] %vm1834_vm3, %v2162_v24   ;;  %2831 = vrot.lane.b32.xlu1 %v2830_v27, %s8515_s18  ;;  %v2929_v4 = vsel %vm56_vm0, %v7497_v19, %v7496_v62  ;;  %v7505_v5 = vld [vmem:[%s8543_s11 + $0xcd5] ss:$24 sm:$0xf]  }
 0x1e0   : > { %v7506_v6 = vld [vmem:[%s8543_s11 + $0xcd5] ss:$24 sm:$0xf0]  }
 0x1e1   : > { %2820 = vrot.lane.b32.xlu0 %v2819_v32, %s8515_s18  ;;  %v7502_v7 = vld [vmem:[%s8543_s11 + $0xc0d] ss:$24 sm:$0xf]   ;;  %v2962_v25 = vsel %vm56_vm0, %v7506_v6, %v7505_v5 }
 0x1e2   : > { %v2184_v12 = vpop.permute.xlu0 %2183   ;;  %v7503_v10 = vld [vmem:[%s8543_s11 + $0xc0d] ss:$24 sm:$0xf0]  }
 0x1e3   : > { %7295 = vst.msk [vmem:[%s8845_s16 + $0x1c8] sm:$0xff] %vm1834_vm3, %v2184_v12   ;;  %2853 = vrot.lane.b32.xlu1 %v2852_v13, %s8515_s18  ;;  %v2951_v23 = vsel %vm56_vm0, %v7503_v10, %v7502_v7  ;;  %v7511_v15 = vld [vmem:[%s8543_s11 + $0xf0d] ss:$24 sm:$0xf]  }
 0x1e4   : > { %v7512_v28 = vld [vmem:[%s8543_s11 + $0xf0d] ss:$24 sm:$0xf0]  }
 0x1e5   : > { %2842 = vrot.lane.b32.xlu0 %v2841_v39, %s8515_s18  ;;  %v7508_v18 = vld [vmem:[%s8543_s11 + $0xe45] ss:$24 sm:$0xf]   ;;  %v2984_v17 = vsel %vm56_vm0, %v7512_v28, %v7511_v15 }
 0x1e6   : > { %v2206_v51 = vpop.permute.xlu0 %2205   ;;  %v7509_v1 = vld [vmem:[%s8543_s11 + $0xe45] ss:$24 sm:$0xf0]  }
 0x1e7   : > { %7301 = vst.msk [vmem:[%s8845_s16 + $0x208] sm:$0xff] %vm1834_vm3, %v2206_v51   ;;  %2875 = vrot.lane.b32.xlu1 %v2874_v43, %s8515_s18  ;;  %v2973_v59 = vsel %vm56_vm0, %v7509_v1, %v7508_v18  ;;  %v7517_v21 = vld [vmem:[%s8543_s11 + $0x1145] ss:$24 sm:$0xf]  }
 0x1e8   : > { %v7518_v22 = vld [vmem:[%s8543_s11 + $0x1145] ss:$24 sm:$0xf0]  }
 0x1e9   : > { %2864 = vrot.lane.b32.xlu0 %v2863_v35, %s8515_s18  ;;  %v2327_v11 = vpop.permute.xlu1 %2326   ;;  %v7514_v30 = vld [vmem:[%s8543_s11 + $0xfd5] ss:$24 sm:$0xf]   ;;  %v3006_v27 = vsel %vm56_vm0, %v7518_v22, %v7517_v21 }
 0x1ea   : > { %v2228_v16 = vpop.permute.xlu0 %2227   ;;  %7334 = vst.msk [vmem:[%s8845_s16 + $0x130] sm:$0xff] %vm1834_vm3, %v2327_v11   ;;  %v7515_v61 = vld [vmem:[%s8543_s11 + $0xfd5] ss:$24 sm:$0xf0]  }
 0x1eb   : > { %7307 = vst.msk [vmem:[%s8845_s16 + $0x10] sm:$0xff] %vm1834_vm3, %v2228_v16   ;;  %2897 = vrot.lane.b32.xlu1 %v2896_v52, %s8515_s18  ;;  %v2995_v32 = vsel %vm56_vm0, %v7515_v61, %v7514_v30  ;;  %v7523_v33 = vld [vmem:[%s8543_s11 + $0x185] ss:$24 sm:$0xf]  }
 0x1ec   : > { %v7524_v34 = vld [vmem:[%s8543_s11 + $0x185] ss:$24 sm:$0xf0]  }
 0x1ed   : > { %2886 = vrot.lane.b32.xlu0 %v2885_v31, %s8515_s18  ;;  %v2349_v20 = vpop.permute.xlu1 %2348   ;;  %v7520_v36 = vld [vmem:[%s8543_s11 + $0x15] ss:$24 sm:$0xf]   ;;  %v3028_v13 = vsel %vm56_vm0, %v7524_v34, %v7523_v33 }
 0x1ee   : > { %v2250_v26 = vpop.permute.xlu0 %2249   ;;  %7340 = vst.msk [vmem:[%s8845_s16 + $0x170] sm:$0xff] %vm1834_vm3, %v2349_v20   ;;  %v7521_v37 = vld [vmem:[%s8543_s11 + $0x15] ss:$24 sm:$0xf0]  }
 0x1ef   : > { %7313 = vst.msk [vmem:[%s8845_s16 + $0x50] sm:$0xff] %vm1834_vm3, %v2250_v26   ;;  %2919 = vrot.lane.b32.xlu1 %v2918_v58, %s8515_s18  ;;  %v3017_v39 = vsel %vm56_vm0, %v7521_v37, %v7520_v36  ;;  %v7529_v2 = vld [vmem:[%s8543_s11 + $0x315] ss:$24 sm:$0xf]  }
 0x1f0   : > { %v7530_v9 = vld [vmem:[%s8543_s11 + $0x315] ss:$24 sm:$0xf0]  }
 0x1f1   : > { %2908 = vrot.lane.b32.xlu0 %v2907_v14, %s8515_s18  ;;  %v7526_v41 = vld [vmem:[%s8543_s11 + $0x24d] ss:$24 sm:$0xf]   ;;  %v3050_v43 = vsel %vm56_vm0, %v7530_v9, %v7529_v2 }
 0x1f2   : > { %v2272_v60 = vpop.permute.xlu0 %2271   ;;  %v7527_v42 = vld [vmem:[%s8543_s11 + $0x24d] ss:$24 sm:$0xf0]  }
 0x1f3   : > { %7319 = vst.msk [vmem:[%s8845_s16 + $0x90] sm:$0xff] %vm1834_vm3, %v2272_v60   ;;  %2941 = vrot.lane.b32.xlu1 %v2940_v49, %s8515_s18  ;;  %v3039_v35 = vsel %vm56_vm0, %v7527_v42, %v7526_v41  ;;  %v7535_v47 = vld [vmem:[%s8543_s11 + $0x54d] ss:$24 sm:$0xf]  }
 0x1f4   : > { %v7536_v48 = vld [vmem:[%s8543_s11 + $0x54d] ss:$24 sm:$0xf0]  }
 0x1f5   : > { %2930 = vrot.lane.b32.xlu0 %v2929_v4, %s8515_s18  ;;  %v2371_v29 = vpop.permute.xlu1 %2370   ;;  %v7532_v50 = vld [vmem:[%s8543_s11 + $0x485] ss:$24 sm:$0xf]   ;;  %v3072_v52 = vsel %vm56_vm0, %v7536_v48, %v7535_v47 }
 0x1f6   : > { %v2294_v8 = vpop.permute.xlu0 %2293   ;;  %7346 = vst.msk [vmem:[%s8845_s16 + $0x1b0] sm:$0xff] %vm1834_vm3, %v2371_v29   ;;  %v7533_v44 = vld [vmem:[%s8543_s11 + $0x485] ss:$24 sm:$0xf0]  }
 0x1f7   : > { %7325 = vst.msk [vmem:[%s8845_s16 + $0xd0] sm:$0xff] %vm1834_vm3, %v2294_v8   ;;  %2963 = vrot.lane.b32.xlu1 %v2962_v25, %s8515_s18  ;;  %v3061_v31 = vsel %vm56_vm0, %v7533_v44, %v7532_v50  ;;  %v7541_v54 = vld [vmem:[%s8543_s11 + $0x785] ss:$24 sm:$0xf]  }
 0x1f8   : > { %v7542_v56 = vld [vmem:[%s8543_s11 + $0x785] ss:$24 sm:$0xf0]  }
 0x1f9   : > { %2952 = vrot.lane.b32.xlu0 %v2951_v23, %s8515_s18  ;;  %v7538_v46 = vld [vmem:[%s8543_s11 + $0x615] ss:$24 sm:$0xf]   ;;  %v3094_v58 = vsel %vm56_vm0, %v7542_v56, %v7541_v54 }
 0x1fa   : > { %v2316_v63 = vpop.permute.xlu0 %2315   ;;  %v7539_v57 = vld [vmem:[%s8543_s11 + $0x615] ss:$24 sm:$0xf0]  }
 0x1fb   : > { %7331 = vst.msk [vmem:[%s8845_s16 + $0x110] sm:$0xff] %vm1834_vm3, %v2316_v63   ;;  %2985 = vrot.lane.b32.xlu1 %v2984_v17, %s8515_s18  ;;  %v3083_v14 = vsel %vm56_vm0, %v7539_v57, %v7538_v46  ;;  %v7547_v40 = vld [vmem:[%s8543_s11 + $0x915] ss:$24 sm:$0xf]  }
 0x1fc   : > { %v7548_v55 = vld [vmem:[%s8543_s11 + $0x915] ss:$24 sm:$0xf0]  }
 0x1fd   : > { %2974 = vrot.lane.b32.xlu0 %v2973_v59, %s8515_s18  ;;  %v7544_v62 = vld [vmem:[%s8543_s11 + $0x84d] ss:$24 sm:$0xf]   ;;  %v3116_v49 = vsel %vm56_vm0, %v7548_v55, %v7547_v40 }
 0x1fe   : > { %v2338_v24 = vpop.permute.xlu0 %2337   ;;  %v7545_v19 = vld [vmem:[%s8543_s11 + $0x84d] ss:$24 sm:$0xf0]  }
 0x1ff   : > { %7337 = vst.msk [vmem:[%s8845_s16 + $0x150] sm:$0xff] %vm1834_vm3, %v2338_v24   ;;  %3007 = vrot.lane.b32.xlu1 %v3006_v27, %s8515_s18  ;;  %v3105_v4 = vsel %vm56_vm0, %v7545_v19, %v7544_v62  ;;  %v7553_v5 = vld [vmem:[%s8543_s11 + $0xb4d] ss:$24 sm:$0xf]  }
 0x200   : > { %v7554_v6 = vld [vmem:[%s8543_s11 + $0xb4d] ss:$24 sm:$0xf0]  }
 0x201   : > { %2996 = vrot.lane.b32.xlu0 %v2995_v32, %s8515_s18  ;;  %v2393_v38 = vpop.permute.xlu1 %2392   ;;  %v7550_v7 = vld [vmem:[%s8543_s11 + $0xa85] ss:$24 sm:$0xf]   ;;  %v3138_v25 = vsel %vm56_vm0, %v7554_v6, %v7553_v5 }
 0x202   : > { %v2360_v12 = vpop.permute.xlu0 %2359   ;;  %7352 = vst.msk [vmem:[%s8845_s16 + $0x1f0] sm:$0xff] %vm1834_vm3, %v2393_v38   ;;  %v7551_v10 = vld [vmem:[%s8543_s11 + $0xa85] ss:$24 sm:$0xf0]  }
 0x203   : > { %7343 = vst.msk [vmem:[%s8845_s16 + $0x190] sm:$0xff] %vm1834_vm3, %v2360_v12   ;;  %3029 = vrot.lane.b32.xlu1 %v3028_v13, %s8515_s18  ;;  %v3127_v23 = vsel %vm56_vm0, %v7551_v10, %v7550_v7  ;;  %v7559_v15 = vld [vmem:[%s8543_s11 + $0xd85] ss:$24 sm:$0xf]  }
 0x204   : > { %v7560_v28 = vld [vmem:[%s8543_s11 + $0xd85] ss:$24 sm:$0xf0]  }
 0x205   : > { %3018 = vrot.lane.b32.xlu0 %v3017_v39, %s8515_s18  ;;  %v2415_v45 = vpop.permute.xlu1 %2414   ;;  %v7556_v18 = vld [vmem:[%s8543_s11 + $0xc15] ss:$24 sm:$0xf]   ;;  %v3160_v17 = vsel %vm56_vm0, %v7560_v28, %v7559_v15 }
 0x206   : > { %v2382_v51 = vpop.permute.xlu0 %2381   ;;  %7358 = vst.msk [vmem:[%s8845_s16 + $0x230] sm:$0xff] %vm1834_vm3, %v2415_v45   ;;  %v7557_v1 = vld [vmem:[%s8543_s11 + $0xc15] ss:$24 sm:$0xf0]  }
 0x207   : > { %7349 = vst.msk [vmem:[%s8845_s16 + $0x1d0] sm:$0xff] %vm1834_vm3, %v2382_v51   ;;  %3051 = vrot.lane.b32.xlu1 %v3050_v43, %s8515_s18  ;;  %v3149_v59 = vsel %vm56_vm0, %v7557_v1, %v7556_v18  ;;  %v7565_v21 = vld [vmem:[%s8543_s11 + $0xf15] ss:$24 sm:$0xf]  }
 0x208   : > { %v7566_v22 = vld [vmem:[%s8543_s11 + $0xf15] ss:$24 sm:$0xf0]  }
 0x209   : > { %3040 = vrot.lane.b32.xlu0 %v3039_v35, %s8515_s18  ;;  %v2437_v53 = vpop.permute.xlu1 %2436   ;;  %v7562_v30 = vld [vmem:[%s8543_s11 + $0xe4d] ss:$24 sm:$0xf]   ;;  %v3182_v27 = vsel %vm56_vm0, %v7566_v22, %v7565_v21 }
 0x20a   : > { %v2404_v16 = vpop.permute.xlu0 %2403   ;;  %7364 = vst.msk [vmem:[%s8845_s16 + $0x38] sm:$0xff] %vm1834_vm3, %v2437_v53   ;;  %v7563_v61 = vld [vmem:[%s8543_s11 + $0xe4d] ss:$24 sm:$0xf0]  }
 0x20b   : > { %7355 = vst.msk [vmem:[%s8845_s16 + $0x210] sm:$0xff] %vm1834_vm3, %v2404_v16   ;;  %3073 = vrot.lane.b32.xlu1 %v3072_v52, %s8515_s18  ;;  %v3171_v32 = vsel %vm56_vm0, %v7563_v61, %v7562_v30  ;;  %v7571_v33 = vld [vmem:[%s8543_s11 + $0x114d] ss:$24 sm:$0xf]  }
 0x20c   : > { %v7572_v34 = vld [vmem:[%s8543_s11 + $0x114d] ss:$24 sm:$0xf0]  }
 0x20d   : > { %3062 = vrot.lane.b32.xlu0 %v3061_v31, %s8515_s18  ;;  %v2459_v3 = vpop.permute.xlu1 %2458   ;;  %v7568_v36 = vld [vmem:[%s8543_s11 + $0x1085] ss:$24 sm:$0xf]   ;;  %v3204_v13 = vsel %vm56_vm0, %v7572_v34, %v7571_v33 }
 0x20e   : > { %v2426_v26 = vpop.permute.xlu0 %2425   ;;  %7370 = vst.msk [vmem:[%s8845_s16 + $0x78] sm:$0xff] %vm1834_vm3, %v2459_v3   ;;  %v7569_v37 = vld [vmem:[%s8543_s11 + $0x1085] ss:$24 sm:$0xf0]  }
 0x20f   : > { %7361 = vst.msk [vmem:[%s8845_s16 + $0x18] sm:$0xff] %vm1834_vm3, %v2426_v26   ;;  %3095 = vrot.lane.b32.xlu1 %v3094_v58, %s8515_s18  ;;  %v3193_v39 = vsel %vm56_vm0, %v7569_v37, %v7568_v36  ;;  %v7577_v2 = vld [vmem:[%s8543_s11 + $0x18d] ss:$24 sm:$0xf]  }
 0x210   : > { %v7578_v9 = vld [vmem:[%s8543_s11 + $0x18d] ss:$24 sm:$0xf0]  }
 0x211   : > { %3084 = vrot.lane.b32.xlu0 %v3083_v14, %s8515_s18  ;;  %v2481_v0 = vpop.permute.xlu1 %2480   ;;  %v7574_v41 = vld [vmem:[%s8543_s11 + $0xc5] ss:$24 sm:$0xf]   ;;  %v3226_v43 = vsel %vm56_vm0, %v7578_v9, %v7577_v2 }
 0x212   : > { %v2448_v60 = vpop.permute.xlu0 %2447   ;;  %7376 = vst.msk [vmem:[%s8845_s16 + $0xb8] sm:$0xff] %vm1834_vm3, %v2481_v0   ;;  %v7575_v42 = vld [vmem:[%s8543_s11 + $0xc5] ss:$24 sm:$0xf0]  }
 0x213   : > { %7367 = vst.msk [vmem:[%s8845_s16 + $0x58] sm:$0xff] %vm1834_vm3, %v2448_v60   ;;  %3117 = vrot.lane.b32.xlu1 %v3116_v49, %s8515_s18  ;;  %v3215_v35 = vsel %vm56_vm0, %v7575_v42, %v7574_v41  ;;  %v7583_v47 = vld [vmem:[%s8543_s11 + $0x3c5] ss:$24 sm:$0xf]  }
 0x214   : > { %v7584_v48 = vld [vmem:[%s8543_s11 + $0x3c5] ss:$24 sm:$0xf0]  }
 0x215   : > { %3106 = vrot.lane.b32.xlu0 %v3105_v4, %s8515_s18  ;;  %v2503_v11 = vpop.permute.xlu1 %2502   ;;  %v7580_v50 = vld [vmem:[%s8543_s11 + $0x255] ss:$24 sm:$0xf]   ;;  %v3248_v52 = vsel %vm56_vm0, %v7584_v48, %v7583_v47  ;;  %v7630_v47 = vld [vmem:[%s8543_s11 + $0xcc] ss:$24 sm:$0xf]  }
 0x216   : > { %v2470_v8 = vpop.permute.xlu0 %2469   ;;  %7382 = vst.msk [vmem:[%s8845_s16 + $0xf8] sm:$0xff] %vm1834_vm3, %v2503_v11   ;;  %v7581_v44 = vld [vmem:[%s8543_s11 + $0x255] ss:$24 sm:$0xf0]  }
 0x217   : > { %7373 = vst.msk [vmem:[%s8845_s16 + $0x98] sm:$0xff] %vm1834_vm3, %v2470_v8   ;;  %3139 = vrot.lane.b32.xlu1 %v3138_v25, %s8515_s18  ;;  %v3237_v31 = vsel %vm56_vm0, %v7581_v44, %v7580_v50  ;;  %v7589_v54 = vld [vmem:[%s8543_s11 + $0x555] ss:$24 sm:$0xf]  }
 0x218   : > { %v7590_v56 = vld [vmem:[%s8543_s11 + $0x555] ss:$24 sm:$0xf0]   ;;  %v7631_v48 = vld [vmem:[%s8543_s11 + $0xcc] ss:$24 sm:$0xf0]  }
 0x219   : > { %3128 = vrot.lane.b32.xlu0 %v3127_v23, %s8515_s18  ;;  %v2525_v20 = vpop.permute.xlu1 %2524   ;;  %v7586_v46 = vld [vmem:[%s8543_s11 + $0x48d] ss:$24 sm:$0xf]   ;;  %v3270_v58 = vsel %vm56_vm0, %v7590_v56, %v7589_v54  ;;  %v7628_v50 = vld [vmem:[%s8543_s11 + $0x4] ss:$24 sm:$0xf]  }
 0x21a   : > { %v2492_v63 = vpop.permute.xlu0 %2491   ;;  %7388 = vst.msk [vmem:[%s8845_s16 + $0x138] sm:$0xff] %vm1834_vm3, %v2525_v20   ;;  %v7587_v57 = vld [vmem:[%s8543_s11 + $0x48d] ss:$24 sm:$0xf0]  }
 0x21b   : > { %7379 = vst.msk [vmem:[%s8845_s16 + $0xd8] sm:$0xff] %vm1834_vm3, %v2492_v63   ;;  %3161 = vrot.lane.b32.xlu1 %v3160_v17, %s8515_s18  ;;  %v3259_v14 = vsel %vm56_vm0, %v7587_v57, %v7586_v46  ;;  %v7595_v40 = vld [vmem:[%s8543_s11 + $0x78d] ss:$24 sm:$0xf]  }
 0x21c   : > { %v7596_v55 = vld [vmem:[%s8543_s11 + $0x78d] ss:$24 sm:$0xf0]   ;;  %v7629_v44 = vld [vmem:[%s8543_s11 + $0x4] ss:$24 sm:$0xf0]  }
 0x21d   : > { %3150 = vrot.lane.b32.xlu0 %v3149_v59, %s8515_s18  ;;  %v2547_v29 = vpop.permute.xlu1 %2546   ;;  %v7592_v62 = vld [vmem:[%s8543_s11 + $0x6c5] ss:$24 sm:$0xf]   ;;  %v3292_v49 = vsel %vm56_vm0, %v7596_v55, %v7595_v40  ;;  %v7636_v54 = vld [vmem:[%s8543_s11 + $0x304] ss:$24 sm:$0xf]  }
 0x21e   : > { %v2514_v24 = vpop.permute.xlu0 %2513   ;;  %7394 = vst.msk [vmem:[%s8845_s16 + $0x178] sm:$0xff] %vm1834_vm3, %v2547_v29   ;;  %v7593_v19 = vld [vmem:[%s8543_s11 + $0x6c5] ss:$24 sm:$0xf0]  }
 0x21f   : > { %7385 = vst.msk [vmem:[%s8845_s16 + $0x118] sm:$0xff] %vm1834_vm3, %v2514_v24   ;;  %3183 = vrot.lane.b32.xlu1 %v3182_v27, %s8515_s18  ;;  %v3281_v4 = vsel %vm56_vm0, %v7593_v19, %v7592_v62  ;;  %v7601_v5 = vld [vmem:[%s8543_s11 + $0x9c5] ss:$24 sm:$0xf]  }
 0x220   : > { %v7602_v6 = vld [vmem:[%s8543_s11 + $0x9c5] ss:$24 sm:$0xf0]   ;;  %v7637_v56 = vld [vmem:[%s8543_s11 + $0x304] ss:$24 sm:$0xf0]  }
 0x221   : > { %3172 = vrot.lane.b32.xlu0 %v3171_v32, %s8515_s18  ;;  %v2569_v38 = vpop.permute.xlu1 %2568   ;;  %v7598_v7 = vld [vmem:[%s8543_s11 + $0x855] ss:$24 sm:$0xf]   ;;  %v3314_v25 = vsel %vm56_vm0, %v7602_v6, %v7601_v5  ;;  %v7633_v46 = vld [vmem:[%s8543_s11 + $0x194] ss:$24 sm:$0xf]  }
 0x222   : > { %v2536_v12 = vpop.permute.xlu0 %2535   ;;  %7400 = vst.msk [vmem:[%s8845_s16 + $0x1b8] sm:$0xff] %vm1834_vm3, %v2569_v38   ;;  %v7599_v10 = vld [vmem:[%s8543_s11 + $0x855] ss:$24 sm:$0xf0]  }
 0x223   : > { %7391 = vst.msk [vmem:[%s8845_s16 + $0x158] sm:$0xff] %vm1834_vm3, %v2536_v12   ;;  %3205 = vrot.lane.b32.xlu1 %v3204_v13, %s8515_s18  ;;  %v3303_v23 = vsel %vm56_vm0, %v7599_v10, %v7598_v7  ;;  %v7607_v15 = vld [vmem:[%s8543_s11 + $0xb55] ss:$24 sm:$0xf]  }
 0x224   : > { %v7608_v28 = vld [vmem:[%s8543_s11 + $0xb55] ss:$24 sm:$0xf0]   ;;  %v7634_v57 = vld [vmem:[%s8543_s11 + $0x194] ss:$24 sm:$0xf0]  }
 0x225   : > { %3194 = vrot.lane.b32.xlu0 %v3193_v39, %s8515_s18  ;;  %v2591_v45 = vpop.permute.xlu1 %2590   ;;  %v7604_v18 = vld [vmem:[%s8543_s11 + $0xa8d] ss:$24 sm:$0xf]   ;;  %v3336_v17 = vsel %vm56_vm0, %v7608_v28, %v7607_v15  ;;  %v7642_v40 = vld [vmem:[%s8543_s11 + $0x494] ss:$24 sm:$0xf]  }
 0x226   : > { %v2558_v51 = vpop.permute.xlu0 %2557   ;;  %7406 = vst.msk [vmem:[%s8845_s16 + $0x1f8] sm:$0xff] %vm1834_vm3, %v2591_v45   ;;  %v7605_v1 = vld [vmem:[%s8543_s11 + $0xa8d] ss:$24 sm:$0xf0]  }
 0x227   : > { %7397 = vst.msk [vmem:[%s8845_s16 + $0x198] sm:$0xff] %vm1834_vm3, %v2558_v51   ;;  %3227 = vrot.lane.b32.xlu1 %v3226_v43, %s8515_s18  ;;  %v3325_v59 = vsel %vm56_vm0, %v7605_v1, %v7604_v18  ;;  %v7613_v21 = vld [vmem:[%s8543_s11 + $0xd8d] ss:$24 sm:$0xf]  }
 0x228   : > { %v7614_v22 = vld [vmem:[%s8543_s11 + $0xd8d] ss:$24 sm:$0xf0]   ;;  %v7643_v55 = vld [vmem:[%s8543_s11 + $0x494] ss:$24 sm:$0xf0]  }
 0x229   : > { %3216 = vrot.lane.b32.xlu0 %v3215_v35, %s8515_s18  ;;  %v2613_v53 = vpop.permute.xlu1 %2612   ;;  %v7610_v30 = vld [vmem:[%s8543_s11 + $0xcc5] ss:$24 sm:$0xf]   ;;  %v3358_v27 = vsel %vm56_vm0, %v7614_v22, %v7613_v21  ;;  %v7639_v62 = vld [vmem:[%s8543_s11 + $0x3cc] ss:$24 sm:$0xf]  }
 0x22a   : > { %v2580_v16 = vpop.permute.xlu0 %2579   ;;  %7412 = vst.msk [vmem:[%s8845_s16 + $0x238] sm:$0xff] %vm1834_vm3, %v2613_v53   ;;  %v7611_v61 = vld [vmem:[%s8543_s11 + $0xcc5] ss:$24 sm:$0xf0]  }
 0x22b   : > { %7403 = vst.msk [vmem:[%s8845_s16 + $0x1d8] sm:$0xff] %vm1834_vm3, %v2580_v16   ;;  %3249 = vrot.lane.b32.xlu1 %v3248_v52, %s8515_s18  ;;  %v3347_v32 = vsel %vm56_vm0, %v7611_v61, %v7610_v30  ;;  %v7619_v33 = vld [vmem:[%s8543_s11 + $0xfc5] ss:$24 sm:$0xf]   ;;  %v3423_v52 = vsel %vm56_vm0, %v7631_v48, %v7630_v47 }
 0x22c   : > { %v7620_v34 = vld [vmem:[%s8543_s11 + $0xfc5] ss:$24 sm:$0xf0]   ;;  %v7640_v19 = vld [vmem:[%s8543_s11 + $0x3cc] ss:$24 sm:$0xf0]  }
 0x22d   : > { %3238 = vrot.lane.b32.xlu0 %v3237_v31, %s8515_s18  ;;  %v2634_v3 = vpop.permute.xlu1 %2633   ;;  %v7616_v36 = vld [vmem:[%s8543_s11 + $0xe55] ss:$24 sm:$0xf]   ;;  %v3380_v13 = vsel %vm56_vm0, %v7620_v34, %v7619_v33  ;;  %v3413_v31 = vsel %vm56_vm0, %v7629_v44, %v7628_v50  ;;  %v7648_v5 = vld [vmem:[%s8543_s11 + $0x6cc] ss:$24 sm:$0xf]  }
 0x22e   : > { %v2602_v26 = vpop.permute.xlu0 %2601   ;;  %7417 = vst.msk [vmem:[%s8845_s16 + $0x20] sm:$0xff] %vm2625_vm4, %v2634_v3   ;;  %v7617_v37 = vld [vmem:[%s8543_s11 + $0xe55] ss:$24 sm:$0xf0]  }
 0x22f   : > { %7409 = vst.msk [vmem:[%s8845_s16 + $0x218] sm:$0xff] %vm1834_vm3, %v2602_v26   ;;  %3271 = vrot.lane.b32.xlu1 %v3270_v58, %s8515_s18  ;;  %v3369_v39 = vsel %vm56_vm0, %v7617_v37, %v7616_v36  ;;  %v7625_v2 = vld [vmem:[%s8543_s11 + $0x1155] ss:$24 sm:$0xf]   ;;  %v3445_v58 = vsel %vm56_vm0, %v7637_v56, %v7636_v54 }
 0x230   : > { %v7626_v9 = vld [vmem:[%s8543_s11 + $0x1155] ss:$24 sm:$0xf0]   ;;  %v7649_v6 = vld [vmem:[%s8543_s11 + $0x6cc] ss:$24 sm:$0xf0]  }
 0x231   : > { %3260 = vrot.lane.b32.xlu0 %v3259_v14, %s8515_s18  ;;  %v2656_v0 = vpop.permute.xlu1 %2655   ;;  %v7622_v41 = vld [vmem:[%s8543_s11 + $0x108d] ss:$24 sm:$0xf]   ;;  %v3402_v43 = vsel %vm56_vm0, %v7626_v9, %v7625_v2  ;;  %v3434_v14 = vsel %vm56_vm0, %v7634_v57, %v7633_v46  ;;  %v7645_v7 = vld [vmem:[%s8543_s11 + $0x604] ss:$24 sm:$0xf]  }
 0x232   : > { %v2624_v60 = vpop.permute.xlu0 %2623   ;;  %7423 = vst.msk [vmem:[%s8845_s16 + $0x60] sm:$0xff] %vm2625_vm4, %v2656_v0   ;;  %v7623_v42 = vld [vmem:[%s8543_s11 + $0x108d] ss:$24 sm:$0xf0]  }
 0x233   : > { %2626 = vst.msk [vmem:[%s8845_s16] sm:$0xff] %vm2625_vm4, %v2624_v60   ;;  %3293 = vrot.lane.b32.xlu1 %v3292_v49, %s8515_s18  ;;  %v3391_v35 = vsel %vm56_vm0, %v7623_v42, %v7622_v41  ;;  %v3467_v49 = vsel %vm56_vm0, %v7643_v55, %v7642_v40  ;;  %v7646_v10 = vld [vmem:[%s8543_s11 + $0x604] ss:$24 sm:$0xf0]  }
 0x234   : > { %v7654_v15 = vld [vmem:[%s8543_s11 + $0x904] ss:$24 sm:$0xf]  }
 0x235   : > { %3282 = vrot.lane.b32.xlu0 %v3281_v4, %s8515_s18  ;;  %v2678_v11 = vpop.permute.xlu1 %2677   ;;  %v3456_v4 = vsel %vm56_vm0, %v7640_v19, %v7639_v62  ;;  %v7655_v28 = vld [vmem:[%s8543_s11 + $0x904] ss:$24 sm:$0xf0]  }
 0x236   : > { %v2645_v8 = vpop.permute.xlu0 %2644   ;;  %7429 = vst.msk [vmem:[%s8845_s16 + $0xa0] sm:$0xff] %vm2625_vm4, %v2678_v11   ;;  %v7651_v18 = vld [vmem:[%s8543_s11 + $0x794] ss:$24 sm:$0xf]  }
 0x237   : > { %7420 = vst.msk [vmem:[%s8845_s16 + $0x40] sm:$0xff] %vm2625_vm4, %v2645_v8   ;;  %3315 = vrot.lane.b32.xlu1 %v3314_v25, %s8515_s18  ;;  %v3489_v25 = vsel %vm56_vm0, %v7649_v6, %v7648_v5  ;;  %v7652_v1 = vld [vmem:[%s8543_s11 + $0x794] ss:$24 sm:$0xf0]  }
 0x238   : > { %v7660_v21 = vld [vmem:[%s8543_s11 + $0xa94] ss:$24 sm:$0xf]  }
 0x239   : > { %3304 = vrot.lane.b32.xlu0 %v3303_v23, %s8515_s18  ;;  %v2700_v20 = vpop.permute.xlu1 %2699   ;;  %v3478_v23 = vsel %vm56_vm0, %v7646_v10, %v7645_v7  ;;  %v7661_v22 = vld [vmem:[%s8543_s11 + $0xa94] ss:$24 sm:$0xf0]  }
 0x23a   : > { %v2667_v63 = vpop.permute.xlu0 %2666   ;;  %7435 = vst.msk [vmem:[%s8845_s16 + $0xe0] sm:$0xff] %vm2625_vm4, %v2700_v20   ;;  %v7657_v30 = vld [vmem:[%s8543_s11 + $0x9cc] ss:$24 sm:$0xf]  }
 0x23b   : > { %7426 = vst.msk [vmem:[%s8845_s16 + $0x80] sm:$0xff] %vm2625_vm4, %v2667_v63   ;;  %3337 = vrot.lane.b32.xlu1 %v3336_v17, %s8515_s18  ;;  %v3511_v17 = vsel %vm56_vm0, %v7655_v28, %v7654_v15  ;;  %v7658_v61 = vld [vmem:[%s8543_s11 + $0x9cc] ss:$24 sm:$0xf0]  }
 0x23c   : > { %v7666_v33 = vld [vmem:[%s8543_s11 + $0xccc] ss:$24 sm:$0xf]  }
 0x23d   : > { %3326 = vrot.lane.b32.xlu0 %v3325_v59, %s8515_s18  ;;  %v2722_v29 = vpop.permute.xlu1 %2721   ;;  %v3500_v59 = vsel %vm56_vm0, %v7652_v1, %v7651_v18  ;;  %v7667_v34 = vld [vmem:[%s8543_s11 + $0xccc] ss:$24 sm:$0xf0]  }
 0x23e   : > { %v2689_v24 = vpop.permute.xlu0 %2688   ;;  %7441 = vst.msk [vmem:[%s8845_s16 + $0x120] sm:$0xff] %vm2625_vm4, %v2722_v29   ;;  %v7663_v36 = vld [vmem:[%s8543_s11 + $0xc04] ss:$24 sm:$0xf]  }
 0x23f   : > { %7432 = vst.msk [vmem:[%s8845_s16 + $0xc0] sm:$0xff] %vm2625_vm4, %v2689_v24   ;;  %3359 = vrot.lane.b32.xlu1 %v3358_v27, %s8515_s18  ;;  %v3533_v27 = vsel %vm56_vm0, %v7661_v22, %v7660_v21  ;;  %v7664_v37 = vld [vmem:[%s8543_s11 + $0xc04] ss:$24 sm:$0xf0]  }
 0x240   : > { %v7672_v2 = vld [vmem:[%s8543_s11 + $0xf04] ss:$24 sm:$0xf]  }
 0x241   : > { %3348 = vrot.lane.b32.xlu0 %v3347_v32, %s8515_s18  ;;  %v2744_v38 = vpop.permute.xlu1 %2743   ;;  %v3522_v32 = vsel %vm56_vm0, %v7658_v61, %v7657_v30  ;;  %v7673_v9 = vld [vmem:[%s8543_s11 + $0xf04] ss:$24 sm:$0xf0]  }
 0x242   : > { %v2711_v12 = vpop.permute.xlu0 %2710   ;;  %7447 = vst.msk [vmem:[%s8845_s16 + $0x160] sm:$0xff] %vm2625_vm4, %v2744_v38   ;;  %v7669_v41 = vld [vmem:[%s8543_s11 + $0xd94] ss:$24 sm:$0xf]  }
 0x243   : > { %7438 = vst.msk [vmem:[%s8845_s16 + $0x100] sm:$0xff] %vm2625_vm4, %v2711_v12   ;;  %3381 = vrot.lane.b32.xlu1 %v3380_v13, %s8515_s18  ;;  %v3555_v13 = vsel %vm56_vm0, %v7667_v34, %v7666_v33  ;;  %v7670_v42 = vld [vmem:[%s8543_s11 + $0xd94] ss:$24 sm:$0xf0]  }
 0x244   : > { %v7678_v47 = vld [vmem:[%s8543_s11 + $0x1094] ss:$24 sm:$0xf]  }
 0x245   : > { %3370 = vrot.lane.b32.xlu0 %v3369_v39, %s8515_s18  ;;  %v2766_v45 = vpop.permute.xlu1 %2765   ;;  %v3544_v39 = vsel %vm56_vm0, %v7664_v37, %v7663_v36  ;;  %v7679_v48 = vld [vmem:[%s8543_s11 + $0x1094] ss:$24 sm:$0xf0]  }
 0x246   : > { %v2733_v51 = vpop.permute.xlu0 %2732   ;;  %7453 = vst.msk [vmem:[%s8845_s16 + $0x1a0] sm:$0xff] %vm2625_vm4, %v2766_v45   ;;  %v7675_v50 = vld [vmem:[%s8543_s11 + $0xfcc] ss:$24 sm:$0xf]  }
 0x247   : > { %7444 = vst.msk [vmem:[%s8845_s16 + $0x140] sm:$0xff] %vm2625_vm4, %v2733_v51   ;;  %3403 = vrot.lane.b32.xlu1 %v3402_v43, %s8515_s18  ;;  %v3577_v43 = vsel %vm56_vm0, %v7673_v9, %v7672_v2  ;;  %v7676_v44 = vld [vmem:[%s8543_s11 + $0xfcc] ss:$24 sm:$0xf0]  }
 0x248   : > { %v7684_v54 = vld [vmem:[%s8543_s11 + $0xd4] ss:$24 sm:$0xf]  }
 0x249   : > { %3392 = vrot.lane.b32.xlu0 %v3391_v35, %s8515_s18  ;;  %v2788_v53 = vpop.permute.xlu1 %2787   ;;  %v3566_v35 = vsel %vm56_vm0, %v7670_v42, %v7669_v41  ;;  %v7685_v56 = vld [vmem:[%s8543_s11 + $0xd4] ss:$24 sm:$0xf0]  }
 0x24a   : > { %v2755_v16 = vpop.permute.xlu0 %2754   ;;  %7459 = vst.msk [vmem:[%s8845_s16 + $0x1e0] sm:$0xff] %vm2625_vm4, %v2788_v53   ;;  %v7681_v46 = vld [vmem:[%s8543_s11 + $0xc] ss:$24 sm:$0xf]  }
 0x24b   : > { %7450 = vst.msk [vmem:[%s8845_s16 + $0x180] sm:$0xff] %vm2625_vm4, %v2755_v16   ;;  %3424 = vrot.lane.b32.xlu1 %v3423_v52, %s8516_s19  ;;  %v3599_v52 = vsel %vm56_vm0, %v7679_v48, %v7678_v47  ;;  %v7682_v57 = vld [vmem:[%s8543_s11 + $0xc] ss:$24 sm:$0xf0]  }
 0x24c   : > { %v7690_v40 = vld [vmem:[%s8543_s11 + $0x30c] ss:$24 sm:$0xf]  }
 0x24d   : > { %3414 = vrot.lane.b32.xlu0 %v3413_v31, %s8516_s19  ;;  %v2810_v3 = vpop.permute.xlu1 %2809   ;;  %v3588_v31 = vsel %vm56_vm0, %v7676_v44, %v7675_v50  ;;  %v7691_v55 = vld [vmem:[%s8543_s11 + $0x30c] ss:$24 sm:$0xf0]  }
 0x24e   : > { %v2777_v26 = vpop.permute.xlu0 %2776   ;;  %7465 = vst.msk [vmem:[%s8845_s16 + $0x220] sm:$0xff] %vm2625_vm4, %v2810_v3   ;;  %v7687_v62 = vld [vmem:[%s8543_s11 + $0x244] ss:$24 sm:$0xf]  }
 0x24f   : > { %7456 = vst.msk [vmem:[%s8845_s16 + $0x1c0] sm:$0xff] %vm2625_vm4, %v2777_v26   ;;  %3446 = vrot.lane.b32.xlu1 %v3445_v58, %s8516_s19  ;;  %v3621_v58 = vsel %vm56_vm0, %v7685_v56, %v7684_v54  ;;  %v7688_v19 = vld [vmem:[%s8543_s11 + $0x244] ss:$24 sm:$0xf0]  }
 0x250   : > { %v7696_v5 = vld [vmem:[%s8543_s11 + $0x544] ss:$24 sm:$0xf]  }
 0x251   : > { %3435 = vrot.lane.b32.xlu0 %v3434_v14, %s8516_s19  ;;  %v2832_v0 = vpop.permute.xlu1 %2831   ;;  %v3610_v14 = vsel %vm56_vm0, %v7682_v57, %v7681_v46  ;;  %v7697_v6 = vld [vmem:[%s8543_s11 + $0x544] ss:$24 sm:$0xf0]  }
 0x252   : > { %v2799_v60 = vpop.permute.xlu0 %2798   ;;  %7471 = vst.msk [vmem:[%s8845_s16 + $0x28] sm:$0xff] %vm2625_vm4, %v2832_v0   ;;  %v7693_v7 = vld [vmem:[%s8543_s11 + $0x3d4] ss:$24 sm:$0xf]  }
 0x253   : > { %7462 = vst.msk [vmem:[%s8845_s16 + $0x200] sm:$0xff] %vm2625_vm4, %v2799_v60   ;;  %3468 = vrot.lane.b32.xlu1 %v3467_v49, %s8516_s19  ;;  %v3643_v49 = vsel %vm56_vm0, %v7691_v55, %v7690_v40  ;;  %v7694_v10 = vld [vmem:[%s8543_s11 + $0x3d4] ss:$24 sm:$0xf0]  }
 0x254   : > { %v7702_v15 = vld [vmem:[%s8543_s11 + $0x6d4] ss:$24 sm:$0xf]  }
 0x255   : > { %3457 = vrot.lane.b32.xlu0 %v3456_v4, %s8516_s19  ;;  %v2854_v11 = vpop.permute.xlu1 %2853   ;;  %v3632_v4 = vsel %vm56_vm0, %v7688_v19, %v7687_v62  ;;  %v7703_v28 = vld [vmem:[%s8543_s11 + $0x6d4] ss:$24 sm:$0xf0]  }
 0x256   : > { %v2821_v8 = vpop.permute.xlu0 %2820   ;;  %7477 = vst.msk [vmem:[%s8845_s16 + $0x68] sm:$0xff] %vm2625_vm4, %v2854_v11   ;;  %v7699_v18 = vld [vmem:[%s8543_s11 + $0x60c] ss:$24 sm:$0xf]  }
 0x257   : > { %7468 = vst.msk [vmem:[%s8845_s16 + $0x8] sm:$0xff] %vm2625_vm4, %v2821_v8   ;;  %3490 = vrot.lane.b32.xlu1 %v3489_v25, %s8516_s19  ;;  %v3665_v25 = vsel %vm56_vm0, %v7697_v6, %v7696_v5  ;;  %v7700_v1 = vld [vmem:[%s8543_s11 + $0x60c] ss:$24 sm:$0xf0]  }
 0x258   : > { %v7708_v21 = vld [vmem:[%s8543_s11 + $0x90c] ss:$24 sm:$0xf]  }
 0x259   : > { %3479 = vrot.lane.b32.xlu0 %v3478_v23, %s8516_s19  ;;  %v2876_v20 = vpop.permute.xlu1 %2875   ;;  %v3654_v23 = vsel %vm56_vm0, %v7694_v10, %v7693_v7  ;;  %v7709_v22 = vld [vmem:[%s8543_s11 + $0x90c] ss:$24 sm:$0xf0]  }
 0x25a   : > { %v2843_v63 = vpop.permute.xlu0 %2842   ;;  %7483 = vst.msk [vmem:[%s8845_s16 + $0xa8] sm:$0xff] %vm2625_vm4, %v2876_v20   ;;  %v7705_v30 = vld [vmem:[%s8543_s11 + $0x844] ss:$24 sm:$0xf]  }
 0x25b   : > { %7474 = vst.msk [vmem:[%s8845_s16 + $0x48] sm:$0xff] %vm2625_vm4, %v2843_v63   ;;  %3512 = vrot.lane.b32.xlu1 %v3511_v17, %s8516_s19  ;;  %v3687_v17 = vsel %vm56_vm0, %v7703_v28, %v7702_v15  ;;  %v7706_v61 = vld [vmem:[%s8543_s11 + $0x844] ss:$24 sm:$0xf0]  }
 0x25c   : > { %v7714_v33 = vld [vmem:[%s8543_s11 + $0xb44] ss:$24 sm:$0xf]  }
 0x25d   : > { %3501 = vrot.lane.b32.xlu0 %v3500_v59, %s8516_s19  ;;  %v2898_v29 = vpop.permute.xlu1 %2897   ;;  %v3676_v59 = vsel %vm56_vm0, %v7700_v1, %v7699_v18  ;;  %v7715_v34 = vld [vmem:[%s8543_s11 + $0xb44] ss:$24 sm:$0xf0]  }
 0x25e   : > { %v2865_v24 = vpop.permute.xlu0 %2864   ;;  %7489 = vst.msk [vmem:[%s8845_s16 + $0xe8] sm:$0xff] %vm2625_vm4, %v2898_v29   ;;  %v7711_v36 = vld [vmem:[%s8543_s11 + $0x9d4] ss:$24 sm:$0xf]  }
 0x25f   : > { %7480 = vst.msk [vmem:[%s8845_s16 + $0x88] sm:$0xff] %vm2625_vm4, %v2865_v24   ;;  %3534 = vrot.lane.b32.xlu1 %v3533_v27, %s8516_s19  ;;  %v3709_v27 = vsel %vm56_vm0, %v7709_v22, %v7708_v21  ;;  %v7712_v37 = vld [vmem:[%s8543_s11 + $0x9d4] ss:$24 sm:$0xf0]  }
 0x260   : > { %v7720_v2 = vld [vmem:[%s8543_s11 + $0xcd4] ss:$24 sm:$0xf]  }
 0x261   : > { %3523 = vrot.lane.b32.xlu0 %v3522_v32, %s8516_s19  ;;  %v2920_v38 = vpop.permute.xlu1 %2919   ;;  %v3698_v32 = vsel %vm56_vm0, %v7706_v61, %v7705_v30  ;;  %v7721_v9 = vld [vmem:[%s8543_s11 + $0xcd4] ss:$24 sm:$0xf0]  }
 0x262   : > { %v2887_v12 = vpop.permute.xlu0 %2886   ;;  %7495 = vst.msk [vmem:[%s8845_s16 + $0x128] sm:$0xff] %vm2625_vm4, %v2920_v38   ;;  %v7717_v41 = vld [vmem:[%s8543_s11 + $0xc0c] ss:$24 sm:$0xf]  }
 0x263   : > { %7486 = vst.msk [vmem:[%s8845_s16 + $0xc8] sm:$0xff] %vm2625_vm4, %v2887_v12   ;;  %3556 = vrot.lane.b32.xlu1 %v3555_v13, %s8516_s19  ;;  %v3731_v13 = vsel %vm56_vm0, %v7715_v34, %v7714_v33  ;;  %v7718_v42 = vld [vmem:[%s8543_s11 + $0xc0c] ss:$24 sm:$0xf0]  }
 0x264   : > { %v7726_v47 = vld [vmem:[%s8543_s11 + $0xf0c] ss:$24 sm:$0xf]  }
 0x265   : > { %3545 = vrot.lane.b32.xlu0 %v3544_v39, %s8516_s19  ;;  %v2942_v45 = vpop.permute.xlu1 %2941   ;;  %v3720_v39 = vsel %vm56_vm0, %v7712_v37, %v7711_v36  ;;  %v7727_v48 = vld [vmem:[%s8543_s11 + $0xf0c] ss:$24 sm:$0xf0]  }
 0x266   : > { %v2909_v51 = vpop.permute.xlu0 %2908   ;;  %7501 = vst.msk [vmem:[%s8845_s16 + $0x168] sm:$0xff] %vm2625_vm4, %v2942_v45   ;;  %v7723_v50 = vld [vmem:[%s8543_s11 + $0xe44] ss:$24 sm:$0xf]  }
 0x267   : > { %7492 = vst.msk [vmem:[%s8845_s16 + $0x108] sm:$0xff] %vm2625_vm4, %v2909_v51   ;;  %3578 = vrot.lane.b32.xlu1 %v3577_v43, %s8516_s19  ;;  %v3753_v43 = vsel %vm56_vm0, %v7721_v9, %v7720_v2  ;;  %v7724_v44 = vld [vmem:[%s8543_s11 + $0xe44] ss:$24 sm:$0xf0]  }
 0x268   : > { %v7732_v54 = vld [vmem:[%s8543_s11 + $0x1144] ss:$24 sm:$0xf]  }
 0x269   : > { %3567 = vrot.lane.b32.xlu0 %v3566_v35, %s8516_s19  ;;  %v2964_v53 = vpop.permute.xlu1 %2963   ;;  %v3742_v35 = vsel %vm56_vm0, %v7718_v42, %v7717_v41  ;;  %v7733_v56 = vld [vmem:[%s8543_s11 + $0x1144] ss:$24 sm:$0xf0]  }
 0x26a   : > { %v2931_v16 = vpop.permute.xlu0 %2930   ;;  %7507 = vst.msk [vmem:[%s8845_s16 + $0x1a8] sm:$0xff] %vm2625_vm4, %v2964_v53   ;;  %v7729_v46 = vld [vmem:[%s8543_s11 + $0xfd4] ss:$24 sm:$0xf]  }
 0x26b   : > { %7498 = vst.msk [vmem:[%s8845_s16 + $0x148] sm:$0xff] %vm2625_vm4, %v2931_v16   ;;  %3600 = vrot.lane.b32.xlu1 %v3599_v52, %s8516_s19  ;;  %v3775_v52 = vsel %vm56_vm0, %v7727_v48, %v7726_v47  ;;  %v7730_v57 = vld [vmem:[%s8543_s11 + $0xfd4] ss:$24 sm:$0xf0]  }
 0x26c   : > { %v7738_v40 = vld [vmem:[%s8543_s11 + $0x184] ss:$24 sm:$0xf]  }
 0x26d   : > { %3589 = vrot.lane.b32.xlu0 %v3588_v31, %s8516_s19  ;;  %v2986_v3 = vpop.permute.xlu1 %2985   ;;  %v3764_v31 = vsel %vm56_vm0, %v7724_v44, %v7723_v50  ;;  %v7739_v55 = vld [vmem:[%s8543_s11 + $0x184] ss:$24 sm:$0xf0]  }
 0x26e   : > { %v2953_v26 = vpop.permute.xlu0 %2952   ;;  %7513 = vst.msk [vmem:[%s8845_s16 + $0x1e8] sm:$0xff] %vm2625_vm4, %v2986_v3   ;;  %v7735_v62 = vld [vmem:[%s8543_s11 + $0x14] ss:$24 sm:$0xf]  }
 0x26f   : > { %7504 = vst.msk [vmem:[%s8845_s16 + $0x188] sm:$0xff] %vm2625_vm4, %v2953_v26   ;;  %3622 = vrot.lane.b32.xlu1 %v3621_v58, %s8516_s19  ;;  %v3797_v58 = vsel %vm56_vm0, %v7733_v56, %v7732_v54  ;;  %v7736_v19 = vld [vmem:[%s8543_s11 + $0x14] ss:$24 sm:$0xf0]  }
 0x270   : > { %v7744_v5 = vld [vmem:[%s8543_s11 + $0x314] ss:$24 sm:$0xf]  }
 0x271   : > { %3611 = vrot.lane.b32.xlu0 %v3610_v14, %s8516_s19  ;;  %v3008_v0 = vpop.permute.xlu1 %3007   ;;  %v3786_v14 = vsel %vm56_vm0, %v7730_v57, %v7729_v46  ;;  %v7745_v6 = vld [vmem:[%s8543_s11 + $0x314] ss:$24 sm:$0xf0]  }
 0x272   : > { %v2975_v60 = vpop.permute.xlu0 %2974   ;;  %7519 = vst.msk [vmem:[%s8845_s16 + $0x228] sm:$0xff] %vm2625_vm4, %v3008_v0   ;;  %v7741_v7 = vld [vmem:[%s8543_s11 + $0x24c] ss:$24 sm:$0xf]  }
 0x273   : > { %7510 = vst.msk [vmem:[%s8845_s16 + $0x1c8] sm:$0xff] %vm2625_vm4, %v2975_v60   ;;  %3644 = vrot.lane.b32.xlu1 %v3643_v49, %s8516_s19  ;;  %v3819_v49 = vsel %vm56_vm0, %v7739_v55, %v7738_v40  ;;  %v7742_v10 = vld [vmem:[%s8543_s11 + $0x24c] ss:$24 sm:$0xf0]  }
 0x274   : > { %v7750_v15 = vld [vmem:[%s8543_s11 + $0x54c] ss:$24 sm:$0xf]  }
 0x275   : > { %3633 = vrot.lane.b32.xlu0 %v3632_v4, %s8516_s19  ;;  %v3030_v11 = vpop.permute.xlu1 %3029   ;;  %v3808_v4 = vsel %vm56_vm0, %v7736_v19, %v7735_v62  ;;  %v7751_v28 = vld [vmem:[%s8543_s11 + $0x54c] ss:$24 sm:$0xf0]  }
 0x276   : > { %v2997_v8 = vpop.permute.xlu0 %2996   ;;  %7525 = vst.msk [vmem:[%s8845_s16 + $0x30] sm:$0xff] %vm2625_vm4, %v3030_v11   ;;  %v7747_v18 = vld [vmem:[%s8543_s11 + $0x484] ss:$24 sm:$0xf]  }
 0x277   : > { %7516 = vst.msk [vmem:[%s8845_s16 + $0x208] sm:$0xff] %vm2625_vm4, %v2997_v8   ;;  %3666 = vrot.lane.b32.xlu1 %v3665_v25, %s8516_s19  ;;  %v3841_v25 = vsel %vm56_vm0, %v7745_v6, %v7744_v5  ;;  %v7748_v1 = vld [vmem:[%s8543_s11 + $0x484] ss:$24 sm:$0xf0]  }
 0x278   : > { %v7756_v21 = vld [vmem:[%s8543_s11 + $0x784] ss:$24 sm:$0xf]  }
 0x279   : > { %3655 = vrot.lane.b32.xlu0 %v3654_v23, %s8516_s19  ;;  %v3052_v20 = vpop.permute.xlu1 %3051   ;;  %v3830_v23 = vsel %vm56_vm0, %v7742_v10, %v7741_v7  ;;  %v7757_v22 = vld [vmem:[%s8543_s11 + $0x784] ss:$24 sm:$0xf0]  }
 0x27a   : > { %v3019_v63 = vpop.permute.xlu0 %3018   ;;  %7531 = vst.msk [vmem:[%s8845_s16 + $0x70] sm:$0xff] %vm2625_vm4, %v3052_v20   ;;  %v7753_v30 = vld [vmem:[%s8543_s11 + $0x614] ss:$24 sm:$0xf]  }
 0x27b   : > { %7522 = vst.msk [vmem:[%s8845_s16 + $0x10] sm:$0xff] %vm2625_vm4, %v3019_v63   ;;  %3688 = vrot.lane.b32.xlu1 %v3687_v17, %s8516_s19  ;;  %v3863_v17 = vsel %vm56_vm0, %v7751_v28, %v7750_v15  ;;  %v7754_v61 = vld [vmem:[%s8543_s11 + $0x614] ss:$24 sm:$0xf0]  }
 0x27c   : > { %v7762_v33 = vld [vmem:[%s8543_s11 + $0x914] ss:$24 sm:$0xf]  }
 0x27d   : > { %3677 = vrot.lane.b32.xlu0 %v3676_v59, %s8516_s19  ;;  %v3074_v29 = vpop.permute.xlu1 %3073   ;;  %v3852_v59 = vsel %vm56_vm0, %v7748_v1, %v7747_v18  ;;  %v7763_v34 = vld [vmem:[%s8543_s11 + $0x914] ss:$24 sm:$0xf0]  }
 0x27e   : > { %v3041_v24 = vpop.permute.xlu0 %3040   ;;  %7537 = vst.msk [vmem:[%s8845_s16 + $0xb0] sm:$0xff] %vm2625_vm4, %v3074_v29   ;;  %v7759_v36 = vld [vmem:[%s8543_s11 + $0x84c] ss:$24 sm:$0xf]  }
 0x27f   : > { %7528 = vst.msk [vmem:[%s8845_s16 + $0x50] sm:$0xff] %vm2625_vm4, %v3041_v24   ;;  %3710 = vrot.lane.b32.xlu1 %v3709_v27, %s8516_s19  ;;  %v3885_v27 = vsel %vm56_vm0, %v7757_v22, %v7756_v21  ;;  %v7760_v37 = vld [vmem:[%s8543_s11 + $0x84c] ss:$24 sm:$0xf0]  }
 0x280   : > { %v7768_v2 = vld [vmem:[%s8543_s11 + $0xb4c] ss:$24 sm:$0xf]  }
 0x281   : > { %3699 = vrot.lane.b32.xlu0 %v3698_v32, %s8516_s19  ;;  %v3096_v38 = vpop.permute.xlu1 %3095   ;;  %v3874_v32 = vsel %vm56_vm0, %v7754_v61, %v7753_v30  ;;  %v7769_v9 = vld [vmem:[%s8543_s11 + $0xb4c] ss:$24 sm:$0xf0]  }
 0x282   : > { %v3063_v12 = vpop.permute.xlu0 %3062   ;;  %7543 = vst.msk [vmem:[%s8845_s16 + $0xf0] sm:$0xff] %vm2625_vm4, %v3096_v38   ;;  %v7765_v41 = vld [vmem:[%s8543_s11 + $0xa84] ss:$24 sm:$0xf]  }
 0x283   : > { %7534 = vst.msk [vmem:[%s8845_s16 + $0x90] sm:$0xff] %vm2625_vm4, %v3063_v12   ;;  %3732 = vrot.lane.b32.xlu1 %v3731_v13, %s8516_s19  ;;  %v3907_v13 = vsel %vm56_vm0, %v7763_v34, %v7762_v33  ;;  %v7766_v42 = vld [vmem:[%s8543_s11 + $0xa84] ss:$24 sm:$0xf0]  }
 0x284   : > { %v7774_v47 = vld [vmem:[%s8543_s11 + $0xd84] ss:$24 sm:$0xf]  }
 0x285   : > { %3721 = vrot.lane.b32.xlu0 %v3720_v39, %s8516_s19  ;;  %v3118_v45 = vpop.permute.xlu1 %3117   ;;  %v3896_v39 = vsel %vm56_vm0, %v7760_v37, %v7759_v36  ;;  %v7775_v48 = vld [vmem:[%s8543_s11 + $0xd84] ss:$24 sm:$0xf0]  }
 0x286   : > { %v3085_v51 = vpop.permute.xlu0 %3084   ;;  %7549 = vst.msk [vmem:[%s8845_s16 + $0x130] sm:$0xff] %vm2625_vm4, %v3118_v45   ;;  %v7771_v50 = vld [vmem:[%s8543_s11 + $0xc14] ss:$24 sm:$0xf]  }
 0x287   : > { %7540 = vst.msk [vmem:[%s8845_s16 + $0xd0] sm:$0xff] %vm2625_vm4, %v3085_v51   ;;  %3754 = vrot.lane.b32.xlu1 %v3753_v43, %s8516_s19  ;;  %v3929_v43 = vsel %vm56_vm0, %v7769_v9, %v7768_v2  ;;  %v7772_v44 = vld [vmem:[%s8543_s11 + $0xc14] ss:$24 sm:$0xf0]  }
 0x288   : > { %v7780_v54 = vld [vmem:[%s8543_s11 + $0xf14] ss:$24 sm:$0xf]  }
 0x289   : > { %3743 = vrot.lane.b32.xlu0 %v3742_v35, %s8516_s19  ;;  %v3140_v53 = vpop.permute.xlu1 %3139   ;;  %v3918_v35 = vsel %vm56_vm0, %v7766_v42, %v7765_v41  ;;  %v7781_v56 = vld [vmem:[%s8543_s11 + $0xf14] ss:$24 sm:$0xf0]  }
 0x28a   : > { %v3107_v16 = vpop.permute.xlu0 %3106   ;;  %7555 = vst.msk [vmem:[%s8845_s16 + $0x170] sm:$0xff] %vm2625_vm4, %v3140_v53   ;;  %v7777_v46 = vld [vmem:[%s8543_s11 + $0xe4c] ss:$24 sm:$0xf]  }
 0x28b   : > { %7546 = vst.msk [vmem:[%s8845_s16 + $0x110] sm:$0xff] %vm2625_vm4, %v3107_v16   ;;  %3776 = vrot.lane.b32.xlu1 %v3775_v52, %s8516_s19  ;;  %v3951_v52 = vsel %vm56_vm0, %v7775_v48, %v7774_v47  ;;  %v7778_v57 = vld [vmem:[%s8543_s11 + $0xe4c] ss:$24 sm:$0xf0]  }
 0x28c   : > { %v7786_v40 = vld [vmem:[%s8543_s11 + $0x114c] ss:$24 sm:$0xf]  }
 0x28d   : > { %3765 = vrot.lane.b32.xlu0 %v3764_v31, %s8516_s19  ;;  %v3162_v3 = vpop.permute.xlu1 %3161   ;;  %v3940_v31 = vsel %vm56_vm0, %v7772_v44, %v7771_v50  ;;  %v7787_v55 = vld [vmem:[%s8543_s11 + $0x114c] ss:$24 sm:$0xf0]  }
 0x28e   : > { %v3129_v26 = vpop.permute.xlu0 %3128   ;;  %7561 = vst.msk [vmem:[%s8845_s16 + $0x1b0] sm:$0xff] %vm2625_vm4, %v3162_v3   ;;  %v7783_v62 = vld [vmem:[%s8543_s11 + $0x1084] ss:$24 sm:$0xf]  }
 0x28f   : > { %7552 = vst.msk [vmem:[%s8845_s16 + $0x150] sm:$0xff] %vm2625_vm4, %v3129_v26   ;;  %3798 = vrot.lane.b32.xlu1 %v3797_v58, %s8516_s19  ;;  %v3973_v58 = vsel %vm56_vm0, %v7781_v56, %v7780_v54  ;;  %v7784_v19 = vld [vmem:[%s8543_s11 + $0x1084] ss:$24 sm:$0xf0]  }
 0x290   : > { %v7792_v5 = vld [vmem:[%s8543_s11 + $0x18c] ss:$24 sm:$0xf]  }
 0x291   : > { %3787 = vrot.lane.b32.xlu0 %v3786_v14, %s8516_s19  ;;  %v3184_v0 = vpop.permute.xlu1 %3183   ;;  %v3962_v14 = vsel %vm56_vm0, %v7778_v57, %v7777_v46  ;;  %v7793_v6 = vld [vmem:[%s8543_s11 + $0x18c] ss:$24 sm:$0xf0]  }
 0x292   : > { %v3151_v60 = vpop.permute.xlu0 %3150   ;;  %7567 = vst.msk [vmem:[%s8845_s16 + $0x1f0] sm:$0xff] %vm2625_vm4, %v3184_v0   ;;  %v7789_v7 = vld [vmem:[%s8543_s11 + $0xc4] ss:$24 sm:$0xf]  }
 0x293   : > { %7558 = vst.msk [vmem:[%s8845_s16 + $0x190] sm:$0xff] %vm2625_vm4, %v3151_v60   ;;  %3820 = vrot.lane.b32.xlu1 %v3819_v49, %s8516_s19  ;;  %v3995_v49 = vsel %vm56_vm0, %v7787_v55, %v7786_v40  ;;  %v7790_v10 = vld [vmem:[%s8543_s11 + $0xc4] ss:$24 sm:$0xf0]  }
 0x294   : > { %v7798_v15 = vld [vmem:[%s8543_s11 + $0x3c4] ss:$24 sm:$0xf]  }
 0x295   : > { %3809 = vrot.lane.b32.xlu0 %v3808_v4, %s8516_s19  ;;  %v3206_v11 = vpop.permute.xlu1 %3205   ;;  %v3984_v4 = vsel %vm56_vm0, %v7784_v19, %v7783_v62  ;;  %v7799_v28 = vld [vmem:[%s8543_s11 + $0x3c4] ss:$24 sm:$0xf0]  }
 0x296   : > { %v3173_v8 = vpop.permute.xlu0 %3172   ;;  %7573 = vst.msk [vmem:[%s8845_s16 + $0x230] sm:$0xff] %vm2625_vm4, %v3206_v11   ;;  %v7795_v18 = vld [vmem:[%s8543_s11 + $0x254] ss:$24 sm:$0xf]  }
 0x297   : > { %7564 = vst.msk [vmem:[%s8845_s16 + $0x1d0] sm:$0xff] %vm2625_vm4, %v3173_v8   ;;  %3842 = vrot.lane.b32.xlu1 %v3841_v25, %s8516_s19  ;;  %v4017_v25 = vsel %vm56_vm0, %v7793_v6, %v7792_v5  ;;  %v7796_v1 = vld [vmem:[%s8543_s11 + $0x254] ss:$24 sm:$0xf0]  }
 0x298   : > { %v7804_v21 = vld [vmem:[%s8543_s11 + $0x554] ss:$24 sm:$0xf]  }
 0x299   : > { %3831 = vrot.lane.b32.xlu0 %v3830_v23, %s8516_s19  ;;  %v3228_v20 = vpop.permute.xlu1 %3227   ;;  %v4006_v23 = vsel %vm56_vm0, %v7790_v10, %v7789_v7  ;;  %v7805_v22 = vld [vmem:[%s8543_s11 + $0x554] ss:$24 sm:$0xf0]  }
 0x29a   : > { %v3195_v63 = vpop.permute.xlu0 %3194   ;;  %7579 = vst.msk [vmem:[%s8845_s16 + $0x38] sm:$0xff] %vm2625_vm4, %v3228_v20   ;;  %v7801_v30 = vld [vmem:[%s8543_s11 + $0x48c] ss:$24 sm:$0xf]  }
 0x29b   : > { %7570 = vst.msk [vmem:[%s8845_s16 + $0x210] sm:$0xff] %vm2625_vm4, %v3195_v63   ;;  %3864 = vrot.lane.b32.xlu1 %v3863_v17, %s8516_s19  ;;  %v4039_v17 = vsel %vm56_vm0, %v7799_v28, %v7798_v15  ;;  %v7802_v61 = vld [vmem:[%s8543_s11 + $0x48c] ss:$24 sm:$0xf0]  }
 0x29c   : > { %v7810_v33 = vld [vmem:[%s8543_s11 + $0x78c] ss:$24 sm:$0xf]   ;;  %v7845_v15 = vld [vmem:[%s8543_s11 + $0xcb] ss:$24 sm:$0xf]  }
 0x29d   : > { %3853 = vrot.lane.b32.xlu0 %v3852_v59, %s8516_s19  ;;  %v3250_v29 = vpop.permute.xlu1 %3249   ;;  %v4028_v59 = vsel %vm56_vm0, %v7796_v1, %v7795_v18  ;;  %v7811_v34 = vld [vmem:[%s8543_s11 + $0x78c] ss:$24 sm:$0xf0]   ;;  %v7846_v28 = vld [vmem:[%s8543_s11 + $0xcb] ss:$24 sm:$0xf0]  }
 0x29e   : > { %v3217_v24 = vpop.permute.xlu0 %3216   ;;  %7585 = vst.msk [vmem:[%s8845_s16 + $0x78] sm:$0xff] %vm2625_vm4, %v3250_v29   ;;  %v7807_v36 = vld [vmem:[%s8543_s11 + $0x6c4] ss:$24 sm:$0xf]  }
 0x29f   : > { %7576 = vst.msk [vmem:[%s8845_s16 + $0x18] sm:$0xff] %vm2625_vm4, %v3217_v24   ;;  %3886 = vrot.lane.b32.xlu1 %v3885_v27, %s8516_s19  ;;  %v4061_v27 = vsel %vm56_vm0, %v7805_v22, %v7804_v21  ;;  %v7808_v37 = vld [vmem:[%s8543_s11 + $0x6c4] ss:$24 sm:$0xf0]  }
 0x2a0   : > { %v7816_v2 = vld [vmem:[%s8543_s11 + $0x9c4] ss:$24 sm:$0xf]   ;;  %v7843_v18 = vld [vmem:[%s8543_s11 + $0x3] ss:$24 sm:$0xf]  }
 0x2a1   : > { %3875 = vrot.lane.b32.xlu0 %v3874_v32, %s8516_s19  ;;  %v3272_v38 = vpop.permute.xlu1 %3271   ;;  %v4050_v32 = vsel %vm56_vm0, %v7802_v61, %v7801_v30  ;;  %v7817_v9 = vld [vmem:[%s8543_s11 + $0x9c4] ss:$24 sm:$0xf0]   ;;  %v7844_v1 = vld [vmem:[%s8543_s11 + $0x3] ss:$24 sm:$0xf0]  }
 0x2a2   : > { %v3239_v12 = vpop.permute.xlu0 %3238   ;;  %7591 = vst.msk [vmem:[%s8845_s16 + $0xb8] sm:$0xff] %vm2625_vm4, %v3272_v38   ;;  %v7813_v41 = vld [vmem:[%s8543_s11 + $0x854] ss:$24 sm:$0xf]  }
 0x2a3   : > { %7582 = vst.msk [vmem:[%s8845_s16 + $0x58] sm:$0xff] %vm2625_vm4, %v3239_v12   ;;  %3908 = vrot.lane.b32.xlu1 %v3907_v13, %s8516_s19  ;;  %v4083_v13 = vsel %vm56_vm0, %v7811_v34, %v7810_v33  ;;  %v7814_v42 = vld [vmem:[%s8543_s11 + $0x854] ss:$24 sm:$0xf0]  }
 0x2a4   : > { %v7822_v47 = vld [vmem:[%s8543_s11 + $0xb54] ss:$24 sm:$0xf]   ;;  %v7851_v21 = vld [vmem:[%s8543_s11 + $0x303] ss:$24 sm:$0xf]  }
 0x2a5   : > { %3897 = vrot.lane.b32.xlu0 %v3896_v39, %s8516_s19  ;;  %v3294_v45 = vpop.permute.xlu1 %3293   ;;  %v4072_v39 = vsel %vm56_vm0, %v7808_v37, %v7807_v36  ;;  %v7823_v48 = vld [vmem:[%s8543_s11 + $0xb54] ss:$24 sm:$0xf0]   ;;  %v7852_v22 = vld [vmem:[%s8543_s11 + $0x303] ss:$24 sm:$0xf0]  }
 0x2a6   : > { %v3261_v51 = vpop.permute.xlu0 %3260   ;;  %7597 = vst.msk [vmem:[%s8845_s16 + $0xf8] sm:$0xff] %vm2625_vm4, %v3294_v45   ;;  %v7819_v50 = vld [vmem:[%s8543_s11 + $0xa8c] ss:$24 sm:$0xf]  }
 0x2a7   : > { %7588 = vst.msk [vmem:[%s8845_s16 + $0x98] sm:$0xff] %vm2625_vm4, %v3261_v51   ;;  %3930 = vrot.lane.b32.xlu1 %v3929_v43, %s8516_s19  ;;  %v4105_v43 = vsel %vm56_vm0, %v7817_v9, %v7816_v2  ;;  %v7820_v44 = vld [vmem:[%s8543_s11 + $0xa8c] ss:$24 sm:$0xf0]  }
 0x2a8   : > { %v7828_v54 = vld [vmem:[%s8543_s11 + $0xd8c] ss:$24 sm:$0xf]   ;;  %v7848_v30 = vld [vmem:[%s8543_s11 + $0x193] ss:$24 sm:$0xf]  }
 0x2a9   : > { %3919 = vrot.lane.b32.xlu0 %v3918_v35, %s8516_s19  ;;  %v3316_v53 = vpop.permute.xlu1 %3315   ;;  %v4094_v35 = vsel %vm56_vm0, %v7814_v42, %v7813_v41  ;;  %v7829_v56 = vld [vmem:[%s8543_s11 + $0xd8c] ss:$24 sm:$0xf0]   ;;  %v7849_v61 = vld [vmem:[%s8543_s11 + $0x193] ss:$24 sm:$0xf0]  }
 0x2aa   : > { %v3283_v16 = vpop.permute.xlu0 %3282   ;;  %7603 = vst.msk [vmem:[%s8845_s16 + $0x138] sm:$0xff] %vm2625_vm4, %v3316_v53   ;;  %v7825_v46 = vld [vmem:[%s8543_s11 + $0xcc4] ss:$24 sm:$0xf]  }
 0x2ab   : > { %7594 = vst.msk [vmem:[%s8845_s16 + $0xd8] sm:$0xff] %vm2625_vm4, %v3283_v16   ;;  %3952 = vrot.lane.b32.xlu1 %v3951_v52, %s8516_s19  ;;  %v4127_v52 = vsel %vm56_vm0, %v7823_v48, %v7822_v47  ;;  %v7826_v57 = vld [vmem:[%s8543_s11 + $0xcc4] ss:$24 sm:$0xf0]  }
 0x2ac   : > { %v7834_v40 = vld [vmem:[%s8543_s11 + $0xfc4] ss:$24 sm:$0xf]   ;;  %v7857_v33 = vld [vmem:[%s8543_s11 + $0x493] ss:$24 sm:$0xf]  }
 0x2ad   : > { %3941 = vrot.lane.b32.xlu0 %v3940_v31, %s8516_s19  ;;  %v3338_v3 = vpop.permute.xlu1 %3337   ;;  %v4116_v31 = vsel %vm56_vm0, %v7820_v44, %v7819_v50  ;;  %v7835_v55 = vld [vmem:[%s8543_s11 + $0xfc4] ss:$24 sm:$0xf0]   ;;  %v7858_v34 = vld [vmem:[%s8543_s11 + $0x493] ss:$24 sm:$0xf0]  }
 0x2ae   : > { %v3305_v26 = vpop.permute.xlu0 %3304   ;;  %7609 = vst.msk [vmem:[%s8845_s16 + $0x178] sm:$0xff] %vm2625_vm4, %v3338_v3   ;;  %v7831_v62 = vld [vmem:[%s8543_s11 + $0xe54] ss:$24 sm:$0xf]  }
 0x2af   : > { %7600 = vst.msk [vmem:[%s8845_s16 + $0x118] sm:$0xff] %vm2625_vm4, %v3305_v26   ;;  %3974 = vrot.lane.b32.xlu1 %v3973_v58, %s8516_s19  ;;  %v4149_v58 = vsel %vm56_vm0, %v7829_v56, %v7828_v54  ;;  %v7832_v19 = vld [vmem:[%s8543_s11 + $0xe54] ss:$24 sm:$0xf0]  }
 0x2b0   : > { %v7840_v5 = vld [vmem:[%s8543_s11 + $0x1154] ss:$24 sm:$0xf]   ;;  %v7854_v36 = vld [vmem:[%s8543_s11 + $0x3cb] ss:$24 sm:$0xf]  }
 0x2b1   : > { %3963 = vrot.lane.b32.xlu0 %v3962_v14, %s8516_s19  ;;  %v3360_v0 = vpop.permute.xlu1 %3359   ;;  %v4138_v14 = vsel %vm56_vm0, %v7826_v57, %v7825_v46  ;;  %v7841_v6 = vld [vmem:[%s8543_s11 + $0x1154] ss:$24 sm:$0xf0]   ;;  %v7855_v37 = vld [vmem:[%s8543_s11 + $0x3cb] ss:$24 sm:$0xf0]  }
 0x2b2   : > { %v3327_v60 = vpop.permute.xlu0 %3326   ;;  %7615 = vst.msk [vmem:[%s8845_s16 + $0x1b8] sm:$0xff] %vm2625_vm4, %v3360_v0   ;;  %v7837_v7 = vld [vmem:[%s8543_s11 + $0x108c] ss:$24 sm:$0xf]  }
 0x2b3   : > { %7606 = vst.msk [vmem:[%s8845_s16 + $0x158] sm:$0xff] %vm2625_vm4, %v3327_v60   ;;  %3996 = vrot.lane.b32.xlu1 %v3995_v49, %s8516_s19  ;;  %v4171_v49 = vsel %vm56_vm0, %v7835_v55, %v7834_v40  ;;  %v7838_v10 = vld [vmem:[%s8543_s11 + $0x108c] ss:$24 sm:$0xf0]  }
 0x2b4   : > { %v7863_v2 = vld [vmem:[%s8543_s11 + $0x6cb] ss:$24 sm:$0xf]  }
 0x2b5   : > { %3985 = vrot.lane.b32.xlu0 %v3984_v4, %s8516_s19  ;;  %v3382_v11 = vpop.permute.xlu1 %3381   ;;  %v4160_v4 = vsel %vm56_vm0, %v7832_v19, %v7831_v62  ;;  %v7864_v9 = vld [vmem:[%s8543_s11 + $0x6cb] ss:$24 sm:$0xf0]  }
 0x2b6   : > { %v3349_v8 = vpop.permute.xlu0 %3348   ;;  %7621 = vst.msk [vmem:[%s8845_s16 + $0x1f8] sm:$0xff] %vm2625_vm4, %v3382_v11   ;;  %v7860_v41 = vld [vmem:[%s8543_s11 + $0x603] ss:$24 sm:$0xf]  }
 0x2b7   : > { %7612 = vst.msk [vmem:[%s8845_s16 + $0x198] sm:$0xff] %vm2625_vm4, %v3349_v8   ;;  %4018 = vrot.lane.b32.xlu1 %v4017_v25, %s8516_s19  ;;  %v4193_v25 = vsel %vm56_vm0, %v7841_v6, %v7840_v5  ;;  %v7861_v42 = vld [vmem:[%s8543_s11 + $0x603] ss:$24 sm:$0xf0]  }
 0x2b8   : > { %v7869_v47 = vld [vmem:[%s8543_s11 + $0x903] ss:$24 sm:$0xf]  }
 0x2b9   : > { %4007 = vrot.lane.b32.xlu0 %v4006_v23, %s8516_s19  ;;  %v3404_v20 = vpop.permute.xlu1 %3403   ;;  %v4182_v23 = vsel %vm56_vm0, %v7838_v10, %v7837_v7  ;;  %v7870_v48 = vld [vmem:[%s8543_s11 + $0x903] ss:$24 sm:$0xf0]  }
 0x2ba   : > { %v3371_v63 = vpop.permute.xlu0 %3370   ;;  %7627 = vst.msk [vmem:[%s8845_s16 + $0x238] sm:$0xff] %vm2625_vm4, %v3404_v20   ;;  %v7866_v50 = vld [vmem:[%s8543_s11 + $0x793] ss:$24 sm:$0xf]  }
 0x2bb   : > { %7618 = vst.msk [vmem:[%s8845_s16 + $0x1d8] sm:$0xff] %vm2625_vm4, %v3371_v63   ;;  %4040 = vrot.lane.b32.xlu1 %v4039_v17, %s8516_s19  ;;  %v4214_v17 = vsel %vm56_vm0, %v7846_v28, %v7845_v15  ;;  %v7867_v44 = vld [vmem:[%s8543_s11 + $0x793] ss:$24 sm:$0xf0]  }
 0x2bc   : > { %v7875_v54 = vld [vmem:[%s8543_s11 + $0xa93] ss:$24 sm:$0xf]  }
 0x2bd   : > { %4029 = vrot.lane.b32.xlu0 %v4028_v59, %s8516_s19  ;;  %v3425_v29 = vpop.permute.xlu1 %3424   ;;  %v4204_v59 = vsel %vm56_vm0, %v7844_v1, %v7843_v18  ;;  %v7876_v56 = vld [vmem:[%s8543_s11 + $0xa93] ss:$24 sm:$0xf0]  }
 0x2be   : > { %v3393_v24 = vpop.permute.xlu0 %3392   ;;  %7632 = vst.msk [vmem:[%s8845_s16 + $0x20] sm:$0xff] %vm3416_vm5, %v3425_v29   ;;  %v7872_v46 = vld [vmem:[%s8543_s11 + $0x9cb] ss:$24 sm:$0xf]  }
 0x2bf   : > { %7624 = vst.msk [vmem:[%s8845_s16 + $0x218] sm:$0xff] %vm2625_vm4, %v3393_v24   ;;  %4062 = vrot.lane.b32.xlu1 %v4061_v27, %s8516_s19  ;;  %v4236_v27 = vsel %vm56_vm0, %v7852_v22, %v7851_v21  ;;  %v7873_v57 = vld [vmem:[%s8543_s11 + $0x9cb] ss:$24 sm:$0xf0]  }
 0x2c0   : > { %v7881_v40 = vld [vmem:[%s8543_s11 + $0xccb] ss:$24 sm:$0xf]  }
 0x2c1   : > { %4051 = vrot.lane.b32.xlu0 %v4050_v32, %s8516_s19  ;;  %v3447_v38 = vpop.permute.xlu1 %3446   ;;  %v4225_v32 = vsel %vm56_vm0, %v7849_v61, %v7848_v30  ;;  %v7882_v55 = vld [vmem:[%s8543_s11 + $0xccb] ss:$24 sm:$0xf0]  }
 0x2c2   : > { %v3415_v12 = vpop.permute.xlu0 %3414   ;;  %7638 = vst.msk [vmem:[%s8845_s16 + $0x60] sm:$0xff] %vm3416_vm5, %v3447_v38   ;;  %v7878_v62 = vld [vmem:[%s8543_s11 + $0xc03] ss:$24 sm:$0xf]  }
 0x2c3   : > { %3417 = vst.msk [vmem:[%s8845_s16] sm:$0xff] %vm3416_vm5, %v3415_v12   ;;  %4084 = vrot.lane.b32.xlu1 %v4083_v13, %s8516_s19  ;;  %v4258_v13 = vsel %vm56_vm0, %v7858_v34, %v7857_v33  ;;  %v7879_v19 = vld [vmem:[%s8543_s11 + $0xc03] ss:$24 sm:$0xf0]  }
 0x2c4   : > { %v7887_v5 = vld [vmem:[%s8543_s11 + $0xf03] ss:$24 sm:$0xf]  }
 0x2c5   : > { %4073 = vrot.lane.b32.xlu0 %v4072_v39, %s8516_s19  ;;  %v3469_v45 = vpop.permute.xlu1 %3468   ;;  %v4247_v39 = vsel %vm56_vm0, %v7855_v37, %v7854_v36  ;;  %v7888_v6 = vld [vmem:[%s8543_s11 + $0xf03] ss:$24 sm:$0xf0]  }
 0x2c6   : > { %v3436_v51 = vpop.permute.xlu0 %3435   ;;  %7644 = vst.msk [vmem:[%s8845_s16 + $0xa0] sm:$0xff] %vm3416_vm5, %v3469_v45   ;;  %v7884_v7 = vld [vmem:[%s8543_s11 + $0xd93] ss:$24 sm:$0xf]  }
 0x2c7   : > { %7635 = vst.msk [vmem:[%s8845_s16 + $0x40] sm:$0xff] %vm3416_vm5, %v3436_v51   ;;  %4106 = vrot.lane.b32.xlu1 %v4105_v43, %s8516_s19  ;;  %v4280_v43 = vsel %vm56_vm0, %v7864_v9, %v7863_v2  ;;  %v7885_v10 = vld [vmem:[%s8543_s11 + $0xd93] ss:$24 sm:$0xf0]  }
 0x2c8   : > { %v7893_v15 = vld [vmem:[%s8543_s11 + $0x1093] ss:$24 sm:$0xf]  }
 0x2c9   : > { %4095 = vrot.lane.b32.xlu0 %v4094_v35, %s8516_s19  ;;  %v3491_v53 = vpop.permute.xlu1 %3490   ;;  %v4269_v35 = vsel %vm56_vm0, %v7861_v42, %v7860_v41  ;;  %v7894_v28 = vld [vmem:[%s8543_s11 + $0x1093] ss:$24 sm:$0xf0]  }
 0x2ca   : > { %v3458_v16 = vpop.permute.xlu0 %3457   ;;  %7650 = vst.msk [vmem:[%s8845_s16 + $0xe0] sm:$0xff] %vm3416_vm5, %v3491_v53   ;;  %v7890_v18 = vld [vmem:[%s8543_s11 + $0xfcb] ss:$24 sm:$0xf]  }
 0x2cb   : > { %7641 = vst.msk [vmem:[%s8845_s16 + $0x80] sm:$0xff] %vm3416_vm5, %v3458_v16   ;;  %4128 = vrot.lane.b32.xlu1 %v4127_v52, %s8516_s19  ;;  %v4302_v52 = vsel %vm56_vm0, %v7870_v48, %v7869_v47  ;;  %v7891_v1 = vld [vmem:[%s8543_s11 + $0xfcb] ss:$24 sm:$0xf0]  }
 0x2cc   : > { %v7899_v21 = vld [vmem:[%s8543_s11 + $0xd3] ss:$24 sm:$0xf]  }
 0x2cd   : > { %4117 = vrot.lane.b32.xlu0 %v4116_v31, %s8516_s19  ;;  %v3513_v3 = vpop.permute.xlu1 %3512   ;;  %v4291_v31 = vsel %vm56_vm0, %v7867_v44, %v7866_v50  ;;  %v7900_v22 = vld [vmem:[%s8543_s11 + $0xd3] ss:$24 sm:$0xf0]  }
 0x2ce   : > { %v3480_v26 = vpop.permute.xlu0 %3479   ;;  %7656 = vst.msk [vmem:[%s8845_s16 + $0x120] sm:$0xff] %vm3416_vm5, %v3513_v3   ;;  %v7896_v30 = vld [vmem:[%s8543_s11 + $0xb] ss:$24 sm:$0xf]  }
 0x2cf   : > { %7647 = vst.msk [vmem:[%s8845_s16 + $0xc0] sm:$0xff] %vm3416_vm5, %v3480_v26   ;;  %4150 = vrot.lane.b32.xlu1 %v4149_v58, %s8516_s19  ;;  %v4324_v58 = vsel %vm56_vm0, %v7876_v56, %v7875_v54  ;;  %v7897_v61 = vld [vmem:[%s8543_s11 + $0xb] ss:$24 sm:$0xf0]  }
 0x2d0   : > { %v7905_v33 = vld [vmem:[%s8543_s11 + $0x30b] ss:$24 sm:$0xf]  }
 0x2d1   : > { %4139 = vrot.lane.b32.xlu0 %v4138_v14, %s8516_s19  ;;  %v3535_v0 = vpop.permute.xlu1 %3534   ;;  %v4313_v14 = vsel %vm56_vm0, %v7873_v57, %v7872_v46  ;;  %v7906_v34 = vld [vmem:[%s8543_s11 + $0x30b] ss:$24 sm:$0xf0]  }
 0x2d2   : > { %v3502_v60 = vpop.permute.xlu0 %3501   ;;  %7662 = vst.msk [vmem:[%s8845_s16 + $0x160] sm:$0xff] %vm3416_vm5, %v3535_v0   ;;  %v7902_v36 = vld [vmem:[%s8543_s11 + $0x243] ss:$24 sm:$0xf]  }
 0x2d3   : > { %7653 = vst.msk [vmem:[%s8845_s16 + $0x100] sm:$0xff] %vm3416_vm5, %v3502_v60   ;;  %4172 = vrot.lane.b32.xlu1 %v4171_v49, %s8516_s19  ;;  %v4346_v49 = vsel %vm56_vm0, %v7882_v55, %v7881_v40  ;;  %v7903_v37 = vld [vmem:[%s8543_s11 + $0x243] ss:$24 sm:$0xf0]  }
 0x2d4   : > { %v7911_v2 = vld [vmem:[%s8543_s11 + $0x543] ss:$24 sm:$0xf]  }
 0x2d5   : > { %4161 = vrot.lane.b32.xlu0 %v4160_v4, %s8516_s19  ;;  %v3557_v11 = vpop.permute.xlu1 %3556   ;;  %v4335_v4 = vsel %vm56_vm0, %v7879_v19, %v7878_v62  ;;  %v7912_v9 = vld [vmem:[%s8543_s11 + $0x543] ss:$24 sm:$0xf0]  }
 0x2d6   : > { %v3524_v8 = vpop.permute.xlu0 %3523   ;;  %7668 = vst.msk [vmem:[%s8845_s16 + $0x1a0] sm:$0xff] %vm3416_vm5, %v3557_v11   ;;  %v7908_v41 = vld [vmem:[%s8543_s11 + $0x3d3] ss:$24 sm:$0xf]  }
 0x2d7   : > { %7659 = vst.msk [vmem:[%s8845_s16 + $0x140] sm:$0xff] %vm3416_vm5, %v3524_v8   ;;  %4194 = vrot.lane.b32.xlu1 %v4193_v25, %s8516_s19  ;;  %v4368_v25 = vsel %vm56_vm0, %v7888_v6, %v7887_v5  ;;  %v7909_v42 = vld [vmem:[%s8543_s11 + $0x3d3] ss:$24 sm:$0xf0]  }
 0x2d8   : > { %v7917_v47 = vld [vmem:[%s8543_s11 + $0x6d3] ss:$24 sm:$0xf]  }
 0x2d9   : > { %4183 = vrot.lane.b32.xlu0 %v4182_v23, %s8516_s19  ;;  %v3579_v20 = vpop.permute.xlu1 %3578   ;;  %v4357_v23 = vsel %vm56_vm0, %v7885_v10, %v7884_v7  ;;  %v7918_v48 = vld [vmem:[%s8543_s11 + $0x6d3] ss:$24 sm:$0xf0]  }
 0x2da   : > { %v3546_v63 = vpop.permute.xlu0 %3545   ;;  %7674 = vst.msk [vmem:[%s8845_s16 + $0x1e0] sm:$0xff] %vm3416_vm5, %v3579_v20   ;;  %v7914_v50 = vld [vmem:[%s8543_s11 + $0x60b] ss:$24 sm:$0xf]  }
 0x2db   : > { %7665 = vst.msk [vmem:[%s8845_s16 + $0x180] sm:$0xff] %vm3416_vm5, %v3546_v63   ;;  %4215 = vrot.lane.b32.xlu1 %v4214_v17, %s8517_s20  ;;  %v4390_v17 = vsel %vm56_vm0, %v7894_v28, %v7893_v15  ;;  %v7915_v44 = vld [vmem:[%s8543_s11 + $0x60b] ss:$24 sm:$0xf0]  }
 0x2dc   : > { %v7923_v54 = vld [vmem:[%s8543_s11 + $0x90b] ss:$24 sm:$0xf]  }
 0x2dd   : > { %4205 = vrot.lane.b32.xlu0 %v4204_v59, %s8517_s20  ;;  %v3601_v29 = vpop.permute.xlu1 %3600   ;;  %v4379_v59 = vsel %vm56_vm0, %v7891_v1, %v7890_v18  ;;  %v7924_v56 = vld [vmem:[%s8543_s11 + $0x90b] ss:$24 sm:$0xf0]  }
 0x2de   : > { %v3568_v24 = vpop.permute.xlu0 %3567   ;;  %7680 = vst.msk [vmem:[%s8845_s16 + $0x220] sm:$0xff] %vm3416_vm5, %v3601_v29   ;;  %v7920_v46 = vld [vmem:[%s8543_s11 + $0x843] ss:$24 sm:$0xf]  }
 0x2df   : > { %7671 = vst.msk [vmem:[%s8845_s16 + $0x1c0] sm:$0xff] %vm3416_vm5, %v3568_v24   ;;  %4237 = vrot.lane.b32.xlu1 %v4236_v27, %s8517_s20  ;;  %v4412_v27 = vsel %vm56_vm0, %v7900_v22, %v7899_v21  ;;  %v7921_v57 = vld [vmem:[%s8543_s11 + $0x843] ss:$24 sm:$0xf0]  }
 0x2e0   : > { %v7929_v40 = vld [vmem:[%s8543_s11 + $0xb43] ss:$24 sm:$0xf]  }
 0x2e1   : > { %4226 = vrot.lane.b32.xlu0 %v4225_v32, %s8517_s20  ;;  %v3623_v38 = vpop.permute.xlu1 %3622   ;;  %v4401_v32 = vsel %vm56_vm0, %v7897_v61, %v7896_v30  ;;  %v7930_v55 = vld [vmem:[%s8543_s11 + $0xb43] ss:$24 sm:$0xf0]  }
 0x2e2   : > { %v3590_v12 = vpop.permute.xlu0 %3589   ;;  %7686 = vst.msk [vmem:[%s8845_s16 + $0x28] sm:$0xff] %vm3416_vm5, %v3623_v38   ;;  %v7926_v62 = vld [vmem:[%s8543_s11 + $0x9d3] ss:$24 sm:$0xf]  }
 0x2e3   : > { %7677 = vst.msk [vmem:[%s8845_s16 + $0x200] sm:$0xff] %vm3416_vm5, %v3590_v12   ;;  %4259 = vrot.lane.b32.xlu1 %v4258_v13, %s8517_s20  ;;  %v4434_v13 = vsel %vm56_vm0, %v7906_v34, %v7905_v33  ;;  %v7927_v19 = vld [vmem:[%s8543_s11 + $0x9d3] ss:$24 sm:$0xf0]  }
 0x2e4   : > { %v7935_v5 = vld [vmem:[%s8543_s11 + $0xcd3] ss:$24 sm:$0xf]  }
 0x2e5   : > { %4248 = vrot.lane.b32.xlu0 %v4247_v39, %s8517_s20  ;;  %v3645_v45 = vpop.permute.xlu1 %3644   ;;  %v4423_v39 = vsel %vm56_vm0, %v7903_v37, %v7902_v36  ;;  %v7936_v6 = vld [vmem:[%s8543_s11 + $0xcd3] ss:$24 sm:$0xf0]  }
 0x2e6   : > { %v3612_v51 = vpop.permute.xlu0 %3611   ;;  %7692 = vst.msk [vmem:[%s8845_s16 + $0x68] sm:$0xff] %vm3416_vm5, %v3645_v45   ;;  %v7932_v7 = vld [vmem:[%s8543_s11 + $0xc0b] ss:$24 sm:$0xf]  }
 0x2e7   : > { %7683 = vst.msk [vmem:[%s8845_s16 + $0x8] sm:$0xff] %vm3416_vm5, %v3612_v51   ;;  %4281 = vrot.lane.b32.xlu1 %v4280_v43, %s8517_s20  ;;  %v4456_v43 = vsel %vm56_vm0, %v7912_v9, %v7911_v2  ;;  %v7933_v10 = vld [vmem:[%s8543_s11 + $0xc0b] ss:$24 sm:$0xf0]  }
 0x2e8   : > { %v7941_v15 = vld [vmem:[%s8543_s11 + $0xf0b] ss:$24 sm:$0xf]  }
 0x2e9   : > { %4270 = vrot.lane.b32.xlu0 %v4269_v35, %s8517_s20  ;;  %v3667_v53 = vpop.permute.xlu1 %3666   ;;  %v4445_v35 = vsel %vm56_vm0, %v7909_v42, %v7908_v41  ;;  %v7942_v28 = vld [vmem:[%s8543_s11 + $0xf0b] ss:$24 sm:$0xf0]  }
 0x2ea   : > { %v3634_v16 = vpop.permute.xlu0 %3633   ;;  %7698 = vst.msk [vmem:[%s8845_s16 + $0xa8] sm:$0xff] %vm3416_vm5, %v3667_v53   ;;  %v7938_v18 = vld [vmem:[%s8543_s11 + $0xe43] ss:$24 sm:$0xf]  }
 0x2eb   : > { %7689 = vst.msk [vmem:[%s8845_s16 + $0x48] sm:$0xff] %vm3416_vm5, %v3634_v16   ;;  %4303 = vrot.lane.b32.xlu1 %v4302_v52, %s8517_s20  ;;  %v4478_v52 = vsel %vm56_vm0, %v7918_v48, %v7917_v47  ;;  %v7939_v1 = vld [vmem:[%s8543_s11 + $0xe43] ss:$24 sm:$0xf0]  }
 0x2ec   : > { %v7947_v21 = vld [vmem:[%s8543_s11 + $0x1143] ss:$24 sm:$0xf]  }
 0x2ed   : > { %4292 = vrot.lane.b32.xlu0 %v4291_v31, %s8517_s20  ;;  %v3689_v3 = vpop.permute.xlu1 %3688   ;;  %v4467_v31 = vsel %vm56_vm0, %v7915_v44, %v7914_v50  ;;  %v7948_v22 = vld [vmem:[%s8543_s11 + $0x1143] ss:$24 sm:$0xf0]  }
 0x2ee   : > { %v3656_v26 = vpop.permute.xlu0 %3655   ;;  %7704 = vst.msk [vmem:[%s8845_s16 + $0xe8] sm:$0xff] %vm3416_vm5, %v3689_v3   ;;  %v7944_v30 = vld [vmem:[%s8543_s11 + $0xfd3] ss:$24 sm:$0xf]  }
 0x2ef   : > { %7695 = vst.msk [vmem:[%s8845_s16 + $0x88] sm:$0xff] %vm3416_vm5, %v3656_v26   ;;  %4325 = vrot.lane.b32.xlu1 %v4324_v58, %s8517_s20  ;;  %v4500_v58 = vsel %vm56_vm0, %v7924_v56, %v7923_v54  ;;  %v7945_v61 = vld [vmem:[%s8543_s11 + $0xfd3] ss:$24 sm:$0xf0]  }
 0x2f0   : > { %v7953_v33 = vld [vmem:[%s8543_s11 + $0x183] ss:$24 sm:$0xf]  }
 0x2f1   : > { %4314 = vrot.lane.b32.xlu0 %v4313_v14, %s8517_s20  ;;  %v3711_v0 = vpop.permute.xlu1 %3710   ;;  %v4489_v14 = vsel %vm56_vm0, %v7921_v57, %v7920_v46  ;;  %v7954_v34 = vld [vmem:[%s8543_s11 + $0x183] ss:$24 sm:$0xf0]  }
 0x2f2   : > { %v3678_v60 = vpop.permute.xlu0 %3677   ;;  %7710 = vst.msk [vmem:[%s8845_s16 + $0x128] sm:$0xff] %vm3416_vm5, %v3711_v0   ;;  %v7950_v36 = vld [vmem:[%s8543_s11 + $0x13] ss:$24 sm:$0xf]  }
 0x2f3   : > { %7701 = vst.msk [vmem:[%s8845_s16 + $0xc8] sm:$0xff] %vm3416_vm5, %v3678_v60   ;;  %4347 = vrot.lane.b32.xlu1 %v4346_v49, %s8517_s20  ;;  %v4522_v49 = vsel %vm56_vm0, %v7930_v55, %v7929_v40  ;;  %v7951_v37 = vld [vmem:[%s8543_s11 + $0x13] ss:$24 sm:$0xf0]  }
 0x2f4   : > { %v7959_v2 = vld [vmem:[%s8543_s11 + $0x313] ss:$24 sm:$0xf]  }
 0x2f5   : > { %4336 = vrot.lane.b32.xlu0 %v4335_v4, %s8517_s20  ;;  %v3733_v11 = vpop.permute.xlu1 %3732   ;;  %v4511_v4 = vsel %vm56_vm0, %v7927_v19, %v7926_v62  ;;  %v7960_v9 = vld [vmem:[%s8543_s11 + $0x313] ss:$24 sm:$0xf0]  }
 0x2f6   : > { %v3700_v8 = vpop.permute.xlu0 %3699   ;;  %7716 = vst.msk [vmem:[%s8845_s16 + $0x168] sm:$0xff] %vm3416_vm5, %v3733_v11   ;;  %v7956_v41 = vld [vmem:[%s8543_s11 + $0x24b] ss:$24 sm:$0xf]  }
 0x2f7   : > { %7707 = vst.msk [vmem:[%s8845_s16 + $0x108] sm:$0xff] %vm3416_vm5, %v3700_v8   ;;  %4369 = vrot.lane.b32.xlu1 %v4368_v25, %s8517_s20  ;;  %v4544_v25 = vsel %vm56_vm0, %v7936_v6, %v7935_v5  ;;  %v7957_v42 = vld [vmem:[%s8543_s11 + $0x24b] ss:$24 sm:$0xf0]  }
 0x2f8   : > { %v7965_v47 = vld [vmem:[%s8543_s11 + $0x54b] ss:$24 sm:$0xf]  }
 0x2f9   : > { %4358 = vrot.lane.b32.xlu0 %v4357_v23, %s8517_s20  ;;  %v3755_v20 = vpop.permute.xlu1 %3754   ;;  %v4533_v23 = vsel %vm56_vm0, %v7933_v10, %v7932_v7  ;;  %v7966_v48 = vld [vmem:[%s8543_s11 + $0x54b] ss:$24 sm:$0xf0]  }
 0x2fa   : > { %v3722_v63 = vpop.permute.xlu0 %3721   ;;  %7722 = vst.msk [vmem:[%s8845_s16 + $0x1a8] sm:$0xff] %vm3416_vm5, %v3755_v20   ;;  %v7962_v50 = vld [vmem:[%s8543_s11 + $0x483] ss:$24 sm:$0xf]  }
 0x2fb   : > { %7713 = vst.msk [vmem:[%s8845_s16 + $0x148] sm:$0xff] %vm3416_vm5, %v3722_v63   ;;  %4391 = vrot.lane.b32.xlu1 %v4390_v17, %s8517_s20  ;;  %v4566_v17 = vsel %vm56_vm0, %v7942_v28, %v7941_v15  ;;  %v7963_v44 = vld [vmem:[%s8543_s11 + $0x483] ss:$24 sm:$0xf0]  }
 0x2fc   : > { %v7971_v54 = vld [vmem:[%s8543_s11 + $0x783] ss:$24 sm:$0xf]  }
 0x2fd   : > { %4380 = vrot.lane.b32.xlu0 %v4379_v59, %s8517_s20  ;;  %v3777_v29 = vpop.permute.xlu1 %3776   ;;  %v4555_v59 = vsel %vm56_vm0, %v7939_v1, %v7938_v18  ;;  %v7972_v56 = vld [vmem:[%s8543_s11 + $0x783] ss:$24 sm:$0xf0]  }
 0x2fe   : > { %v3744_v24 = vpop.permute.xlu0 %3743   ;;  %7728 = vst.msk [vmem:[%s8845_s16 + $0x1e8] sm:$0xff] %vm3416_vm5, %v3777_v29   ;;  %v7968_v46 = vld [vmem:[%s8543_s11 + $0x613] ss:$24 sm:$0xf]  }
 0x2ff   : > { %7719 = vst.msk [vmem:[%s8845_s16 + $0x188] sm:$0xff] %vm3416_vm5, %v3744_v24   ;;  %4413 = vrot.lane.b32.xlu1 %v4412_v27, %s8517_s20  ;;  %v4588_v27 = vsel %vm56_vm0, %v7948_v22, %v7947_v21  ;;  %v7969_v57 = vld [vmem:[%s8543_s11 + $0x613] ss:$24 sm:$0xf0]  }
 0x300   : > { %v7977_v40 = vld [vmem:[%s8543_s11 + $0x913] ss:$24 sm:$0xf]  }
 0x301   : > { %4402 = vrot.lane.b32.xlu0 %v4401_v32, %s8517_s20  ;;  %v3799_v38 = vpop.permute.xlu1 %3798   ;;  %v4577_v32 = vsel %vm56_vm0, %v7945_v61, %v7944_v30  ;;  %v7978_v55 = vld [vmem:[%s8543_s11 + $0x913] ss:$24 sm:$0xf0]  }
 0x302   : > { %v3766_v12 = vpop.permute.xlu0 %3765   ;;  %7734 = vst.msk [vmem:[%s8845_s16 + $0x228] sm:$0xff] %vm3416_vm5, %v3799_v38   ;;  %v7974_v62 = vld [vmem:[%s8543_s11 + $0x84b] ss:$24 sm:$0xf]  }
 0x303   : > { %7725 = vst.msk [vmem:[%s8845_s16 + $0x1c8] sm:$0xff] %vm3416_vm5, %v3766_v12   ;;  %4435 = vrot.lane.b32.xlu1 %v4434_v13, %s8517_s20  ;;  %v4610_v13 = vsel %vm56_vm0, %v7954_v34, %v7953_v33  ;;  %v7975_v19 = vld [vmem:[%s8543_s11 + $0x84b] ss:$24 sm:$0xf0]  }
 0x304   : > { %v7983_v5 = vld [vmem:[%s8543_s11 + $0xb4b] ss:$24 sm:$0xf]  }
 0x305   : > { %4424 = vrot.lane.b32.xlu0 %v4423_v39, %s8517_s20  ;;  %v3821_v45 = vpop.permute.xlu1 %3820   ;;  %v4599_v39 = vsel %vm56_vm0, %v7951_v37, %v7950_v36  ;;  %v7984_v6 = vld [vmem:[%s8543_s11 + $0xb4b] ss:$24 sm:$0xf0]  }
 0x306   : > { %v3788_v51 = vpop.permute.xlu0 %3787   ;;  %7740 = vst.msk [vmem:[%s8845_s16 + $0x30] sm:$0xff] %vm3416_vm5, %v3821_v45   ;;  %v7980_v7 = vld [vmem:[%s8543_s11 + $0xa83] ss:$24 sm:$0xf]  }
 0x307   : > { %7731 = vst.msk [vmem:[%s8845_s16 + $0x208] sm:$0xff] %vm3416_vm5, %v3788_v51   ;;  %4457 = vrot.lane.b32.xlu1 %v4456_v43, %s8517_s20  ;;  %v4632_v43 = vsel %vm56_vm0, %v7960_v9, %v7959_v2  ;;  %v7981_v10 = vld [vmem:[%s8543_s11 + $0xa83] ss:$24 sm:$0xf0]  }
 0x308   : > { %v7989_v15 = vld [vmem:[%s8543_s11 + $0xd83] ss:$24 sm:$0xf]  }
 0x309   : > { %4446 = vrot.lane.b32.xlu0 %v4445_v35, %s8517_s20  ;;  %v3843_v53 = vpop.permute.xlu1 %3842   ;;  %v4621_v35 = vsel %vm56_vm0, %v7957_v42, %v7956_v41  ;;  %v7990_v28 = vld [vmem:[%s8543_s11 + $0xd83] ss:$24 sm:$0xf0]  }
 0x30a   : > { %v3810_v16 = vpop.permute.xlu0 %3809   ;;  %7746 = vst.msk [vmem:[%s8845_s16 + $0x70] sm:$0xff] %vm3416_vm5, %v3843_v53   ;;  %v7986_v18 = vld [vmem:[%s8543_s11 + $0xc13] ss:$24 sm:$0xf]  }
 0x30b   : > { %7737 = vst.msk [vmem:[%s8845_s16 + $0x10] sm:$0xff] %vm3416_vm5, %v3810_v16   ;;  %4479 = vrot.lane.b32.xlu1 %v4478_v52, %s8517_s20  ;;  %v4654_v52 = vsel %vm56_vm0, %v7966_v48, %v7965_v47  ;;  %v7987_v1 = vld [vmem:[%s8543_s11 + $0xc13] ss:$24 sm:$0xf0]  }
 0x30c   : > { %v7995_v21 = vld [vmem:[%s8543_s11 + $0xf13] ss:$24 sm:$0xf]  }
 0x30d   : > { %4468 = vrot.lane.b32.xlu0 %v4467_v31, %s8517_s20  ;;  %v3865_v3 = vpop.permute.xlu1 %3864   ;;  %v4643_v31 = vsel %vm56_vm0, %v7963_v44, %v7962_v50  ;;  %v7996_v22 = vld [vmem:[%s8543_s11 + $0xf13] ss:$24 sm:$0xf0]  }
 0x30e   : > { %v3832_v26 = vpop.permute.xlu0 %3831   ;;  %7752 = vst.msk [vmem:[%s8845_s16 + $0xb0] sm:$0xff] %vm3416_vm5, %v3865_v3   ;;  %v7992_v30 = vld [vmem:[%s8543_s11 + $0xe4b] ss:$24 sm:$0xf]  }
 0x30f   : > { %7743 = vst.msk [vmem:[%s8845_s16 + $0x50] sm:$0xff] %vm3416_vm5, %v3832_v26   ;;  %4501 = vrot.lane.b32.xlu1 %v4500_v58, %s8517_s20  ;;  %v4676_v58 = vsel %vm56_vm0, %v7972_v56, %v7971_v54  ;;  %v7993_v61 = vld [vmem:[%s8543_s11 + $0xe4b] ss:$24 sm:$0xf0]  }
 0x310   : > { %v8001_v33 = vld [vmem:[%s8543_s11 + $0x114b] ss:$24 sm:$0xf]  }
 0x311   : > { %4490 = vrot.lane.b32.xlu0 %v4489_v14, %s8517_s20  ;;  %v3887_v0 = vpop.permute.xlu1 %3886   ;;  %v4665_v14 = vsel %vm56_vm0, %v7969_v57, %v7968_v46  ;;  %v8002_v34 = vld [vmem:[%s8543_s11 + $0x114b] ss:$24 sm:$0xf0]  }
 0x312   : > { %v3854_v60 = vpop.permute.xlu0 %3853   ;;  %7758 = vst.msk [vmem:[%s8845_s16 + $0xf0] sm:$0xff] %vm3416_vm5, %v3887_v0   ;;  %v7998_v36 = vld [vmem:[%s8543_s11 + $0x1083] ss:$24 sm:$0xf]  }
 0x313   : > { %7749 = vst.msk [vmem:[%s8845_s16 + $0x90] sm:$0xff] %vm3416_vm5, %v3854_v60   ;;  %4523 = vrot.lane.b32.xlu1 %v4522_v49, %s8517_s20  ;;  %v4698_v49 = vsel %vm56_vm0, %v7978_v55, %v7977_v40  ;;  %v7999_v37 = vld [vmem:[%s8543_s11 + $0x1083] ss:$24 sm:$0xf0]  }
 0x314   : > { %v8007_v2 = vld [vmem:[%s8543_s11 + $0x18b] ss:$24 sm:$0xf]  }
 0x315   : > { %4512 = vrot.lane.b32.xlu0 %v4511_v4, %s8517_s20  ;;  %v3909_v11 = vpop.permute.xlu1 %3908   ;;  %v4687_v4 = vsel %vm56_vm0, %v7975_v19, %v7974_v62  ;;  %v8008_v9 = vld [vmem:[%s8543_s11 + $0x18b] ss:$24 sm:$0xf0]  }
 0x316   : > { %v3876_v8 = vpop.permute.xlu0 %3875   ;;  %7764 = vst.msk [vmem:[%s8845_s16 + $0x130] sm:$0xff] %vm3416_vm5, %v3909_v11   ;;  %v8004_v41 = vld [vmem:[%s8543_s11 + $0xc3] ss:$24 sm:$0xf]  }
 0x317   : > { %7755 = vst.msk [vmem:[%s8845_s16 + $0xd0] sm:$0xff] %vm3416_vm5, %v3876_v8   ;;  %4545 = vrot.lane.b32.xlu1 %v4544_v25, %s8517_s20  ;;  %v4720_v25 = vsel %vm56_vm0, %v7984_v6, %v7983_v5  ;;  %v8005_v42 = vld [vmem:[%s8543_s11 + $0xc3] ss:$24 sm:$0xf0]  }
 0x318   : > { %v8013_v47 = vld [vmem:[%s8543_s11 + $0x3c3] ss:$24 sm:$0xf]  }
 0x319   : > { %4534 = vrot.lane.b32.xlu0 %v4533_v23, %s8517_s20  ;;  %v3931_v20 = vpop.permute.xlu1 %3930   ;;  %v4709_v23 = vsel %vm56_vm0, %v7981_v10, %v7980_v7  ;;  %v8014_v48 = vld [vmem:[%s8543_s11 + $0x3c3] ss:$24 sm:$0xf0]  }
 0x31a   : > { %v3898_v63 = vpop.permute.xlu0 %3897   ;;  %7770 = vst.msk [vmem:[%s8845_s16 + $0x170] sm:$0xff] %vm3416_vm5, %v3931_v20   ;;  %v8010_v50 = vld [vmem:[%s8543_s11 + $0x253] ss:$24 sm:$0xf]  }
 0x31b   : > { %7761 = vst.msk [vmem:[%s8845_s16 + $0x110] sm:$0xff] %vm3416_vm5, %v3898_v63   ;;  %4567 = vrot.lane.b32.xlu1 %v4566_v17, %s8517_s20  ;;  %v4742_v17 = vsel %vm56_vm0, %v7990_v28, %v7989_v15  ;;  %v8011_v44 = vld [vmem:[%s8543_s11 + $0x253] ss:$24 sm:$0xf0]  }
 0x31c   : > { %v8019_v54 = vld [vmem:[%s8543_s11 + $0x553] ss:$24 sm:$0xf]  }
 0x31d   : > { %4556 = vrot.lane.b32.xlu0 %v4555_v59, %s8517_s20  ;;  %v3953_v29 = vpop.permute.xlu1 %3952   ;;  %v4731_v59 = vsel %vm56_vm0, %v7987_v1, %v7986_v18  ;;  %v8020_v56 = vld [vmem:[%s8543_s11 + $0x553] ss:$24 sm:$0xf0]  }
 0x31e   : > { %v3920_v24 = vpop.permute.xlu0 %3919   ;;  %7776 = vst.msk [vmem:[%s8845_s16 + $0x1b0] sm:$0xff] %vm3416_vm5, %v3953_v29   ;;  %v8016_v46 = vld [vmem:[%s8543_s11 + $0x48b] ss:$24 sm:$0xf]  }
 0x31f   : > { %7767 = vst.msk [vmem:[%s8845_s16 + $0x150] sm:$0xff] %vm3416_vm5, %v3920_v24   ;;  %4589 = vrot.lane.b32.xlu1 %v4588_v27, %s8517_s20  ;;  %v4764_v27 = vsel %vm56_vm0, %v7996_v22, %v7995_v21  ;;  %v8017_v57 = vld [vmem:[%s8543_s11 + $0x48b] ss:$24 sm:$0xf0]  }
 0x320   : > { %v8025_v40 = vld [vmem:[%s8543_s11 + $0x78b] ss:$24 sm:$0xf]  }
 0x321   : > { %4578 = vrot.lane.b32.xlu0 %v4577_v32, %s8517_s20  ;;  %v3975_v38 = vpop.permute.xlu1 %3974   ;;  %v4753_v32 = vsel %vm56_vm0, %v7993_v61, %v7992_v30  ;;  %v8026_v55 = vld [vmem:[%s8543_s11 + $0x78b] ss:$24 sm:$0xf0]  }
 0x322   : > { %v3942_v12 = vpop.permute.xlu0 %3941   ;;  %7782 = vst.msk [vmem:[%s8845_s16 + $0x1f0] sm:$0xff] %vm3416_vm5, %v3975_v38   ;;  %v8022_v62 = vld [vmem:[%s8543_s11 + $0x6c3] ss:$24 sm:$0xf]  }
 0x323   : > { %7773 = vst.msk [vmem:[%s8845_s16 + $0x190] sm:$0xff] %vm3416_vm5, %v3942_v12   ;;  %4611 = vrot.lane.b32.xlu1 %v4610_v13, %s8517_s20  ;;  %v4786_v13 = vsel %vm56_vm0, %v8002_v34, %v8001_v33  ;;  %v8023_v19 = vld [vmem:[%s8543_s11 + $0x6c3] ss:$24 sm:$0xf0]  }
 0x324   : > { %v8031_v5 = vld [vmem:[%s8543_s11 + $0x9c3] ss:$24 sm:$0xf]  }
 0x325   : > { %4600 = vrot.lane.b32.xlu0 %v4599_v39, %s8517_s20  ;;  %v3997_v45 = vpop.permute.xlu1 %3996   ;;  %v4775_v39 = vsel %vm56_vm0, %v7999_v37, %v7998_v36  ;;  %v8032_v6 = vld [vmem:[%s8543_s11 + $0x9c3] ss:$24 sm:$0xf0]  }
 0x326   : > { %v3964_v51 = vpop.permute.xlu0 %3963   ;;  %7788 = vst.msk [vmem:[%s8845_s16 + $0x230] sm:$0xff] %vm3416_vm5, %v3997_v45   ;;  %v8028_v7 = vld [vmem:[%s8543_s11 + $0x853] ss:$24 sm:$0xf]  }
 0x327   : > { %7779 = vst.msk [vmem:[%s8845_s16 + $0x1d0] sm:$0xff] %vm3416_vm5, %v3964_v51   ;;  %4633 = vrot.lane.b32.xlu1 %v4632_v43, %s8517_s20  ;;  %v4808_v43 = vsel %vm56_vm0, %v8008_v9, %v8007_v2  ;;  %v8029_v10 = vld [vmem:[%s8543_s11 + $0x853] ss:$24 sm:$0xf0]  }
 0x328   : > { %v8037_v15 = vld [vmem:[%s8543_s11 + $0xb53] ss:$24 sm:$0xf]  }
 0x329   : > { %4622 = vrot.lane.b32.xlu0 %v4621_v35, %s8517_s20  ;;  %v4019_v53 = vpop.permute.xlu1 %4018   ;;  %v4797_v35 = vsel %vm56_vm0, %v8005_v42, %v8004_v41  ;;  %v8038_v28 = vld [vmem:[%s8543_s11 + $0xb53] ss:$24 sm:$0xf0]  }
 0x32a   : > { %v3986_v16 = vpop.permute.xlu0 %3985   ;;  %7794 = vst.msk [vmem:[%s8845_s16 + $0x38] sm:$0xff] %vm3416_vm5, %v4019_v53   ;;  %v8034_v18 = vld [vmem:[%s8543_s11 + $0xa8b] ss:$24 sm:$0xf]  }
 0x32b   : > { %7785 = vst.msk [vmem:[%s8845_s16 + $0x210] sm:$0xff] %vm3416_vm5, %v3986_v16   ;;  %4655 = vrot.lane.b32.xlu1 %v4654_v52, %s8517_s20  ;;  %v4830_v52 = vsel %vm56_vm0, %v8014_v48, %v8013_v47  ;;  %v8035_v1 = vld [vmem:[%s8543_s11 + $0xa8b] ss:$24 sm:$0xf0]  }
 0x32c   : > { %v8043_v21 = vld [vmem:[%s8543_s11 + $0xd8b] ss:$24 sm:$0xf]   ;;  %v8060_v47 = vld [vmem:[%s8543_s11 + $0xca] ss:$24 sm:$0xf]  }
 0x32d   : > { %4644 = vrot.lane.b32.xlu0 %v4643_v31, %s8517_s20  ;;  %v4041_v3 = vpop.permute.xlu1 %4040   ;;  %v4819_v31 = vsel %vm56_vm0, %v8011_v44, %v8010_v50  ;;  %v8044_v22 = vld [vmem:[%s8543_s11 + $0xd8b] ss:$24 sm:$0xf0]   ;;  %v8061_v48 = vld [vmem:[%s8543_s11 + $0xca] ss:$24 sm:$0xf0]  }
 0x32e   : > { %v4008_v26 = vpop.permute.xlu0 %4007   ;;  %7800 = vst.msk [vmem:[%s8845_s16 + $0x78] sm:$0xff] %vm3416_vm5, %v4041_v3   ;;  %v8040_v30 = vld [vmem:[%s8543_s11 + $0xcc3] ss:$24 sm:$0xf]  }
 0x32f   : > { %7791 = vst.msk [vmem:[%s8845_s16 + $0x18] sm:$0xff] %vm3416_vm5, %v4008_v26   ;;  %4677 = vrot.lane.b32.xlu1 %v4676_v58, %s8517_s20  ;;  %v4852_v58 = vsel %vm56_vm0, %v8020_v56, %v8019_v54  ;;  %v8041_v61 = vld [vmem:[%s8543_s11 + $0xcc3] ss:$24 sm:$0xf0]  }
 0x330   : > { %v8049_v33 = vld [vmem:[%s8543_s11 + $0xfc3] ss:$24 sm:$0xf]   ;;  %v8058_v50 = vld [vmem:[%s8543_s11 + $0x2] ss:$24 sm:$0xf]  }
 0x331   : > { %4666 = vrot.lane.b32.xlu0 %v4665_v14, %s8517_s20  ;;  %v4063_v0 = vpop.permute.xlu1 %4062   ;;  %v4841_v14 = vsel %vm56_vm0, %v8017_v57, %v8016_v46  ;;  %v8050_v34 = vld [vmem:[%s8543_s11 + $0xfc3] ss:$24 sm:$0xf0]   ;;  %v8059_v44 = vld [vmem:[%s8543_s11 + $0x2] ss:$24 sm:$0xf0]  }
 0x332   : > { %v4030_v60 = vpop.permute.xlu0 %4029   ;;  %7806 = vst.msk [vmem:[%s8845_s16 + $0xb8] sm:$0xff] %vm3416_vm5, %v4063_v0   ;;  %v8046_v36 = vld [vmem:[%s8543_s11 + $0xe53] ss:$24 sm:$0xf]  }
 0x333   : > { %7797 = vst.msk [vmem:[%s8845_s16 + $0x58] sm:$0xff] %vm3416_vm5, %v4030_v60   ;;  %4699 = vrot.lane.b32.xlu1 %v4698_v49, %s8517_s20  ;;  %v4874_v49 = vsel %vm56_vm0, %v8026_v55, %v8025_v40  ;;  %v8047_v37 = vld [vmem:[%s8543_s11 + $0xe53] ss:$24 sm:$0xf0]  }
 0x334   : > { %v8055_v2 = vld [vmem:[%s8543_s11 + $0x1153] ss:$24 sm:$0xf]   ;;  %v8066_v54 = vld [vmem:[%s8543_s11 + $0x302] ss:$24 sm:$0xf]  }
 0x335   : > { %4688 = vrot.lane.b32.xlu0 %v4687_v4, %s8517_s20  ;;  %v4085_v11 = vpop.permute.xlu1 %4084   ;;  %v4863_v4 = vsel %vm56_vm0, %v8023_v19, %v8022_v62  ;;  %v8056_v9 = vld [vmem:[%s8543_s11 + $0x1153] ss:$24 sm:$0xf0]   ;;  %v8067_v56 = vld [vmem:[%s8543_s11 + $0x302] ss:$24 sm:$0xf0]  }
 0x336   : > { %v4052_v8 = vpop.permute.xlu0 %4051   ;;  %7812 = vst.msk [vmem:[%s8845_s16 + $0xf8] sm:$0xff] %vm3416_vm5, %v4085_v11   ;;  %v8052_v41 = vld [vmem:[%s8543_s11 + $0x108b] ss:$24 sm:$0xf]  }
 0x337   : > { %7803 = vst.msk [vmem:[%s8845_s16 + $0x98] sm:$0xff] %vm3416_vm5, %v4052_v8   ;;  %4721 = vrot.lane.b32.xlu1 %v4720_v25, %s8517_s20  ;;  %v4896_v25 = vsel %vm56_vm0, %v8032_v6, %v8031_v5  ;;  %v8053_v42 = vld [vmem:[%s8543_s11 + $0x108b] ss:$24 sm:$0xf0]  }
 0x338   : > { %v8063_v46 = vld [vmem:[%s8543_s11 + $0x192] ss:$24 sm:$0xf]  }
 0x339   : > { %4710 = vrot.lane.b32.xlu0 %v4709_v23, %s8517_s20  ;;  %v4107_v20 = vpop.permute.xlu1 %4106   ;;  %v4885_v23 = vsel %vm56_vm0, %v8029_v10, %v8028_v7  ;;  %v8064_v57 = vld [vmem:[%s8543_s11 + $0x192] ss:$24 sm:$0xf0]  }
 0x33a   : > { %v4074_v63 = vpop.permute.xlu0 %4073   ;;  %7818 = vst.msk [vmem:[%s8845_s16 + $0x138] sm:$0xff] %vm3416_vm5, %v4107_v20   ;;  %v8072_v40 = vld [vmem:[%s8543_s11 + $0x492] ss:$24 sm:$0xf]  }
 0x33b   : > { %7809 = vst.msk [vmem:[%s8845_s16 + $0xd8] sm:$0xff] %vm3416_vm5, %v4074_v63   ;;  %4743 = vrot.lane.b32.xlu1 %v4742_v17, %s8517_s20  ;;  %v4918_v17 = vsel %vm56_vm0, %v8038_v28, %v8037_v15  ;;  %v8073_v55 = vld [vmem:[%s8543_s11 + $0x492] ss:$24 sm:$0xf0]  }
 0x33c   : > { %v8069_v62 = vld [vmem:[%s8543_s11 + $0x3ca] ss:$24 sm:$0xf]  }
 0x33d   : > { %4732 = vrot.lane.b32.xlu0 %v4731_v59, %s8517_s20  ;;  %v4129_v29 = vpop.permute.xlu1 %4128   ;;  %v4907_v59 = vsel %vm56_vm0, %v8035_v1, %v8034_v18  ;;  %v8070_v19 = vld [vmem:[%s8543_s11 + $0x3ca] ss:$24 sm:$0xf0]  }
 0x33e   : > { %v4096_v24 = vpop.permute.xlu0 %4095   ;;  %7824 = vst.msk [vmem:[%s8845_s16 + $0x178] sm:$0xff] %vm3416_vm5, %v4129_v29   ;;  %v8078_v5 = vld [vmem:[%s8543_s11 + $0x6ca] ss:$24 sm:$0xf]  }
 0x33f   : > { %7815 = vst.msk [vmem:[%s8845_s16 + $0x118] sm:$0xff] %vm3416_vm5, %v4096_v24   ;;  %4765 = vrot.lane.b32.xlu1 %v4764_v27, %s8517_s20  ;;  %v4940_v27 = vsel %vm56_vm0, %v8044_v22, %v8043_v21  ;;  %v8079_v6 = vld [vmem:[%s8543_s11 + $0x6ca] ss:$24 sm:$0xf0]  }
 0x340   : > { %v8075_v7 = vld [vmem:[%s8543_s11 + $0x602] ss:$24 sm:$0xf]  }
 0x341   : > { %4754 = vrot.lane.b32.xlu0 %v4753_v32, %s8517_s20  ;;  %v4151_v38 = vpop.permute.xlu1 %4150   ;;  %v4929_v32 = vsel %vm56_vm0, %v8041_v61, %v8040_v30  ;;  %v8076_v10 = vld [vmem:[%s8543_s11 + $0x602] ss:$24 sm:$0xf0]  }
 0x342   : > { %v4118_v12 = vpop.permute.xlu0 %4117   ;;  %7830 = vst.msk [vmem:[%s8845_s16 + $0x1b8] sm:$0xff] %vm3416_vm5, %v4151_v38   ;;  %v8084_v15 = vld [vmem:[%s8543_s11 + $0x902] ss:$24 sm:$0xf]  }
 0x343   : > { %7821 = vst.msk [vmem:[%s8845_s16 + $0x158] sm:$0xff] %vm3416_vm5, %v4118_v12   ;;  %4787 = vrot.lane.b32.xlu1 %v4786_v13, %s8517_s20  ;;  %v4962_v13 = vsel %vm56_vm0, %v8050_v34, %v8049_v33  ;;  %v8085_v28 = vld [vmem:[%s8543_s11 + $0x902] ss:$24 sm:$0xf0]  }
 0x344   : > { %v8081_v18 = vld [vmem:[%s8543_s11 + $0x792] ss:$24 sm:$0xf]  }
 0x345   : > { %4776 = vrot.lane.b32.xlu0 %v4775_v39, %s8517_s20  ;;  %v4173_v45 = vpop.permute.xlu1 %4172   ;;  %v4951_v39 = vsel %vm56_vm0, %v8047_v37, %v8046_v36  ;;  %v8082_v1 = vld [vmem:[%s8543_s11 + $0x792] ss:$24 sm:$0xf0]  }
 0x346   : > { %v4140_v51 = vpop.permute.xlu0 %4139   ;;  %7836 = vst.msk [vmem:[%s8845_s16 + $0x1f8] sm:$0xff] %vm3416_vm5, %v4173_v45   ;;  %v8090_v21 = vld [vmem:[%s8543_s11 + $0xa92] ss:$24 sm:$0xf]  }
 0x347   : > { %7827 = vst.msk [vmem:[%s8845_s16 + $0x198] sm:$0xff] %vm3416_vm5, %v4140_v51   ;;  %4809 = vrot.lane.b32.xlu1 %v4808_v43, %s8517_s20  ;;  %v4984_v43 = vsel %vm56_vm0, %v8056_v9, %v8055_v2  ;;  %v8091_v22 = vld [vmem:[%s8543_s11 + $0xa92] ss:$24 sm:$0xf0]  }
 0x348   : > { %v8087_v30 = vld [vmem:[%s8543_s11 + $0x9ca] ss:$24 sm:$0xf]  }
 0x349   : > { %4798 = vrot.lane.b32.xlu0 %v4797_v35, %s8517_s20  ;;  %v4195_v53 = vpop.permute.xlu1 %4194   ;;  %v4973_v35 = vsel %vm56_vm0, %v8053_v42, %v8052_v41  ;;  %v8088_v61 = vld [vmem:[%s8543_s11 + $0x9ca] ss:$24 sm:$0xf0]  }
 0x34a   : > { %v4162_v16 = vpop.permute.xlu0 %4161   ;;  %7842 = vst.msk [vmem:[%s8845_s16 + $0x238] sm:$0xff] %vm3416_vm5, %v4195_v53   ;;  %v8096_v33 = vld [vmem:[%s8543_s11 + $0xcca] ss:$24 sm:$0xf]  }
 0x34b   : > { %7833 = vst.msk [vmem:[%s8845_s16 + $0x1d8] sm:$0xff] %vm3416_vm5, %v4162_v16   ;;  %4831 = vrot.lane.b32.xlu1 %v4830_v52, %s8517_s20  ;;  %v5005_v52 = vsel %vm56_vm0, %v8061_v48, %v8060_v47  ;;  %v8097_v34 = vld [vmem:[%s8543_s11 + $0xcca] ss:$24 sm:$0xf0]  }
 0x34c   : > { %v8093_v36 = vld [vmem:[%s8543_s11 + $0xc02] ss:$24 sm:$0xf]  }
 0x34d   : > { %4820 = vrot.lane.b32.xlu0 %v4819_v31, %s8517_s20  ;;  %v4216_v3 = vpop.permute.xlu1 %4215   ;;  %v4995_v31 = vsel %vm56_vm0, %v8059_v44, %v8058_v50  ;;  %v8094_v37 = vld [vmem:[%s8543_s11 + $0xc02] ss:$24 sm:$0xf0]  }
 0x34e   : > { %v4184_v26 = vpop.permute.xlu0 %4183   ;;  %7847 = vst.msk [vmem:[%s8845_s16 + $0x20] sm:$0xff] %vm4207_vm6, %v4216_v3   ;;  %v8102_v2 = vld [vmem:[%s8543_s11 + $0xf02] ss:$24 sm:$0xf]  }
 0x34f   : > { %7839 = vst.msk [vmem:[%s8845_s16 + $0x218] sm:$0xff] %vm3416_vm5, %v4184_v26   ;;  %4853 = vrot.lane.b32.xlu1 %v4852_v58, %s8517_s20  ;;  %v5027_v58 = vsel %vm56_vm0, %v8067_v56, %v8066_v54  ;;  %v8103_v9 = vld [vmem:[%s8543_s11 + $0xf02] ss:$24 sm:$0xf0]  }
 0x350   : > { %v8099_v41 = vld [vmem:[%s8543_s11 + $0xd92] ss:$24 sm:$0xf]  }
 0x351   : > { %4842 = vrot.lane.b32.xlu0 %v4841_v14, %s8517_s20  ;;  %v4238_v0 = vpop.permute.xlu1 %4237   ;;  %v5016_v14 = vsel %vm56_vm0, %v8064_v57, %v8063_v46  ;;  %v8100_v42 = vld [vmem:[%s8543_s11 + $0xd92] ss:$24 sm:$0xf0]  }
 0x352   : > { %v4206_v60 = vpop.permute.xlu0 %4205   ;;  %7853 = vst.msk [vmem:[%s8845_s16 + $0x60] sm:$0xff] %vm4207_vm6, %v4238_v0   ;;  %v8108_v47 = vld [vmem:[%s8543_s11 + $0x1092] ss:$24 sm:$0xf]  }
 0x353   : > { %4208 = vst.msk [vmem:[%s8845_s16] sm:$0xff] %vm4207_vm6, %v4206_v60   ;;  %4875 = vrot.lane.b32.xlu1 %v4874_v49, %s8517_s20  ;;  %v5049_v49 = vsel %vm56_vm0, %v8073_v55, %v8072_v40  ;;  %v8109_v48 = vld [vmem:[%s8543_s11 + $0x1092] ss:$24 sm:$0xf0]  }
 0x354   : > { %v8105_v50 = vld [vmem:[%s8543_s11 + $0xfca] ss:$24 sm:$0xf]  }
 0x355   : > { %4864 = vrot.lane.b32.xlu0 %v4863_v4, %s8517_s20  ;;  %v4260_v11 = vpop.permute.xlu1 %4259   ;;  %v5038_v4 = vsel %vm56_vm0, %v8070_v19, %v8069_v62  ;;  %v8106_v44 = vld [vmem:[%s8543_s11 + $0xfca] ss:$24 sm:$0xf0]  }
 0x356   : > { %v4227_v8 = vpop.permute.xlu0 %4226   ;;  %7859 = vst.msk [vmem:[%s8845_s16 + $0xa0] sm:$0xff] %vm4207_vm6, %v4260_v11   ;;  %v8114_v54 = vld [vmem:[%s8543_s11 + $0xd2] ss:$24 sm:$0xf]  }
 0x357   : > { %7850 = vst.msk [vmem:[%s8845_s16 + $0x40] sm:$0xff] %vm4207_vm6, %v4227_v8   ;;  %4897 = vrot.lane.b32.xlu1 %v4896_v25, %s8517_s20  ;;  %v5071_v25 = vsel %vm56_vm0, %v8079_v6, %v8078_v5  ;;  %v8115_v56 = vld [vmem:[%s8543_s11 + $0xd2] ss:$24 sm:$0xf0]  }
 0x358   : > { %v8111_v46 = vld [vmem:[%s8543_s11 + $0xa] ss:$24 sm:$0xf]  }
 0x359   : > { %4886 = vrot.lane.b32.xlu0 %v4885_v23, %s8517_s20  ;;  %v4282_v20 = vpop.permute.xlu1 %4281   ;;  %v5060_v23 = vsel %vm56_vm0, %v8076_v10, %v8075_v7  ;;  %v8112_v57 = vld [vmem:[%s8543_s11 + $0xa] ss:$24 sm:$0xf0]  }
 0x35a   : > { %v4249_v63 = vpop.permute.xlu0 %4248   ;;  %7865 = vst.msk [vmem:[%s8845_s16 + $0xe0] sm:$0xff] %vm4207_vm6, %v4282_v20   ;;  %v8120_v40 = vld [vmem:[%s8543_s11 + $0x30a] ss:$24 sm:$0xf]  }
 0x35b   : > { %7856 = vst.msk [vmem:[%s8845_s16 + $0x80] sm:$0xff] %vm4207_vm6, %v4249_v63   ;;  %4919 = vrot.lane.b32.xlu1 %v4918_v17, %s8517_s20  ;;  %v5093_v17 = vsel %vm56_vm0, %v8085_v28, %v8084_v15  ;;  %v8121_v55 = vld [vmem:[%s8543_s11 + $0x30a] ss:$24 sm:$0xf0]  }
 0x35c   : > { %v8117_v62 = vld [vmem:[%s8543_s11 + $0x242] ss:$24 sm:$0xf]  }
 0x35d   : > { %4908 = vrot.lane.b32.xlu0 %v4907_v59, %s8517_s20  ;;  %v4304_v29 = vpop.permute.xlu1 %4303   ;;  %v5082_v59 = vsel %vm56_vm0, %v8082_v1, %v8081_v18  ;;  %v8118_v19 = vld [vmem:[%s8543_s11 + $0x242] ss:$24 sm:$0xf0]  }
 0x35e   : > { %v4271_v24 = vpop.permute.xlu0 %4270   ;;  %7871 = vst.msk [vmem:[%s8845_s16 + $0x120] sm:$0xff] %vm4207_vm6, %v4304_v29   ;;  %v8126_v5 = vld [vmem:[%s8543_s11 + $0x542] ss:$24 sm:$0xf]  }
 0x35f   : > { %7862 = vst.msk [vmem:[%s8845_s16 + $0xc0] sm:$0xff] %vm4207_vm6, %v4271_v24   ;;  %4941 = vrot.lane.b32.xlu1 %v4940_v27, %s8517_s20  ;;  %v5115_v27 = vsel %vm56_vm0, %v8091_v22, %v8090_v21  ;;  %v8127_v6 = vld [vmem:[%s8543_s11 + $0x542] ss:$24 sm:$0xf0]  }
 0x360   : > { %v8123_v7 = vld [vmem:[%s8543_s11 + $0x3d2] ss:$24 sm:$0xf]  }
 0x361   : > { %4930 = vrot.lane.b32.xlu0 %v4929_v32, %s8517_s20  ;;  %v4326_v38 = vpop.permute.xlu1 %4325   ;;  %v5104_v32 = vsel %vm56_vm0, %v8088_v61, %v8087_v30  ;;  %v8124_v10 = vld [vmem:[%s8543_s11 + $0x3d2] ss:$24 sm:$0xf0]  }
 0x362   : > { %v4293_v12 = vpop.permute.xlu0 %4292   ;;  %7877 = vst.msk [vmem:[%s8845_s16 + $0x160] sm:$0xff] %vm4207_vm6, %v4326_v38   ;;  %v8132_v15 = vld [vmem:[%s8543_s11 + $0x6d2] ss:$24 sm:$0xf]  }
 0x363   : > { %7868 = vst.msk [vmem:[%s8845_s16 + $0x100] sm:$0xff] %vm4207_vm6, %v4293_v12   ;;  %4963 = vrot.lane.b32.xlu1 %v4962_v13, %s8517_s20  ;;  %v5137_v13 = vsel %vm56_vm0, %v8097_v34, %v8096_v33  ;;  %v8133_v28 = vld [vmem:[%s8543_s11 + $0x6d2] ss:$24 sm:$0xf0]  }
 0x364   : > { %v8129_v18 = vld [vmem:[%s8543_s11 + $0x60a] ss:$24 sm:$0xf]  }
 0x365   : > { %4952 = vrot.lane.b32.xlu0 %v4951_v39, %s8517_s20  ;;  %v4348_v45 = vpop.permute.xlu1 %4347   ;;  %v5126_v39 = vsel %vm56_vm0, %v8094_v37, %v8093_v36  ;;  %v8130_v1 = vld [vmem:[%s8543_s11 + $0x60a] ss:$24 sm:$0xf0]  }
 0x366   : > { %v4315_v51 = vpop.permute.xlu0 %4314   ;;  %7883 = vst.msk [vmem:[%s8845_s16 + $0x1a0] sm:$0xff] %vm4207_vm6, %v4348_v45   ;;  %v8138_v21 = vld [vmem:[%s8543_s11 + $0x90a] ss:$24 sm:$0xf]  }
 0x367   : > { %7874 = vst.msk [vmem:[%s8845_s16 + $0x140] sm:$0xff] %vm4207_vm6, %v4315_v51   ;;  %4985 = vrot.lane.b32.xlu1 %v4984_v43, %s8517_s20  ;;  %v5159_v43 = vsel %vm56_vm0, %v8103_v9, %v8102_v2  ;;  %v8139_v22 = vld [vmem:[%s8543_s11 + $0x90a] ss:$24 sm:$0xf0]  }
 0x368   : > { %v8135_v30 = vld [vmem:[%s8543_s11 + $0x842] ss:$24 sm:$0xf]  }
 0x369   : > { %4974 = vrot.lane.b32.xlu0 %v4973_v35, %s8517_s20  ;;  %v4370_v53 = vpop.permute.xlu1 %4369   ;;  %v5148_v35 = vsel %vm56_vm0, %v8100_v42, %v8099_v41  ;;  %v8136_v61 = vld [vmem:[%s8543_s11 + $0x842] ss:$24 sm:$0xf0]  }
 0x36a   : > { %v4337_v16 = vpop.permute.xlu0 %4336   ;;  %7889 = vst.msk [vmem:[%s8845_s16 + $0x1e0] sm:$0xff] %vm4207_vm6, %v4370_v53   ;;  %v8144_v33 = vld [vmem:[%s8543_s11 + $0xb42] ss:$24 sm:$0xf]  }
 0x36b   : > { %7880 = vst.msk [vmem:[%s8845_s16 + $0x180] sm:$0xff] %vm4207_vm6, %v4337_v16   ;;  %5006 = vrot.lane.b32.xlu1 %v5005_v52, %s8518_s21  ;;  %v5181_v52 = vsel %vm56_vm0, %v8109_v48, %v8108_v47  ;;  %v8145_v34 = vld [vmem:[%s8543_s11 + $0xb42] ss:$24 sm:$0xf0]  }
 0x36c   : > { %v8141_v36 = vld [vmem:[%s8543_s11 + $0x9d2] ss:$24 sm:$0xf]  }
 0x36d   : > { %4996 = vrot.lane.b32.xlu0 %v4995_v31, %s8518_s21  ;;  %v4392_v3 = vpop.permute.xlu1 %4391   ;;  %v5170_v31 = vsel %vm56_vm0, %v8106_v44, %v8105_v50  ;;  %v8142_v37 = vld [vmem:[%s8543_s11 + $0x9d2] ss:$24 sm:$0xf0]  }
 0x36e   : > { %v4359_v26 = vpop.permute.xlu0 %4358   ;;  %7895 = vst.msk [vmem:[%s8845_s16 + $0x220] sm:$0xff] %vm4207_vm6, %v4392_v3   ;;  %v8150_v2 = vld [vmem:[%s8543_s11 + $0xcd2] ss:$24 sm:$0xf]  }
 0x36f   : > { %7886 = vst.msk [vmem:[%s8845_s16 + $0x1c0] sm:$0xff] %vm4207_vm6, %v4359_v26   ;;  %5028 = vrot.lane.b32.xlu1 %v5027_v58, %s8518_s21  ;;  %v5203_v58 = vsel %vm56_vm0, %v8115_v56, %v8114_v54  ;;  %v8151_v9 = vld [vmem:[%s8543_s11 + $0xcd2] ss:$24 sm:$0xf0]  }
 0x370   : > { %v8147_v41 = vld [vmem:[%s8543_s11 + $0xc0a] ss:$24 sm:$0xf]  }
 0x371   : > { %5017 = vrot.lane.b32.xlu0 %v5016_v14, %s8518_s21  ;;  %v4414_v0 = vpop.permute.xlu1 %4413   ;;  %v5192_v14 = vsel %vm56_vm0, %v8112_v57, %v8111_v46  ;;  %v8148_v42 = vld [vmem:[%s8543_s11 + $0xc0a] ss:$24 sm:$0xf0]  }
 0x372   : > { %v4381_v60 = vpop.permute.xlu0 %4380   ;;  %7901 = vst.msk [vmem:[%s8845_s16 + $0x28] sm:$0xff] %vm4207_vm6, %v4414_v0   ;;  %v8156_v47 = vld [vmem:[%s8543_s11 + $0xf0a] ss:$24 sm:$0xf]  }
 0x373   : > { %7892 = vst.msk [vmem:[%s8845_s16 + $0x200] sm:$0xff] %vm4207_vm6, %v4381_v60   ;;  %5050 = vrot.lane.b32.xlu1 %v5049_v49, %s8518_s21  ;;  %v5225_v49 = vsel %vm56_vm0, %v8121_v55, %v8120_v40  ;;  %v8157_v48 = vld [vmem:[%s8543_s11 + $0xf0a] ss:$24 sm:$0xf0]  }
 0x374   : > { %v8153_v50 = vld [vmem:[%s8543_s11 + $0xe42] ss:$24 sm:$0xf]  }
 0x375   : > { %5039 = vrot.lane.b32.xlu0 %v5038_v4, %s8518_s21  ;;  %v4436_v11 = vpop.permute.xlu1 %4435   ;;  %v5214_v4 = vsel %vm56_vm0, %v8118_v19, %v8117_v62  ;;  %v8154_v44 = vld [vmem:[%s8543_s11 + $0xe42] ss:$24 sm:$0xf0]  }
 0x376   : > { %v4403_v8 = vpop.permute.xlu0 %4402   ;;  %7907 = vst.msk [vmem:[%s8845_s16 + $0x68] sm:$0xff] %vm4207_vm6, %v4436_v11   ;;  %v8162_v54 = vld [vmem:[%s8543_s11 + $0x1142] ss:$24 sm:$0xf]  }
 0x377   : > { %7898 = vst.msk [vmem:[%s8845_s16 + $0x8] sm:$0xff] %vm4207_vm6, %v4403_v8   ;;  %5072 = vrot.lane.b32.xlu1 %v5071_v25, %s8518_s21  ;;  %v5247_v25 = vsel %vm56_vm0, %v8127_v6, %v8126_v5  ;;  %v8163_v56 = vld [vmem:[%s8543_s11 + $0x1142] ss:$24 sm:$0xf0]  }
 0x378   : > { %v8159_v46 = vld [vmem:[%s8543_s11 + $0xfd2] ss:$24 sm:$0xf]  }
 0x379   : > { %5061 = vrot.lane.b32.xlu0 %v5060_v23, %s8518_s21  ;;  %v4458_v20 = vpop.permute.xlu1 %4457   ;;  %v5236_v23 = vsel %vm56_vm0, %v8124_v10, %v8123_v7  ;;  %v8160_v57 = vld [vmem:[%s8543_s11 + $0xfd2] ss:$24 sm:$0xf0]  }
 0x37a   : > { %v4425_v63 = vpop.permute.xlu0 %4424   ;;  %7913 = vst.msk [vmem:[%s8845_s16 + $0xa8] sm:$0xff] %vm4207_vm6, %v4458_v20   ;;  %v8168_v40 = vld [vmem:[%s8543_s11 + $0x182] ss:$24 sm:$0xf]  }
 0x37b   : > { %7904 = vst.msk [vmem:[%s8845_s16 + $0x48] sm:$0xff] %vm4207_vm6, %v4425_v63   ;;  %5094 = vrot.lane.b32.xlu1 %v5093_v17, %s8518_s21  ;;  %v5269_v17 = vsel %vm56_vm0, %v8133_v28, %v8132_v15  ;;  %v8169_v55 = vld [vmem:[%s8543_s11 + $0x182] ss:$24 sm:$0xf0]  }
 0x37c   : > { %v8165_v62 = vld [vmem:[%s8543_s11 + $0x12] ss:$24 sm:$0xf]  }
 0x37d   : > { %5083 = vrot.lane.b32.xlu0 %v5082_v59, %s8518_s21  ;;  %v4480_v29 = vpop.permute.xlu1 %4479   ;;  %v5258_v59 = vsel %vm56_vm0, %v8130_v1, %v8129_v18  ;;  %v8166_v19 = vld [vmem:[%s8543_s11 + $0x12] ss:$24 sm:$0xf0]  }
 0x37e   : > { %v4447_v24 = vpop.permute.xlu0 %4446   ;;  %7919 = vst.msk [vmem:[%s8845_s16 + $0xe8] sm:$0xff] %vm4207_vm6, %v4480_v29   ;;  %v8174_v5 = vld [vmem:[%s8543_s11 + $0x312] ss:$24 sm:$0xf]  }
 0x37f   : > { %7910 = vst.msk [vmem:[%s8845_s16 + $0x88] sm:$0xff] %vm4207_vm6, %v4447_v24   ;;  %5116 = vrot.lane.b32.xlu1 %v5115_v27, %s8518_s21  ;;  %v5291_v27 = vsel %vm56_vm0, %v8139_v22, %v8138_v21  ;;  %v8175_v6 = vld [vmem:[%s8543_s11 + $0x312] ss:$24 sm:$0xf0]  }
 0x380   : > { %v8171_v7 = vld [vmem:[%s8543_s11 + $0x24a] ss:$24 sm:$0xf]  }
 0x381   : > { %5105 = vrot.lane.b32.xlu0 %v5104_v32, %s8518_s21  ;;  %v4502_v38 = vpop.permute.xlu1 %4501   ;;  %v5280_v32 = vsel %vm56_vm0, %v8136_v61, %v8135_v30  ;;  %v8172_v10 = vld [vmem:[%s8543_s11 + $0x24a] ss:$24 sm:$0xf0]  }
 0x382   : > { %v4469_v12 = vpop.permute.xlu0 %4468   ;;  %7925 = vst.msk [vmem:[%s8845_s16 + $0x128] sm:$0xff] %vm4207_vm6, %v4502_v38   ;;  %v8180_v15 = vld [vmem:[%s8543_s11 + $0x54a] ss:$24 sm:$0xf]  }
 0x383   : > { %7916 = vst.msk [vmem:[%s8845_s16 + $0xc8] sm:$0xff] %vm4207_vm6, %v4469_v12   ;;  %5138 = vrot.lane.b32.xlu1 %v5137_v13, %s8518_s21  ;;  %v5313_v13 = vsel %vm56_vm0, %v8145_v34, %v8144_v33  ;;  %v8181_v28 = vld [vmem:[%s8543_s11 + $0x54a] ss:$24 sm:$0xf0]  }
 0x384   : > { %v8177_v18 = vld [vmem:[%s8543_s11 + $0x482] ss:$24 sm:$0xf]  }
 0x385   : > { %5127 = vrot.lane.b32.xlu0 %v5126_v39, %s8518_s21  ;;  %v4524_v45 = vpop.permute.xlu1 %4523   ;;  %v5302_v39 = vsel %vm56_vm0, %v8142_v37, %v8141_v36  ;;  %v8178_v1 = vld [vmem:[%s8543_s11 + $0x482] ss:$24 sm:$0xf0]  }
 0x386   : > { %v4491_v51 = vpop.permute.xlu0 %4490   ;;  %7931 = vst.msk [vmem:[%s8845_s16 + $0x168] sm:$0xff] %vm4207_vm6, %v4524_v45   ;;  %v8186_v21 = vld [vmem:[%s8543_s11 + $0x782] ss:$24 sm:$0xf]  }
 0x387   : > { %7922 = vst.msk [vmem:[%s8845_s16 + $0x108] sm:$0xff] %vm4207_vm6, %v4491_v51   ;;  %5160 = vrot.lane.b32.xlu1 %v5159_v43, %s8518_s21  ;;  %v5335_v43 = vsel %vm56_vm0, %v8151_v9, %v8150_v2  ;;  %v8187_v22 = vld [vmem:[%s8543_s11 + $0x782] ss:$24 sm:$0xf0]  }
 0x388   : > { %v8183_v30 = vld [vmem:[%s8543_s11 + $0x612] ss:$24 sm:$0xf]  }
 0x389   : > { %5149 = vrot.lane.b32.xlu0 %v5148_v35, %s8518_s21  ;;  %v4546_v53 = vpop.permute.xlu1 %4545   ;;  %v5324_v35 = vsel %vm56_vm0, %v8148_v42, %v8147_v41  ;;  %v8184_v61 = vld [vmem:[%s8543_s11 + $0x612] ss:$24 sm:$0xf0]  }
 0x38a   : > { %v4513_v16 = vpop.permute.xlu0 %4512   ;;  %7937 = vst.msk [vmem:[%s8845_s16 + $0x1a8] sm:$0xff] %vm4207_vm6, %v4546_v53   ;;  %v8192_v33 = vld [vmem:[%s8543_s11 + $0x912] ss:$24 sm:$0xf]  }
 0x38b   : > { %7928 = vst.msk [vmem:[%s8845_s16 + $0x148] sm:$0xff] %vm4207_vm6, %v4513_v16   ;;  %5182 = vrot.lane.b32.xlu1 %v5181_v52, %s8518_s21  ;;  %v5357_v52 = vsel %vm56_vm0, %v8157_v48, %v8156_v47  ;;  %v8193_v34 = vld [vmem:[%s8543_s11 + $0x912] ss:$24 sm:$0xf0]  }
 0x38c   : > { %v8189_v36 = vld [vmem:[%s8543_s11 + $0x84a] ss:$24 sm:$0xf]  }
 0x38d   : > { %5171 = vrot.lane.b32.xlu0 %v5170_v31, %s8518_s21  ;;  %v4568_v3 = vpop.permute.xlu1 %4567   ;;  %v5346_v31 = vsel %vm56_vm0, %v8154_v44, %v8153_v50  ;;  %v8190_v37 = vld [vmem:[%s8543_s11 + $0x84a] ss:$24 sm:$0xf0]  }
 0x38e   : > { %v4535_v26 = vpop.permute.xlu0 %4534   ;;  %7943 = vst.msk [vmem:[%s8845_s16 + $0x1e8] sm:$0xff] %vm4207_vm6, %v4568_v3   ;;  %v8198_v2 = vld [vmem:[%s8543_s11 + $0xb4a] ss:$24 sm:$0xf]  }
 0x38f   : > { %7934 = vst.msk [vmem:[%s8845_s16 + $0x188] sm:$0xff] %vm4207_vm6, %v4535_v26   ;;  %5204 = vrot.lane.b32.xlu1 %v5203_v58, %s8518_s21  ;;  %v5379_v58 = vsel %vm56_vm0, %v8163_v56, %v8162_v54  ;;  %v8199_v9 = vld [vmem:[%s8543_s11 + $0xb4a] ss:$24 sm:$0xf0]  }
 0x390   : > { %v8195_v41 = vld [vmem:[%s8543_s11 + $0xa82] ss:$24 sm:$0xf]  }
 0x391   : > { %5193 = vrot.lane.b32.xlu0 %v5192_v14, %s8518_s21  ;;  %v4590_v0 = vpop.permute.xlu1 %4589   ;;  %v5368_v14 = vsel %vm56_vm0, %v8160_v57, %v8159_v46  ;;  %v8196_v42 = vld [vmem:[%s8543_s11 + $0xa82] ss:$24 sm:$0xf0]  }
 0x392   : > { %v4557_v60 = vpop.permute.xlu0 %4556   ;;  %7949 = vst.msk [vmem:[%s8845_s16 + $0x228] sm:$0xff] %vm4207_vm6, %v4590_v0   ;;  %v8204_v47 = vld [vmem:[%s8543_s11 + $0xd82] ss:$24 sm:$0xf]  }
 0x393   : > { %7940 = vst.msk [vmem:[%s8845_s16 + $0x1c8] sm:$0xff] %vm4207_vm6, %v4557_v60   ;;  %5226 = vrot.lane.b32.xlu1 %v5225_v49, %s8518_s21  ;;  %v5401_v49 = vsel %vm56_vm0, %v8169_v55, %v8168_v40  ;;  %v8205_v48 = vld [vmem:[%s8543_s11 + $0xd82] ss:$24 sm:$0xf0]  }
 0x394   : > { %v8201_v50 = vld [vmem:[%s8543_s11 + $0xc12] ss:$24 sm:$0xf]  }
 0x395   : > { %5215 = vrot.lane.b32.xlu0 %v5214_v4, %s8518_s21  ;;  %v4612_v11 = vpop.permute.xlu1 %4611   ;;  %v5390_v4 = vsel %vm56_vm0, %v8166_v19, %v8165_v62  ;;  %v8202_v44 = vld [vmem:[%s8543_s11 + $0xc12] ss:$24 sm:$0xf0]  }
 0x396   : > { %v4579_v8 = vpop.permute.xlu0 %4578   ;;  %7955 = vst.msk [vmem:[%s8845_s16 + $0x30] sm:$0xff] %vm4207_vm6, %v4612_v11   ;;  %v8210_v54 = vld [vmem:[%s8543_s11 + $0xf12] ss:$24 sm:$0xf]  }
 0x397   : > { %7946 = vst.msk [vmem:[%s8845_s16 + $0x208] sm:$0xff] %vm4207_vm6, %v4579_v8   ;;  %5248 = vrot.lane.b32.xlu1 %v5247_v25, %s8518_s21  ;;  %v5423_v25 = vsel %vm56_vm0, %v8175_v6, %v8174_v5  ;;  %v8211_v56 = vld [vmem:[%s8543_s11 + $0xf12] ss:$24 sm:$0xf0]  }
 0x398   : > { %v8207_v46 = vld [vmem:[%s8543_s11 + $0xe4a] ss:$24 sm:$0xf]  }
 0x399   : > { %5237 = vrot.lane.b32.xlu0 %v5236_v23, %s8518_s21  ;;  %v4634_v20 = vpop.permute.xlu1 %4633   ;;  %v5412_v23 = vsel %vm56_vm0, %v8172_v10, %v8171_v7  ;;  %v8208_v57 = vld [vmem:[%s8543_s11 + $0xe4a] ss:$24 sm:$0xf0]  }
 0x39a   : > { %v4601_v63 = vpop.permute.xlu0 %4600   ;;  %7961 = vst.msk [vmem:[%s8845_s16 + $0x70] sm:$0xff] %vm4207_vm6, %v4634_v20   ;;  %v8216_v40 = vld [vmem:[%s8543_s11 + $0x114a] ss:$24 sm:$0xf]  }
 0x39b   : > { %7952 = vst.msk [vmem:[%s8845_s16 + $0x10] sm:$0xff] %vm4207_vm6, %v4601_v63   ;;  %5270 = vrot.lane.b32.xlu1 %v5269_v17, %s8518_s21  ;;  %v5445_v17 = vsel %vm56_vm0, %v8181_v28, %v8180_v15  ;;  %v8217_v55 = vld [vmem:[%s8543_s11 + $0x114a] ss:$24 sm:$0xf0]  }
 0x39c   : > { %v8213_v62 = vld [vmem:[%s8543_s11 + $0x1082] ss:$24 sm:$0xf]  }
 0x39d   : > { %5259 = vrot.lane.b32.xlu0 %v5258_v59, %s8518_s21  ;;  %v4656_v29 = vpop.permute.xlu1 %4655   ;;  %v5434_v59 = vsel %vm56_vm0, %v8178_v1, %v8177_v18  ;;  %v8214_v19 = vld [vmem:[%s8543_s11 + $0x1082] ss:$24 sm:$0xf0]  }
 0x39e   : > { %v4623_v24 = vpop.permute.xlu0 %4622   ;;  %7967 = vst.msk [vmem:[%s8845_s16 + $0xb0] sm:$0xff] %vm4207_vm6, %v4656_v29   ;;  %v8222_v5 = vld [vmem:[%s8543_s11 + $0x18a] ss:$24 sm:$0xf]  }
 0x39f   : > { %7958 = vst.msk [vmem:[%s8845_s16 + $0x50] sm:$0xff] %vm4207_vm6, %v4623_v24   ;;  %5292 = vrot.lane.b32.xlu1 %v5291_v27, %s8518_s21  ;;  %v5467_v27 = vsel %vm56_vm0, %v8187_v22, %v8186_v21  ;;  %v8223_v6 = vld [vmem:[%s8543_s11 + $0x18a] ss:$24 sm:$0xf0]  }
 0x3a0   : > { %v8219_v7 = vld [vmem:[%s8543_s11 + $0xc2] ss:$24 sm:$0xf]  }
 0x3a1   : > { %5281 = vrot.lane.b32.xlu0 %v5280_v32, %s8518_s21  ;;  %v4678_v38 = vpop.permute.xlu1 %4677   ;;  %v5456_v32 = vsel %vm56_vm0, %v8184_v61, %v8183_v30  ;;  %v8220_v10 = vld [vmem:[%s8543_s11 + $0xc2] ss:$24 sm:$0xf0]  }
 0x3a2   : > { %v4645_v12 = vpop.permute.xlu0 %4644   ;;  %7973 = vst.msk [vmem:[%s8845_s16 + $0xf0] sm:$0xff] %vm4207_vm6, %v4678_v38   ;;  %v8228_v15 = vld [vmem:[%s8543_s11 + $0x3c2] ss:$24 sm:$0xf]  }
 0x3a3   : > { %7964 = vst.msk [vmem:[%s8845_s16 + $0x90] sm:$0xff] %vm4207_vm6, %v4645_v12   ;;  %5314 = vrot.lane.b32.xlu1 %v5313_v13, %s8518_s21  ;;  %v5489_v13 = vsel %vm56_vm0, %v8193_v34, %v8192_v33  ;;  %v8229_v28 = vld [vmem:[%s8543_s11 + $0x3c2] ss:$24 sm:$0xf0]  }
 0x3a4   : > { %v8225_v18 = vld [vmem:[%s8543_s11 + $0x252] ss:$24 sm:$0xf]  }
 0x3a5   : > { %5303 = vrot.lane.b32.xlu0 %v5302_v39, %s8518_s21  ;;  %v4700_v45 = vpop.permute.xlu1 %4699   ;;  %v5478_v39 = vsel %vm56_vm0, %v8190_v37, %v8189_v36  ;;  %v8226_v1 = vld [vmem:[%s8543_s11 + $0x252] ss:$24 sm:$0xf0]  }
 0x3a6   : > { %v4667_v51 = vpop.permute.xlu0 %4666   ;;  %7979 = vst.msk [vmem:[%s8845_s16 + $0x130] sm:$0xff] %vm4207_vm6, %v4700_v45   ;;  %v8234_v21 = vld [vmem:[%s8543_s11 + $0x552] ss:$24 sm:$0xf]  }
 0x3a7   : > { %7970 = vst.msk [vmem:[%s8845_s16 + $0xd0] sm:$0xff] %vm4207_vm6, %v4667_v51   ;;  %5336 = vrot.lane.b32.xlu1 %v5335_v43, %s8518_s21  ;;  %v5511_v43 = vsel %vm56_vm0, %v8199_v9, %v8198_v2  ;;  %v8235_v22 = vld [vmem:[%s8543_s11 + $0x552] ss:$24 sm:$0xf0]  }
 0x3a8   : > { %v8231_v30 = vld [vmem:[%s8543_s11 + $0x48a] ss:$24 sm:$0xf]  }
 0x3a9   : > { %5325 = vrot.lane.b32.xlu0 %v5324_v35, %s8518_s21  ;;  %v4722_v53 = vpop.permute.xlu1 %4721   ;;  %v5500_v35 = vsel %vm56_vm0, %v8196_v42, %v8195_v41  ;;  %v8232_v61 = vld [vmem:[%s8543_s11 + $0x48a] ss:$24 sm:$0xf0]  }
 0x3aa   : > { %v4689_v16 = vpop.permute.xlu0 %4688   ;;  %7985 = vst.msk [vmem:[%s8845_s16 + $0x170] sm:$0xff] %vm4207_vm6, %v4722_v53   ;;  %v8240_v33 = vld [vmem:[%s8543_s11 + $0x78a] ss:$24 sm:$0xf]  }
 0x3ab   : > { %7976 = vst.msk [vmem:[%s8845_s16 + $0x110] sm:$0xff] %vm4207_vm6, %v4689_v16   ;;  %5358 = vrot.lane.b32.xlu1 %v5357_v52, %s8518_s21  ;;  %v5533_v52 = vsel %vm56_vm0, %v8205_v48, %v8204_v47  ;;  %v8241_v34 = vld [vmem:[%s8543_s11 + $0x78a] ss:$24 sm:$0xf0]  }
 0x3ac   : > { %v8237_v36 = vld [vmem:[%s8543_s11 + $0x6c2] ss:$24 sm:$0xf]  }
 0x3ad   : > { %5347 = vrot.lane.b32.xlu0 %v5346_v31, %s8518_s21  ;;  %v4744_v3 = vpop.permute.xlu1 %4743   ;;  %v5522_v31 = vsel %vm56_vm0, %v8202_v44, %v8201_v50  ;;  %v8238_v37 = vld [vmem:[%s8543_s11 + $0x6c2] ss:$24 sm:$0xf0]  }
 0x3ae   : > { %v4711_v26 = vpop.permute.xlu0 %4710   ;;  %7991 = vst.msk [vmem:[%s8845_s16 + $0x1b0] sm:$0xff] %vm4207_vm6, %v4744_v3   ;;  %v8246_v2 = vld [vmem:[%s8543_s11 + $0x9c2] ss:$24 sm:$0xf]  }
 0x3af   : > { %7982 = vst.msk [vmem:[%s8845_s16 + $0x150] sm:$0xff] %vm4207_vm6, %v4711_v26   ;;  %5380 = vrot.lane.b32.xlu1 %v5379_v58, %s8518_s21  ;;  %v5555_v58 = vsel %vm56_vm0, %v8211_v56, %v8210_v54  ;;  %v8247_v9 = vld [vmem:[%s8543_s11 + $0x9c2] ss:$24 sm:$0xf0]  }
 0x3b0   : > { %v8243_v41 = vld [vmem:[%s8543_s11 + $0x852] ss:$24 sm:$0xf]  }
 0x3b1   : > { %5369 = vrot.lane.b32.xlu0 %v5368_v14, %s8518_s21  ;;  %v4766_v0 = vpop.permute.xlu1 %4765   ;;  %v5544_v14 = vsel %vm56_vm0, %v8208_v57, %v8207_v46  ;;  %v8244_v42 = vld [vmem:[%s8543_s11 + $0x852] ss:$24 sm:$0xf0]  }
 0x3b2   : > { %v4733_v60 = vpop.permute.xlu0 %4732   ;;  %7997 = vst.msk [vmem:[%s8845_s16 + $0x1f0] sm:$0xff] %vm4207_vm6, %v4766_v0   ;;  %v8252_v47 = vld [vmem:[%s8543_s11 + $0xb52] ss:$24 sm:$0xf]  }
 0x3b3   : > { %7988 = vst.msk [vmem:[%s8845_s16 + $0x190] sm:$0xff] %vm4207_vm6, %v4733_v60   ;;  %5402 = vrot.lane.b32.xlu1 %v5401_v49, %s8518_s21  ;;  %v5577_v49 = vsel %vm56_vm0, %v8217_v55, %v8216_v40  ;;  %v8253_v48 = vld [vmem:[%s8543_s11 + $0xb52] ss:$24 sm:$0xf0]  }
 0x3b4   : > { %v8249_v50 = vld [vmem:[%s8543_s11 + $0xa8a] ss:$24 sm:$0xf]  }
 0x3b5   : > { %5391 = vrot.lane.b32.xlu0 %v5390_v4, %s8518_s21  ;;  %v4788_v11 = vpop.permute.xlu1 %4787   ;;  %v5566_v4 = vsel %vm56_vm0, %v8214_v19, %v8213_v62  ;;  %v8250_v44 = vld [vmem:[%s8543_s11 + $0xa8a] ss:$24 sm:$0xf0]  }
 0x3b6   : > { %v4755_v8 = vpop.permute.xlu0 %4754   ;;  %8003 = vst.msk [vmem:[%s8845_s16 + $0x230] sm:$0xff] %vm4207_vm6, %v4788_v11   ;;  %v8258_v54 = vld [vmem:[%s8543_s11 + $0xd8a] ss:$24 sm:$0xf]  }
 0x3b7   : > { %7994 = vst.msk [vmem:[%s8845_s16 + $0x1d0] sm:$0xff] %vm4207_vm6, %v4755_v8   ;;  %5424 = vrot.lane.b32.xlu1 %v5423_v25, %s8518_s21  ;;  %v5599_v25 = vsel %vm56_vm0, %v8223_v6, %v8222_v5  ;;  %v8259_v56 = vld [vmem:[%s8543_s11 + $0xd8a] ss:$24 sm:$0xf0]  }
 0x3b8   : > { %v8255_v46 = vld [vmem:[%s8543_s11 + $0xcc2] ss:$24 sm:$0xf]  }
 0x3b9   : > { %5413 = vrot.lane.b32.xlu0 %v5412_v23, %s8518_s21  ;;  %v4810_v20 = vpop.permute.xlu1 %4809   ;;  %v5588_v23 = vsel %vm56_vm0, %v8220_v10, %v8219_v7  ;;  %v8256_v57 = vld [vmem:[%s8543_s11 + $0xcc2] ss:$24 sm:$0xf0]  }
 0x3ba   : > { %v4777_v63 = vpop.permute.xlu0 %4776   ;;  %8009 = vst.msk [vmem:[%s8845_s16 + $0x38] sm:$0xff] %vm4207_vm6, %v4810_v20   ;;  %v8264_v40 = vld [vmem:[%s8543_s11 + $0xfc2] ss:$24 sm:$0xf]  }
 0x3bb   : > { %8000 = vst.msk [vmem:[%s8845_s16 + $0x210] sm:$0xff] %vm4207_vm6, %v4777_v63   ;;  %5446 = vrot.lane.b32.xlu1 %v5445_v17, %s8518_s21  ;;  %v5621_v17 = vsel %vm56_vm0, %v8229_v28, %v8228_v15  ;;  %v8265_v55 = vld [vmem:[%s8543_s11 + $0xfc2] ss:$24 sm:$0xf0]  }
 0x3bc   : > { %v8261_v62 = vld [vmem:[%s8543_s11 + $0xe52] ss:$24 sm:$0xf]   ;;  %v8275_v15 = vld [vmem:[%s8543_s11 + $0xc9] ss:$24 sm:$0xf]  }
 0x3bd   : > { %5435 = vrot.lane.b32.xlu0 %v5434_v59, %s8518_s21  ;;  %v4832_v29 = vpop.permute.xlu1 %4831   ;;  %v5610_v59 = vsel %vm56_vm0, %v8226_v1, %v8225_v18  ;;  %v8262_v19 = vld [vmem:[%s8543_s11 + $0xe52] ss:$24 sm:$0xf0]   ;;  %v8276_v28 = vld [vmem:[%s8543_s11 + $0xc9] ss:$24 sm:$0xf0]  }
 0x3be   : > { %v4799_v24 = vpop.permute.xlu0 %4798   ;;  %8015 = vst.msk [vmem:[%s8845_s16 + $0x78] sm:$0xff] %vm4207_vm6, %v4832_v29   ;;  %v8270_v5 = vld [vmem:[%s8543_s11 + $0x1152] ss:$24 sm:$0xf]  }
 0x3bf   : > { %8006 = vst.msk [vmem:[%s8845_s16 + $0x18] sm:$0xff] %vm4207_vm6, %v4799_v24   ;;  %5468 = vrot.lane.b32.xlu1 %v5467_v27, %s8518_s21  ;;  %v5643_v27 = vsel %vm56_vm0, %v8235_v22, %v8234_v21  ;;  %v8271_v6 = vld [vmem:[%s8543_s11 + $0x1152] ss:$24 sm:$0xf0]  }
 0x3c0   : > { %v8267_v7 = vld [vmem:[%s8543_s11 + $0x108a] ss:$24 sm:$0xf]   ;;  %v8273_v18 = vld [vmem:[%s8543_s11 + $0x1] ss:$24 sm:$0xf]  }
 0x3c1   : > { %5457 = vrot.lane.b32.xlu0 %v5456_v32, %s8518_s21  ;;  %v4854_v38 = vpop.permute.xlu1 %4853   ;;  %v5632_v32 = vsel %vm56_vm0, %v8232_v61, %v8231_v30  ;;  %v8268_v10 = vld [vmem:[%s8543_s11 + $0x108a] ss:$24 sm:$0xf0]   ;;  %v8274_v1 = vld [vmem:[%s8543_s11 + $0x1] ss:$24 sm:$0xf0]  }
 0x3c2   : > { %v4821_v12 = vpop.permute.xlu0 %4820   ;;  %8021 = vst.msk [vmem:[%s8845_s16 + $0xb8] sm:$0xff] %vm4207_vm6, %v4854_v38   ;;  %v8281_v21 = vld [vmem:[%s8543_s11 + $0x301] ss:$24 sm:$0xf]  }
 0x3c3   : > { %8012 = vst.msk [vmem:[%s8845_s16 + $0x58] sm:$0xff] %vm4207_vm6, %v4821_v12   ;;  %5490 = vrot.lane.b32.xlu1 %v5489_v13, %s8518_s21  ;;  %v5665_v13 = vsel %vm56_vm0, %v8241_v34, %v8240_v33  ;;  %v8282_v22 = vld [vmem:[%s8543_s11 + $0x301] ss:$24 sm:$0xf0]  }
 0x3c4   : > { %v8278_v30 = vld [vmem:[%s8543_s11 + $0x191] ss:$24 sm:$0xf]  }
 0x3c5   : > { %5479 = vrot.lane.b32.xlu0 %v5478_v39, %s8518_s21  ;;  %v4876_v45 = vpop.permute.xlu1 %4875   ;;  %v5654_v39 = vsel %vm56_vm0, %v8238_v37, %v8237_v36  ;;  %v8279_v61 = vld [vmem:[%s8543_s11 + $0x191] ss:$24 sm:$0xf0]  }
 0x3c6   : > { %v4843_v51 = vpop.permute.xlu0 %4842   ;;  %8027 = vst.msk [vmem:[%s8845_s16 + $0xf8] sm:$0xff] %vm4207_vm6, %v4876_v45   ;;  %v8287_v33 = vld [vmem:[%s8543_s11 + $0x491] ss:$24 sm:$0xf]  }
 0x3c7   : > { %8018 = vst.msk [vmem:[%s8845_s16 + $0x98] sm:$0xff] %vm4207_vm6, %v4843_v51   ;;  %5512 = vrot.lane.b32.xlu1 %v5511_v43, %s8518_s21  ;;  %v5687_v43 = vsel %vm56_vm0, %v8247_v9, %v8246_v2  ;;  %v8288_v34 = vld [vmem:[%s8543_s11 + $0x491] ss:$24 sm:$0xf0]  }
 0x3c8   : > { %v8284_v36 = vld [vmem:[%s8543_s11 + $0x3c9] ss:$24 sm:$0xf]  }
 0x3c9   : > { %5501 = vrot.lane.b32.xlu0 %v5500_v35, %s8518_s21  ;;  %v4898_v53 = vpop.permute.xlu1 %4897   ;;  %v5676_v35 = vsel %vm56_vm0, %v8244_v42, %v8243_v41  ;;  %v8285_v37 = vld [vmem:[%s8543_s11 + $0x3c9] ss:$24 sm:$0xf0]  }
 0x3ca   : > { %v4865_v16 = vpop.permute.xlu0 %4864   ;;  %8033 = vst.msk [vmem:[%s8845_s16 + $0x138] sm:$0xff] %vm4207_vm6, %v4898_v53   ;;  %v8293_v2 = vld [vmem:[%s8543_s11 + $0x6c9] ss:$24 sm:$0xf]  }
 0x3cb   : > { %8024 = vst.msk [vmem:[%s8845_s16 + $0xd8] sm:$0xff] %vm4207_vm6, %v4865_v16   ;;  %5534 = vrot.lane.b32.xlu1 %v5533_v52, %s8518_s21  ;;  %v5709_v52 = vsel %vm56_vm0, %v8253_v48, %v8252_v47  ;;  %v8294_v9 = vld [vmem:[%s8543_s11 + $0x6c9] ss:$24 sm:$0xf0]  }
 0x3cc   : > { %v8290_v41 = vld [vmem:[%s8543_s11 + $0x601] ss:$24 sm:$0xf]  }
 0x3cd   : > { %5523 = vrot.lane.b32.xlu0 %v5522_v31, %s8518_s21  ;;  %v4920_v3 = vpop.permute.xlu1 %4919   ;;  %v5698_v31 = vsel %vm56_vm0, %v8250_v44, %v8249_v50  ;;  %v8291_v42 = vld [vmem:[%s8543_s11 + $0x601] ss:$24 sm:$0xf0]  }
 0x3ce   : > { %v4887_v26 = vpop.permute.xlu0 %4886   ;;  %8039 = vst.msk [vmem:[%s8845_s16 + $0x178] sm:$0xff] %vm4207_vm6, %v4920_v3   ;;  %v8299_v47 = vld [vmem:[%s8543_s11 + $0x901] ss:$24 sm:$0xf]  }
 0x3cf   : > { %8030 = vst.msk [vmem:[%s8845_s16 + $0x118] sm:$0xff] %vm4207_vm6, %v4887_v26   ;;  %5556 = vrot.lane.b32.xlu1 %v5555_v58, %s8518_s21  ;;  %v5731_v58 = vsel %vm56_vm0, %v8259_v56, %v8258_v54  ;;  %v8300_v48 = vld [vmem:[%s8543_s11 + $0x901] ss:$24 sm:$0xf0]  }
 0x3d0   : > { %v8296_v50 = vld [vmem:[%s8543_s11 + $0x791] ss:$24 sm:$0xf]  }
 0x3d1   : > { %5545 = vrot.lane.b32.xlu0 %v5544_v14, %s8518_s21  ;;  %v4942_v0 = vpop.permute.xlu1 %4941   ;;  %v5720_v14 = vsel %vm56_vm0, %v8256_v57, %v8255_v46  ;;  %v8297_v44 = vld [vmem:[%s8543_s11 + $0x791] ss:$24 sm:$0xf0]  }
 0x3d2   : > { %v4909_v60 = vpop.permute.xlu0 %4908   ;;  %8045 = vst.msk [vmem:[%s8845_s16 + $0x1b8] sm:$0xff] %vm4207_vm6, %v4942_v0   ;;  %v8305_v54 = vld [vmem:[%s8543_s11 + $0xa91] ss:$24 sm:$0xf]  }
 0x3d3   : > { %8036 = vst.msk [vmem:[%s8845_s16 + $0x158] sm:$0xff] %vm4207_vm6, %v4909_v60   ;;  %5578 = vrot.lane.b32.xlu1 %v5577_v49, %s8518_s21  ;;  %v5753_v49 = vsel %vm56_vm0, %v8265_v55, %v8264_v40  ;;  %v8306_v56 = vld [vmem:[%s8543_s11 + $0xa91] ss:$24 sm:$0xf0]  }
 0x3d4   : > { %v8302_v46 = vld [vmem:[%s8543_s11 + $0x9c9] ss:$24 sm:$0xf]  }
 0x3d5   : > { %5567 = vrot.lane.b32.xlu0 %v5566_v4, %s8518_s21  ;;  %v4964_v11 = vpop.permute.xlu1 %4963   ;;  %v5742_v4 = vsel %vm56_vm0, %v8262_v19, %v8261_v62  ;;  %v8303_v57 = vld [vmem:[%s8543_s11 + $0x9c9] ss:$24 sm:$0xf0]  }
 0x3d6   : > { %v4931_v8 = vpop.permute.xlu0 %4930   ;;  %8051 = vst.msk [vmem:[%s8845_s16 + $0x1f8] sm:$0xff] %vm4207_vm6, %v4964_v11   ;;  %v8311_v40 = vld [vmem:[%s8543_s11 + $0xcc9] ss:$24 sm:$0xf]  }
 0x3d7   : > { %8042 = vst.msk [vmem:[%s8845_s16 + $0x198] sm:$0xff] %vm4207_vm6, %v4931_v8   ;;  %5600 = vrot.lane.b32.xlu1 %v5599_v25, %s8518_s21  ;;  %v5775_v25 = vsel %vm56_vm0, %v8271_v6, %v8270_v5  ;;  %v8312_v55 = vld [vmem:[%s8543_s11 + $0xcc9] ss:$24 sm:$0xf0]  }
 0x3d8   : > { %v8308_v62 = vld [vmem:[%s8543_s11 + $0xc01] ss:$24 sm:$0xf]  }
 0x3d9   : > { %5589 = vrot.lane.b32.xlu0 %v5588_v23, %s8518_s21  ;;  %v4986_v20 = vpop.permute.xlu1 %4985   ;;  %v5764_v23 = vsel %vm56_vm0, %v8268_v10, %v8267_v7  ;;  %v8309_v19 = vld [vmem:[%s8543_s11 + $0xc01] ss:$24 sm:$0xf0]  }
 0x3da   : > { %v4953_v63 = vpop.permute.xlu0 %4952   ;;  %8057 = vst.msk [vmem:[%s8845_s16 + $0x238] sm:$0xff] %vm4207_vm6, %v4986_v20   ;;  %v8317_v5 = vld [vmem:[%s8543_s11 + $0xf01] ss:$24 sm:$0xf]  }
 0x3db   : > { %8048 = vst.msk [vmem:[%s8845_s16 + $0x1d8] sm:$0xff] %vm4207_vm6, %v4953_v63   ;;  %5622 = vrot.lane.b32.xlu1 %v5621_v17, %s8518_s21  ;;  %v5796_v17 = vsel %vm56_vm0, %v8276_v28, %v8275_v15  ;;  %v8318_v6 = vld [vmem:[%s8543_s11 + $0xf01] ss:$24 sm:$0xf0]  }
 0x3dc   : > { %v8314_v7 = vld [vmem:[%s8543_s11 + $0xd91] ss:$24 sm:$0xf]  }
 0x3dd   : > { %5611 = vrot.lane.b32.xlu0 %v5610_v59, %s8518_s21  ;;  %v5007_v29 = vpop.permute.xlu1 %5006   ;;  %v5786_v59 = vsel %vm56_vm0, %v8274_v1, %v8273_v18  ;;  %v8315_v10 = vld [vmem:[%s8543_s11 + $0xd91] ss:$24 sm:$0xf0]  }
 0x3de   : > { %v4975_v24 = vpop.permute.xlu0 %4974   ;;  %8062 = vst.msk [vmem:[%s8845_s16 + $0x20] sm:$0xff] %vm4998_vm7, %v5007_v29   ;;  %v8323_v15 = vld [vmem:[%s8543_s11 + $0x1091] ss:$24 sm:$0xf]  }
 0x3df   : > { %8054 = vst.msk [vmem:[%s8845_s16 + $0x218] sm:$0xff] %vm4207_vm6, %v4975_v24   ;;  %5644 = vrot.lane.b32.xlu1 %v5643_v27, %s8518_s21  ;;  %v5818_v27 = vsel %vm56_vm0, %v8282_v22, %v8281_v21  ;;  %v8324_v28 = vld [vmem:[%s8543_s11 + $0x1091] ss:$24 sm:$0xf0]  }
 0x3e0   : > { %v8320_v18 = vld [vmem:[%s8543_s11 + $0xfc9] ss:$24 sm:$0xf]  }
 0x3e1   : > { %5633 = vrot.lane.b32.xlu0 %v5632_v32, %s8518_s21  ;;  %v5029_v38 = vpop.permute.xlu1 %5028   ;;  %v5807_v32 = vsel %vm56_vm0, %v8279_v61, %v8278_v30  ;;  %v8321_v1 = vld [vmem:[%s8543_s11 + $0xfc9] ss:$24 sm:$0xf0]  }
 0x3e2   : > { %v4997_v12 = vpop.permute.xlu0 %4996   ;;  %8068 = vst.msk [vmem:[%s8845_s16 + $0x60] sm:$0xff] %vm4998_vm7, %v5029_v38   ;;  %v8329_v21 = vld [vmem:[%s8543_s11 + $0xd1] ss:$24 sm:$0xf]  }
 0x3e3   : > { %4999 = vst.msk [vmem:[%s8845_s16] sm:$0xff] %vm4998_vm7, %v4997_v12   ;;  %5666 = vrot.lane.b32.xlu1 %v5665_v13, %s8518_s21  ;;  %v5840_v13 = vsel %vm56_vm0, %v8288_v34, %v8287_v33  ;;  %v8330_v22 = vld [vmem:[%s8543_s11 + $0xd1] ss:$24 sm:$0xf0]  }
 0x3e4   : > { %v8326_v30 = vld [vmem:[%s8543_s11 + $0x9] ss:$24 sm:$0xf]  }
 0x3e5   : > { %5655 = vrot.lane.b32.xlu0 %v5654_v39, %s8518_s21  ;;  %v5051_v45 = vpop.permute.xlu1 %5050   ;;  %v5829_v39 = vsel %vm56_vm0, %v8285_v37, %v8284_v36  ;;  %v8327_v61 = vld [vmem:[%s8543_s11 + $0x9] ss:$24 sm:$0xf0]  }
 0x3e6   : > { %v5018_v51 = vpop.permute.xlu0 %5017   ;;  %8074 = vst.msk [vmem:[%s8845_s16 + $0xa0] sm:$0xff] %vm4998_vm7, %v5051_v45   ;;  %v8335_v33 = vld [vmem:[%s8543_s11 + $0x309] ss:$24 sm:$0xf]  }
 0x3e7   : > { %8065 = vst.msk [vmem:[%s8845_s16 + $0x40] sm:$0xff] %vm4998_vm7, %v5018_v51   ;;  %5688 = vrot.lane.b32.xlu1 %v5687_v43, %s8518_s21  ;;  %v5862_v43 = vsel %vm56_vm0, %v8294_v9, %v8293_v2  ;;  %v8336_v34 = vld [vmem:[%s8543_s11 + $0x309] ss:$24 sm:$0xf0]  }
 0x3e8   : > { %v8332_v36 = vld [vmem:[%s8543_s11 + $0x241] ss:$24 sm:$0xf]  }
 0x3e9   : > { %5677 = vrot.lane.b32.xlu0 %v5676_v35, %s8518_s21  ;;  %v5073_v53 = vpop.permute.xlu1 %5072   ;;  %v5851_v35 = vsel %vm56_vm0, %v8291_v42, %v8290_v41  ;;  %v8333_v37 = vld [vmem:[%s8543_s11 + $0x241] ss:$24 sm:$0xf0]  }
 0x3ea   : > { %v5040_v16 = vpop.permute.xlu0 %5039   ;;  %8080 = vst.msk [vmem:[%s8845_s16 + $0xe0] sm:$0xff] %vm4998_vm7, %v5073_v53   ;;  %v8341_v2 = vld [vmem:[%s8543_s11 + $0x541] ss:$24 sm:$0xf]  }
 0x3eb   : > { %8071 = vst.msk [vmem:[%s8845_s16 + $0x80] sm:$0xff] %vm4998_vm7, %v5040_v16   ;;  %5710 = vrot.lane.b32.xlu1 %v5709_v52, %s8518_s21  ;;  %v5884_v52 = vsel %vm56_vm0, %v8300_v48, %v8299_v47  ;;  %v8342_v9 = vld [vmem:[%s8543_s11 + $0x541] ss:$24 sm:$0xf0]  }
 0x3ec   : > { %v8338_v41 = vld [vmem:[%s8543_s11 + $0x3d1] ss:$24 sm:$0xf]  }
 0x3ed   : > { %5699 = vrot.lane.b32.xlu0 %v5698_v31, %s8518_s21  ;;  %v5095_v3 = vpop.permute.xlu1 %5094   ;;  %v5873_v31 = vsel %vm56_vm0, %v8297_v44, %v8296_v50  ;;  %v8339_v42 = vld [vmem:[%s8543_s11 + $0x3d1] ss:$24 sm:$0xf0]  }
 0x3ee   : > { %v5062_v26 = vpop.permute.xlu0 %5061   ;;  %8086 = vst.msk [vmem:[%s8845_s16 + $0x120] sm:$0xff] %vm4998_vm7, %v5095_v3   ;;  %v8347_v47 = vld [vmem:[%s8543_s11 + $0x6d1] ss:$24 sm:$0xf]  }
 0x3ef   : > { %8077 = vst.msk [vmem:[%s8845_s16 + $0xc0] sm:$0xff] %vm4998_vm7, %v5062_v26   ;;  %5732 = vrot.lane.b32.xlu1 %v5731_v58, %s8518_s21  ;;  %v5906_v58 = vsel %vm56_vm0, %v8306_v56, %v8305_v54  ;;  %v8348_v48 = vld [vmem:[%s8543_s11 + $0x6d1] ss:$24 sm:$0xf0]  }
 0x3f0   : > { %v8344_v50 = vld [vmem:[%s8543_s11 + $0x609] ss:$24 sm:$0xf]  }
 0x3f1   : > { %5721 = vrot.lane.b32.xlu0 %v5720_v14, %s8518_s21  ;;  %v5117_v0 = vpop.permute.xlu1 %5116   ;;  %v5895_v14 = vsel %vm56_vm0, %v8303_v57, %v8302_v46  ;;  %v8345_v44 = vld [vmem:[%s8543_s11 + $0x609] ss:$24 sm:$0xf0]  }
 0x3f2   : > { %v5084_v60 = vpop.permute.xlu0 %5083   ;;  %8092 = vst.msk [vmem:[%s8845_s16 + $0x160] sm:$0xff] %vm4998_vm7, %v5117_v0   ;;  %v8353_v54 = vld [vmem:[%s8543_s11 + $0x909] ss:$24 sm:$0xf]  }
 0x3f3   : > { %8083 = vst.msk [vmem:[%s8845_s16 + $0x100] sm:$0xff] %vm4998_vm7, %v5084_v60   ;;  %5754 = vrot.lane.b32.xlu1 %v5753_v49, %s8518_s21  ;;  %v5928_v49 = vsel %vm56_vm0, %v8312_v55, %v8311_v40  ;;  %v8354_v56 = vld [vmem:[%s8543_s11 + $0x909] ss:$24 sm:$0xf0]  }
 0x3f4   : > { %v8350_v46 = vld [vmem:[%s8543_s11 + $0x841] ss:$24 sm:$0xf]  }
 0x3f5   : > { %5743 = vrot.lane.b32.xlu0 %v5742_v4, %s8518_s21  ;;  %v5139_v11 = vpop.permute.xlu1 %5138   ;;  %v5917_v4 = vsel %vm56_vm0, %v8309_v19, %v8308_v62  ;;  %v8351_v57 = vld [vmem:[%s8543_s11 + $0x841] ss:$24 sm:$0xf0]  }
 0x3f6   : > { %v5106_v8 = vpop.permute.xlu0 %5105   ;;  %8098 = vst.msk [vmem:[%s8845_s16 + $0x1a0] sm:$0xff] %vm4998_vm7, %v5139_v11   ;;  %v8359_v40 = vld [vmem:[%s8543_s11 + $0xb41] ss:$24 sm:$0xf]  }
 0x3f7   : > { %8089 = vst.msk [vmem:[%s8845_s16 + $0x140] sm:$0xff] %vm4998_vm7, %v5106_v8   ;;  %5776 = vrot.lane.b32.xlu1 %v5775_v25, %s8518_s21  ;;  %v5950_v25 = vsel %vm56_vm0, %v8318_v6, %v8317_v5  ;;  %v8360_v55 = vld [vmem:[%s8543_s11 + $0xb41] ss:$24 sm:$0xf0]  }
 0x3f8   : > { %v8356_v62 = vld [vmem:[%s8543_s11 + $0x9d1] ss:$24 sm:$0xf]  }
 0x3f9   : > { %5765 = vrot.lane.b32.xlu0 %v5764_v23, %s8518_s21  ;;  %v5161_v20 = vpop.permute.xlu1 %5160   ;;  %v5939_v23 = vsel %vm56_vm0, %v8315_v10, %v8314_v7  ;;  %v8357_v19 = vld [vmem:[%s8543_s11 + $0x9d1] ss:$24 sm:$0xf0]  }
 0x3fa   : > { %v5128_v63 = vpop.permute.xlu0 %5127   ;;  %8104 = vst.msk [vmem:[%s8845_s16 + $0x1e0] sm:$0xff] %vm4998_vm7, %v5161_v20   ;;  %v8365_v5 = vld [vmem:[%s8543_s11 + $0xcd1] ss:$24 sm:$0xf]  }
 0x3fb   : > { %8095 = vst.msk [vmem:[%s8845_s16 + $0x180] sm:$0xff] %vm4998_vm7, %v5128_v63   ;;  %5797 = vrot.lane.b32.xlu1 %v5796_v17, %s8519_s22  ;;  %v5972_v17 = vsel %vm56_vm0, %v8324_v28, %v8323_v15  ;;  %v8366_v6 = vld [vmem:[%s8543_s11 + $0xcd1] ss:$24 sm:$0xf0]  }
 0x3fc   : > { %v8362_v7 = vld [vmem:[%s8543_s11 + $0xc09] ss:$24 sm:$0xf]  }
 0x3fd   : > { %5787 = vrot.lane.b32.xlu0 %v5786_v59, %s8519_s22  ;;  %v5183_v29 = vpop.permute.xlu1 %5182   ;;  %v5961_v59 = vsel %vm56_vm0, %v8321_v1, %v8320_v18  ;;  %v8363_v10 = vld [vmem:[%s8543_s11 + $0xc09] ss:$24 sm:$0xf0]  }
 0x3fe   : > { %v5150_v24 = vpop.permute.xlu0 %5149   ;;  %8110 = vst.msk [vmem:[%s8845_s16 + $0x220] sm:$0xff] %vm4998_vm7, %v5183_v29   ;;  %v8371_v15 = vld [vmem:[%s8543_s11 + $0xf09] ss:$24 sm:$0xf]  }
 0x3ff   : > { %8101 = vst.msk [vmem:[%s8845_s16 + $0x1c0] sm:$0xff] %vm4998_vm7, %v5150_v24   ;;  %5819 = vrot.lane.b32.xlu1 %v5818_v27, %s8519_s22  ;;  %v5994_v27 = vsel %vm56_vm0, %v8330_v22, %v8329_v21  ;;  %v8372_v28 = vld [vmem:[%s8543_s11 + $0xf09] ss:$24 sm:$0xf0]  }
 0x400   : > { %v8368_v18 = vld [vmem:[%s8543_s11 + $0xe41] ss:$24 sm:$0xf]  }
 0x401   : > { %5808 = vrot.lane.b32.xlu0 %v5807_v32, %s8519_s22  ;;  %v5205_v38 = vpop.permute.xlu1 %5204   ;;  %v5983_v32 = vsel %vm56_vm0, %v8327_v61, %v8326_v30  ;;  %v8369_v1 = vld [vmem:[%s8543_s11 + $0xe41] ss:$24 sm:$0xf0]  }
 0x402   : > { %v5172_v12 = vpop.permute.xlu0 %5171   ;;  %8116 = vst.msk [vmem:[%s8845_s16 + $0x28] sm:$0xff] %vm4998_vm7, %v5205_v38   ;;  %v8377_v21 = vld [vmem:[%s8543_s11 + $0x1141] ss:$24 sm:$0xf]  }
 0x403   : > { %8107 = vst.msk [vmem:[%s8845_s16 + $0x200] sm:$0xff] %vm4998_vm7, %v5172_v12   ;;  %5841 = vrot.lane.b32.xlu1 %v5840_v13, %s8519_s22  ;;  %v6016_v13 = vsel %vm56_vm0, %v8336_v34, %v8335_v33  ;;  %v8378_v22 = vld [vmem:[%s8543_s11 + $0x1141] ss:$24 sm:$0xf0]  }
 0x404   : > { %v8374_v30 = vld [vmem:[%s8543_s11 + $0xfd1] ss:$24 sm:$0xf]  }
 0x405   : > { %5830 = vrot.lane.b32.xlu0 %v5829_v39, %s8519_s22  ;;  %v5227_v45 = vpop.permute.xlu1 %5226   ;;  %v6005_v39 = vsel %vm56_vm0, %v8333_v37, %v8332_v36  ;;  %v8375_v61 = vld [vmem:[%s8543_s11 + $0xfd1] ss:$24 sm:$0xf0]  }
 0x406   : > { %v5194_v51 = vpop.permute.xlu0 %5193   ;;  %8122 = vst.msk [vmem:[%s8845_s16 + $0x68] sm:$0xff] %vm4998_vm7, %v5227_v45   ;;  %v8383_v33 = vld [vmem:[%s8543_s11 + $0x181] ss:$24 sm:$0xf]  }
 0x407   : > { %8113 = vst.msk [vmem:[%s8845_s16 + $0x8] sm:$0xff] %vm4998_vm7, %v5194_v51   ;;  %5863 = vrot.lane.b32.xlu1 %v5862_v43, %s8519_s22  ;;  %v6038_v43 = vsel %vm56_vm0, %v8342_v9, %v8341_v2  ;;  %v8384_v34 = vld [vmem:[%s8543_s11 + $0x181] ss:$24 sm:$0xf0]  }
 0x408   : > { %v8380_v36 = vld [vmem:[%s8543_s11 + $0x11] ss:$24 sm:$0xf]  }
 0x409   : > { %5852 = vrot.lane.b32.xlu0 %v5851_v35, %s8519_s22  ;;  %v5249_v53 = vpop.permute.xlu1 %5248   ;;  %v6027_v35 = vsel %vm56_vm0, %v8339_v42, %v8338_v41  ;;  %v8381_v37 = vld [vmem:[%s8543_s11 + $0x11] ss:$24 sm:$0xf0]  }
 0x40a   : > { %v5216_v16 = vpop.permute.xlu0 %5215   ;;  %8128 = vst.msk [vmem:[%s8845_s16 + $0xa8] sm:$0xff] %vm4998_vm7, %v5249_v53   ;;  %v8389_v2 = vld [vmem:[%s8543_s11 + $0x311] ss:$24 sm:$0xf]  }
 0x40b   : > { %8119 = vst.msk [vmem:[%s8845_s16 + $0x48] sm:$0xff] %vm4998_vm7, %v5216_v16   ;;  %5885 = vrot.lane.b32.xlu1 %v5884_v52, %s8519_s22  ;;  %v6060_v52 = vsel %vm56_vm0, %v8348_v48, %v8347_v47  ;;  %v8390_v9 = vld [vmem:[%s8543_s11 + $0x311] ss:$24 sm:$0xf0]  }
 0x40c   : > { %v8386_v41 = vld [vmem:[%s8543_s11 + $0x249] ss:$24 sm:$0xf]  }
 0x40d   : > { %5874 = vrot.lane.b32.xlu0 %v5873_v31, %s8519_s22  ;;  %v5271_v3 = vpop.permute.xlu1 %5270   ;;  %v6049_v31 = vsel %vm56_vm0, %v8345_v44, %v8344_v50  ;;  %v8387_v42 = vld [vmem:[%s8543_s11 + $0x249] ss:$24 sm:$0xf0]  }
 0x40e   : > { %v5238_v26 = vpop.permute.xlu0 %5237   ;;  %8134 = vst.msk [vmem:[%s8845_s16 + $0xe8] sm:$0xff] %vm4998_vm7, %v5271_v3   ;;  %v8395_v47 = vld [vmem:[%s8543_s11 + $0x549] ss:$24 sm:$0xf]  }
 0x40f   : > { %8125 = vst.msk [vmem:[%s8845_s16 + $0x88] sm:$0xff] %vm4998_vm7, %v5238_v26   ;;  %5907 = vrot.lane.b32.xlu1 %v5906_v58, %s8519_s22  ;;  %v6082_v58 = vsel %vm56_vm0, %v8354_v56, %v8353_v54  ;;  %v8396_v48 = vld [vmem:[%s8543_s11 + $0x549] ss:$24 sm:$0xf0]  }
 0x410   : > { %v8392_v50 = vld [vmem:[%s8543_s11 + $0x481] ss:$24 sm:$0xf]  }
 0x411   : > { %5896 = vrot.lane.b32.xlu0 %v5895_v14, %s8519_s22  ;;  %v5293_v0 = vpop.permute.xlu1 %5292   ;;  %v6071_v14 = vsel %vm56_vm0, %v8351_v57, %v8350_v46  ;;  %v8393_v44 = vld [vmem:[%s8543_s11 + $0x481] ss:$24 sm:$0xf0]  }
 0x412   : > { %v5260_v60 = vpop.permute.xlu0 %5259   ;;  %8140 = vst.msk [vmem:[%s8845_s16 + $0x128] sm:$0xff] %vm4998_vm7, %v5293_v0   ;;  %v8401_v54 = vld [vmem:[%s8543_s11 + $0x781] ss:$24 sm:$0xf]  }
 0x413   : > { %8131 = vst.msk [vmem:[%s8845_s16 + $0xc8] sm:$0xff] %vm4998_vm7, %v5260_v60   ;;  %5929 = vrot.lane.b32.xlu1 %v5928_v49, %s8519_s22  ;;  %v6104_v49 = vsel %vm56_vm0, %v8360_v55, %v8359_v40  ;;  %v8402_v56 = vld [vmem:[%s8543_s11 + $0x781] ss:$24 sm:$0xf0]  }
 0x414   : > { %v8398_v46 = vld [vmem:[%s8543_s11 + $0x611] ss:$24 sm:$0xf]  }
 0x415   : > { %5918 = vrot.lane.b32.xlu0 %v5917_v4, %s8519_s22  ;;  %v5315_v11 = vpop.permute.xlu1 %5314   ;;  %v6093_v4 = vsel %vm56_vm0, %v8357_v19, %v8356_v62  ;;  %v8399_v57 = vld [vmem:[%s8543_s11 + $0x611] ss:$24 sm:$0xf0]  }
 0x416   : > { %v5282_v8 = vpop.permute.xlu0 %5281   ;;  %8146 = vst.msk [vmem:[%s8845_s16 + $0x168] sm:$0xff] %vm4998_vm7, %v5315_v11   ;;  %v8407_v40 = vld [vmem:[%s8543_s11 + $0x911] ss:$24 sm:$0xf]  }
 0x417   : > { %8137 = vst.msk [vmem:[%s8845_s16 + $0x108] sm:$0xff] %vm4998_vm7, %v5282_v8   ;;  %5951 = vrot.lane.b32.xlu1 %v5950_v25, %s8519_s22  ;;  %v6126_v25 = vsel %vm56_vm0, %v8366_v6, %v8365_v5  ;;  %v8408_v55 = vld [vmem:[%s8543_s11 + $0x911] ss:$24 sm:$0xf0]  }
 0x418   : > { %v8404_v62 = vld [vmem:[%s8543_s11 + $0x849] ss:$24 sm:$0xf]  }
 0x419   : > { %5940 = vrot.lane.b32.xlu0 %v5939_v23, %s8519_s22  ;;  %v5337_v20 = vpop.permute.xlu1 %5336   ;;  %v6115_v23 = vsel %vm56_vm0, %v8363_v10, %v8362_v7  ;;  %v8405_v19 = vld [vmem:[%s8543_s11 + $0x849] ss:$24 sm:$0xf0]  }
 0x41a   : > { %v5304_v63 = vpop.permute.xlu0 %5303   ;;  %8152 = vst.msk [vmem:[%s8845_s16 + $0x1a8] sm:$0xff] %vm4998_vm7, %v5337_v20   ;;  %v8413_v5 = vld [vmem:[%s8543_s11 + $0xb49] ss:$24 sm:$0xf]  }
 0x41b   : > { %8143 = vst.msk [vmem:[%s8845_s16 + $0x148] sm:$0xff] %vm4998_vm7, %v5304_v63   ;;  %5973 = vrot.lane.b32.xlu1 %v5972_v17, %s8519_s22  ;;  %v6148_v17 = vsel %vm56_vm0, %v8372_v28, %v8371_v15  ;;  %v8414_v6 = vld [vmem:[%s8543_s11 + $0xb49] ss:$24 sm:$0xf0]  }
 0x41c   : > { %v8410_v7 = vld [vmem:[%s8543_s11 + $0xa81] ss:$24 sm:$0xf]  }
 0x41d   : > { %5962 = vrot.lane.b32.xlu0 %v5961_v59, %s8519_s22  ;;  %v5359_v29 = vpop.permute.xlu1 %5358   ;;  %v6137_v59 = vsel %vm56_vm0, %v8369_v1, %v8368_v18  ;;  %v8411_v10 = vld [vmem:[%s8543_s11 + $0xa81] ss:$24 sm:$0xf0]  }
 0x41e   : > { %v5326_v24 = vpop.permute.xlu0 %5325   ;;  %8158 = vst.msk [vmem:[%s8845_s16 + $0x1e8] sm:$0xff] %vm4998_vm7, %v5359_v29   ;;  %v8419_v15 = vld [vmem:[%s8543_s11 + $0xd81] ss:$24 sm:$0xf]  }
 0x41f   : > { %8149 = vst.msk [vmem:[%s8845_s16 + $0x188] sm:$0xff] %vm4998_vm7, %v5326_v24   ;;  %5995 = vrot.lane.b32.xlu1 %v5994_v27, %s8519_s22  ;;  %v6170_v27 = vsel %vm56_vm0, %v8378_v22, %v8377_v21  ;;  %v8420_v28 = vld [vmem:[%s8543_s11 + $0xd81] ss:$24 sm:$0xf0]  }
 0x420   : > { %v8416_v18 = vld [vmem:[%s8543_s11 + $0xc11] ss:$24 sm:$0xf]  }
 0x421   : > { %5984 = vrot.lane.b32.xlu0 %v5983_v32, %s8519_s22  ;;  %v5381_v38 = vpop.permute.xlu1 %5380   ;;  %v6159_v32 = vsel %vm56_vm0, %v8375_v61, %v8374_v30  ;;  %v8417_v1 = vld [vmem:[%s8543_s11 + $0xc11] ss:$24 sm:$0xf0]  }
 0x422   : > { %v5348_v12 = vpop.permute.xlu0 %5347   ;;  %8164 = vst.msk [vmem:[%s8845_s16 + $0x228] sm:$0xff] %vm4998_vm7, %v5381_v38   ;;  %v8425_v21 = vld [vmem:[%s8543_s11 + $0xf11] ss:$24 sm:$0xf]  }
 0x423   : > { %8155 = vst.msk [vmem:[%s8845_s16 + $0x1c8] sm:$0xff] %vm4998_vm7, %v5348_v12   ;;  %6017 = vrot.lane.b32.xlu1 %v6016_v13, %s8519_s22  ;;  %v6192_v13 = vsel %vm56_vm0, %v8384_v34, %v8383_v33  ;;  %v8426_v22 = vld [vmem:[%s8543_s11 + $0xf11] ss:$24 sm:$0xf0]  }
 0x424   : > { %v8422_v30 = vld [vmem:[%s8543_s11 + $0xe49] ss:$24 sm:$0xf]  }
 0x425   : > { %6006 = vrot.lane.b32.xlu0 %v6005_v39, %s8519_s22  ;;  %v5403_v45 = vpop.permute.xlu1 %5402   ;;  %v6181_v39 = vsel %vm56_vm0, %v8381_v37, %v8380_v36  ;;  %v8423_v61 = vld [vmem:[%s8543_s11 + $0xe49] ss:$24 sm:$0xf0]  }
 0x426   : > { %v5370_v51 = vpop.permute.xlu0 %5369   ;;  %8170 = vst.msk [vmem:[%s8845_s16 + $0x30] sm:$0xff] %vm4998_vm7, %v5403_v45   ;;  %v8431_v33 = vld [vmem:[%s8543_s11 + $0x1149] ss:$24 sm:$0xf]  }
 0x427   : > { %8161 = vst.msk [vmem:[%s8845_s16 + $0x208] sm:$0xff] %vm4998_vm7, %v5370_v51   ;;  %6039 = vrot.lane.b32.xlu1 %v6038_v43, %s8519_s22  ;;  %v6214_v43 = vsel %vm56_vm0, %v8390_v9, %v8389_v2  ;;  %v8432_v34 = vld [vmem:[%s8543_s11 + $0x1149] ss:$24 sm:$0xf0]  }
 0x428   : > { %v8428_v36 = vld [vmem:[%s8543_s11 + $0x1081] ss:$24 sm:$0xf]  }
 0x429   : > { %6028 = vrot.lane.b32.xlu0 %v6027_v35, %s8519_s22  ;;  %v5425_v53 = vpop.permute.xlu1 %5424   ;;  %v6203_v35 = vsel %vm56_vm0, %v8387_v42, %v8386_v41  ;;  %v8429_v37 = vld [vmem:[%s8543_s11 + $0x1081] ss:$24 sm:$0xf0]  }
 0x42a   : > { %v5392_v16 = vpop.permute.xlu0 %5391   ;;  %8176 = vst.msk [vmem:[%s8845_s16 + $0x70] sm:$0xff] %vm4998_vm7, %v5425_v53   ;;  %v8437_v2 = vld [vmem:[%s8543_s11 + $0x189] ss:$24 sm:$0xf]  }
 0x42b   : > { %8167 = vst.msk [vmem:[%s8845_s16 + $0x10] sm:$0xff] %vm4998_vm7, %v5392_v16   ;;  %6061 = vrot.lane.b32.xlu1 %v6060_v52, %s8519_s22  ;;  %v6236_v52 = vsel %vm56_vm0, %v8396_v48, %v8395_v47  ;;  %v8438_v9 = vld [vmem:[%s8543_s11 + $0x189] ss:$24 sm:$0xf0]  }
 0x42c   : > { %v8434_v41 = vld [vmem:[%s8543_s11 + $0xc1] ss:$24 sm:$0xf]  }
 0x42d   : > { %6050 = vrot.lane.b32.xlu0 %v6049_v31, %s8519_s22  ;;  %v5447_v3 = vpop.permute.xlu1 %5446   ;;  %v6225_v31 = vsel %vm56_vm0, %v8393_v44, %v8392_v50  ;;  %v8435_v42 = vld [vmem:[%s8543_s11 + $0xc1] ss:$24 sm:$0xf0]  }
 0x42e   : > { %v5414_v26 = vpop.permute.xlu0 %5413   ;;  %8182 = vst.msk [vmem:[%s8845_s16 + $0xb0] sm:$0xff] %vm4998_vm7, %v5447_v3   ;;  %v8443_v47 = vld [vmem:[%s8543_s11 + $0x3c1] ss:$24 sm:$0xf]  }
 0x42f   : > { %8173 = vst.msk [vmem:[%s8845_s16 + $0x50] sm:$0xff] %vm4998_vm7, %v5414_v26   ;;  %6083 = vrot.lane.b32.xlu1 %v6082_v58, %s8519_s22  ;;  %v6258_v58 = vsel %vm56_vm0, %v8402_v56, %v8401_v54  ;;  %v8444_v48 = vld [vmem:[%s8543_s11 + $0x3c1] ss:$24 sm:$0xf0]  }
 0x430   : > { %v8440_v50 = vld [vmem:[%s8543_s11 + $0x251] ss:$24 sm:$0xf]  }
 0x431   : > { %6072 = vrot.lane.b32.xlu0 %v6071_v14, %s8519_s22  ;;  %v5469_v0 = vpop.permute.xlu1 %5468   ;;  %v6247_v14 = vsel %vm56_vm0, %v8399_v57, %v8398_v46  ;;  %v8441_v44 = vld [vmem:[%s8543_s11 + $0x251] ss:$24 sm:$0xf0]  }
 0x432   : > { %v5436_v60 = vpop.permute.xlu0 %5435   ;;  %8188 = vst.msk [vmem:[%s8845_s16 + $0xf0] sm:$0xff] %vm4998_vm7, %v5469_v0   ;;  %v8449_v54 = vld [vmem:[%s8543_s11 + $0x551] ss:$24 sm:$0xf]  }
 0x433   : > { %8179 = vst.msk [vmem:[%s8845_s16 + $0x90] sm:$0xff] %vm4998_vm7, %v5436_v60   ;;  %6105 = vrot.lane.b32.xlu1 %v6104_v49, %s8519_s22  ;;  %v6280_v49 = vsel %vm56_vm0, %v8408_v55, %v8407_v40  ;;  %v8450_v56 = vld [vmem:[%s8543_s11 + $0x551] ss:$24 sm:$0xf0]  }
 0x434   : > { %v8446_v46 = vld [vmem:[%s8543_s11 + $0x489] ss:$24 sm:$0xf]  }
 0x435   : > { %6094 = vrot.lane.b32.xlu0 %v6093_v4, %s8519_s22  ;;  %v5491_v11 = vpop.permute.xlu1 %5490   ;;  %v6269_v4 = vsel %vm56_vm0, %v8405_v19, %v8404_v62  ;;  %v8447_v57 = vld [vmem:[%s8543_s11 + $0x489] ss:$24 sm:$0xf0]  }
 0x436   : > { %v5458_v8 = vpop.permute.xlu0 %5457   ;;  %8194 = vst.msk [vmem:[%s8845_s16 + $0x130] sm:$0xff] %vm4998_vm7, %v5491_v11   ;;  %v8455_v40 = vld [vmem:[%s8543_s11 + $0x789] ss:$24 sm:$0xf]  }
 0x437   : > { %8185 = vst.msk [vmem:[%s8845_s16 + $0xd0] sm:$0xff] %vm4998_vm7, %v5458_v8   ;;  %6127 = vrot.lane.b32.xlu1 %v6126_v25, %s8519_s22  ;;  %v6302_v25 = vsel %vm56_vm0, %v8414_v6, %v8413_v5  ;;  %v8456_v55 = vld [vmem:[%s8543_s11 + $0x789] ss:$24 sm:$0xf0]  }
 0x438   : > { %v8452_v62 = vld [vmem:[%s8543_s11 + $0x6c1] ss:$24 sm:$0xf]  }
 0x439   : > { %6116 = vrot.lane.b32.xlu0 %v6115_v23, %s8519_s22  ;;  %v5513_v20 = vpop.permute.xlu1 %5512   ;;  %v6291_v23 = vsel %vm56_vm0, %v8411_v10, %v8410_v7  ;;  %v8453_v19 = vld [vmem:[%s8543_s11 + $0x6c1] ss:$24 sm:$0xf0]  }
 0x43a   : > { %v5480_v63 = vpop.permute.xlu0 %5479   ;;  %8200 = vst.msk [vmem:[%s8845_s16 + $0x170] sm:$0xff] %vm4998_vm7, %v5513_v20   ;;  %v8461_v5 = vld [vmem:[%s8543_s11 + $0x9c1] ss:$24 sm:$0xf]  }
 0x43b   : > { %8191 = vst.msk [vmem:[%s8845_s16 + $0x110] sm:$0xff] %vm4998_vm7, %v5480_v63   ;;  %6149 = vrot.lane.b32.xlu1 %v6148_v17, %s8519_s22  ;;  %v6324_v17 = vsel %vm56_vm0, %v8420_v28, %v8419_v15  ;;  %v8462_v6 = vld [vmem:[%s8543_s11 + $0x9c1] ss:$24 sm:$0xf0]  }
 0x43c   : > { %v8458_v7 = vld [vmem:[%s8543_s11 + $0x851] ss:$24 sm:$0xf]  }
 0x43d   : > { %6138 = vrot.lane.b32.xlu0 %v6137_v59, %s8519_s22  ;;  %v5535_v29 = vpop.permute.xlu1 %5534   ;;  %v6313_v59 = vsel %vm56_vm0, %v8417_v1, %v8416_v18  ;;  %v8459_v10 = vld [vmem:[%s8543_s11 + $0x851] ss:$24 sm:$0xf0]  }
 0x43e   : > { %v5502_v24 = vpop.permute.xlu0 %5501   ;;  %8206 = vst.msk [vmem:[%s8845_s16 + $0x1b0] sm:$0xff] %vm4998_vm7, %v5535_v29   ;;  %v8467_v15 = vld [vmem:[%s8543_s11 + $0xb51] ss:$24 sm:$0xf]  }
 0x43f   : > { %8197 = vst.msk [vmem:[%s8845_s16 + $0x150] sm:$0xff] %vm4998_vm7, %v5502_v24   ;;  %6171 = vrot.lane.b32.xlu1 %v6170_v27, %s8519_s22  ;;  %v6346_v27 = vsel %vm56_vm0, %v8426_v22, %v8425_v21  ;;  %v8468_v28 = vld [vmem:[%s8543_s11 + $0xb51] ss:$24 sm:$0xf0]  }
 0x440   : > { %v8464_v18 = vld [vmem:[%s8543_s11 + $0xa89] ss:$24 sm:$0xf]  }
 0x441   : > { %6160 = vrot.lane.b32.xlu0 %v6159_v32, %s8519_s22  ;;  %v5557_v38 = vpop.permute.xlu1 %5556   ;;  %v6335_v32 = vsel %vm56_vm0, %v8423_v61, %v8422_v30  ;;  %v8465_v1 = vld [vmem:[%s8543_s11 + $0xa89] ss:$24 sm:$0xf0]  }
 0x442   : > { %v5524_v12 = vpop.permute.xlu0 %5523   ;;  %8212 = vst.msk [vmem:[%s8845_s16 + $0x1f0] sm:$0xff] %vm4998_vm7, %v5557_v38   ;;  %v8473_v21 = vld [vmem:[%s8543_s11 + $0xd89] ss:$24 sm:$0xf]  }
 0x443   : > { %8203 = vst.msk [vmem:[%s8845_s16 + $0x190] sm:$0xff] %vm4998_vm7, %v5524_v12   ;;  %6193 = vrot.lane.b32.xlu1 %v6192_v13, %s8519_s22  ;;  %v6368_v13 = vsel %vm56_vm0, %v8432_v34, %v8431_v33  ;;  %v8474_v22 = vld [vmem:[%s8543_s11 + $0xd89] ss:$24 sm:$0xf0]  }
 0x444   : > { %v8470_v30 = vld [vmem:[%s8543_s11 + $0xcc1] ss:$24 sm:$0xf]  }
 0x445   : > { %6182 = vrot.lane.b32.xlu0 %v6181_v39, %s8519_s22  ;;  %v5579_v45 = vpop.permute.xlu1 %5578   ;;  %v6357_v39 = vsel %vm56_vm0, %v8429_v37, %v8428_v36  ;;  %v8471_v61 = vld [vmem:[%s8543_s11 + $0xcc1] ss:$24 sm:$0xf0]  }
 0x446   : > { %v5546_v51 = vpop.permute.xlu0 %5545   ;;  %8218 = vst.msk [vmem:[%s8845_s16 + $0x230] sm:$0xff] %vm4998_vm7, %v5579_v45   ;;  %v8479_v33 = vld [vmem:[%s8543_s11 + $0xfc1] ss:$24 sm:$0xf]  }
 0x447   : > { %8209 = vst.msk [vmem:[%s8845_s16 + $0x1d0] sm:$0xff] %vm4998_vm7, %v5546_v51   ;;  %6215 = vrot.lane.b32.xlu1 %v6214_v43, %s8519_s22  ;;  %v6390_v43 = vsel %vm56_vm0, %v8438_v9, %v8437_v2  ;;  %v8480_v34 = vld [vmem:[%s8543_s11 + $0xfc1] ss:$24 sm:$0xf0]  }
 0x448   : > { %v8476_v36 = vld [vmem:[%s8543_s11 + $0xe51] ss:$24 sm:$0xf]  }
 0x449   : > { %6204 = vrot.lane.b32.xlu0 %v6203_v35, %s8519_s22  ;;  %v5601_v53 = vpop.permute.xlu1 %5600   ;;  %v6379_v35 = vsel %vm56_vm0, %v8435_v42, %v8434_v41  ;;  %v8477_v37 = vld [vmem:[%s8543_s11 + $0xe51] ss:$24 sm:$0xf0]  }
 0x44a   : > { %v5568_v16 = vpop.permute.xlu0 %5567   ;;  %8224 = vst.msk [vmem:[%s8845_s16 + $0x38] sm:$0xff] %vm4998_vm7, %v5601_v53   ;;  %v8485_v2 = vld [vmem:[%s8543_s11 + $0x1151] ss:$24 sm:$0xf]  }
 0x44b   : > { %8215 = vst.msk [vmem:[%s8845_s16 + $0x210] sm:$0xff] %vm4998_vm7, %v5568_v16   ;;  %6237 = vrot.lane.b32.xlu1 %v6236_v52, %s8519_s22  ;;  %v6412_v52 = vsel %vm56_vm0, %v8444_v48, %v8443_v47  ;;  %v8486_v9 = vld [vmem:[%s8543_s11 + $0x1151] ss:$24 sm:$0xf0]  }
 0x44c   : > { %v8482_v41 = vld [vmem:[%s8543_s11 + $0x1089] ss:$24 sm:$0xf]  }
 0x44d   : > { %6226 = vrot.lane.b32.xlu0 %v6225_v31, %s8519_s22  ;;  %v5623_v3 = vpop.permute.xlu1 %5622   ;;  %v6401_v31 = vsel %vm56_vm0, %v8441_v44, %v8440_v50  ;;  %v8483_v42 = vld [vmem:[%s8543_s11 + $0x1089] ss:$24 sm:$0xf0]  }
 0x44e   : > { %v5590_v26 = vpop.permute.xlu0 %5589   ;;  %8230 = vst.msk [vmem:[%s8845_s16 + $0x78] sm:$0xff] %vm4998_vm7, %v5623_v3  }
 0x44f   : > { %8221 = vst.msk [vmem:[%s8845_s16 + $0x18] sm:$0xff] %vm4998_vm7, %v5590_v26   ;;  %6259 = vrot.lane.b32.xlu1 %v6258_v58, %s8519_s22  ;;  %v6434_v58 = vsel %vm56_vm0, %v8450_v56, %v8449_v54 }
 0x451   : > { %6248 = vrot.lane.b32.xlu0 %v6247_v14, %s8519_s22  ;;  %v5645_v0 = vpop.permute.xlu1 %5644   ;;  %v6423_v14 = vsel %vm56_vm0, %v8447_v57, %v8446_v46 }
 0x452   : > { %v5612_v60 = vpop.permute.xlu0 %5611   ;;  %8236 = vst.msk [vmem:[%s8845_s16 + $0xb8] sm:$0xff] %vm4998_vm7, %v5645_v0  }
 0x453   : > { %8227 = vst.msk [vmem:[%s8845_s16 + $0x58] sm:$0xff] %vm4998_vm7, %v5612_v60   ;;  %6281 = vrot.lane.b32.xlu1 %v6280_v49, %s8519_s22  ;;  %v6456_v49 = vsel %vm56_vm0, %v8456_v55, %v8455_v40 }
 0x455   : > { %6270 = vrot.lane.b32.xlu0 %v6269_v4, %s8519_s22  ;;  %v5667_v11 = vpop.permute.xlu1 %5666   ;;  %v6445_v4 = vsel %vm56_vm0, %v8453_v19, %v8452_v62 }
 0x456   : > { %v5634_v8 = vpop.permute.xlu0 %5633   ;;  %8242 = vst.msk [vmem:[%s8845_s16 + $0xf8] sm:$0xff] %vm4998_vm7, %v5667_v11  }
 0x457   : > { %8233 = vst.msk [vmem:[%s8845_s16 + $0x98] sm:$0xff] %vm4998_vm7, %v5634_v8   ;;  %6303 = vrot.lane.b32.xlu1 %v6302_v25, %s8519_s22  ;;  %v6478_v25 = vsel %vm56_vm0, %v8462_v6, %v8461_v5 }
 0x459   : > { %6292 = vrot.lane.b32.xlu0 %v6291_v23, %s8519_s22  ;;  %v5689_v20 = vpop.permute.xlu1 %5688   ;;  %v6467_v23 = vsel %vm56_vm0, %v8459_v10, %v8458_v7 }
 0x45a   : > { %v5656_v63 = vpop.permute.xlu0 %5655   ;;  %8248 = vst.msk [vmem:[%s8845_s16 + $0x138] sm:$0xff] %vm4998_vm7, %v5689_v20  }
 0x45b   : > { %8239 = vst.msk [vmem:[%s8845_s16 + $0xd8] sm:$0xff] %vm4998_vm7, %v5656_v63   ;;  %6325 = vrot.lane.b32.xlu1 %v6324_v17, %s8519_s22  ;;  %v6500_v17 = vsel %vm56_vm0, %v8468_v28, %v8467_v15 }
 0x45d   : > { %6314 = vrot.lane.b32.xlu0 %v6313_v59, %s8519_s22  ;;  %v5711_v29 = vpop.permute.xlu1 %5710   ;;  %v6489_v59 = vsel %vm56_vm0, %v8465_v1, %v8464_v18 }
 0x45e   : > { %v5678_v24 = vpop.permute.xlu0 %5677   ;;  %8254 = vst.msk [vmem:[%s8845_s16 + $0x178] sm:$0xff] %vm4998_vm7, %v5711_v29  }
 0x45f   : > { %8245 = vst.msk [vmem:[%s8845_s16 + $0x118] sm:$0xff] %vm4998_vm7, %v5678_v24   ;;  %6347 = vrot.lane.b32.xlu1 %v6346_v27, %s8519_s22  ;;  %v6522_v27 = vsel %vm56_vm0, %v8474_v22, %v8473_v21 }
 0x461   : > { %6336 = vrot.lane.b32.xlu0 %v6335_v32, %s8519_s22  ;;  %v5733_v38 = vpop.permute.xlu1 %5732   ;;  %v6511_v32 = vsel %vm56_vm0, %v8471_v61, %v8470_v30 }
 0x462   : > { %v5700_v12 = vpop.permute.xlu0 %5699   ;;  %8260 = vst.msk [vmem:[%s8845_s16 + $0x1b8] sm:$0xff] %vm4998_vm7, %v5733_v38  }
 0x463   : > { %8251 = vst.msk [vmem:[%s8845_s16 + $0x158] sm:$0xff] %vm4998_vm7, %v5700_v12   ;;  %6369 = vrot.lane.b32.xlu1 %v6368_v13, %s8519_s22  ;;  %v6544_v13 = vsel %vm56_vm0, %v8480_v34, %v8479_v33 }
 0x465   : > { %6358 = vrot.lane.b32.xlu0 %v6357_v39, %s8519_s22  ;;  %v5755_v45 = vpop.permute.xlu1 %5754   ;;  %v6533_v39 = vsel %vm56_vm0, %v8477_v37, %v8476_v36 }
 0x466   : > { %v5722_v51 = vpop.permute.xlu0 %5721   ;;  %8266 = vst.msk [vmem:[%s8845_s16 + $0x1f8] sm:$0xff] %vm4998_vm7, %v5755_v45  }
 0x467   : > { %8257 = vst.msk [vmem:[%s8845_s16 + $0x198] sm:$0xff] %vm4998_vm7, %v5722_v51   ;;  %6391 = vrot.lane.b32.xlu1 %v6390_v43, %s8519_s22  ;;  %v6566_v43 = vsel %vm56_vm0, %v8486_v9, %v8485_v2 }
 0x469   : > { %6380 = vrot.lane.b32.xlu0 %v6379_v35, %s8519_s22  ;;  %v5777_v53 = vpop.permute.xlu1 %5776   ;;  %v6555_v35 = vsel %vm56_vm0, %v8483_v42, %v8482_v41 }
 0x46a   : > { %v5744_v16 = vpop.permute.xlu0 %5743   ;;  %8272 = vst.msk [vmem:[%s8845_s16 + $0x238] sm:$0xff] %vm4998_vm7, %v5777_v53  }
 0x46b   : > { %8263 = vst.msk [vmem:[%s8845_s16 + $0x1d8] sm:$0xff] %vm4998_vm7, %v5744_v16   ;;  %6413 = vrot.lane.b32.xlu1 %v6412_v52, %s8519_s22 }
 0x46d   : > { %6402 = vrot.lane.b32.xlu0 %v6401_v31, %s8519_s22  ;;  %v5798_v3 = vpop.permute.xlu1 %5797  }
 0x46e   : > { %v5766_v26 = vpop.permute.xlu0 %5765   ;;  %8277 = vst.msk [vmem:[%s8845_s16 + $0x20] sm:$0xff] %vm5789_vm8, %v5798_v3  }
 0x46f   : > { %8269 = vst.msk [vmem:[%s8845_s16 + $0x218] sm:$0xff] %vm4998_vm7, %v5766_v26   ;;  %6435 = vrot.lane.b32.xlu1 %v6434_v58, %s8519_s22 }
 0x471   : > { %6424 = vrot.lane.b32.xlu0 %v6423_v14, %s8519_s22  ;;  %v5820_v0 = vpop.permute.xlu1 %5819  }
 0x472   : > { %v5788_v60 = vpop.permute.xlu0 %5787   ;;  %8283 = vst.msk [vmem:[%s8845_s16 + $0x60] sm:$0xff] %vm5789_vm8, %v5820_v0  }
 0x473   : > { %5790 = vst.msk [vmem:[%s8845_s16] sm:$0xff] %vm5789_vm8, %v5788_v60   ;;  %6457 = vrot.lane.b32.xlu1 %v6456_v49, %s8519_s22 }
 0x475   : > { %6446 = vrot.lane.b32.xlu0 %v6445_v4, %s8519_s22  ;;  %v5842_v11 = vpop.permute.xlu1 %5841  }
 0x476   : > { %v5809_v8 = vpop.permute.xlu0 %5808   ;;  %8289 = vst.msk [vmem:[%s8845_s16 + $0xa0] sm:$0xff] %vm5789_vm8, %v5842_v11  }
 0x477   : > { %8280 = vst.msk [vmem:[%s8845_s16 + $0x40] sm:$0xff] %vm5789_vm8, %v5809_v8   ;;  %6479 = vrot.lane.b32.xlu1 %v6478_v25, %s8519_s22 }
 0x479   : > { %6468 = vrot.lane.b32.xlu0 %v6467_v23, %s8519_s22  ;;  %v5864_v20 = vpop.permute.xlu1 %5863  }
 0x47a   : > { %v5831_v63 = vpop.permute.xlu0 %5830   ;;  %8295 = vst.msk [vmem:[%s8845_s16 + $0xe0] sm:$0xff] %vm5789_vm8, %v5864_v20  }
 0x47b   : > { %8286 = vst.msk [vmem:[%s8845_s16 + $0x80] sm:$0xff] %vm5789_vm8, %v5831_v63   ;;  %6501 = vrot.lane.b32.xlu1 %v6500_v17, %s8519_s22 }
 0x47d   : > { %6490 = vrot.lane.b32.xlu0 %v6489_v59, %s8519_s22  ;;  %v5886_v29 = vpop.permute.xlu1 %5885  }
 0x47e   : > { %v5853_v24 = vpop.permute.xlu0 %5852   ;;  %8301 = vst.msk [vmem:[%s8845_s16 + $0x120] sm:$0xff] %vm5789_vm8, %v5886_v29  }
 0x47f   : > { %8292 = vst.msk [vmem:[%s8845_s16 + $0xc0] sm:$0xff] %vm5789_vm8, %v5853_v24   ;;  %6523 = vrot.lane.b32.xlu1 %v6522_v27, %s8519_s22 }
 0x481   : > { %6512 = vrot.lane.b32.xlu0 %v6511_v32, %s8519_s22  ;;  %v5908_v38 = vpop.permute.xlu1 %5907  }
 0x482   : > { %v5875_v12 = vpop.permute.xlu0 %5874   ;;  %8307 = vst.msk [vmem:[%s8845_s16 + $0x160] sm:$0xff] %vm5789_vm8, %v5908_v38  }
 0x483   : > { %8298 = vst.msk [vmem:[%s8845_s16 + $0x100] sm:$0xff] %vm5789_vm8, %v5875_v12   ;;  %6545 = vrot.lane.b32.xlu1 %v6544_v13, %s8519_s22 }
 0x485   : > { %6534 = vrot.lane.b32.xlu0 %v6533_v39, %s8519_s22  ;;  %v5930_v45 = vpop.permute.xlu1 %5929  }
 0x486   : > { %v5897_v51 = vpop.permute.xlu0 %5896   ;;  %8313 = vst.msk [vmem:[%s8845_s16 + $0x1a0] sm:$0xff] %vm5789_vm8, %v5930_v45  }
 0x487   : > { %8304 = vst.msk [vmem:[%s8845_s16 + $0x140] sm:$0xff] %vm5789_vm8, %v5897_v51   ;;  %6567 = vrot.lane.b32.xlu1 %v6566_v43, %s8519_s22 }
 0x489   : > { %6556 = vrot.lane.b32.xlu0 %v6555_v35, %s8519_s22  ;;  %v5952_v48 = vpop.permute.xlu1 %5951  }
 0x48a   : > { %v5919_v47 = vpop.permute.xlu0 %5918   ;;  %8319 = vst.msk [vmem:[%s8845_s16 + $0x1e0] sm:$0xff] %vm5789_vm8, %v5952_v48  }
 0x48b   : > { %8310 = vst.msk [vmem:[%s8845_s16 + $0x180] sm:$0xff] %vm5789_vm8, %v5919_v47  }
 0x48d   : > { %v5974_v50 = vpop.permute.xlu1 %5973  }
 0x48e   : > { %v5941_v16 = vpop.permute.xlu0 %5940   ;;  %8325 = vst.msk [vmem:[%s8845_s16 + $0x220] sm:$0xff] %vm5789_vm8, %v5974_v50  }
 0x48f   : > { %8316 = vst.msk [vmem:[%s8845_s16 + $0x1c0] sm:$0xff] %vm5789_vm8, %v5941_v16  }
 0x491   : > { %v5996_v52 = vpop.permute.xlu1 %5995  }
 0x492   : > { %v5963_v44 = vpop.permute.xlu0 %5962   ;;  %8331 = vst.msk [vmem:[%s8845_s16 + $0x28] sm:$0xff] %vm5789_vm8, %v5996_v52  }
 0x493   : > { %8322 = vst.msk [vmem:[%s8845_s16 + $0x200] sm:$0xff] %vm5789_vm8, %v5963_v44  }
 0x495   : > { %v6018_v31 = vpop.permute.xlu1 %6017  }
 0x496   : > { %v5985_v53 = vpop.permute.xlu0 %5984   ;;  %8337 = vst.msk [vmem:[%s8845_s16 + $0x68] sm:$0xff] %vm5789_vm8, %v6018_v31  }
 0x497   : > { %8328 = vst.msk [vmem:[%s8845_s16 + $0x8] sm:$0xff] %vm5789_vm8, %v5985_v53  }
 0x499   : > { %v6040_v56 = vpop.permute.xlu1 %6039  }
 0x49a   : > { %v6007_v54 = vpop.permute.xlu0 %6006   ;;  %8343 = vst.msk [vmem:[%s8845_s16 + $0xa8] sm:$0xff] %vm5789_vm8, %v6040_v56  }
 0x49b   : > { %8334 = vst.msk [vmem:[%s8845_s16 + $0x48] sm:$0xff] %vm5789_vm8, %v6007_v54  }
 0x49d   : > { %v6062_v46 = vpop.permute.xlu1 %6061  }
 0x49e   : > { %v6029_v26 = vpop.permute.xlu0 %6028   ;;  %8349 = vst.msk [vmem:[%s8845_s16 + $0xe8] sm:$0xff] %vm5789_vm8, %v6062_v46  }
 0x49f   : > { %8340 = vst.msk [vmem:[%s8845_s16 + $0x88] sm:$0xff] %vm5789_vm8, %v6029_v26  }
 0x4a1   : > { %v6084_v58 = vpop.permute.xlu1 %6083  }
 0x4a2   : > { %v6051_v57 = vpop.permute.xlu0 %6050   ;;  %8355 = vst.msk [vmem:[%s8845_s16 + $0x128] sm:$0xff] %vm5789_vm8, %v6084_v58  }
 0x4a3   : > { %8346 = vst.msk [vmem:[%s8845_s16 + $0xc8] sm:$0xff] %vm5789_vm8, %v6051_v57  }
 0x4a5   : > { %v6106_v14 = vpop.permute.xlu1 %6105  }
 0x4a6   : > { %v6073_v3 = vpop.permute.xlu0 %6072   ;;  %8361 = vst.msk [vmem:[%s8845_s16 + $0x168] sm:$0xff] %vm5789_vm8, %v6106_v14  }
 0x4a7   : > { %8352 = vst.msk [vmem:[%s8845_s16 + $0x108] sm:$0xff] %vm5789_vm8, %v6073_v3  }
 0x4a9   : > { %v6128_v55 = vpop.permute.xlu1 %6127  }
 0x4aa   : > { %v6095_v40 = vpop.permute.xlu0 %6094   ;;  %8367 = vst.msk [vmem:[%s8845_s16 + $0x1a8] sm:$0xff] %vm5789_vm8, %v6128_v55  }
 0x4ab   : > { %8358 = vst.msk [vmem:[%s8845_s16 + $0x148] sm:$0xff] %vm5789_vm8, %v6095_v40  }
 0x4ad   : > { %v6150_v62 = vpop.permute.xlu1 %6149  }
 0x4ae   : > { %v6117_v60 = vpop.permute.xlu0 %6116   ;;  %8373 = vst.msk [vmem:[%s8845_s16 + $0x1e8] sm:$0xff] %vm5789_vm8, %v6150_v62  }
 0x4af   : > { %8364 = vst.msk [vmem:[%s8845_s16 + $0x188] sm:$0xff] %vm5789_vm8, %v6117_v60  }
 0x4b1   : > { %v6172_v49 = vpop.permute.xlu1 %6171  }
 0x4b2   : > { %v6139_v19 = vpop.permute.xlu0 %6138   ;;  %8379 = vst.msk [vmem:[%s8845_s16 + $0x228] sm:$0xff] %vm5789_vm8, %v6172_v49  }
 0x4b3   : > { %8370 = vst.msk [vmem:[%s8845_s16 + $0x1c8] sm:$0xff] %vm5789_vm8, %v6139_v19  }
 0x4b5   : > { %v6194_v4 = vpop.permute.xlu1 %6193  }
 0x4b6   : > { %v6161_v0 = vpop.permute.xlu0 %6160   ;;  %8385 = vst.msk [vmem:[%s8845_s16 + $0x30] sm:$0xff] %vm5789_vm8, %v6194_v4  }
 0x4b7   : > { %8376 = vst.msk [vmem:[%s8845_s16 + $0x208] sm:$0xff] %vm5789_vm8, %v6161_v0  }
 0x4b9   : > { %v6216_v6 = vpop.permute.xlu1 %6215  }
 0x4ba   : > { %v6183_v5 = vpop.permute.xlu0 %6182   ;;  %8391 = vst.msk [vmem:[%s8845_s16 + $0x70] sm:$0xff] %vm5789_vm8, %v6216_v6  }
 0x4bb   : > { %8382 = vst.msk [vmem:[%s8845_s16 + $0x10] sm:$0xff] %vm5789_vm8, %v6183_v5  }
 0x4bd   : > { %v6238_v7 = vpop.permute.xlu1 %6237  }
 0x4be   : > { %v6205_v8 = vpop.permute.xlu0 %6204   ;;  %8397 = vst.msk [vmem:[%s8845_s16 + $0xb0] sm:$0xff] %vm5789_vm8, %v6238_v7  }
 0x4bf   : > { %8388 = vst.msk [vmem:[%s8845_s16 + $0x50] sm:$0xff] %vm5789_vm8, %v6205_v8  }
 0x4c1   : > { %v6260_v25 = vpop.permute.xlu1 %6259  }
 0x4c2   : > { %v6227_v10 = vpop.permute.xlu0 %6226   ;;  %8403 = vst.msk [vmem:[%s8845_s16 + $0xf0] sm:$0xff] %vm5789_vm8, %v6260_v25  }
 0x4c3   : > { %8394 = vst.msk [vmem:[%s8845_s16 + $0x90] sm:$0xff] %vm5789_vm8, %v6227_v10  }
 0x4c5   : > { %v6282_v23 = vpop.permute.xlu1 %6281  }
 0x4c6   : > { %v6249_v11 = vpop.permute.xlu0 %6248   ;;  %8409 = vst.msk [vmem:[%s8845_s16 + $0x130] sm:$0xff] %vm5789_vm8, %v6282_v23  }
 0x4c7   : > { %8400 = vst.msk [vmem:[%s8845_s16 + $0xd0] sm:$0xff] %vm5789_vm8, %v6249_v11  }
 0x4c9   : > { %v6304_v28 = vpop.permute.xlu1 %6303  }
 0x4ca   : > { %v6271_v15 = vpop.permute.xlu0 %6270   ;;  %8415 = vst.msk [vmem:[%s8845_s16 + $0x170] sm:$0xff] %vm5789_vm8, %v6304_v28  }
 0x4cb   : > { %8406 = vst.msk [vmem:[%s8845_s16 + $0x110] sm:$0xff] %vm5789_vm8, %v6271_v15  }
 0x4cd   : > { %v6326_v18 = vpop.permute.xlu1 %6325  }
 0x4ce   : > { %v6293_v63 = vpop.permute.xlu0 %6292   ;;  %8421 = vst.msk [vmem:[%s8845_s16 + $0x1b0] sm:$0xff] %vm5789_vm8, %v6326_v18  }
 0x4cf   : > { %8412 = vst.msk [vmem:[%s8845_s16 + $0x150] sm:$0xff] %vm5789_vm8, %v6293_v63  }
 0x4d1   : > { %v6348_v17 = vpop.permute.xlu1 %6347  }
 0x4d2   : > { %v6315_v1 = vpop.permute.xlu0 %6314   ;;  %8427 = vst.msk [vmem:[%s8845_s16 + $0x1f0] sm:$0xff] %vm5789_vm8, %v6348_v17  }
 0x4d3   : > { %8418 = vst.msk [vmem:[%s8845_s16 + $0x190] sm:$0xff] %vm5789_vm8, %v6315_v1  }
 0x4d5   : > { %v6370_v59 = vpop.permute.xlu1 %6369  }
 0x4d6   : > { %v6337_v20 = vpop.permute.xlu0 %6336   ;;  %8433 = vst.msk [vmem:[%s8845_s16 + $0x230] sm:$0xff] %vm5789_vm8, %v6370_v59  }
 0x4d7   : > { %8424 = vst.msk [vmem:[%s8845_s16 + $0x1d0] sm:$0xff] %vm5789_vm8, %v6337_v20  }
 0x4d9   : > { %v6392_v22 = vpop.permute.xlu1 %6391  }
 0x4da   : > { %v6359_v21 = vpop.permute.xlu0 %6358   ;;  %8439 = vst.msk [vmem:[%s8845_s16 + $0x38] sm:$0xff] %vm5789_vm8, %v6392_v22  }
 0x4db   : > { %8430 = vst.msk [vmem:[%s8845_s16 + $0x210] sm:$0xff] %vm5789_vm8, %v6359_v21  }
 0x4dd   : > { %v6414_v30 = vpop.permute.xlu1 %6413  }
 0x4de   : > { %v6381_v24 = vpop.permute.xlu0 %6380   ;;  %8445 = vst.msk [vmem:[%s8845_s16 + $0x78] sm:$0xff] %vm5789_vm8, %v6414_v30  }
 0x4df   : > { %8436 = vst.msk [vmem:[%s8845_s16 + $0x18] sm:$0xff] %vm5789_vm8, %v6381_v24  }
 0x4e1   : > { %v6436_v27 = vpop.permute.xlu1 %6435  }
 0x4e2   : > { %v6403_v61 = vpop.permute.xlu0 %6402   ;;  %8451 = vst.msk [vmem:[%s8845_s16 + $0xb8] sm:$0xff] %vm5789_vm8, %v6436_v27  }
 0x4e3   : > { %8442 = vst.msk [vmem:[%s8845_s16 + $0x58] sm:$0xff] %vm5789_vm8, %v6403_v61  }
 0x4e5   : > { %v6458_v32 = vpop.permute.xlu1 %6457  }
 0x4e6   : > { %v6425_v29 = vpop.permute.xlu0 %6424   ;;  %8457 = vst.msk [vmem:[%s8845_s16 + $0xf8] sm:$0xff] %vm5789_vm8, %v6458_v32  }
 0x4e7   : > { %8448 = vst.msk [vmem:[%s8845_s16 + $0x98] sm:$0xff] %vm5789_vm8, %v6425_v29  }
 0x4e9   : > { %v6480_v34 = vpop.permute.xlu1 %6479  }
 0x4ea   : > { %v6447_v33 = vpop.permute.xlu0 %6446   ;;  %8463 = vst.msk [vmem:[%s8845_s16 + $0x138] sm:$0xff] %vm5789_vm8, %v6480_v34  }
 0x4eb   : > { %8454 = vst.msk [vmem:[%s8845_s16 + $0xd8] sm:$0xff] %vm5789_vm8, %v6447_v33  }
 0x4ed   : > { %v6502_v36 = vpop.permute.xlu1 %6501  }
 0x4ee   : > { %v6469_v12 = vpop.permute.xlu0 %6468   ;;  %8469 = vst.msk [vmem:[%s8845_s16 + $0x178] sm:$0xff] %vm5789_vm8, %v6502_v36  }
 0x4ef   : > { %8460 = vst.msk [vmem:[%s8845_s16 + $0x118] sm:$0xff] %vm5789_vm8, %v6469_v12  }
 0x4f1   : > { %v6524_v13 = vpop.permute.xlu1 %6523  }
 0x4f2   : > { %v6491_v37 = vpop.permute.xlu0 %6490   ;;  %8475 = vst.msk [vmem:[%s8845_s16 + $0x1b8] sm:$0xff] %vm5789_vm8, %v6524_v13  }
 0x4f3   : > { %8466 = vst.msk [vmem:[%s8845_s16 + $0x158] sm:$0xff] %vm5789_vm8, %v6491_v37  }
 0x4f5   : > { %v6546_v39 = vpop.permute.xlu1 %6545  }
 0x4f6   : > { %v6513_v38 = vpop.permute.xlu0 %6512   ;;  %8481 = vst.msk [vmem:[%s8845_s16 + $0x1f8] sm:$0xff] %vm5789_vm8, %v6546_v39  }
 0x4f7   : > { %8472 = vst.msk [vmem:[%s8845_s16 + $0x198] sm:$0xff] %vm5789_vm8, %v6513_v38  }
 0x4f9   : > { %v6568_v9 = vpop.permute.xlu1 %6567  }
 0x4fa   : > { %v6535_v2 = vpop.permute.xlu0 %6534   ;;  %8487 = vst.msk [vmem:[%s8845_s16 + $0x238] sm:$0xff] %vm5789_vm8, %v6568_v9  }
 0x4fb   : > { %8478 = vst.msk [vmem:[%s8845_s16 + $0x1d8] sm:$0xff] %vm5789_vm8, %v6535_v2  }
 0x4fe   : > { %v6557_v51 = vpop.permute.xlu0 %6556  }
 0x4ff   : > { %8484 = vst.msk [vmem:[%s8845_s16 + $0x218] sm:$0xff] %vm5789_vm8, %v6557_v51  }
 0x500 PF: > { %s7_s6 = sadd.s32 1, %s8511_s6  }
 0x501   : > { %p4_p5 = scmp.ge.s32.totalorder %s7_s6, 4  }
 0x503   :  { %6 = sbr.rel (!%p4_p5) target bundleno = 1 (0x1), region = 1927 }

// kernel: tile.35
= control target key start
LH: loop header
LB: loop body
LE: loop exit
PB: predicated region body
PF: predicated region fallthrough
CT: control target
= control target key end

     0   :  { %s34_s0 = inlined_call_operand.vmem [shape: f32[16], index: 0, kind: input, shape index: {}]   ;;  %s35_s1 = inlined_call_operand.vmem [shape: f32[24,1,1,16], index: 1, kind: output, shape index: {}]  }
   0x1   :  { %v4_v0 = vld [vmem:[%s34_s0] ss:$0 sm:$0xff] }
   0x2   :  { %5 = vst [vmem:[%s35_s1] sm:$0xff] %v4_v0  ;;  %10 = vst [vmem:[%s35_s1 + $0x8] sm:$0xff] %v4_v0 }
   0x3   :  { %11 = vst [vmem:[%s35_s1 + $0x10] sm:$0xff] %v4_v0 }

// kernel: tile.36
= control target key start
LH: loop header
LB: loop body
LE: loop exit
PB: predicated region body
PF: predicated region fallthrough
CT: control target
= control target key end

     0   :  { %s81_s8 = smov 112   ;;  %s82_s11 = smov 80   ;;  %vm3_vm0 = vcmask 130048   ;;  %vm9_vm1 = vcmask 1048448   ;;  %vm15_vm2 = vcmask 917248   ;;  %vm21_vm3 = vcmask 786048   ;;  %s131_s0 = inlined_call_operand.vmem [shape: f32[24,1,1,16], index: 0, kind: input, shape index: {}]   ;;  %s132_s1 = inlined_call_operand.vmem [shape: f32[1,384], index: 1, kind: output, shape index: {}]  }
   0x1   :  { %v65_v0 = vld [vmem:[%s131_s0 + $0x7] ss:$8 sm:$0x7]   ;;  %v67_v1 = vld [vmem:[%s131_s0 + $0x5] ss:$8 sm:$0x7]  }
   0x2   :  { %7 = vrot.lane.b32.xlu0 %v65_v0, %s81_s8  ;;  %19 = vrot.lane.b32.xlu1 %v67_v1, %s82_s11  ;;  %v66_v2 = vld [vmem:[%s131_s0 + $0x6] ss:$8 sm:$0x7]   ;;  %v68_v3 = vld [vmem:[%s131_s0 + $0x4] ss:$8 sm:$0x7]  }
   0x3   :  { %s83_s16 = smov 96   ;;  %v2_v4 = vld [vmem:[%s131_s0] ss:$8 sm:$0x7]   ;;  %s84_s19 = smov 64   ;;  %vm27_vm4 = vcmask 654848  }
   0x4   :  { %v69_v5 = vld [vmem:[%s131_s0 + $0x3] ss:$8 sm:$0x7]   ;;  %4 = vst.msk [vmem:[#allocation0] ss:$8 sm:$0x7] %vm3_vm0, %v2_v4  }
   0x5   :  { %v70_v6 = vld [vmem:[%s131_s0 + $0x2] ss:$8 sm:$0x7]   ;;  %s85_s24 = smov 48   ;;  %s86_s25 = smov 32   ;;  %vm33_vm5 = vcmask 523648  }
   0x6   :  { %13 = vrot.lane.b32.xlu0 %v66_v2, %s83_s16  ;;  %25 = vrot.lane.b32.xlu1 %v68_v3, %s84_s19  ;;  %v71_v7 = vld [vmem:[%s131_s0 + $0x1] ss:$8 sm:$0x7]   ;;  %s87_s0 = smov 16   ;;  %vm39_vm6 = vcmask 392448   ;;  %vm45_vm7 = vcmask 261248  }
   0xa   :  { %31 = vrot.lane.b32.xlu0 %v69_v5, %s85_s24  ;;  %37 = vrot.lane.b32.xlu1 %v70_v6, %s86_s25 }
   0xe   :  { %43 = vrot.lane.b32.xlu0 %v71_v7, %s87_s0 }
  0x74   :  { %v8_v8 = vpop.permute.xlu0 %7   ;;  %v20_v9 = vpop.permute.xlu1 %19  }
  0x75   :  { %10 = vst.msk [vmem:[#allocation0] ss:$8 sm:$0x7] %vm9_vm1, %v8_v8  }
  0x78   :  { %v14_v10 = vpop.permute.xlu0 %13   ;;  %v26_v11 = vpop.permute.xlu1 %25  }
  0x79   :  { %16 = vst.msk [vmem:[#allocation0] ss:$8 sm:$0x7] %vm15_vm2, %v14_v10  }
  0x7a   :  { %22 = vst.msk [vmem:[#allocation0] ss:$8 sm:$0x7] %vm21_vm3, %v20_v9  }
  0x7b   :  { %28 = vst.msk [vmem:[#allocation0] ss:$8 sm:$0x7] %vm27_vm4, %v26_v11  }
  0x7c   :  { %v32_v12 = vpop.permute.xlu0 %31   ;;  %v38_v13 = vpop.permute.xlu1 %37  }
  0x7d   :  { %34 = vst.msk [vmem:[#allocation0] ss:$8 sm:$0x7] %vm33_vm5, %v32_v12  }
  0x7e   :  { %40 = vst.msk [vmem:[#allocation0] ss:$8 sm:$0x7] %vm39_vm6, %v38_v13  }
  0x80   :  { %v44_v14 = vpop.permute.xlu0 %43  }
  0x81   :  { %46 = vst.msk [vmem:[#allocation0] ss:$8 sm:$0x7] %vm45_vm7, %v44_v14  }
  0x88   :  { %v50_v15 = vld [vmem:[#allocation0] sm:$0x1]  ;;  %v54_v16 = vld [vmem:[#allocation0 + $0x8] sm:$0x1]  ;;  %v59_v17 = vld [vmem:[#allocation0 + $0x10] sm:$0x1] }
  0x89   :  { %52 = vst [vmem:[%s132_s1] sm:$0x1] %v50_v15  ;;  %72 = vst [vmem:[%s132_s1 + $0x1] sm:$0x1] %v54_v16 }
  0x8a   :  { %73 = vst [vmem:[%s132_s1 + $0x2] sm:$0x1] %v59_v17 }

// kernel: tile.57
= control target key start
LH: loop header
LB: loop body
LE: loop exit
PB: predicated region body
PF: predicated region fallthrough
CT: control target
= control target key end

     0   :  { %vm4_vm0 = vcmask 1047556   ;;  %s340_s14 = smov 112   ;;  %s341_s2 = smov 96   ;;  %vm6_vm1 = vcmask 130048   ;;  %vm48_vm2 = vcmask 1048448   ;;  %vm80_vm3 = vcmask 917248   ;;  %s628_s0 = inlined_call_operand.vmem [shape: f32[8,24,16], index: 0, kind: input, shape index: {}]   ;;  %s629_s1 = inlined_call_operand.vmem [shape: f32[8,384], index: 1, kind: output, shape index: {}]  }
   0x1   :  { %v277_v0 = vld [vmem:[%s628_s0 + $0x7] ss:$24 sm:$0xf]   ;;  %v285_v9 = vld [vmem:[%s628_s0 + $0x6] ss:$24 sm:$0xf]  }
   0x2   :  { %v278_v1 = vld [vmem:[%s628_s0 + $0x7] ss:$24 sm:$0xf0]   ;;  %v286_v10 = vld [vmem:[%s628_s0 + $0x6] ss:$24 sm:$0xf0]  }
   0x3   :  { %v45_v2 = vsel %vm4_vm0, %v278_v1, %v277_v0  ;;  %v282_v3 = vld [vmem:[%s628_s0 + $0x17] ss:$24 sm:$0xf]   ;;  %v77_v11 = vsel %vm4_vm0, %v286_v10, %v285_v9  ;;  %v287_v12 = vld [vmem:[%s628_s0 + $0xe] ss:$24 sm:$0xf]  }
   0x4   :  { %v283_v4 = vld [vmem:[%s628_s0 + $0x17] ss:$24 sm:$0xf0]   ;;  %46 = vrot.lane.b32.xlu0 %v45_v2, %s340_s14  ;;  %v288_v13 = vld [vmem:[%s628_s0 + $0xe] ss:$24 sm:$0xf0]  }
   0x5   :  { %v66_v5 = vsel %vm4_vm0, %v283_v4, %v282_v3  ;;  %v279_v6 = vld [vmem:[%s628_s0 + $0xf] ss:$24 sm:$0xf]   ;;  %v290_v14 = vld [vmem:[%s628_s0 + $0x16] ss:$24 sm:$0xf]   ;;  %v87_v16 = vsel %vm4_vm0, %v288_v13, %v287_v12 }
   0x6   :  { %v280_v7 = vld [vmem:[%s628_s0 + $0xf] ss:$24 sm:$0xf0]   ;;  %67 = vrot.lane.b32.xlu1 %v66_v5, %s340_s14  ;;  %v291_v15 = vld [vmem:[%s628_s0 + $0x16] ss:$24 sm:$0xf0]  }
   0x7   :  { %v55_v8 = vsel %vm4_vm0, %v280_v7, %v279_v6  ;;  %v98_v17 = vsel %vm4_vm0, %v291_v15, %v290_v14  ;;  %v293_v18 = vld [vmem:[%s628_s0 + $0x5] ss:$24 sm:$0xf]   ;;  %v301_v26 = vld [vmem:[%s628_s0 + $0x4] ss:$24 sm:$0xf]  }
   0x8   :  { %56 = vrot.lane.b32.xlu0 %v55_v8, %s340_s14  ;;  %v294_v19 = vld [vmem:[%s628_s0 + $0x5] ss:$24 sm:$0xf0]   ;;  %v302_v27 = vld [vmem:[%s628_s0 + $0x4] ss:$24 sm:$0xf0]  }
   0x9   :  { %v295_v20 = vld [vmem:[%s628_s0 + $0xd] ss:$24 sm:$0xf]   ;;  %v109_v22 = vsel %vm4_vm0, %v294_v19, %v293_v18  ;;  %s342_s19 = smov 80   ;;  %v141_v29 = vsel %vm4_vm0, %v302_v27, %v301_v26  ;;  %s343_s28 = smov 64   ;;  %vm112_vm4 = vcmask 786048  }
   0xa   :  { %78 = vrot.lane.b32.xlu1 %v77_v11, %s341_s2  ;;  %v296_v21 = vld [vmem:[%s628_s0 + $0xd] ss:$24 sm:$0xf0]   ;;  %v303_v30 = vld [vmem:[%s628_s0 + $0xc] ss:$24 sm:$0xf]  }
   0xb   :  { %v119_v23 = vsel %vm4_vm0, %v296_v21, %v295_v20  ;;  %v298_v24 = vld [vmem:[%s628_s0 + $0x15] ss:$24 sm:$0xf]   ;;  %v304_v31 = vld [vmem:[%s628_s0 + $0xc] ss:$24 sm:$0xf0]  }
   0xc   :  { %88 = vrot.lane.b32.xlu0 %v87_v16, %s341_s2  ;;  %v299_v25 = vld [vmem:[%s628_s0 + $0x15] ss:$24 sm:$0xf0]   ;;  %v306_v32 = vld [vmem:[%s628_s0 + $0x14] ss:$24 sm:$0xf]   ;;  %v151_v34 = vsel %vm4_vm0, %v304_v31, %v303_v30 }
   0xd   :  { %v130_v28 = vsel %vm4_vm0, %v299_v25, %v298_v24  ;;  %v307_v33 = vld [vmem:[%s628_s0 + $0x14] ss:$24 sm:$0xf0]   ;;  %v309_v35 = vld [vmem:[%s628_s0 + $0x3] ss:$24 sm:$0xf]  }
   0xe   :  { %99 = vrot.lane.b32.xlu1 %v98_v17, %s341_s2  ;;  %v162_v36 = vsel %vm4_vm0, %v307_v33, %v306_v32  ;;  %v310_v37 = vld [vmem:[%s628_s0 + $0x3] ss:$24 sm:$0xf0]   ;;  %v2_v42 = vld [vmem:[%s628_s0] ss:$8 sm:$0xf]  }
   0xf   :  { %v311_v38 = vld [vmem:[%s628_s0 + $0xb] ss:$24 sm:$0xf]   ;;  %v173_v43 = vsel %vm4_vm0, %v310_v37, %v309_v35  ;;  %v317_v44 = vld [vmem:[%s628_s0 + $0x2] ss:$24 sm:$0xf]  }
  0x10   :  { %110 = vrot.lane.b32.xlu0 %v109_v22, %s342_s19  ;;  %v312_v39 = vld [vmem:[%s628_s0 + $0xb] ss:$24 sm:$0xf0]   ;;  %v3_v45 = vld [vmem:[%s628_s0] ss:$8 sm:$0xf0]  }
  0x11   :  { %v314_v40 = vld [vmem:[%s628_s0 + $0x13] ss:$24 sm:$0xf]   ;;  %v266_v46 = vld [vmem:[%s628_s0 + $0x40] ss:$8 sm:$0xf]   ;;  %v183_v47 = vsel %vm4_vm0, %v312_v39, %v311_v38  ;;  %v5_v48 = vsel %vm4_vm0, %v3_v45, %v2_v42 }
  0x12   :  { %120 = vrot.lane.b32.xlu1 %v119_v23, %s342_s19  ;;  %v315_v41 = vld [vmem:[%s628_s0 + $0x13] ss:$24 sm:$0xf0]   ;;  %v267_v49 = vld [vmem:[%s628_s0 + $0x40] ss:$8 sm:$0xf0]  }
  0x13   :  { %v272_v50 = vld [vmem:[%s628_s0 + $0x80] ss:$8 sm:$0xf]   ;;  %v318_v51 = vld [vmem:[%s628_s0 + $0x2] ss:$24 sm:$0xf0]   ;;  %v17_v52 = vsel %vm4_vm0, %v267_v49, %v266_v46  ;;  %v194_v55 = vsel %vm4_vm0, %v315_v41, %v314_v40 }
  0x14   :  { %131 = vrot.lane.b32.xlu0 %v130_v28, %s342_s19  ;;  %7 = vst.msk [vmem:[%s629_s1] ss:$8 sm:$0x7] %vm6_vm1, %v5_v48   ;;  %264 = vst.msk [vmem:[%s629_s1 - $0x17] ss:$8 sm:$0x38] %vm6_vm1, %v5_v48   ;;  %v205_v56 = vsel %vm4_vm0, %v318_v51, %v317_v44 }
  0x15   :  { %265 = vst.msk [vmem:[%s629_s1 - $0x2e] ss:$8 sm:$0xc0] %vm6_vm1, %v5_v48   ;;  %v273_v53 = vld [vmem:[%s628_s0 + $0x80] ss:$8 sm:$0xf0]  }
  0x16   :  { %142 = vrot.lane.b32.xlu1 %v141_v29, %s343_s28  ;;  %s344_s5 = smov 48   ;;  %268 = vst.msk [vmem:[%s629_s1 + $0x12] ss:$-15 sm:$0x3] %vm6_vm1, %v17_v52   ;;  %271 = vst.msk [vmem:[%s629_s1 - $0x2] sm:$0x80] %vm6_vm1, %v17_v52   ;;  %v32_v54 = vsel %vm4_vm0, %v273_v53, %v272_v50 }
  0x17   :  { %270 = vst.msk [vmem:[%s629_s1 - $0x1c] ss:$8 sm:$0x70] %vm6_vm1, %v17_v52   ;;  %269 = vst.msk [vmem:[%s629_s1 - $0x5] ss:$8 sm:$0xc] %vm6_vm1, %v17_v52  }
  0x18   :  { %152 = vrot.lane.b32.xlu0 %v151_v34, %s343_s28  ;;  %275 = vst.msk [vmem:[%s629_s1 - $0xa] ss:$8 sm:$0x1c] %vm6_vm1, %v32_v54   ;;  %276 = vst.msk [vmem:[%s629_s1 - $0x21] ss:$8 sm:$0xe0] %vm6_vm1, %v32_v54  }
  0x19   :  { %274 = vst.msk [vmem:[%s629_s1 + $0xd] ss:$8 sm:$0x3] %vm6_vm1, %v32_v54   ;;  %v319_v57 = vld [vmem:[%s628_s0 + $0xa] ss:$24 sm:$0xf]  }
  0x1a   :  { %163 = vrot.lane.b32.xlu1 %v162_v36, %s343_s28  ;;  %v320_v58 = vld [vmem:[%s628_s0 + $0xa] ss:$24 sm:$0xf0]   ;;  %s345_s28 = smov 32   ;;  %vm144_vm5 = vcmask 654848   ;;  %vm176_vm6 = vcmask 523648  }
  0x1b   :  { %v322_v59 = vld [vmem:[%s628_s0 + $0x12] ss:$24 sm:$0xf]   ;;  %v215_v61 = vsel %vm4_vm0, %v320_v58, %v319_v57  ;;  %v325_v63 = vld [vmem:[%s628_s0 + $0x1] ss:$24 sm:$0xf]  }
  0x1c   :  { %174 = vrot.lane.b32.xlu0 %v173_v43, %s344_s5  ;;  %v323_v60 = vld [vmem:[%s628_s0 + $0x12] ss:$24 sm:$0xf0]   ;;  %v326_v0 = vld [vmem:[%s628_s0 + $0x1] ss:$24 sm:$0xf0]  }
  0x1d   :  { %v226_v62 = vsel %vm4_vm0, %v323_v60, %v322_v59  ;;  %v327_v1 = vld [vmem:[%s628_s0 + $0x9] ss:$24 sm:$0xf]   ;;  %v237_v3 = vsel %vm4_vm0, %v326_v0, %v325_v63  ;;  %vm208_vm7 = vcmask 392448   ;;  %vm240_vm8 = vcmask 261248  }
  0x1e   :  { %184 = vrot.lane.b32.xlu1 %v183_v47, %s344_s5  ;;  %v328_v2 = vld [vmem:[%s628_s0 + $0x9] ss:$24 sm:$0xf0]  }
  0x1f   :  { %v247_v4 = vsel %vm4_vm0, %v328_v2, %v327_v1  ;;  %v330_v5 = vld [vmem:[%s628_s0 + $0x11] ss:$24 sm:$0xf]  }
  0x20   :  { %195 = vrot.lane.b32.xlu0 %v194_v55, %s344_s5  ;;  %v331_v6 = vld [vmem:[%s628_s0 + $0x11] ss:$24 sm:$0xf0]   ;;  %s346_s0 = smov 16  }
  0x21   :  { %v258_v7 = vsel %vm4_vm0, %v331_v6, %v330_v5 }
  0x22   :  { %206 = vrot.lane.b32.xlu1 %v205_v56, %s345_s28 }
  0x24   :  { %216 = vrot.lane.b32.xlu0 %v215_v61, %s345_s28 }
  0x26   :  { %227 = vrot.lane.b32.xlu1 %v226_v62, %s345_s28 }
  0x28   :  { %238 = vrot.lane.b32.xlu0 %v237_v3, %s346_s0 }
  0x2a   :  { %248 = vrot.lane.b32.xlu1 %v247_v4, %s346_s0 }
  0x2c   :  { %259 = vrot.lane.b32.xlu0 %v258_v7, %s346_s0 }
  0x76   :  { %v47_v8 = vpop.permute.xlu0 %46  }
  0x77   :  { %49 = vst.msk [vmem:[%s629_s1] sm:$0xff] %vm48_vm2, %v47_v8  }
  0x78   :  { %v68_v9 = vpop.permute.xlu1 %67  }
  0x79   :  { %284 = vst.msk [vmem:[%s629_s1 + $0x10] sm:$0xff] %vm48_vm2, %v68_v9  }
  0x7a   :  { %v57_v10 = vpop.permute.xlu0 %56  }
  0x7b   :  { %281 = vst.msk [vmem:[%s629_s1 + $0x8] sm:$0xff] %vm48_vm2, %v57_v10  }
  0x7c   :  { %v79_v11 = vpop.permute.xlu1 %78  }
  0x7d   :  { %81 = vst.msk [vmem:[%s629_s1] sm:$0xff] %vm80_vm3, %v79_v11  }
  0x7e   :  { %v89_v12 = vpop.permute.xlu0 %88  }
  0x7f   :  { %289 = vst.msk [vmem:[%s629_s1 + $0x8] sm:$0xff] %vm80_vm3, %v89_v12  }
  0x80   :  { %v100_v13 = vpop.permute.xlu1 %99  }
  0x81   :  { %292 = vst.msk [vmem:[%s629_s1 + $0x10] sm:$0xff] %vm80_vm3, %v100_v13  }
  0x82   :  { %v111_v14 = vpop.permute.xlu0 %110  }
  0x83   :  { %113 = vst.msk [vmem:[%s629_s1] sm:$0xff] %vm112_vm4, %v111_v14  }
  0x84   :  { %v121_v15 = vpop.permute.xlu1 %120  }
  0x85   :  { %297 = vst.msk [vmem:[%s629_s1 + $0x8] sm:$0xff] %vm112_vm4, %v121_v15  }
  0x86   :  { %v132_v16 = vpop.permute.xlu0 %131  }
  0x87   :  { %300 = vst.msk [vmem:[%s629_s1 + $0x10] sm:$0xff] %vm112_vm4, %v132_v16  }
  0x88   :  { %v143_v17 = vpop.permute.xlu1 %142  }
  0x89   :  { %145 = vst.msk [vmem:[%s629_s1] sm:$0xff] %vm144_vm5, %v143_v17  }
  0x8a   :  { %v153_v18 = vpop.permute.xlu0 %152  }
  0x8b   :  { %305 = vst.msk [vmem:[%s629_s1 + $0x8] sm:$0xff] %vm144_vm5, %v153_v18  }
  0x8c   :  { %v164_v19 = vpop.permute.xlu1 %163  }
  0x8d   :  { %308 = vst.msk [vmem:[%s629_s1 + $0x10] sm:$0xff] %vm144_vm5, %v164_v19  }
  0x8e   :  { %v175_v20 = vpop.permute.xlu0 %174  }
  0x8f   :  { %177 = vst.msk [vmem:[%s629_s1] sm:$0xff] %vm176_vm6, %v175_v20  }
  0x90   :  { %v185_v21 = vpop.permute.xlu1 %184  }
  0x91   :  { %313 = vst.msk [vmem:[%s629_s1 + $0x8] sm:$0xff] %vm176_vm6, %v185_v21  }
  0x92   :  { %v196_v22 = vpop.permute.xlu0 %195  }
  0x93   :  { %316 = vst.msk [vmem:[%s629_s1 + $0x10] sm:$0xff] %vm176_vm6, %v196_v22  }
  0x94   :  { %v207_v23 = vpop.permute.xlu1 %206  }
  0x95   :  { %209 = vst.msk [vmem:[%s629_s1] sm:$0xff] %vm208_vm7, %v207_v23  }
  0x96   :  { %v217_v24 = vpop.permute.xlu0 %216  }
  0x97   :  { %321 = vst.msk [vmem:[%s629_s1 + $0x8] sm:$0xff] %vm208_vm7, %v217_v24  }
  0x98   :  { %v228_v25 = vpop.permute.xlu1 %227  }
  0x99   :  { %324 = vst.msk [vmem:[%s629_s1 + $0x10] sm:$0xff] %vm208_vm7, %v228_v25  }
  0x9a   :  { %v239_v26 = vpop.permute.xlu0 %238  }
  0x9b   :  { %241 = vst.msk [vmem:[%s629_s1] sm:$0xff] %vm240_vm8, %v239_v26  }
  0x9c   :  { %v249_v27 = vpop.permute.xlu1 %248  }
  0x9d   :  { %329 = vst.msk [vmem:[%s629_s1 + $0x8] sm:$0xff] %vm240_vm8, %v249_v27  }
  0x9e   :  { %v260_v28 = vpop.permute.xlu0 %259  }
  0x9f   :  { %332 = vst.msk [vmem:[%s629_s1 + $0x10] sm:$0xff] %vm240_vm8, %v260_v28  }

// kernel: conditional_conv_block.1
= control target key start
LH: loop header
LB: loop body
LE: loop exit
PB: predicated region body
PF: predicated region fallthrough
CT: control target
= control target key end

     0   :  { %s5167_s17 = smov 0   ;;  %s7418_s0 = inlined_call_operand.vmem [shape: f32[2,18,96], index: 0, kind: input, shape index: {}]   ;;  %s7419_s1 = inlined_call_operand.vmem [shape: f32[2,2,384], index: 1, kind: input, shape index: {}]   ;;  %s7420_s2 = inlined_call_operand.vmem [shape: f32[3,96,384], index: 2, kind: input, shape index: {}]   ;;  %s7421_s3 = inlined_call_operand.vmem [shape: f32[384,1152], index: 3, kind: input, shape index: {}]   ;;  %s7422_s4 = inlined_call_operand.vmem [shape: f32[2,16,16], index: 4, kind: input, shape index: {}]   ;;  %s7423_s5 = inlined_call_operand.vmem [shape: f32[2,384], index: 5, kind: input, shape index: {}]   ;;  %s7424_s6 = inlined_call_operand.vmem [shape: f32[2,384], index: 6, kind: input, shape index: {}]   ;;  %s7425_s7 = inlined_call_operand.vmem [shape: f32[2,384], index: 7, kind: input, shape index: {}]   ;;  %s7426_s8 = inlined_call_operand.vmem [shape: f32[1,384], index: 8, kind: input, shape index: {}]   ;;  %s7427_s9 = inlined_call_operand.vmem [shape: f32[384,8], index: 9, kind: input, shape index: {}]   ;;  %s7428_s10 = inlined_call_operand.vmem [shape: f32[8,384], index: 10, kind: input, shape index: {}]   ;;  %s7429_s11 = inlined_call_operand.vmem [shape: f32[2,16,384], index: 11, kind: output, shape index: {}]  }
   0x1 LB: > { %s3731_s18 = sadd.s32 4294967295, %s5102_s17   ;;  %p3735_p0 = scmp.ge.s32.totalorder %s5102_s17, 1  ;;  %s5102_s17 = sphi %s5167_s17, %s21_s17  }
   0x2   : > { %p347_p1 = scmp.lt.s32.totalorder %s5102_s17, 3 }
   0x4   : > { %p348_p2 = pnand %p3735_p0, %p347_p1 }
   0x5   : > { %v3740_v0 = vld [vmem:[%s7420_s2 + $0x128] sm:$0xff] (!%p348_p2)  ;;  %v3743_v1 = vld [vmem:[%s7420_s2 + $0x140] sm:$0xff] (!%p348_p2)  ;;  %v3741_v2 = vld [vmem:[%s7420_s2 + $0x130] sm:$0xff] (!%p348_p2)  ;;  %p392_p3 = scmp.lt.s32.totalorder (!%p348_p2), %s3731_s18, 1  ;;  %v7432_v7 = vmov (!%p348_p2), 0.0   ;;  %vm484_vm0 = vcmask (!%p348_p2), 785408  }
   0x6   : > { %351 = sbr.rel (%p348_p2) target bundleno = 1937 (0x791), region = 64  ;;  %v4279_v3 = vpack.c.bf16 (!%p348_p2), %v3743_v1, %v3740_v0  ;;  %v3744_v4 = vld [vmem:[%s7420_s2 + $0x148] sm:$0xff] (!%p348_p2)  ;;  %v3739_v5 = vld [vmem:[%s7420_s2 + $0x120] sm:$0xff] (!%p348_p2)  ;;  %v3742_v6 = vld [vmem:[%s7420_s2 + $0x138] sm:$0xff] (!%p348_p2)  ;;  %555 = vmatprep.mubr.f32.mxu0 (!%p348_p2), %v7432_v7  ;;  %vm5106_vm1 = vmmov (!%p348_p2), 0   ;;  %vm1293_vm3 = vcmask (!%p348_p2), 64512  }
   0x7   : > { %v4303_v8 = vpack.c.bf16 (!%p348_p2), %v3744_v4, %v3741_v2  ;;  %v4281_v9 = vpack.c.bf16 (!%p348_p2), %v3742_v6, %v3739_v5  ;;  %v3746_v10 = vld [vmem:[%s7420_s2 + $0x158] sm:$0xff] (!%p348_p2)  ;;  %v3749_v11 = vld [vmem:[%s7420_s2 + $0x170] sm:$0xff] (!%p348_p2)  ;;  %v3747_v12 = vld [vmem:[%s7420_s2 + $0x160] sm:$0xff] (!%p348_p2)  ;;  %vm2830_vm4 = vcmask (!%p348_p2), 130048  }
   0x8   : > { %4280 = vmatprep.subr.bf16.mxu0 (!%p348_p2), %v4279_v3  ;;  %v4283_v13 = vpack.c.bf16 (!%p348_p2), %v3749_v11, %v3746_v10  ;;  %v3750_v14 = vld [vmem:[%s7420_s2 + $0x178] sm:$0xff] (!%p348_p2)  ;;  %v3745_v15 = vld [vmem:[%s7420_s2 + $0x150] sm:$0xff] (!%p348_p2)  ;;  %v3748_v16 = vld [vmem:[%s7420_s2 + $0x168] sm:$0xff] (!%p348_p2) }
   0x9   : > { %4304 = vmatprep.subr.bf16.mxu1 (!%p348_p2), %v4303_v8  ;;  %4282 = vmatpush1.bf16.msra.mxu0 (!%p348_p2), %v4281_v9  ;;  %v4307_v17 = vpack.c.bf16 (!%p348_p2), %v3750_v14, %v3747_v12  ;;  %v4285_v18 = vpack.c.bf16 (!%p348_p2), %v3748_v16, %v3745_v15  ;;  %v3752_v19 = vld [vmem:[%s7420_s2 + $0x188] sm:$0xff] (!%p348_p2)  ;;  %v3755_v20 = vld [vmem:[%s7420_s2 + $0x1a0] sm:$0xff] (!%p348_p2)  ;;  %v3753_v21 = vld [vmem:[%s7420_s2 + $0x190] sm:$0xff] (!%p348_p2) }
   0xa   : > { %4306 = vmatpush3.bf16.msra.mxu1 (!%p348_p2), %v4303_v8  ;;  %4284 = vmatprep.subr.bf16.mxu0 (!%p348_p2), %v4283_v13  ;;  %v4287_v22 = vpack.c.bf16 (!%p348_p2), %v3755_v20, %v3752_v19  ;;  %v3756_v23 = vld [vmem:[%s7420_s2 + $0x1a8] sm:$0xff] (!%p348_p2)  ;;  %v3751_v24 = vld [vmem:[%s7420_s2 + $0x180] sm:$0xff] (!%p348_p2)  ;;  %v3754_v25 = vld [vmem:[%s7420_s2 + $0x198] sm:$0xff] (!%p348_p2) }
   0xb   : > { %4308 = vmatprep.subr.bf16.mxu1 (!%p348_p2), %v4307_v17  ;;  %v4311_v26 = vpack.c.bf16 (!%p348_p2), %v3756_v23, %v3753_v21  ;;  %v3758_v27 = vld [vmem:[%s7420_s2 + $0x1b8] sm:$0xff] (!%p348_p2)  ;;  %v3761_v28 = vld [vmem:[%s7420_s2 + $0x1d0] sm:$0xff] (!%p348_p2)  ;;  %v3759_v29 = vld [vmem:[%s7420_s2 + $0x1c0] sm:$0xff] (!%p348_p2)  ;;  %v4289_v31 = vpack.c.bf16 (!%p348_p2), %v3754_v25, %v3751_v24 }
   0xc   : > { %v3762_v30 = vld [vmem:[%s7420_s2 + $0x1d8] sm:$0xff] (!%p348_p2)  ;;  %v4291_v32 = vpack.c.bf16 (!%p348_p2), %v3761_v28, %v3758_v27  ;;  %v3757_v33 = vld [vmem:[%s7420_s2 + $0x1b0] sm:$0xff] (!%p348_p2)  ;;  %v3760_v34 = vld [vmem:[%s7420_s2 + $0x1c8] sm:$0xff] (!%p348_p2) }
   0xd   : > { %s7437_s18 = smov (!%p392_p3, %s3731_s18), 1  ;;  %4286 = vmatpush1.bf16.msra.mxu0 %v4285_v18  ;;  %v4315_v35 = vpack.c.bf16 %v3762_v30, %v3759_v29  ;;  %v3764_v36 = vld [vmem:[%s7420_s2 + $0x1e8] sm:$0xff]  ;;  %v3767_v37 = vld [vmem:[%s7420_s2 + $0x200] sm:$0xff]  ;;  %v3765_v38 = vld [vmem:[%s7420_s2 + $0x1f0] sm:$0xff]  ;;  %v4293_v40 = vpack.c.bf16 %v3760_v34, %v3757_v33 }
   0xe   : > { %s5027_s21 = smul.u32 24, %s7437_s18  ;;  %4310 = vmatpush3.bf16.msra.mxu1 %v4307_v17  ;;  %4288 = vmatprep.subr.bf16.mxu0 %v4287_v22  ;;  %v3768_v39 = vld [vmem:[%s7420_s2 + $0x208] sm:$0xff]  ;;  %v4295_v42 = vpack.c.bf16 %v3767_v37, %v3764_v36  ;;  %v3763_v43 = vld [vmem:[%s7420_s2 + $0x1e0] sm:$0xff]  ;;  %v3766_v44 = vld [vmem:[%s7420_s2 + $0x1f8] sm:$0xff] }
   0xf   : > { %4312 = vmatprep.subr.bf16.mxu1 %v4311_v26  ;;  %v4319_v45 = vpack.c.bf16 %v3768_v39, %v3765_v38  ;;  %v3770_v46 = vld [vmem:[%s7420_s2 + $0x218] sm:$0xff]  ;;  %v3773_v47 = vld [vmem:[%s7420_s2 + $0x230] sm:$0xff]  ;;  %v3771_v48 = vld [vmem:[%s7420_s2 + $0x220] sm:$0xff]  ;;  %v4297_v50 = vpack.c.bf16 %v3766_v44, %v3763_v43  ;;  %s5028_s28 = smul.u32 6, %s7437_s18 }
  0x10   : > { %s5254_s19 = scalar_lea.vmem %s7418_s0, %s5027_s21  ;;  %v3774_v49 = vld [vmem:[%s7420_s2 + $0x238] sm:$0xff]  ;;  %v4299_v51 = vpack.c.bf16 %v3773_v47, %v3770_v46  ;;  %v3769_v52 = vld [vmem:[%s7420_s2 + $0x210] sm:$0xff]  ;;  %v3772_v53 = vld [vmem:[%s7420_s2 + $0x228] sm:$0xff]  ;;  %s5029_s25 = smul.u32 48, %s7437_s18 }
  0x11   : > { %4290 = vmatpush1.bf16.msra.mxu0 %v4289_v31  ;;  %v445_v41 = vld [vmem:[%s5254_s19 + $0x1] sm:$0xff]  ;;  %v4323_v54 = vpack.c.bf16 %v3774_v49, %v3771_v48  ;;  %v411_v57 = vld [vmem:[%s7420_s2 + $0x10] sm:$0xff]  ;;  %v4301_v59 = vpack.c.bf16 %v3772_v53, %v3769_v52  ;;  %v412_v62 = vld [vmem:[%s7420_s2 + $0x18] sm:$0xff]  ;;  %s401_s30 = scalar_lea.vmem %s7419_s1, %s5028_s28 }
  0x12   : > { %4314 = vmatpush3.bf16.msra.mxu1 %v4311_v26  ;;  %4292 = vmatprep.subr.bf16.mxu0 %v4291_v32  ;;  %v410_v55 = vld [vmem:[%s7420_s2 + $0x8] sm:$0xff]  ;;  %v413_v56 = vld [vmem:[%s7420_s2 + $0x20] sm:$0xff]  ;;  %v416_v0 = vld [vmem:[%s7420_s2 + $0x38] sm:$0xff]  ;;  %s406_s28 = scalar_lea.vmem %s7429_s11, %s5029_s25 }
  0x13   : > { %4316 = vmatprep.subr.bf16.mxu1 %v4315_v35  ;;  %4093 = vmatprep.mubr.msk.f32.mxu1 %vm484_vm0, %v445_v41  ;;  %v414_v58 = vld [vmem:[%s7420_s2 + $0x28] sm:$0xff]  ;;  %v4327_v60 = vpack.c.bf16 %v413_v56, %v410_v55  ;;  %v409_v61 = vld [vmem:[%s7420_s2] sm:$0xff]  ;;  %v419_v1 = vld [vmem:[%s7420_s2 + $0x50] sm:$0xff] }
  0x14   : > { %v4351_v63 = vpack.c.bf16 %v414_v58, %v411_v57  ;;  %v417_v2 = vld [vmem:[%s7420_s2 + $0x40] sm:$0xff]  ;;  %v420_v3 = vld [vmem:[%s7420_s2 + $0x58] sm:$0xff]  ;;  %v4329_v4 = vpack.c.bf16 %v412_v62, %v409_v61  ;;  %v446_v5 = vld [vmem:[%s5254_s19 + $0x9] sm:$0xff]  ;;  %v4331_v6 = vpack.c.bf16 %v419_v1, %v416_v0 }
  0x15   : > { %4294 = vmatpush1.bf16.msra.mxu0 %v4293_v40  ;;  %v415_v8 = vld [vmem:[%s7420_s2 + $0x30] sm:$0xff]  ;;  %v418_v9 = vld [vmem:[%s7420_s2 + $0x48] sm:$0xff]  ;;  %v4355_v10 = vpack.c.bf16 %v420_v3, %v417_v2  ;;  %v425_v12 = vld [vmem:[%s7420_s2 + $0x80] sm:$0xff] }
  0x16   : > { %4318 = vmatpush3.bf16.msra.mxu1 %v4315_v35  ;;  %4296 = vmatprep.subr.bf16.mxu0 %v4295_v42  ;;  %v422_v11 = vld [vmem:[%s7420_s2 + $0x68] sm:$0xff]  ;;  %v423_v13 = vld [vmem:[%s7420_s2 + $0x70] sm:$0xff]  ;;  %v4333_v15 = vpack.c.bf16 %v418_v9, %v415_v8  ;;  %v5346_v16 = vld [vmem:[%s5254_s19] sm:$0xff] }
  0x17   : > { %4320 = vmatprep.subr.bf16.mxu1 %v4319_v45  ;;  %v426_v14 = vld [vmem:[%s7420_s2 + $0x88] sm:$0xff]  ;;  %v4335_v17 = vpack.c.bf16 %v425_v12, %v422_v11  ;;  %v421_v18 = vld [vmem:[%s7420_s2 + $0x60] sm:$0xff]  ;;  %v424_v19 = vld [vmem:[%s7420_s2 + $0x78] sm:$0xff] }
  0x18   : > { %v4359_v20 = vpack.c.bf16 %v426_v14, %v423_v13  ;;  %v428_v21 = vld [vmem:[%s7420_s2 + $0x98] sm:$0xff]  ;;  %v431_v22 = vld [vmem:[%s7420_s2 + $0xb0] sm:$0xff]  ;;  %v429_v23 = vld [vmem:[%s7420_s2 + $0xa0] sm:$0xff]  ;;  %v4337_v25 = vpack.c.bf16 %v424_v19, %v421_v18 }
  0x19   : > { %4298 = vmatpush1.bf16.msra.mxu0 %v4297_v50  ;;  %v432_v24 = vld [vmem:[%s7420_s2 + $0xb8] sm:$0xff]  ;;  %v4339_v26 = vpack.c.bf16 %v431_v22, %v428_v21  ;;  %v427_v27 = vld [vmem:[%s7420_s2 + $0x90] sm:$0xff]  ;;  %v430_v28 = vld [vmem:[%s7420_s2 + $0xa8] sm:$0xff] }
  0x1a   : > { %4322 = vmatpush3.bf16.msra.mxu1 %v4319_v45  ;;  %4300 = vmatprep.subr.bf16.mxu0 %v4299_v51  ;;  %v4363_v29 = vpack.c.bf16 %v432_v24, %v429_v23  ;;  %v434_v30 = vld [vmem:[%s7420_s2 + $0xc8] sm:$0xff]  ;;  %v437_v31 = vld [vmem:[%s7420_s2 + $0xe0] sm:$0xff]  ;;  %v435_v32 = vld [vmem:[%s7420_s2 + $0xd0] sm:$0xff]  ;;  %v4341_v34 = vpack.c.bf16 %v430_v28, %v427_v27 }
  0x1b   : > { %4324 = vmatprep.subr.bf16.mxu1 %v4323_v54  ;;  %v438_v33 = vld [vmem:[%s7420_s2 + $0xe8] sm:$0xff]  ;;  %v4343_v35 = vpack.c.bf16 %v437_v31, %v434_v30  ;;  %v433_v36 = vld [vmem:[%s7420_s2 + $0xc0] sm:$0xff]  ;;  %v436_v37 = vld [vmem:[%s7420_s2 + $0xd8] sm:$0xff] }
  0x1c   : > { %v4367_v38 = vpack.c.bf16 %v438_v33, %v435_v32  ;;  %v440_v39 = vld [vmem:[%s7420_s2 + $0xf8] sm:$0xff]  ;;  %v443_v40 = vld [vmem:[%s7420_s2 + $0x110] sm:$0xff]  ;;  %v4345_v43 = vpack.c.bf16 %v436_v37, %v433_v36  ;;  %v442_v46 = vld [vmem:[%s7420_s2 + $0x108] sm:$0xff] }
  0x1d   : > { %4302 = vmatpush1.bf16.msra.mxu0 %v4301_v59  ;;  %v444_v42 = vld [vmem:[%s7420_s2 + $0x118] sm:$0xff]  ;;  %v4347_v44 = vpack.c.bf16 %v443_v40, %v440_v39  ;;  %v439_v45 = vld [vmem:[%s7420_s2 + $0xf0] sm:$0xff]  ;;  %v3784_v48 = vld [vmem:[%s7420_s2 + $0x248] sm:$0xff] }
  0x1e   : > { %4326 = vmatpush3.bf16.msra.mxu1 %v4323_v54  ;;  %4328 = vmatprep.subr.bf16.mxu0 %v4327_v60  ;;  %v3787_v49 = vld [vmem:[%s7420_s2 + $0x260] sm:$0xff]  ;;  %v3785_v50 = vld [vmem:[%s7420_s2 + $0x250] sm:$0xff]  ;;  %v3788_v51 = vld [vmem:[%s7420_s2 + $0x268] sm:$0xff]  ;;  %v4349_v52 = vpack.c.bf16 %v442_v46, %v439_v45 }
  0x1f   : > { %4352 = vmatprep.subr.bf16.mxu1 %v4351_v63  ;;  %v4375_v53 = vpack.c.bf16 %v3787_v49, %v3784_v48  ;;  %v3783_v54 = vld [vmem:[%s7420_s2 + $0x240] sm:$0xff]  ;;  %v3786_v55 = vld [vmem:[%s7420_s2 + $0x258] sm:$0xff]  ;;  %v4399_v56 = vpack.c.bf16 %v3788_v51, %v3785_v50  ;;  %v3793_v58 = vld [vmem:[%s7420_s2 + $0x290] sm:$0xff] }
  0x20   : > { %3775 = vmatmul.mubr.msk.f32.vlgmr.msra.gmra.mrb[0].mxu0 %vm484_vm0, %v445_v41  ;;  %v441_v41 = vld [vmem:[%s7420_s2 + $0x100] sm:$0xff]  ;;  %v3790_v57 = vld [vmem:[%s7420_s2 + $0x278] sm:$0xff]  ;;  %v4377_v61 = vpack.c.bf16 %v3786_v55, %v3783_v54  ;;  %v408_v62 = vld [vmem:[%s5254_s19 + $0x8] sm:$0xff]  ;;  %v7430_v55 = vmov 0.0|0.0  }
  0x21   : > { %4094 = vmatmul.mubr.msk.f32.vlgmr.msra.gmra.mrb[0].mxu1 %vm484_vm0, %v446_v5  ;;  %4330 = vmatpush1.bf16.msra.mxu0 %v4329_v4  ;;  %v4371_v47 = vpack.c.bf16 %v444_v42, %v441_v41  ;;  %v3791_v59 = vld [vmem:[%s7420_s2 + $0x280] sm:$0xff]  ;;  %v3794_v60 = vld [vmem:[%s7420_s2 + $0x298] sm:$0xff]  ;;  %v3789_v0 = vld [vmem:[%s7420_s2 + $0x270] sm:$0xff] }
  0x22   : > { %4354 = vmatpush3.bf16.msra.mxu1 %v4351_v63  ;;  %4332 = vmatprep.subr.bf16.mxu0 %v4331_v6  ;;  %v4379_v63 = vpack.c.bf16 %v3793_v58, %v3790_v57  ;;  %v3792_v1 = vld [vmem:[%s7420_s2 + $0x288] sm:$0xff]  ;;  %v4403_v2 = vpack.c.bf16 %v3794_v60, %v3791_v59  ;;  %v3799_v4 = vld [vmem:[%s7420_s2 + $0x2c0] sm:$0xff]  ;;  %v3798_v12 = vld [vmem:[%s7420_s2 + $0x2b8] sm:$0xff] }
  0x23   : > { %4356 = vmatprep.subr.bf16.mxu1 %v4355_v10  ;;  %561 = vmatprep.mubr.f32.mxu0 %v7432_v7  ;;  %v3796_v3 = vld [vmem:[%s7420_s2 + $0x2a8] sm:$0xff]  ;;  %v4381_v8 = vpack.c.bf16 %v3792_v1, %v3789_v0  ;;  %v3795_v11 = vld [vmem:[%s7420_s2 + $0x2a0] sm:$0xff]  ;;  %v3802_v14 = vld [vmem:[%s7420_s2 + $0x2d8] sm:$0xff] }
  0x24   : > { %3776 = vmatmul.mubr.msk.f32.gmra.mrb[2].mxu0 %vm484_vm0, %v446_v5  ;;  %4120 = vmatprep.mubr.msk.f32.mxu1 %vm484_vm0, %v5346_v16  ;;  %v3797_v5 = vld [vmem:[%s7420_s2 + $0x2b0] sm:$0xff]  ;;  %v3800_v6 = vld [vmem:[%s7420_s2 + $0x2c8] sm:$0xff]  ;;  %v4385_v18 = vpack.c.bf16 %v3798_v12, %v3795_v11  ;;  %v3811_v24 = vld [vmem:[%s7420_s2 + $0x320] sm:$0xff] }
  0x25   : > { %4334 = vmatpush1.bf16.msra.mxu0 %v4333_v15  ;;  %713 = vmatprep.mubr.f32.mxu0 %v7432_v7  ;;  %v5466_v9 = vld [vmem:[%s5254_s19 + $0x2] sm:$0xff]  ;;  %v4407_v13 = vpack.c.bf16 %v3800_v6, %v3797_v5  ;;  %v3805_v15 = vld [vmem:[%s7420_s2 + $0x2f0] sm:$0xff]  ;;  %v3810_v30 = vld [vmem:[%s7420_s2 + $0x318] sm:$0xff] }
  0x26   : > { %4358 = vmatpush3.bf16.msra.mxu1 %v4355_v10  ;;  %4336 = vmatprep.subr.bf16.mxu0 %v4335_v17  ;;  %v4383_v10 = vpack.c.bf16 %v3799_v4, %v3796_v3  ;;  %v3806_v17 = vld [vmem:[%s7420_s2 + $0x2f8] sm:$0xff]  ;;  %v4387_v19 = vpack.c.bf16 %v3805_v15, %v3802_v14  ;;  %v3804_v21 = vld [vmem:[%s7420_s2 + $0x2e8] sm:$0xff]  ;;  %v3817_v33 = vld [vmem:[%s7420_s2 + $0x350] sm:$0xff] }
  0x27   : > { %4360 = vmatprep.subr.bf16.mxu1 %v4359_v20  ;;  %v3808_v23 = vld [vmem:[%s7420_s2 + $0x308] sm:$0xff]  ;;  %v3814_v32 = vld [vmem:[%s7420_s2 + $0x338] sm:$0xff]  ;;  %v1100_v41 = vld [vmem:[%s7427_s9 + $0x80] sm:$0xff] }
  0x28   : > { %v4391_v28 = vpack.c.bf16 %v3811_v24, %v3808_v23  ;;  %v4395_v37 = vpack.c.bf16 %v3817_v33, %v3814_v32  ;;  %v3816_v39 = vld [vmem:[%s7420_s2 + $0x348] sm:$0xff]  ;;  %v1102_v49 = vld [vmem:[%s7427_s9 + $0x90] sm:$0xff]  ;;  %v1103_v50 = vld [vmem:[%s7427_s9 + $0x98] sm:$0xff] }
  0x29   : > { %4338 = vmatpush1.bf16.msra.mxu0 %v4337_v25  ;;  %v3809_v25 = vld [vmem:[%s7420_s2 + $0x310] sm:$0xff]  ;;  %v1101_v42 = vld [vmem:[%s7427_s9 + $0x88] sm:$0xff]  ;;  %v5572_v57 = vpack.c.bf16 %v1103_v50, %v1102_v49  ;;  %v1087_v59 = vld [vmem:[%s7427_s9 + $0x18] sm:$0xff] }
  0x2a   : > { %4362 = vmatpush3.bf16.msra.mxu1 %v4359_v20  ;;  %4340 = vmatprep.subr.bf16.mxu0 %v4339_v26  ;;  %v3801_v20 = vld [vmem:[%s7420_s2 + $0x2d0] sm:$0xff]  ;;  %v3812_v26 = vld [vmem:[%s7420_s2 + $0x328] sm:$0xff]  ;;  %v5542_v45 = vpack.c.bf16 %v1101_v42, %v1100_v41  ;;  %v1104_v1 = vld [vmem:[%s7427_s9 + $0xa0] sm:$0xff] }
  0x2b   : > { %4364 = vmatprep.subr.bf16.mxu1 %v4363_v29  ;;  %v4389_v27 = vpack.c.bf16 %v3804_v21, %v3801_v20  ;;  %v4415_v31 = vpack.c.bf16 %v3812_v26, %v3809_v25  ;;  %v1117_v46 = vld [vmem:[%s7427_s9 + $0x108] sm:$0xff]  ;;  %v1086_v58 = vld [vmem:[%s7427_s9 + $0x10] sm:$0xff]  ;;  %v1123_v5 = vld [vmem:[%s7427_s9 + $0x138] sm:$0xff] }
  0x2c   : > { %v1085_v48 = vld [vmem:[%s7427_s9 + $0x8] sm:$0xff]  ;;  %v1122_v3 = vld [vmem:[%s7427_s9 + $0x130] sm:$0xff]  ;;  %v1088_v6 = vld [vmem:[%s7427_s9 + $0x20] sm:$0xff] }
  0x2d   : > { %4342 = vmatpush1.bf16.msra.mxu0 %v4341_v34  ;;  %v3815_v34 = vld [vmem:[%s7420_s2 + $0x340] sm:$0xff]  ;;  %v802_v51 = vld [vmem:[%s5254_s19 + $0xa] sm:$0xff]  ;;  %v1107_v12 = vld [vmem:[%s7427_s9 + $0xb8] sm:$0xff] }
  0x2e   : > { %4366 = vmatpush3.bf16.msra.mxu1 %v4363_v29  ;;  %4344 = vmatprep.subr.bf16.mxu0 %v4343_v35  ;;  %v3807_v29 = vld [vmem:[%s7420_s2 + $0x300] sm:$0xff]  ;;  %v3818_v35 = vld [vmem:[%s7420_s2 + $0x358] sm:$0xff]  ;;  %v1106_v11 = vld [vmem:[%s7427_s9 + $0xb0] sm:$0xff] }
  0x2f   : > { %4368 = vmatprep.subr.bf16.mxu1 %v4367_v38  ;;  %v4393_v36 = vpack.c.bf16 %v3810_v30, %v3807_v29  ;;  %v4419_v40 = vpack.c.bf16 %v3818_v35, %v3815_v34  ;;  %v5643_v14 = vpack.c.bf16 %v1107_v12, %v1106_v11  ;;  %v1125_v15 = vld [vmem:[%s7427_s9 + $0x148] sm:$0xff]  ;;  %v1108_v20 = vld [vmem:[%s7427_s9 + $0xc0] sm:$0xff]  ;;  %v1127_v24 = vld [vmem:[%s7427_s9 + $0x158] sm:$0xff] }
  0x30   : > { %v1109_v21 = vld [vmem:[%s7427_s9 + $0xc8] sm:$0xff]  ;;  %v1092_v25 = vld [vmem:[%s7427_s9 + $0x40] sm:$0xff]  ;;  %v1110_v29 = vld [vmem:[%s7427_s9 + $0xd0] sm:$0xff] }
  0x31   : > { %4346 = vmatpush1.bf16.msra.mxu0 %v4345_v43  ;;  %v5671_v23 = vpack.c.bf16 %v1109_v21, %v1108_v20  ;;  %v1093_v26 = vld [vmem:[%s7427_s9 + $0x48] sm:$0xff]  ;;  %v1111_v30 = vld [vmem:[%s7427_s9 + $0xd8] sm:$0xff]  ;;  %v1094_v34 = vld [vmem:[%s7427_s9 + $0x50] sm:$0xff] }
  0x32   : > { %4370 = vmatpush3.bf16.msra.mxu1 %v4367_v38  ;;  %4348 = vmatprep.subr.bf16.mxu0 %v4347_v44  ;;  %v3813_v38 = vld [vmem:[%s7420_s2 + $0x330] sm:$0xff]  ;;  %v1116_v44 = vld [vmem:[%s7427_s9 + $0x100] sm:$0xff]  ;;  %v5699_v32 = vpack.c.bf16 %v1111_v30, %v1110_v29  ;;  %v1129_v33 = vld [vmem:[%s7427_s9 + $0x168] sm:$0xff] }
  0x33   : > { %4372 = vmatprep.subr.bf16.mxu1 %v4371_v47  ;;  %v4397_v43 = vpack.c.bf16 %v3816_v39, %v3813_v38  ;;  %v1095_v35 = vld [vmem:[%s7427_s9 + $0x58] sm:$0xff]  ;;  %v1112_v38 = vld [vmem:[%s7427_s9 + $0xe0] sm:$0xff]  ;;  %v1113_v39 = vld [vmem:[%s7427_s9 + $0xe8] sm:$0xff] }
  0x34   : > { %v5727_v41 = vpack.c.bf16 %v1113_v39, %v1112_v38  ;;  %v1131_v42 = vld [vmem:[%s7427_s9 + $0x178] sm:$0xff] }
  0x35   : > { %4350 = vmatpush1.bf16.msra.mxu0 %v4349_v52  ;;  %v5560_v52 = vpack.c.bf16 %v1117_v46, %v1116_v44  ;;  %v1097_v44 = vld [vmem:[%s7427_s9 + $0x68] sm:$0xff]  ;;  %v1115_v49 = vld [vmem:[%s7427_s9 + $0xf8] sm:$0xff] }
  0x36   : > { %4374 = vmatpush3.bf16.msra.mxu1 %v4371_v47  ;;  %4376 = vmatprep.subr.bf16.mxu0 %v4375_v53  ;;  %v1084_v47 = vld [vmem:[%s7427_s9] sm:$0xff]  ;;  %v1118_v53 = vld [vmem:[%s7427_s9 + $0x110] sm:$0xff] }
  0x37   : > { %4400 = vmatprep.subr.bf16.mxu1 %v4399_v56  ;;  %v5566_v54 = vpack.c.bf16 %v1085_v48, %v1084_v47  ;;  %v1114_v48 = vld [vmem:[%s7427_s9 + $0xf0] sm:$0xff] }
  0x38   : > { %3779 = vmatmul.mubr.msk.f32.vlgmr.msra.gmra.mrb[0].mxu0 %vm484_vm0, %v5346_v16  ;;  %v3803_v16 = vld [vmem:[%s7420_s2 + $0x2e0] sm:$0xff]  ;;  %v5753_v50 = vpack.c.bf16 %v1115_v49, %v1114_v48 }
  0x39   : > { %4121 = vmatmul.mubr.msk.f32.vlgmr.msra.gmra.mrb[0].mxu1 %vm484_vm0, %v408_v62  ;;  %4378 = vmatpush1.bf16.msra.mxu0 %v4377_v61  ;;  %v4411_v22 = vpack.c.bf16 %v3806_v17, %v3803_v16  ;;  %v5588_v61 = vpack.c.bf16 %v1087_v59, %v1086_v58  ;;  %v1090_v16 = vld [vmem:[%s7427_s9 + $0x30] sm:$0xff]  ;;  %v1091_v17 = vld [vmem:[%s7427_s9 + $0x38] sm:$0xff]  ;;  %v1006_v58 = vlaneseq }
  0x3a   : > { %4402 = vmatpush3.bf16.msra.mxu1 %v4399_v56  ;;  %4380 = vmatprep.subr.bf16.mxu0 %v4379_v63  ;;  %v1119_v56 = vld [vmem:[%s7427_s9 + $0x118] sm:$0xff]  ;;  %v1121_v63 = vld [vmem:[%s7427_s9 + $0x128] sm:$0xff] }
  0x3b   : > { %4404 = vmatprep.subr.bf16.mxu1 %v4403_v2  ;;  %719 = vmatprep.mubr.f32.mxu0 %v7432_v7  ;;  %v5585_v60 = vpack.c.bf16 %v1119_v56, %v1118_v53  ;;  %v1099_v53 = vld [vmem:[%s7427_s9 + $0x78] sm:$0xff]  ;;  %v5766_v59 = vshrl.u32 %v1006_v58, 7 }
  0x3c   : > { %3780 = vmatmul.mubr.msk.f32.gmra.mrb[2].mxu0 %vm484_vm0, %v408_v62  ;;  %4147 = vmatprep.mubr.msk.f32.mxu1 %vm484_vm0, %v5466_v9  ;;  %v1120_v62 = vld [vmem:[%s7427_s9 + $0x120] sm:$0xff] }
  0x3d   : > { %4382 = vmatpush1.bf16.msra.mxu0 %v4381_v8  ;;  %910 = vmatprep.mubr.f32.mxu0 %v7432_v7  ;;  %v5600_v0 = vpack.c.bf16 %v1121_v63, %v1120_v62  ;;  %v1089_v8 = vld [vmem:[%s7427_s9 + $0x28] sm:$0xff]  ;;  %v5769_v62 = vsub.s32 0, %v5766_v59  ;;  %v5772_v63 = vsub.s32 2, %v5766_v59  ;;  %vm1080_vm2 = vcmp.eq.s32.totalorder %v5766_v59, 0 }
  0x3e   : > { %4406 = vmatpush3.bf16.msra.mxu1 %v4403_v2  ;;  %4384 = vmatprep.subr.bf16.mxu0 %v4383_v10  ;;  %v1105_v2 = vld [vmem:[%s7427_s9 + $0xa8] sm:$0xff]  ;;  %v5628_v10 = vpack.c.bf16 %v1089_v8, %v1088_v6 }
  0x3f   : > { %4408 = vmatprep.subr.bf16.mxu1 %v4407_v13  ;;  %v5615_v4 = vpack.c.bf16 %v1105_v2, %v1104_v1  ;;  %v1004_v1 = vld [vmem:[%s7423_s5] ss:$2 sm:$0x7]  ;;  %v5778_v2 = vsub.s32 1, %v5766_v59 }
  0x41   : > { %4386 = vmatpush1.bf16.msra.mxu0 %v4385_v18  ;;  %v1013_v8 = vrot.slane %v1004_v1, %v5778_v2 }
  0x42   : > { %4410 = vmatpush3.bf16.msra.mxu1 %v4407_v13  ;;  %4388 = vmatprep.subr.bf16.mxu0 %v4387_v19  ;;  %v1124_v13 = vld [vmem:[%s7427_s9 + $0x140] sm:$0xff]  ;;  %v5656_v19 = vpack.c.bf16 %v1091_v17, %v1090_v16 }
  0x43   : > { %4412 = vmatprep.subr.bf16.mxu1 %v4411_v22  ;;  %v5654_v18 = vpack.c.bf16 %v1125_v15, %v1124_v13 }
  0x45   : > { %4390 = vmatpush1.bf16.msra.mxu0 %v4389_v27 }
  0x46   : > { %4414 = vmatpush3.bf16.msra.mxu1 %v4411_v22  ;;  %4392 = vmatprep.subr.bf16.mxu0 %v4391_v28  ;;  %v1126_v22 = vld [vmem:[%s7427_s9 + $0x150] sm:$0xff]  ;;  %v5684_v28 = vpack.c.bf16 %v1093_v26, %v1092_v25 }
  0x47   : > { %4416 = vmatprep.subr.bf16.mxu1 %v4415_v31  ;;  %v5682_v27 = vpack.c.bf16 %v1127_v24, %v1126_v22 }
  0x49   : > { %4394 = vmatpush1.bf16.msra.mxu0 %v4393_v36 }
  0x4a   : > { %4418 = vmatpush3.bf16.msra.mxu1 %v4415_v31  ;;  %4396 = vmatprep.subr.bf16.mxu0 %v4395_v37  ;;  %v1128_v31 = vld [vmem:[%s7427_s9 + $0x160] sm:$0xff]  ;;  %v5712_v37 = vpack.c.bf16 %v1095_v35, %v1094_v34 }
  0x4b   : > { %4420 = vmatprep.subr.bf16.mxu1 %v4419_v40  ;;  %v5710_v36 = vpack.c.bf16 %v1129_v33, %v1128_v31 }
  0x4d   : > { %4398 = vmatpush1.bf16.msra.mxu0 %v4397_v43  ;;  %v1096_v43 = vld [vmem:[%s7427_s9 + $0x60] sm:$0xff] }
  0x4e   : > { %4422 = vmatpush3.bf16.msra.mxu1 %v4419_v40  ;;  %4424 = vmatprep.subr.bf16.mxu0 %v5542_v45  ;;  %v1130_v40 = vld [vmem:[%s7427_s9 + $0x170] sm:$0xff]  ;;  %v5740_v47 = vpack.c.bf16 %v1097_v44, %v1096_v43 }
  0x4f   : > { %4455 = vmatprep.subr.bf16.mxu1 %v7430_v55  ;;  %v5738_v46 = vpack.c.bf16 %v1131_v42, %v1130_v40 }
  0x50   : > { %3819 = vmatmul.mubr.msk.f32.vlgmr.msra.gmra.mrb[0].mxu0 %vm484_vm0, %v5466_v9  ;;  %v5626_v9 = vpack.c.bf16 %v1123_v5, %v1122_v3  ;;  %v1009_v3 = vrot.slane %v1004_v1, %v5769_v62  ;;  %v1017_v5 = vrot.slane %v1004_v1, %v5772_v63 }
  0x51   : > { %4148 = vmatmul.mubr.msk.f32.vlgmr.msra.gmra.mrb[0].mxu1 %vm484_vm0, %v802_v51  ;;  %916 = vmatprep.mubr.f32.mxu0 %v7432_v7 }
  0x52   : > { %4457 = vmatpush3.bf16.msra.mxu1 %v5560_v52  ;;  %4426 = vmatpush3.bf16.msra.mxu0 %v5566_v54 }
  0x53   : > { %4458 = vmatprep.subr.bf16.mxu1 %v7430_v55  ;;  %4428 = vmatprep.subr.bf16.mxu0 %v5572_v57 }
  0x54   : > { %3820 = vmatmul.mubr.msk.f32.gmra.mrb[2].mxu0 %vm484_vm0, %v802_v51  ;;  %4182 = vmatprep.mubr.msk.f32.mxu1 %vm5106_vm1, %v7432_v7  ;;  %v1098_v51 = vld [vmem:[%s7427_s9 + $0x70] sm:$0xff] }
  0x55   : > { %v5762_v56 = vpack.c.bf16 %v1099_v53, %v1098_v51 }
  0x56   : > { %4460 = vmatpush3.bf16.msra.mxu1 %v5585_v60  ;;  %4430 = vmatpush3.bf16.msra.mxu0 %v5588_v61 }
  0x57   : > { %4461 = vmatprep.subr.bf16.mxu1 %v7430_v55  ;;  %4432 = vmatprep.subr.bf16.mxu0 %v5615_v4 }
  0x5a   : > { %4463 = vmatpush3.bf16.msra.mxu1 %v5600_v0  ;;  %4434 = vmatpush3.bf16.msra.mxu0 %v5628_v10 }
  0x5b   : > { %4464 = vmatprep.subr.bf16.mxu1 %v7430_v55  ;;  %4436 = vmatprep.subr.bf16.mxu0 %v5643_v14 }
  0x5e   : > { %4466 = vmatpush3.bf16.msra.mxu1 %v5626_v9  ;;  %4438 = vmatpush3.bf16.msra.mxu0 %v5656_v19 }
  0x5f   : > { %4467 = vmatprep.subr.bf16.mxu1 %v7430_v55  ;;  %4440 = vmatprep.subr.bf16.mxu0 %v5671_v23 }
  0x62   : > { %4469 = vmatpush3.bf16.msra.mxu1 %v5654_v18  ;;  %4442 = vmatpush3.bf16.msra.mxu0 %v5684_v28 }
  0x63   : > { %4470 = vmatprep.subr.bf16.mxu1 %v7430_v55  ;;  %4444 = vmatprep.subr.bf16.mxu0 %v5699_v32 }
  0x66   : > { %4472 = vmatpush3.bf16.msra.mxu1 %v5682_v27  ;;  %4446 = vmatpush3.bf16.msra.mxu0 %v5712_v37 }
  0x67   : > { %4473 = vmatprep.subr.bf16.mxu1 %v7430_v55  ;;  %4448 = vmatprep.subr.bf16.mxu0 %v5727_v41 }
  0x6a   : > { %4475 = vmatpush3.bf16.msra.mxu1 %v5710_v36  ;;  %4450 = vmatpush3.bf16.msra.mxu0 %v5740_v47 }
  0x6b   : > { %4476 = vmatprep.subr.bf16.mxu1 %v7430_v55  ;;  %4452 = vmatprep.subr.bf16.mxu0 %v5753_v50 }
  0x6e   : > { %4478 = vmatpush3.bf16.msra.mxu1 %v5738_v46  ;;  %4454 = vmatpush3.bf16.msra.mxu0 %v5762_v56 }
  0x6f   : > { %4185 = vmatprep.subr.mxu1 %v7432_v7 }
 0x123   : > { %v912_v6 = vpop.f32.mrb[0].mxu0 }
 0x124   : > { %v4149_v11 = vpop.f32.mrb[0].mxu1  ;;  %v914_v12 = vpop.f32.mrb[1].mxu0  ;;  %v5783_v13 = vadd.f32 %v1009_v3, %v912_v6 }
 0x125   : > { %v5785_v15 = vadd.f32 %v4149_v11, %v1017_v5  ;;  %v989_v16 = vpop.f32.mrb[1].mxu1  ;;  %v5791_v21 = vadd.f32 %v1013_v8, %v914_v12 }
 0x126   : > { %v5787_v17 = vadd.f32 %v1017_v5, %v989_v16  ;;  %v1051_v30 = vmul.f32 %v5783_v13, %v5783_v13 }
 0x127   : > { %v1056_v20 = vmul.f32 %v5785_v15, %v5785_v15  ;;  %v918_v22 = vpop.f32.mrb[2].mxu0  ;;  %v1052_v39 = vmul.f32 %v5791_v21, %v5791_v21 }
 0x128   : > { %v1044_v24 = vadd.f32 %v5785_v15, %v5787_v17  ;;  %v1053_v25 = vmul.f32 %v5787_v17, %v5787_v17  ;;  %v5797_v26 = vadd.f32 %v1009_v3, %v918_v22  ;;  %v920_v29 = vpop.f32.mrb[3].mxu0 }
 0x129   : > { %v5801_v31 = vadd.f32 %v1013_v8, %v920_v29 }
 0x12a   : > { %v1045_v33 = vrot.slane %v1044_v24, 4  ;;  %v1071_v34 = vadd.f32 %v1056_v20, %v1053_v25  ;;  %v1030_v35 = vadd.f32 %v5797_v26, %v5783_v13  ;;  %v1054_v38 = vmul.f32 %v5797_v26, %v5797_v26 }
 0x12b   : > { %v1037_v40 = vadd.f32 %v5801_v31, %v5791_v21  ;;  %v1055_v42 = vmul.f32 %v5801_v31, %v5801_v31 }
 0x12c   : > { %v1046_v43 = vadd.f32 %v1045_v33, %v1044_v24  ;;  %v1072_v44 = vrot.slane %v1071_v34, 4  ;;  %v1031_v48 = vrot.slane %v1030_v35, 4  ;;  %v1057_v49 = vadd.f32 %v1054_v38, %v1051_v30 }
 0x12d   : > { %v1038_v51 = vrot.slane %v1037_v40, 4  ;;  %v1064_v53 = vadd.f32 %v1055_v42, %v1052_v39 }
 0x12e   : > { %v1047_v58 = vrot.slane %v1046_v43, 2  ;;  %v1073_v1 = vadd.f32 %v1072_v44, %v1071_v34  ;;  %v1032_v3 = vadd.f32 %v1031_v48, %v1030_v35  ;;  %v1058_v5 = vrot.slane %v1057_v49, 4 }
 0x12f   : > { %v1039_v6 = vadd.f32 %v1038_v51, %v1037_v40  ;;  %v1065_v8 = vrot.slane %v1064_v53, 4 }
 0x130   : > { %v1048_v11 = vadd.f32 %v1047_v58, %v1046_v43  ;;  %v1074_v12 = vrot.slane %v1073_v1, 2  ;;  %v1033_v16 = vrot.slane %v1032_v3, 2  ;;  %v1059_v20 = vadd.f32 %v1058_v5, %v1057_v49 }
 0x131   : > { %v1040_v22 = vrot.slane %v1039_v6, 2  ;;  %v1066_v25 = vadd.f32 %v1065_v8, %v1064_v53  ;;  %v1292_v8 = vld [vmem:[%s7428_s10 + $0x10] sm:$0xff] }
 0x132   : > { %v1034_v29 = vadd.f32 %v1033_v16, %v1032_v3  ;;  %v1060_v55 = vrot.slane %v1059_v20, 2  ;;  %v1049_v24 = vrot.slane %v1048_v11, 1  ;;  %v1075_v33 = vadd.f32 %v1074_v12, %v1073_v1  ;;  %v1640_v12 = vld [vmem:[%s7421_s3 + $0x50] sm:$0xff]  ;;  %v1633_v16 = vld [vmem:[%s7421_s3 + $0x18] sm:$0xff] }
 0x133   : > { %v1041_v7 = vadd.f32 %v1040_v22, %v1039_v6  ;;  %v1067_v30 = vrot.slane %v1066_v25, 2  ;;  %v7434_v3 = vmov 0.0   ;;  %v1291_v6 = vld [vmem:[%s7428_s10 + $0x8] sm:$0xff]  ;;  %v1642_v22 = vld [vmem:[%s7421_s3 + $0x60] sm:$0xff] }
 0x134   : > { %v1061_v38 = vadd.f32 %v1060_v55, %v1059_v20  ;;  %v1076_v39 = vrot.slane %v1075_v33, 1  ;;  %v1035_v40 = vrot.slane %v1034_v29, 1  ;;  %v1050_v42 = vadd.f32 %v1049_v24, %v1048_v11  ;;  %1297 = vmatprep.subr.mxu0 %v1291_v6  ;;  %v1631_v11 = vld [vmem:[%s7421_s3 + $0x8] sm:$0xff] }
 0x135   : > { %v1042_v34 = vrot.slane %v1041_v7, 1  ;;  %v1068_v35 = vadd.f32 %v1067_v30, %v1066_v25  ;;  %v4479_v20 = vpack.c.bf16 %v1640_v12, %v1631_v11  ;;  %v4575_v25 = vpack.c.bf16 %v1642_v22, %v1633_v16  ;;  %v1648_v16 = vld [vmem:[%s7421_s3 + $0x90] sm:$0xff] }
 0x136   : > { %v1077_v43 = vadd.f32 %v1076_v39, %v1075_v33  ;;  %v1062_v44 = vrot.slane %v1061_v38, 1  ;;  %v1036_v1 = vadd.f32 %v1035_v40, %v1034_v29 }
 0x137   : > { %v1069_v48 = vrot.slane %v1068_v35, 1  ;;  %v1043_v53 = vadd.f32 %v1042_v34, %v1041_v7  ;;  %v1290_v7 = vld [vmem:[%s7428_s10] sm:$0xff] }
 0x138   : > { %v1083_v49 = vsel %vm1080_vm2, %v1050_v42, %v1077_v43  ;;  %v1063_v51 = vadd.f32 %v1062_v44, %v1061_v38 }
 0x139   : > { %4183 = vmatmul.mubr.f32.vlgmr.msra.gmra.mrb[2].mxu1 %v1083_v49  ;;  %v1070_v58 = vadd.f32 %v1069_v48, %v1068_v35  ;;  %v1630_v48 = vld [vmem:[%s7421_s3] sm:$0xff]  ;;  %v1639_v49 = vld [vmem:[%s7421_s3 + $0x48] sm:$0xff] }
 0x13a   : > { %4187 = vmatprep.mubr.msk.f32.mxu1 %vm5106_vm1, %v7434_v3  ;;  %v1081_v5 = vsel %vm1080_vm2, %v1036_v1, %v1063_v51  ;;  %4186 = vmatpush3.msra.mxu1 %v1292_v8  ;;  %v1632_v51 = vld [vmem:[%s7421_s3 + $0x10] sm:$0xff]  ;;  %v1658_v1 = vld [vmem:[%s7421_s3 + $0xe0] sm:$0xff]  ;;  %v4481_v11 = vpack.c.bf16 %v1639_v49, %v1630_v48 }
 0x13b   : > { %v1082_v55 = vsel %vm1080_vm2, %v1043_v53, %v1070_v58  ;;  %4576 = vmatprep.subr.bf16.mxu1 %v4575_v25  ;;  %v1641_v53 = vld [vmem:[%s7421_s3 + $0x58] sm:$0xff]  ;;  %v1668_v49 = vld [vmem:[%s7421_s3 + $0x130] sm:$0xff] }
 0x13c   : > { %1196 = vmatprep.mubr.f32.mxu0 %v1082_v55  ;;  %v1649_v58 = vld [vmem:[%s7421_s3 + $0x98] sm:$0xff]  ;;  %v1651_v55 = vld [vmem:[%s7421_s3 + $0xa8] sm:$0xff]  ;;  %v4577_v12 = vpack.c.bf16 %v1641_v53, %v1632_v51 }
 0x13d   : > { %1197 = vmatmul.mubr.f32.vlgmr.msra.gmra.mrb[4].mxu0 %v1081_v5  ;;  %v1660_v5 = vld [vmem:[%s7421_s3 + $0xf0] sm:$0xff]  ;;  %v4483_v22 = vpack.c.bf16 %v1658_v1, %v1649_v58  ;;  %v1677_v51 = vld [vmem:[%s7421_s3 + $0x178] sm:$0xff]  ;;  %v1694_v58 = vld [vmem:[%s7421_s3 + $0x200] sm:$0xff] }
 0x13e   : > { %1361 = vmatprep.mubr.f32.mxu0 %v7434_v3  ;;  %1298 = vmatpush1.msra.mxu0 %v1290_v7  ;;  %v4579_v25 = vpack.c.bf16 %v1660_v5, %v1651_v55  ;;  %v1685_v53 = vld [vmem:[%s7421_s3 + $0x1b8] sm:$0xff]  ;;  %v1687_v1 = vld [vmem:[%s7421_s3 + $0x1c8] sm:$0xff]  ;;  %v1696_v55 = vld [vmem:[%s7421_s3 + $0x210] sm:$0xff] }
 0x13f   : > { %4480 = vmatprep.subr.bf16.mxu0 %v4479_v20  ;;  %v1657_v20 = vld [vmem:[%s7421_s3 + $0xd8] sm:$0xff] }
 0x20c   : > { %v1268_v29 = vpop.f32.mrb[2].mxu1 }
 0x20d   : > { %v4184_v24 = vpop.f32.mrb[3].mxu1 }
 0x20e   : > { %v1659_v24 = vld [vmem:[%s7421_s3 + $0xe8] sm:$0xff] }
 0x210   : > { %v3929_v33 = vpop.f32.mrb[4].mxu0 }
 0x211   : > { %v3930_v30 = vpop.f32.mrb[5].mxu0 }
 0x212   : > { %v3931_v38 = vadd.f32 %v3930_v30, %v3929_v33  ;;  %v1667_v33 = vld [vmem:[%s7421_s3 + $0x128] sm:$0xff] }
 0x214   : > { %v1269_v39 = vadd.f32 %v3931_v38, %v1268_v29  ;;  %v1650_v29 = vld [vmem:[%s7421_s3 + $0xa0] sm:$0xff]  ;;  %v1676_v38 = vld [vmem:[%s7421_s3 + $0x170] sm:$0xff] }
 0x216   : > { %v1272_v34 = vmul.f32 0.001953125, %v1269_v39  ;;  %v1669_v39 = vld [vmem:[%s7421_s3 + $0x138] sm:$0xff] }
 0x218   : > { %v1273_v35 = vmul.f32 %v1272_v34, %v1272_v34  ;;  %v1284_v7 = vrot.slane %v1272_v34, %v5769_v62 }
 0x21a   : > { %v1275_v40 = vrot.slane %v1273_v35, 7  ;;  %v4485_v35 = vpack.c.bf16 %v1657_v20, %v1648_v16  ;;  %v1686_v16 = vld [vmem:[%s7421_s3 + $0x1c0] sm:$0xff]  ;;  %v1695_v20 = vld [vmem:[%s7421_s3 + $0x208] sm:$0xff] }
 0x21c   : > { %v1277_v42 = vsub.f32 %v1272_v34, %v1275_v40  ;;  %v1678_v34 = vld [vmem:[%s7421_s3 + $0x180] sm:$0xff]  ;;  %v4581_v40 = vpack.c.bf16 %v1659_v24, %v1650_v29  ;;  %v1705_v29 = vld [vmem:[%s7421_s3 + $0x258] sm:$0xff] }
 0x21d   : > { %v4583_v48 = vpack.c.bf16 %v1678_v34, %v1669_v39  ;;  %v1714_v24 = vld [vmem:[%s7421_s3 + $0x2a0] sm:$0xff] }
 0x21e   : > { %v1278_v43 = vmax.f32 %v1277_v42, 0.0  ;;  %v1666_v42 = vld [vmem:[%s7421_s3 + $0x120] sm:$0xff]  ;;  %v4591_v34 = vpack.c.bf16 %v1714_v24, %v1705_v29  ;;  %v1747_v24 = vld [vmem:[%s7421_s3 + $0x3a8] sm:$0xff] }
 0x21f   : > { %v1738_v29 = vld [vmem:[%s7421_s3 + $0x360] sm:$0xff] }
 0x220   : > { %v1279_v44 = vadd.f32 1e-05, %v1278_v43  ;;  %v1675_v43 = vld [vmem:[%s7421_s3 + $0x168] sm:$0xff] }
 0x221   : > { %v4489_v5 = vpack.c.bf16 %v1675_v43, %v1666_v42  ;;  %v1713_v42 = vld [vmem:[%s7421_s3 + $0x298] sm:$0xff] }
 0x222   : > { %5041 = vrsqrt.f32 %v1279_v44  ;;  %v4487_v44 = vpack.c.bf16 %v1676_v38, %v1667_v33  ;;  %v1702_v38 = vld [vmem:[%s7421_s3 + $0x240] sm:$0xff] }
 0x22c   : > { %v5042_v6 = vpop.eup %5041 }
 0x22d   : > { %v1288_v8 = vrot.slane %v5042_v6, %v5778_v2  ;;  %v4585_v6 = vpack.c.bf16 %v1677_v51, %v1668_v49  ;;  %v1730_v49 = vld [vmem:[%s7421_s3 + $0x320] sm:$0xff]  ;;  %v1723_v51 = vld [vmem:[%s7421_s3 + $0x2e8] sm:$0xff] }
 0x22f   : > { %v1289_v30 = vsel %vm1080_vm2, %v1284_v7, %v1288_v8  ;;  %v1684_v7 = vld [vmem:[%s7421_s3 + $0x1b0] sm:$0xff]  ;;  %v1693_v8 = vld [vmem:[%s7421_s3 + $0x1f8] sm:$0xff] }
 0x230   : > { %3824 = vmatmul.mubr.msk.f32.vlgmr.msra.gmra.mrb[6].mxu0 %vm1293_vm3, %v1289_v30  ;;  %4188 = vmatmul.mubr.msk.f32.vlgmr.msra.gmra.mrb[4].mxu1 %vm1293_vm3, %v1289_v30  ;;  %v4493_v33 = vpack.c.bf16 %v1693_v8, %v1684_v7  ;;  %v4589_v30 = vpack.c.bf16 %v1695_v20, %v1686_v16  ;;  %v1722_v7 = vld [vmem:[%s7421_s3 + $0x2e0] sm:$0xff]  ;;  %v1731_v8 = vld [vmem:[%s7421_s3 + $0x328] sm:$0xff]  ;;  %v1748_v16 = vld [vmem:[%s7421_s3 + $0x3b0] sm:$0xff] }
 0x231   : > { %4482 = vmatpush1.bf16.msra.mxu0 %v4481_v11  ;;  %4578 = vmatpush1.bf16.msra.mxu1 %v4577_v12  ;;  %v4491_v11 = vpack.c.bf16 %v1694_v58, %v1685_v53  ;;  %v4587_v12 = vpack.c.bf16 %v1696_v55, %v1687_v1  ;;  %v1732_v58 = vld [vmem:[%s7421_s3 + $0x330] sm:$0xff]  ;;  %v1729_v55 = vld [vmem:[%s7421_s3 + $0x318] sm:$0xff] }
 0x232   : > { %4484 = vmatprep.subr.bf16.mxu0 %v4483_v22  ;;  %4580 = vmatprep.subr.bf16.mxu1 %v4579_v25  ;;  %v1703_v22 = vld [vmem:[%s7421_s3 + $0x248] sm:$0xff]  ;;  %v1712_v25 = vld [vmem:[%s7421_s3 + $0x290] sm:$0xff]  ;;  %v1741_v20 = vld [vmem:[%s7421_s3 + $0x378] sm:$0xff] }
 0x233   : > { %v4495_v39 = vpack.c.bf16 %v1712_v25, %v1703_v22  ;;  %v1720_v1 = vld [vmem:[%s7421_s3 + $0x2d0] sm:$0xff]  ;;  %v1750_v25 = vld [vmem:[%s7421_s3 + $0x3c0] sm:$0xff] }
 0x235   : > { %4486 = vmatpush1.bf16.msra.mxu0 %v4485_v35  ;;  %4582 = vmatpush1.bf16.msra.mxu1 %v4581_v40  ;;  %v1711_v35 = vld [vmem:[%s7421_s3 + $0x288] sm:$0xff]  ;;  %v1704_v40 = vld [vmem:[%s7421_s3 + $0x250] sm:$0xff] }
 0x236   : > { %4488 = vmatprep.subr.bf16.mxu0 %v4487_v44  ;;  %4584 = vmatprep.subr.bf16.mxu1 %v4583_v48  ;;  %v4497_v43 = vpack.c.bf16 %v1711_v35, %v1702_v38  ;;  %v4593_v44 = vpack.c.bf16 %v1713_v42, %v1704_v40  ;;  %v1721_v48 = vld [vmem:[%s7421_s3 + $0x2d8] sm:$0xff]  ;;  %v1740_v38 = vld [vmem:[%s7421_s3 + $0x370] sm:$0xff]  ;;  %v1766_v40 = vld [vmem:[%s7421_s3 + $0x440] sm:$0xff] }
 0x237   : > { %v4499_v53 = vpack.c.bf16 %v1730_v49, %v1721_v48  ;;  %v1757_v35 = vld [vmem:[%s7421_s3 + $0x3f8] sm:$0xff]  ;;  %v1759_v42 = vld [vmem:[%s7421_s3 + $0x408] sm:$0xff]  ;;  %v1756_v48 = vld [vmem:[%s7421_s3 + $0x3f0] sm:$0xff] }
 0x238   : > { %v1765_v49 = vld [vmem:[%s7421_s3 + $0x438] sm:$0xff] }
 0x239   : > { %4490 = vmatpush1.bf16.msra.mxu0 %v4489_v5  ;;  %4586 = vmatpush1.bf16.msra.mxu1 %v4585_v6  ;;  %v4595_v5 = vpack.c.bf16 %v1732_v58, %v1723_v51  ;;  %v4501_v6 = vpack.c.bf16 %v1729_v55, %v1720_v1  ;;  %v1758_v58 = vld [vmem:[%s7421_s3 + $0x400] sm:$0xff]  ;;  %v1767_v1 = vld [vmem:[%s7421_s3 + $0x448] sm:$0xff] }
 0x23a   : > { %4492 = vmatprep.subr.bf16.mxu0 %v4491_v11  ;;  %4588 = vmatprep.subr.bf16.mxu1 %v4587_v12  ;;  %v4597_v11 = vpack.c.bf16 %v1731_v8, %v1722_v7  ;;  %v1739_v12 = vld [vmem:[%s7421_s3 + $0x368] sm:$0xff]  ;;  %v4605_v55 = vpack.c.bf16 %v1767_v1, %v1758_v58  ;;  %v1777_v7 = vld [vmem:[%s7421_s3 + $0x498] sm:$0xff] }
 0x23b   : > { %v4503_v22 = vpack.c.bf16 %v1748_v16, %v1739_v12  ;;  %v1774_v12 = vld [vmem:[%s7421_s3 + $0x480] sm:$0xff]  ;;  %v1783_v16 = vld [vmem:[%s7421_s3 + $0x4c8] sm:$0xff]  ;;  %v1813_v58 = vld [vmem:[%s7421_s3 + $0x5b8] sm:$0xff] }
 0x23d   : > { %4494 = vmatpush1.bf16.msra.mxu0 %v4493_v33  ;;  %4590 = vmatpush1.bf16.msra.mxu1 %v4589_v30  ;;  %v4599_v33 = vpack.c.bf16 %v1750_v25, %v1741_v20  ;;  %v4505_v30 = vpack.c.bf16 %v1747_v24, %v1738_v29  ;;  %v1776_v25 = vld [vmem:[%s7421_s3 + $0x490] sm:$0xff]  ;;  %v1785_v29 = vld [vmem:[%s7421_s3 + $0x4d8] sm:$0xff] }
 0x23e   : > { %4496 = vmatprep.subr.bf16.mxu0 %v4495_v39  ;;  %4592 = vmatprep.subr.bf16.mxu1 %v4591_v34  ;;  %v1749_v39 = vld [vmem:[%s7421_s3 + $0x3b8] sm:$0xff]  ;;  %v4609_v24 = vpack.c.bf16 %v1785_v29, %v1776_v25  ;;  %v1831_v25 = vld [vmem:[%s7421_s3 + $0x648] sm:$0xff] }
 0x23f   : > { %v4601_v34 = vpack.c.bf16 %v1749_v39, %v1740_v38  ;;  %v1795_v38 = vld [vmem:[%s7421_s3 + $0x528] sm:$0xff] }
 0x241   : > { %4498 = vmatpush1.bf16.msra.mxu0 %v4497_v43  ;;  %4594 = vmatpush1.bf16.msra.mxu1 %v4593_v44  ;;  %v4507_v43 = vpack.c.bf16 %v1766_v40, %v1757_v35  ;;  %v1768_v44 = vld [vmem:[%s7421_s3 + $0x450] sm:$0xff]  ;;  %v1801_v40 = vld [vmem:[%s7421_s3 + $0x558] sm:$0xff] }
 0x242   : > { %4500 = vmatprep.subr.bf16.mxu0 %v4499_v53  ;;  %4596 = vmatprep.subr.bf16.mxu1 %v4595_v5  ;;  %v4603_v51 = vpack.c.bf16 %v1768_v44, %v1759_v42  ;;  %v4509_v53 = vpack.c.bf16 %v1765_v49, %v1756_v48  ;;  %v1775_v5 = vld [vmem:[%s7421_s3 + $0x488] sm:$0xff]  ;;  %v1792_v35 = vld [vmem:[%s7421_s3 + $0x510] sm:$0xff]  ;;  %v1794_v44 = vld [vmem:[%s7421_s3 + $0x520] sm:$0xff] }
 0x243   : > { %v1803_v48 = vld [vmem:[%s7421_s3 + $0x568] sm:$0xff] }
 0x244   : > { %v4613_v49 = vpack.c.bf16 %v1803_v48, %v1794_v44  ;;  %v1849_v44 = vld [vmem:[%s7421_s3 + $0x6d8] sm:$0xff] }
 0x245   : > { %4502 = vmatpush1.bf16.msra.mxu0 %v4501_v6  ;;  %4598 = vmatpush1.bf16.msra.mxu1 %v4597_v11  ;;  %v1784_v6 = vld [vmem:[%s7421_s3 + $0x4d0] sm:$0xff]  ;;  %v1786_v11 = vld [vmem:[%s7421_s3 + $0x4e0] sm:$0xff] }
 0x246   : > { %4504 = vmatprep.subr.bf16.mxu0 %v4503_v22  ;;  %4600 = vmatprep.subr.bf16.mxu1 %v4599_v33  ;;  %v4511_v8 = vpack.c.bf16 %v1784_v6, %v1775_v5  ;;  %v4607_v20 = vpack.c.bf16 %v1786_v11, %v1777_v7  ;;  %v4513_v22 = vpack.c.bf16 %v1783_v16, %v1774_v12  ;;  %v1793_v33 = vld [vmem:[%s7421_s3 + $0x518] sm:$0xff]  ;;  %v1810_v5 = vld [vmem:[%s7421_s3 + $0x5a0] sm:$0xff]  ;;  %v1819_v6 = vld [vmem:[%s7421_s3 + $0x5e8] sm:$0xff] }
 0x247   : > { %v1812_v11 = vld [vmem:[%s7421_s3 + $0x5b0] sm:$0xff]  ;;  %v1821_v12 = vld [vmem:[%s7421_s3 + $0x5f8] sm:$0xff] }
 0x248   : > { %v4617_v16 = vpack.c.bf16 %v1821_v12, %v1812_v11  ;;  %v1867_v11 = vld [vmem:[%s7421_s3 + $0x768] sm:$0xff] }
 0x249   : > { %4506 = vmatpush1.bf16.msra.mxu0 %v4505_v30  ;;  %4602 = vmatpush1.bf16.msra.mxu1 %v4601_v34  ;;  %v1802_v30 = vld [vmem:[%s7421_s3 + $0x560] sm:$0xff]  ;;  %v1804_v34 = vld [vmem:[%s7421_s3 + $0x570] sm:$0xff] }
 0x24a   : > { %4508 = vmatprep.subr.bf16.mxu0 %v4507_v43  ;;  %4604 = vmatprep.subr.bf16.mxu1 %v4603_v51  ;;  %v4515_v39 = vpack.c.bf16 %v1802_v30, %v1793_v33  ;;  %v4611_v42 = vpack.c.bf16 %v1804_v34, %v1795_v38  ;;  %v4517_v43 = vpack.c.bf16 %v1801_v40, %v1792_v35  ;;  %v1811_v51 = vld [vmem:[%s7421_s3 + $0x5a8] sm:$0xff]  ;;  %v1828_v33 = vld [vmem:[%s7421_s3 + $0x630] sm:$0xff]  ;;  %v1837_v30 = vld [vmem:[%s7421_s3 + $0x678] sm:$0xff] }
 0x24b   : > { %v1830_v34 = vld [vmem:[%s7421_s3 + $0x640] sm:$0xff]  ;;  %v1839_v35 = vld [vmem:[%s7421_s3 + $0x688] sm:$0xff] }
 0x24c   : > { %v4621_v40 = vpack.c.bf16 %v1839_v35, %v1830_v34  ;;  %v1885_v35 = vld [vmem:[%s7421_s3 + $0x7f8] sm:$0xff] }
 0x24d   : > { %4510 = vmatpush1.bf16.msra.mxu0 %v4509_v53  ;;  %4606 = vmatpush1.bf16.msra.mxu1 %v4605_v55  ;;  %v1820_v53 = vld [vmem:[%s7421_s3 + $0x5f0] sm:$0xff]  ;;  %v1822_v55 = vld [vmem:[%s7421_s3 + $0x600] sm:$0xff] }
 0x24e   : > { %4512 = vmatprep.subr.bf16.mxu0 %v4511_v8  ;;  %4608 = vmatprep.subr.bf16.mxu1 %v4607_v20  ;;  %v4519_v1 = vpack.c.bf16 %v1820_v53, %v1811_v51  ;;  %v4615_v7 = vpack.c.bf16 %v1822_v55, %v1813_v58  ;;  %v4521_v8 = vpack.c.bf16 %v1819_v6, %v1810_v5  ;;  %v1829_v20 = vld [vmem:[%s7421_s3 + $0x638] sm:$0xff]  ;;  %v1846_v51 = vld [vmem:[%s7421_s3 + $0x6c0] sm:$0xff]  ;;  %v1855_v53 = vld [vmem:[%s7421_s3 + $0x708] sm:$0xff] }
 0x24f   : > { %v1848_v55 = vld [vmem:[%s7421_s3 + $0x6d0] sm:$0xff]  ;;  %v1857_v5 = vld [vmem:[%s7421_s3 + $0x718] sm:$0xff] }
 0x250   : > { %v4625_v6 = vpack.c.bf16 %v1857_v5, %v1848_v55  ;;  %v1903_v55 = vld [vmem:[%s7421_s3 + $0x888] sm:$0xff] }
 0x251   : > { %4514 = vmatpush1.bf16.msra.mxu0 %v4513_v22  ;;  %4610 = vmatpush1.bf16.msra.mxu1 %v4609_v24  ;;  %v1838_v22 = vld [vmem:[%s7421_s3 + $0x680] sm:$0xff]  ;;  %v1840_v24 = vld [vmem:[%s7421_s3 + $0x690] sm:$0xff] }
 0x252   : > { %4516 = vmatprep.subr.bf16.mxu0 %v4515_v39  ;;  %4612 = vmatprep.subr.bf16.mxu1 %v4611_v42  ;;  %v4523_v29 = vpack.c.bf16 %v1838_v22, %v1829_v20  ;;  %v4619_v38 = vpack.c.bf16 %v1840_v24, %v1831_v25  ;;  %v4525_v39 = vpack.c.bf16 %v1837_v30, %v1828_v33  ;;  %v1847_v42 = vld [vmem:[%s7421_s3 + $0x6c8] sm:$0xff]  ;;  %v1864_v20 = vld [vmem:[%s7421_s3 + $0x750] sm:$0xff]  ;;  %v1873_v22 = vld [vmem:[%s7421_s3 + $0x798] sm:$0xff] }
 0x253   : > { %v1866_v24 = vld [vmem:[%s7421_s3 + $0x760] sm:$0xff]  ;;  %v1875_v33 = vld [vmem:[%s7421_s3 + $0x7a8] sm:$0xff] }
 0x254   : > { %v4629_v30 = vpack.c.bf16 %v1875_v33, %v1866_v24  ;;  %v1921_v24 = vld [vmem:[%s7421_s3 + $0x918] sm:$0xff] }
 0x255   : > { %4518 = vmatpush1.bf16.msra.mxu0 %v4517_v43  ;;  %4614 = vmatpush1.bf16.msra.mxu1 %v4613_v49  ;;  %v1856_v43 = vld [vmem:[%s7421_s3 + $0x710] sm:$0xff]  ;;  %v1858_v49 = vld [vmem:[%s7421_s3 + $0x720] sm:$0xff] }
 0x256   : > { %4520 = vmatprep.subr.bf16.mxu0 %v4519_v1  ;;  %4616 = vmatprep.subr.bf16.mxu1 %v4615_v7  ;;  %v4527_v48 = vpack.c.bf16 %v1856_v43, %v1847_v42  ;;  %v4623_v58 = vpack.c.bf16 %v1858_v49, %v1849_v44  ;;  %v4529_v1 = vpack.c.bf16 %v1855_v53, %v1846_v51  ;;  %v1865_v7 = vld [vmem:[%s7421_s3 + $0x758] sm:$0xff]  ;;  %v1882_v42 = vld [vmem:[%s7421_s3 + $0x7e0] sm:$0xff]  ;;  %v1891_v44 = vld [vmem:[%s7421_s3 + $0x828] sm:$0xff] }
 0x257   : > { %v1893_v49 = vld [vmem:[%s7421_s3 + $0x838] sm:$0xff]  ;;  %v4537_v51 = vpack.c.bf16 %v1891_v44, %v1882_v42  ;;  %v3823_v44 = vld [vmem:[%s7424_s6 + $0x1] ss:$2 sm:$0x7] }
 0x259   : > { %4522 = vmatpush1.bf16.msra.mxu0 %v4521_v8  ;;  %4618 = vmatpush1.bf16.msra.mxu1 %v4617_v16  ;;  %v1874_v8 = vld [vmem:[%s7421_s3 + $0x7a0] sm:$0xff]  ;;  %v1876_v16 = vld [vmem:[%s7421_s3 + $0x7b0] sm:$0xff] }
 0x25a   : > { %4524 = vmatprep.subr.bf16.mxu0 %v4523_v29  ;;  %4620 = vmatprep.subr.bf16.mxu1 %v4619_v38  ;;  %v4531_v12 = vpack.c.bf16 %v1874_v8, %v1865_v7  ;;  %v4627_v25 = vpack.c.bf16 %v1876_v16, %v1867_v11  ;;  %v4533_v29 = vpack.c.bf16 %v1873_v22, %v1864_v20  ;;  %v1883_v38 = vld [vmem:[%s7421_s3 + $0x7e8] sm:$0xff]  ;;  %v1900_v7 = vld [vmem:[%s7421_s3 + $0x870] sm:$0xff]  ;;  %v1909_v8 = vld [vmem:[%s7421_s3 + $0x8b8] sm:$0xff] }
 0x25b   : > { %v1902_v16 = vld [vmem:[%s7421_s3 + $0x880] sm:$0xff]  ;;  %v1911_v20 = vld [vmem:[%s7421_s3 + $0x8c8] sm:$0xff] }
 0x25c   : > { %v4637_v22 = vpack.c.bf16 %v1911_v20, %v1902_v16 }
 0x25d   : > { %4526 = vmatpush1.bf16.msra.mxu0 %v4525_v39  ;;  %4622 = vmatpush1.bf16.msra.mxu1 %v4621_v40  ;;  %v1892_v39 = vld [vmem:[%s7421_s3 + $0x830] sm:$0xff]  ;;  %v1894_v40 = vld [vmem:[%s7421_s3 + $0x840] sm:$0xff] }
 0x25e   : > { %4528 = vmatprep.subr.bf16.mxu0 %v4527_v48  ;;  %4624 = vmatprep.subr.bf16.mxu1 %v4623_v58  ;;  %v4535_v34 = vpack.c.bf16 %v1892_v39, %v1883_v38  ;;  %v4631_v43 = vpack.c.bf16 %v1894_v40, %v1885_v35  ;;  %v1884_v48 = vld [vmem:[%s7421_s3 + $0x7f0] sm:$0xff]  ;;  %v1901_v58 = vld [vmem:[%s7421_s3 + $0x878] sm:$0xff]  ;;  %v1027_v39 = vld [vmem:[%s7424_s6] ss:$2 sm:$0x7] }
 0x25f   : > { %v4633_v53 = vpack.c.bf16 %v1893_v49, %v1884_v48 }
 0x261   : > { %4530 = vmatpush1.bf16.msra.mxu0 %v4529_v1  ;;  %4626 = vmatpush1.bf16.msra.mxu1 %v4625_v6  ;;  %v1910_v1 = vld [vmem:[%s7421_s3 + $0x8c0] sm:$0xff]  ;;  %v1912_v6 = vld [vmem:[%s7421_s3 + $0x8d0] sm:$0xff] }
 0x262   : > { %4532 = vmatprep.subr.bf16.mxu0 %v4531_v12  ;;  %4628 = vmatprep.subr.bf16.mxu1 %v4627_v25  ;;  %v4539_v5 = vpack.c.bf16 %v1910_v1, %v1901_v58  ;;  %v4635_v11 = vpack.c.bf16 %v1912_v6, %v1903_v55  ;;  %v4541_v12 = vpack.c.bf16 %v1909_v8, %v1900_v7  ;;  %v1919_v25 = vld [vmem:[%s7421_s3 + $0x908] sm:$0xff] }
 0x263   : > { %v1478_v58 = vrot.slane %v1027_v39, %v5769_v62  ;;  %v1482_v6 = vrot.slane %v1027_v39, %v5778_v2 }
 0x265   : > { %4534 = vmatpush1.bf16.msra.mxu0 %v4533_v29  ;;  %4630 = vmatpush1.bf16.msra.mxu1 %v4629_v30  ;;  %v1928_v29 = vld [vmem:[%s7421_s3 + $0x950] sm:$0xff]  ;;  %v1930_v30 = vld [vmem:[%s7421_s3 + $0x960] sm:$0xff] }
 0x266   : > { %4536 = vmatprep.subr.bf16.mxu0 %v4535_v34  ;;  %4632 = vmatprep.subr.bf16.mxu1 %v4631_v43  ;;  %v4543_v33 = vpack.c.bf16 %v1928_v29, %v1919_v25  ;;  %v4639_v38 = vpack.c.bf16 %v1930_v30, %v1921_v24 }
 0x269   : > { %4538 = vmatpush1.bf16.msra.mxu0 %v4537_v51  ;;  %4634 = vmatpush1.bf16.msra.mxu1 %v4633_v53 }
 0x26a   : > { %4540 = vmatprep.subr.bf16.mxu0 %v4539_v5  ;;  %4636 = vmatprep.subr.bf16.mxu1 %v4635_v11  ;;  %v1500_v11 = vrot.slane %v3823_v44, %v5769_v62 }
 0x26d   : > { %4542 = vmatpush1.bf16.msra.mxu0 %v4541_v12  ;;  %4638 = vmatpush1.bf16.msra.mxu1 %v4637_v22 }
 0x26e   : > { %4544 = vmatprep.subr.bf16.mxu0 %v4543_v33  ;;  %4640 = vmatprep.subr.bf16.mxu1 %v4639_v38 }
 0x303   : > { %v1363_v34 = vpop.f32.mrb[6].mxu0  ;;  %v1434_v35 = vpop.f32.mrb[4].mxu1 }
 0x304   : > { %v1441_v40 = vrot.slane %v1363_v34, %v5769_v62  ;;  %v1365_v42 = vpop.f32.mrb[7].mxu0  ;;  %v4189_v43 = vpop.f32.mrb[5].mxu1  ;;  %v1459_v53 = vrot.slane %v1363_v34, %v5778_v2  ;;  %v1449_v34 = vrot.slane %v1434_v35, %v5769_v62 }
 0x305   : > { %v1445_v48 = vrot.slane %v1365_v42, %v5769_v62  ;;  %v1463_v5 = vrot.slane %v1365_v42, %v5778_v2  ;;  %v1467_v43 = vrot.slane %v1434_v35, %v5778_v2 }
 0x306   : > { %v1450_v49 = vsub.f32 %v5783_v13, %v1441_v40  ;;  %v1453_v51 = vsub.f32 %v5797_v26, %v1441_v40  ;;  %v1504_v26 = vrot.slane %v3823_v44, %v5778_v2  ;;  %v1452_v42 = vsub.f32 %v5787_v17, %v1449_v34 }
 0x307   : > { %v1451_v1 = vsub.f32 %v5791_v21, %v1445_v48  ;;  %v1454_v55 = vsub.f32 %v5801_v31, %v1445_v48  ;;  %v1455_v48 = vsub.f32 %v5785_v15, %v1449_v34 }
 0x308   : > { %v1468_v7 = vmul.f32 %v1459_v53, %v1450_v49  ;;  %v1471_v8 = vmul.f32 %v1459_v53, %v1453_v51  ;;  %v1470_v49 = vmul.f32 %v1467_v43, %v1452_v42  ;;  %v1486_v51 = vrot.slane %v1027_v39, %v5772_v63 }
 0x309   : > { %v1469_v12 = vmul.f32 %v1463_v5, %v1451_v1  ;;  %v1472_v13 = vmul.f32 %v1463_v5, %v1454_v55  ;;  %v1473_v5 = vmul.f32 %v1467_v43, %v1455_v48  ;;  %v6281_v43 = vld [vmem:[%s7426_s8] sm:$0x7] }
 0x30a   : > { %v1490_v16 = vmul.f32 %v1478_v58, %v1468_v7  ;;  %v1493_v20 = vmul.f32 %v1478_v58, %v1471_v8  ;;  %v1508_v7 = vrot.slane %v3823_v44, %v5772_v63 }
 0x30b   : > { %v1491_v22 = vmul.f32 %v1482_v6, %v1469_v12  ;;  %v1494_v25 = vmul.f32 %v1482_v6, %v1472_v13  ;;  %v1492_v6 = vmul.f32 %v1486_v51, %v1470_v49  ;;  %v1495_v15 = vmul.f32 %v1486_v51, %v1473_v5  ;;  %v6264_v12 = vld [vmem:[%s401_s30] ss:$2 sm:$0x7] }
 0x30c   : > { %v1512_v29 = vadd.f32 %v1500_v11, %v1490_v16  ;;  %v1515_v21 = vadd.f32 %v1500_v11, %v1493_v20  ;;  %v1565_v16 = vrot.slane %v6264_v12, %v5769_v62 }
 0x30d   : > { %v1513_v24 = vadd.f32 %v1504_v26, %v1491_v22  ;;  %v1516_v31 = vadd.f32 %v1504_v26, %v1494_v25  ;;  %v6262_v39 = vadd.f32 %v1508_v7, %v1492_v6  ;;  %v6266_v13 = vadd.f32 %v1508_v7, %v1495_v15  ;;  %v6271_v25 = vld [vmem:[%s401_s30 + $0x1] ss:$2 sm:$0x7]  ;;  %v1929_v7 = vld [vmem:[%s7421_s3 + $0x958] sm:$0xff]  ;;  %v1939_v15 = vld [vmem:[%s7421_s3 + $0x9a8] sm:$0xff] }
 0x30e   : > { %v3826_v33 = vmul.f32 -1.442695, %v1512_v29  ;;  %v3829_v30 = vmul.f32 -1.442695, %v1515_v21  ;;  %v1589_v42 = vrot.slane %v6271_v25, %v5769_v62  ;;  %v1593_v49 = vrot.slane %v6271_v25, %v5778_v2 }
 0x30f   : > { %v3827_v38 = vmul.f32 -1.442695, %v1513_v24  ;;  %v3830_v40 = vmul.f32 -1.442695, %v1516_v31  ;;  %v3828_v44 = vmul.f32 -1.442695, %v6262_v39  ;;  %v1612_v6 = vrot.slane %v6281_v43, %v5769_v62 }
 0x310   : > { %5043 = vpow2.f32 %v3826_v33  ;;  %v3831_v33 = vmul.f32 -1.442695, %v6266_v13 }
 0x311   : > { %5045 = vpow2.f32 %v3829_v30  ;;  %v1569_v30 = vrot.slane %v6264_v12, %v5778_v2 }
 0x312   : > { %5047 = vpow2.f32 %v3827_v38 }
 0x313   : > { %5049 = vpow2.f32 %v3830_v40 }
 0x31a   : > { %v5044_v53 = vpop.eup %5043 }
 0x31b   : > { %v5046_v58 = vpop.eup %5045  ;;  %v1536_v1 = vadd.f32 1.0, %v5044_v53 }
 0x31c   : > { %v1539_v55 = vadd.f32 1.0, %v5046_v58  ;;  %v5048_v8 = vpop.eup %5047  ;;  %v1918_v58 = vld [vmem:[%s7421_s3 + $0x900] sm:$0xff] }
 0x31d   : > { %5051 = vrcp.f32 %v1536_v1  ;;  %v5050_v17 = vpop.eup %5049  ;;  %v1537_v11 = vadd.f32 1.0, %v5048_v8 }
 0x31e   : > { %5053 = vrcp.f32 %v1539_v55  ;;  %v1540_v35 = vadd.f32 1.0, %v5050_v17  ;;  %v1937_v17 = vld [vmem:[%s7421_s3 + $0x998] sm:$0xff] }
 0x31f   : > { %5055 = vrcp.f32 %v1537_v11 }
 0x320   : > { %5057 = vrcp.f32 %v1540_v35  ;;  %v1946_v35 = vld [vmem:[%s7421_s3 + $0x9e0] sm:$0xff] }
 0x321   : > { %5059 = vpow2.f32 %v3828_v44  ;;  %v1948_v44 = vld [vmem:[%s7421_s3 + $0x9f0] sm:$0xff] }
 0x322   : > { %5061 = vpow2.f32 %v3831_v33  ;;  %v1945_v33 = vld [vmem:[%s7421_s3 + $0x9d8] sm:$0xff] }
 0x327   : > { %v5052_v26 = vpop.eup %5051 }
 0x328   : > { %v5054_v20 = vpop.eup %5053  ;;  %v1554_v22 = vmul.f32 %v5052_v26, %v1512_v29 }
 0x329   : > { %v5056_v38 = vpop.eup %5055  ;;  %v1557_v34 = vmul.f32 %v5054_v20, %v1515_v21  ;;  %v1616_v21 = vrot.slane %v6281_v43, %v5778_v2 }
 0x32a   : > { %v1577_v40 = vmul.f32 %v1565_v16, %v1554_v22  ;;  %v5058_v29 = vpop.eup %5057  ;;  %v1555_v48 = vmul.f32 %v5056_v38, %v1513_v24  ;;  %v1927_v24 = vld [vmem:[%s7421_s3 + $0x948] sm:$0xff]  ;;  %v1936_v22 = vld [vmem:[%s7421_s3 + $0x990] sm:$0xff] }
 0x32b   : > { %v1558_v51 = vmul.f32 %v5058_v29, %v1516_v31  ;;  %v1580_v1 = vmul.f32 %v1565_v16, %v1557_v34  ;;  %v1920_v31 = vld [vmem:[%s7421_s3 + $0x910] sm:$0xff]  ;;  %v4545_v16 = vpack.c.bf16 %v1927_v24, %v1918_v58  ;;  %v1947_v29 = vld [vmem:[%s7421_s3 + $0x9e8] sm:$0xff]  ;;  %v1966_v58 = vld [vmem:[%s7421_s3 + $0xa80] sm:$0xff] }
 0x32c   : > { %v1578_v53 = vmul.f32 %v1569_v30, %v1555_v48  ;;  %v1601_v55 = vadd.f32 %v1589_v42, %v1577_v40  ;;  %v4641_v20 = vpack.c.bf16 %v1929_v7, %v1920_v31  ;;  %v1938_v40 = vld [vmem:[%s7421_s3 + $0x9a0] sm:$0xff]  ;;  %v1955_v48 = vld [vmem:[%s7421_s3 + $0xa28] sm:$0xff] }
 0x32d   : > { %v1581_v5 = vmul.f32 %v1569_v30, %v1558_v51  ;;  %v5060_v30 = vpop.eup %5059  ;;  %v1604_v38 = vadd.f32 %v1589_v42, %v1580_v1  ;;  %v4643_v42 = vpack.c.bf16 %v1948_v44, %v1939_v15  ;;  %v1964_v51 = vld [vmem:[%s7421_s3 + $0xa70] sm:$0xff]  ;;  %v4645_v24 = vpack.c.bf16 %v1947_v29, %v1938_v40  ;;  %v1954_v31 = vld [vmem:[%s7421_s3 + $0xa20] sm:$0xff]  ;;  %v1963_v7 = vld [vmem:[%s7421_s3 + $0xa68] sm:$0xff] }
 0x32e   : > { %v1602_v8 = vadd.f32 %v1593_v49, %v1578_v53  ;;  %v6321_v34 = vmul.f32 %v1612_v6, %v1601_v55  ;;  %v1957_v53 = vld [vmem:[%s7421_s3 + $0xa38] sm:$0xff]  ;;  %v1538_v55 = vadd.f32 1.0, %v5060_v30 }
 0x32f   : > { %v1605_v11 = vadd.f32 %v1593_v49, %v1581_v5  ;;  %v4547_v49 = vpack.c.bf16 %v1946_v35, %v1937_v17  ;;  %v4549_v5 = vpack.c.bf16 %v1945_v33, %v1936_v22  ;;  %v4551_v17 = vpack.c.bf16 %v1964_v51, %v1955_v48  ;;  %v1956_v35 = vld [vmem:[%s7421_s3 + $0xa30] sm:$0xff]  ;;  %v1965_v15 = vld [vmem:[%s7421_s3 + $0xa78] sm:$0xff]  ;;  %v1991_v51 = vld [vmem:[%s7421_s3 + $0xb48] sm:$0xff] }
 0x330   : > { %v6313_v26 = vmul.f32 %v1616_v21, %v1602_v8  ;;  %v5062_v8 = vpop.eup %5061  ;;  %v1973_v44 = vld [vmem:[%s7421_s3 + $0xab8] sm:$0xff]  ;;  %5063 = vrcp.f32 %v1538_v55  ;;  %v4553_v33 = vpack.c.bf16 %v1963_v7, %v1954_v31  ;;  %v4649_v30 = vpack.c.bf16 %v1965_v15, %v1956_v35  ;;  %v2002_v55 = vld [vmem:[%s7421_s3 + $0xba0] sm:$0xff]  ;;  %v1999_v7 = vld [vmem:[%s7421_s3 + $0xb88] sm:$0xff] }
 0x331   : > { %v6345_v1 = vmul.f32 %v1616_v21, %v1605_v11  ;;  %v6355_v21 = vmul.f32 %v1612_v6, %v1604_v38  ;;  %v4647_v11 = vpack.c.bf16 %v1966_v58, %v1957_v53  ;;  %v1982_v6 = vld [vmem:[%s7421_s3 + $0xb00] sm:$0xff]  ;;  %v1541_v22 = vadd.f32 1.0, %v5062_v8  ;;  %v1972_v38 = vld [vmem:[%s7421_s3 + $0xab0] sm:$0xff]  ;;  %v1981_v40 = vld [vmem:[%s7421_s3 + $0xaf8] sm:$0xff] }
 0x332   : > { %2126 = vmatprep.mubr.f32.mxu0 %v6313_v26  ;;  %2280 = vmatprep.mubr.f32.mxu1 %v6313_v26  ;;  %v4555_v29 = vpack.c.bf16 %v1982_v6, %v1973_v44  ;;  %v2000_v53 = vld [vmem:[%s7421_s3 + $0xb90] sm:$0xff]  ;;  %v1993_v58 = vld [vmem:[%s7421_s3 + $0xb58] sm:$0xff]  ;;  %v1990_v31 = vld [vmem:[%s7421_s3 + $0xb40] sm:$0xff] }
 0x333   : > { %2127 = vmatmul.mubr.f32.vlgmr.msra.gmra.mrb[8].mxu0 %v6321_v34  ;;  %2281 = vmatmul.mubr.f32.vlgmr.msra.gmra.mrb[6].mxu1 %v6321_v34  ;;  %5065 = vrcp.f32 %v1541_v22  ;;  %v4559_v8 = vpack.c.bf16 %v2000_v53, %v1991_v51  ;;  %v2001_v35 = vld [vmem:[%s7421_s3 + $0xb98] sm:$0xff]  ;;  %v2018_v44 = vld [vmem:[%s7421_s3 + $0xc20] sm:$0xff]  ;;  %v2011_v6 = vld [vmem:[%s7421_s3 + $0xbe8] sm:$0xff] }
 0x334   : > { %4546 = vmatpush1.bf16.msra.mxu0 %v4545_v16  ;;  %4642 = vmatpush1.bf16.msra.mxu1 %v4641_v20  ;;  %v1975_v16 = vld [vmem:[%s7421_s3 + $0xac8] sm:$0xff]  ;;  %v1984_v20 = vld [vmem:[%s7421_s3 + $0xb10] sm:$0xff]  ;;  %v2009_v15 = vld [vmem:[%s7421_s3 + $0xbd8] sm:$0xff] }
 0x335   : > { %2132 = vmatprep.mubr.f32.mxu0 %v6345_v1  ;;  %2286 = vmatprep.mubr.f32.mxu1 %v6345_v1  ;;  %v4651_v48 = vpack.c.bf16 %v1984_v20, %v1975_v16  ;;  %v2020_v16 = vld [vmem:[%s7421_s3 + $0xc30] sm:$0xff]  ;;  %v4561_v20 = vpack.c.bf16 %v1999_v7, %v1990_v31  ;;  %v2029_v53 = vld [vmem:[%s7421_s3 + $0xc78] sm:$0xff]  ;;  %v2026_v31 = vld [vmem:[%s7421_s3 + $0xc60] sm:$0xff] }
 0x336   : > { %4548 = vmatprep.subr.bf16.mxu0 %v4547_v49  ;;  %4644 = vmatprep.subr.bf16.mxu1 %v4643_v42  ;;  %v1974_v49 = vld [vmem:[%s7421_s3 + $0xac0] sm:$0xff]  ;;  %v1983_v42 = vld [vmem:[%s7421_s3 + $0xb08] sm:$0xff]  ;;  %v2036_v51 = vld [vmem:[%s7421_s3 + $0xcb0] sm:$0xff] }
 0x337   : > { %2133 = vmatmul.mubr.f32.gmra.mrb[10].mxu0 %v6355_v21  ;;  %2287 = vmatmul.mubr.f32.gmra.mrb[8].mxu1 %v6355_v21  ;;  %v2035_v7 = vld [vmem:[%s7421_s3 + $0xca8] sm:$0xff] }
 0x338   : > { %4550 = vmatpush1.bf16.msra.mxu0 %v4549_v5  ;;  %4646 = vmatpush1.bf16.msra.mxu1 %v4645_v24  ;;  %v4557_v5 = vpack.c.bf16 %v1981_v40, %v1972_v38  ;;  %v4653_v24 = vpack.c.bf16 %v1983_v42, %v1974_v49  ;;  %v4563_v38 = vpack.c.bf16 %v2018_v44, %v2009_v15  ;;  %v2027_v49 = vld [vmem:[%s7421_s3 + $0xc68] sm:$0xff]  ;;  %v2045_v15 = vld [vmem:[%s7421_s3 + $0xcf8] sm:$0xff]  ;;  %v2054_v44 = vld [vmem:[%s7421_s3 + $0xd40] sm:$0xff] }
 0x339   : > { %4552 = vmatprep.subr.bf16.mxu0 %v4551_v17  ;;  %4648 = vmatprep.subr.bf16.mxu1 %v4647_v11  ;;  %v4655_v17 = vpack.c.bf16 %v2002_v55, %v1993_v58  ;;  %v1992_v11 = vld [vmem:[%s7421_s3 + $0xb50] sm:$0xff]  ;;  %v4659_v40 = vpack.c.bf16 %v2020_v16, %v2011_v6  ;;  %v2038_v58 = vld [vmem:[%s7421_s3 + $0xcc0] sm:$0xff]  ;;  %v1573_v55 = vrot.slane %v6264_v12, %v5772_v63 }
 0x33a   : > { %2203 = vmatprep.mubr.f32.mxu0 %v7434_v3  ;;  %2357 = vmatprep.mubr.f32.mxu1 %v7434_v3  ;;  %v4657_v22 = vpack.c.bf16 %v2001_v35, %v1992_v11  ;;  %v5064_v42 = vpop.eup %5063  ;;  %v4567_v12 = vpack.c.bf16 %v2036_v51, %v2027_v49  ;;  %v4663_v11 = vpack.c.bf16 %v2038_v58, %v2029_v53  ;;  %v2037_v35 = vld [vmem:[%s7421_s3 + $0xcb8] sm:$0xff]  ;;  %v2056_v16 = vld [vmem:[%s7421_s3 + $0xd50] sm:$0xff]  ;;  %v1635_v51 = vld [vmem:[%s7421_s3 + $0x28] sm:$0xff] }
 0x33b   : > { %v1644_v53 = vld [vmem:[%s7421_s3 + $0x70] sm:$0xff]  ;;  %v1646_v58 = vld [vmem:[%s7421_s3 + $0x80] sm:$0xff] }
 0x33c   : > { %4554 = vmatpush1.bf16.msra.mxu0 %v4553_v33  ;;  %4650 = vmatpush1.bf16.msra.mxu1 %v4649_v30  ;;  %v2008_v33 = vld [vmem:[%s7421_s3 + $0xbd0] sm:$0xff]  ;;  %v2017_v30 = vld [vmem:[%s7421_s3 + $0xc18] sm:$0xff] }
 0x33d   : > { %4556 = vmatprep.subr.bf16.mxu0 %v4555_v29  ;;  %4652 = vmatprep.subr.bf16.mxu1 %v4651_v48  ;;  %v2010_v29 = vld [vmem:[%s7421_s3 + $0xbe0] sm:$0xff]  ;;  %v2019_v48 = vld [vmem:[%s7421_s3 + $0xc28] sm:$0xff]  ;;  %v5066_v6 = vpop.eup %5065 }
 0x340   : > { %4558 = vmatpush1.bf16.msra.mxu0 %v4557_v5  ;;  %4654 = vmatpush1.bf16.msra.mxu1 %v4653_v24  ;;  %v4565_v5 = vpack.c.bf16 %v2017_v30, %v2008_v33  ;;  %v4661_v24 = vpack.c.bf16 %v2019_v48, %v2010_v29  ;;  %v4571_v30 = vpack.c.bf16 %v2054_v44, %v2045_v15  ;;  %v2046_v29 = vld [vmem:[%s7421_s3 + $0xd00] sm:$0xff]  ;;  %v1645_v15 = vld [vmem:[%s7421_s3 + $0x78] sm:$0xff] }
 0x341   : > { %4560 = vmatprep.subr.bf16.mxu0 %v4559_v8  ;;  %4656 = vmatprep.subr.bf16.mxu1 %v4655_v17  ;;  %v2028_v8 = vld [vmem:[%s7421_s3 + $0xc70] sm:$0xff]  ;;  %v1556_v17 = vmul.f32 %v5064_v42, %v6262_v39  ;;  %v2047_v39 = vld [vmem:[%s7421_s3 + $0xd08] sm:$0xff]  ;;  %v1559_v48 = vmul.f32 %v5066_v6, %v6266_v13  ;;  %v1637_v13 = vld [vmem:[%s7421_s3 + $0x38] sm:$0xff] }
 0x342   : > { %v4665_v33 = vpack.c.bf16 %v2037_v35, %v2028_v8  ;;  %v4667_v49 = vpack.c.bf16 %v2056_v16, %v2047_v39  ;;  %v2055_v42 = vld [vmem:[%s7421_s3 + $0xd48] sm:$0xff]  ;;  %v1634_v8 = vld [vmem:[%s7421_s3 + $0x20] sm:$0xff]  ;;  %v1664_v39 = vld [vmem:[%s7421_s3 + $0x110] sm:$0xff] }
 0x343   : > { %v1643_v35 = vld [vmem:[%s7421_s3 + $0x68] sm:$0xff]  ;;  %v1662_v44 = vld [vmem:[%s7421_s3 + $0x100] sm:$0xff] }
 0x344   : > { %4562 = vmatpush1.bf16.msra.mxu0 %v4561_v20  ;;  %4658 = vmatpush1.bf16.msra.mxu1 %v4657_v22  ;;  %v1597_v20 = vrot.slane %v6271_v25, %v5772_v63  ;;  %v4569_v22 = vpack.c.bf16 %v2035_v7, %v2026_v31  ;;  %v1579_v25 = vmul.f32 %v1573_v55, %v1556_v17  ;;  %v1655_v6 = vld [vmem:[%s7421_s3 + $0xc8] sm:$0xff] }
 0x345   : > { %4564 = vmatprep.subr.bf16.mxu0 %v4563_v38  ;;  %4660 = vmatprep.subr.bf16.mxu1 %v4659_v40  ;;  %v2044_v38 = vld [vmem:[%s7421_s3 + $0xcf0] sm:$0xff]  ;;  %v2053_v40 = vld [vmem:[%s7421_s3 + $0xd38] sm:$0xff]  ;;  %v4669_v31 = vpack.c.bf16 %v2055_v42, %v2046_v29  ;;  %v4671_v7 = vpack.c.bf16 %v1644_v53, %v1635_v51  ;;  %v1582_v17 = vmul.f32 %v1573_v55, %v1559_v48  ;;  %v1682_v53 = vld [vmem:[%s7421_s3 + $0x1a0] sm:$0xff] }
 0x346   : > { %v1653_v55 = vld [vmem:[%s7421_s3 + $0xb8] sm:$0xff]  ;;  %v4673_v16 = vpack.c.bf16 %v1643_v35, %v1634_v8  ;;  %v4771_v48 = vpack.c.bf16 %v1664_v39, %v1655_v6  ;;  %v1680_v42 = vld [vmem:[%s7421_s3 + $0x190] sm:$0xff]  ;;  %v1698_v35 = vld [vmem:[%s7421_s3 + $0x220] sm:$0xff] }
 0x347   : > { %v4675_v29 = vpack.c.bf16 %v1662_v44, %v1653_v55  ;;  %v1673_v51 = vld [vmem:[%s7421_s3 + $0x158] sm:$0xff]  ;;  %v1672_v8 = vld [vmem:[%s7421_s3 + $0x150] sm:$0xff] }
 0x348   : > { %4566 = vmatpush1.bf16.msra.mxu0 %v4565_v5  ;;  %4662 = vmatpush1.bf16.msra.mxu1 %v4661_v24  ;;  %v1620_v5 = vrot.slane %v6281_v43, %v5772_v63  ;;  %v4573_v24 = vpack.c.bf16 %v2053_v40, %v2044_v38  ;;  %v1636_v43 = vld [vmem:[%s7421_s3 + $0x30] sm:$0xff]  ;;  %v1661_v40 = vld [vmem:[%s7421_s3 + $0xf8] sm:$0xff] }
 0x349   : > { %4568 = vmatprep.subr.bf16.mxu0 %v4567_v12  ;;  %4664 = vmatprep.subr.bf16.mxu1 %v4663_v11  ;;  %v1603_v12 = vadd.f32 %v1597_v20, %v1579_v25  ;;  %v4767_v11 = vpack.c.bf16 %v1646_v58, %v1637_v13  ;;  %v1652_v38 = vld [vmem:[%s7421_s3 + $0xb0] sm:$0xff]  ;;  %v1654_v25 = vld [vmem:[%s7421_s3 + $0xc0] sm:$0xff] }
 0x34a   : > { %v4677_v13 = vpack.c.bf16 %v1661_v40, %v1652_v38  ;;  %v1688_v39 = vld [vmem:[%s7421_s3 + $0x1d0] sm:$0xff]  ;;  %v1699_v38 = vld [vmem:[%s7421_s3 + $0x228] sm:$0xff] }
 0x34b   : > { %v1707_v40 = vld [vmem:[%s7421_s3 + $0x268] sm:$0xff] }
 0x34c   : > { %4570 = vmatpush1.bf16.msra.mxu0 %v4569_v22  ;;  %4666 = vmatpush1.bf16.msra.mxu1 %v4665_v33  ;;  %v4769_v22 = vpack.c.bf16 %v1645_v15, %v1636_v43  ;;  %v1606_v33 = vadd.f32 %v1597_v20, %v1582_v17  ;;  %v1663_v20 = vld [vmem:[%s7421_s3 + $0x108] sm:$0xff]  ;;  %v1700_v15 = vld [vmem:[%s7421_s3 + $0x230] sm:$0xff] }
 0x34d   : > { %4572 = vmatprep.subr.bf16.mxu0 %v4571_v30  ;;  %4668 = vmatprep.subr.bf16.mxu1 %v4667_v49  ;;  %v6531_v30 = vmul.f32 %v1620_v5, %v1603_v12  ;;  %v1671_v49 = vld [vmem:[%s7421_s3 + $0x148] sm:$0xff]  ;;  %v4775_v12 = vpack.c.bf16 %v1682_v53, %v1673_v51  ;;  %v1706_v51 = vld [vmem:[%s7421_s3 + $0x260] sm:$0xff] }
 0x34e   : > { %v6561_v58 = vmul.f32 %v1620_v5, %v1606_v33  ;;  %v4679_v17 = vpack.c.bf16 %v1680_v42, %v1671_v49  ;;  %v1681_v5 = vld [vmem:[%s7421_s3 + $0x198] sm:$0xff]  ;;  %v1691_v43 = vld [vmem:[%s7421_s3 + $0x1e8] sm:$0xff] }
 0x34f   : > { %v4777_v44 = vpack.c.bf16 %v1681_v5, %v1672_v8  ;;  %v4779_v33 = vpack.c.bf16 %v1700_v15, %v1691_v43  ;;  %v1715_v53 = vld [vmem:[%s7421_s3 + $0x2a8] sm:$0xff]  ;;  %v1734_v8 = vld [vmem:[%s7421_s3 + $0x340] sm:$0xff]  ;;  %v1724_v43 = vld [vmem:[%s7421_s3 + $0x2f0] sm:$0xff] }
 0x350   : > { %4574 = vmatpush1.bf16.msra.mxu0 %v4573_v24  ;;  %4670 = vmatpush1.bf16.msra.mxu1 %v4669_v31  ;;  %v4773_v24 = vpack.c.bf16 %v1663_v20, %v1654_v25  ;;  %v1670_v31 = vld [vmem:[%s7421_s3 + $0x140] sm:$0xff]  ;;  %v4689_v5 = vpack.c.bf16 %v1715_v53, %v1706_v51  ;;  %v1733_v15 = vld [vmem:[%s7421_s3 + $0x338] sm:$0xff] }
 0x351   : > { %4672 = vmatprep.subr.bf16.mxu0 %v4671_v7  ;;  %4768 = vmatprep.subr.bf16.mxu1 %v4767_v11  ;;  %v1679_v7 = vld [vmem:[%s7421_s3 + $0x188] sm:$0xff]  ;;  %v1689_v11 = vld [vmem:[%s7421_s3 + $0x1d8] sm:$0xff]  ;;  %v1718_v25 = vld [vmem:[%s7421_s3 + $0x2c0] sm:$0xff] }
 0x352   : > { %v4681_v55 = vpack.c.bf16 %v1679_v7, %v1670_v31  ;;  %v4683_v6 = vpack.c.bf16 %v1698_v35, %v1689_v11  ;;  %v1717_v31 = vld [vmem:[%s7421_s3 + $0x2b8] sm:$0xff]  ;;  %v1770_v53 = vld [vmem:[%s7421_s3 + $0x460] sm:$0xff] }
 0x353   : > { %2204 = vmatmul.mubr.f32.vlgmr.msra.gmra.mrb[8].mxu0 %v6531_v30  ;;  %2358 = vmatmul.mubr.f32.vlgmr.msra.gmra.mrb[6].mxu1 %v6531_v30  ;;  %v1725_v7 = vld [vmem:[%s7421_s3 + $0x2f8] sm:$0xff] }
 0x354   : > { %4674 = vmatpush1.bf16.msra.mxu0 %v4673_v16  ;;  %4770 = vmatpush1.bf16.msra.mxu1 %v4769_v22  ;;  %v1697_v16 = vld [vmem:[%s7421_s3 + $0x218] sm:$0xff]  ;;  %v1690_v22 = vld [vmem:[%s7421_s3 + $0x1e0] sm:$0xff]  ;;  %v4691_v35 = vpack.c.bf16 %v1734_v8, %v1725_v7 }
 0x355   : > { %2209 = vmatprep.mubr.f32.mxu0 %v7434_v3  ;;  %2363 = vmatprep.mubr.f32.mxu1 %v7434_v3  ;;  %v4685_v20 = vpack.c.bf16 %v1697_v16, %v1688_v39  ;;  %v4781_v49 = vpack.c.bf16 %v1699_v38, %v1690_v22  ;;  %v1743_v39 = vld [vmem:[%s7421_s3 + $0x388] sm:$0xff]  ;;  %v1752_v16 = vld [vmem:[%s7421_s3 + $0x3d0] sm:$0xff]  ;;  %v1745_v22 = vld [vmem:[%s7421_s3 + $0x398] sm:$0xff]  ;;  %v4693_v38 = vpack.c.bf16 %v1733_v15, %v1724_v43 }
 0x356   : > { %4676 = vmatprep.subr.bf16.mxu0 %v4675_v29  ;;  %4772 = vmatprep.subr.bf16.mxu1 %v4771_v48  ;;  %v1716_v29 = vld [vmem:[%s7421_s3 + $0x2b0] sm:$0xff]  ;;  %v1709_v48 = vld [vmem:[%s7421_s3 + $0x278] sm:$0xff]  ;;  %v1779_v43 = vld [vmem:[%s7421_s3 + $0x4a8] sm:$0xff] }
 0x357   : > { %2210 = vmatmul.mubr.f32.gmra.mrb[10].mxu0 %v6561_v58  ;;  %2364 = vmatmul.mubr.f32.gmra.mrb[8].mxu1 %v6561_v58  ;;  %v4687_v42 = vpack.c.bf16 %v1716_v29, %v1707_v40  ;;  %v4695_v29 = vpack.c.bf16 %v1752_v16, %v1743_v39  ;;  %v1761_v51 = vld [vmem:[%s7421_s3 + $0x418] sm:$0xff]  ;;  %v1788_v15 = vld [vmem:[%s7421_s3 + $0x4f0] sm:$0xff] }
 0x358   : > { %4678 = vmatpush1.bf16.msra.mxu0 %v4677_v13  ;;  %2434 = vmatprep.mubr.f32.mxu0 %v6313_v26  ;;  %v1708_v13 = vld [vmem:[%s7421_s3 + $0x270] sm:$0xff]  ;;  %v4699_v8 = vpack.c.bf16 %v1770_v53, %v1761_v51  ;;  %v4703_v16 = vpack.c.bf16 %v1788_v15, %v1779_v43 }
 0x359   : > { %4774 = vmatpush1.bf16.msra.mxu1 %v4773_v24  ;;  %2588 = vmatprep.mubr.f32.mxu1 %v6313_v26  ;;  %v4783_v24 = vpack.c.bf16 %v1718_v25, %v1709_v48  ;;  %v4785_v11 = vpack.c.bf16 %v1717_v31, %v1708_v13  ;;  %v1742_v48 = vld [vmem:[%s7421_s3 + $0x380] sm:$0xff]  ;;  %v1751_v25 = vld [vmem:[%s7421_s3 + $0x3c8] sm:$0xff] }
 0x35a   : > { %4680 = vmatprep.subr.bf16.mxu0 %v4679_v17  ;;  %4776 = vmatprep.subr.bf16.mxu1 %v4775_v12  ;;  %v1727_v17 = vld [vmem:[%s7421_s3 + $0x308] sm:$0xff]  ;;  %v1736_v12 = vld [vmem:[%s7421_s3 + $0x350] sm:$0xff]  ;;  %v4697_v31 = vpack.c.bf16 %v1751_v25, %v1742_v48  ;;  %v1797_v48 = vld [vmem:[%s7421_s3 + $0x538] sm:$0xff] }
 0x35b   : > { %v1763_v13 = vld [vmem:[%s7421_s3 + $0x428] sm:$0xff]  ;;  %v1806_v25 = vld [vmem:[%s7421_s3 + $0x580] sm:$0xff] }
 0x35c   : > { %4682 = vmatpush1.bf16.msra.mxu0 %v4681_v55  ;;  %v1726_v55 = vld [vmem:[%s7421_s3 + $0x300] sm:$0xff]  ;;  %v4707_v53 = vpack.c.bf16 %v1806_v25, %v1797_v48 }
 0x35d   : > { %4778 = vmatpush1.bf16.msra.mxu1 %v4777_v44  ;;  %4684 = vmatprep.subr.bf16.mxu0 %v4683_v6  ;;  %v4787_v44 = vpack.c.bf16 %v1736_v12, %v1727_v17  ;;  %v1735_v6 = vld [vmem:[%s7421_s3 + $0x348] sm:$0xff]  ;;  %v1760_v17 = vld [vmem:[%s7421_s3 + $0x410] sm:$0xff]  ;;  %v1769_v12 = vld [vmem:[%s7421_s3 + $0x458] sm:$0xff] }
 0x35e   : > { %4780 = vmatprep.subr.bf16.mxu1 %v4779_v33  ;;  %v1754_v33 = vld [vmem:[%s7421_s3 + $0x3e0] sm:$0xff]  ;;  %v4789_v40 = vpack.c.bf16 %v1735_v6, %v1726_v55  ;;  %v1781_v55 = vld [vmem:[%s7421_s3 + $0x4b8] sm:$0xff]  ;;  %v4701_v6 = vpack.c.bf16 %v1769_v12, %v1760_v17  ;;  %v1815_v17 = vld [vmem:[%s7421_s3 + $0x5c8] sm:$0xff] }
 0x35f   : > { %v1824_v12 = vld [vmem:[%s7421_s3 + $0x610] sm:$0xff] }
 0x360   : > { %4686 = vmatpush1.bf16.msra.mxu0 %v4685_v20  ;;  %v1744_v20 = vld [vmem:[%s7421_s3 + $0x390] sm:$0xff]  ;;  %v4711_v15 = vpack.c.bf16 %v1824_v12, %v1815_v17 }
 0x361   : > { %4782 = vmatpush1.bf16.msra.mxu1 %v4781_v49  ;;  %4688 = vmatprep.subr.bf16.mxu0 %v4687_v42  ;;  %v4791_v49 = vpack.c.bf16 %v1754_v33, %v1745_v22  ;;  %v1753_v42 = vld [vmem:[%s7421_s3 + $0x3d8] sm:$0xff]  ;;  %v1778_v22 = vld [vmem:[%s7421_s3 + $0x4a0] sm:$0xff]  ;;  %v1787_v33 = vld [vmem:[%s7421_s3 + $0x4e8] sm:$0xff] }
 0x362   : > { %4784 = vmatprep.subr.bf16.mxu1 %v4783_v24  ;;  %v1772_v24 = vld [vmem:[%s7421_s3 + $0x470] sm:$0xff]  ;;  %v4793_v7 = vpack.c.bf16 %v1753_v42, %v1744_v20  ;;  %v1799_v20 = vld [vmem:[%s7421_s3 + $0x548] sm:$0xff]  ;;  %v4705_v42 = vpack.c.bf16 %v1787_v33, %v1778_v22  ;;  %v1833_v22 = vld [vmem:[%s7421_s3 + $0x658] sm:$0xff] }
 0x363   : > { %v1842_v33 = vld [vmem:[%s7421_s3 + $0x6a0] sm:$0xff] }
 0x364   : > { %4690 = vmatpush1.bf16.msra.mxu0 %v4689_v5  ;;  %v1762_v5 = vld [vmem:[%s7421_s3 + $0x420] sm:$0xff]  ;;  %v4715_v25 = vpack.c.bf16 %v1842_v33, %v1833_v22 }
 0x365   : > { %4786 = vmatpush1.bf16.msra.mxu1 %v4785_v11  ;;  %4692 = vmatprep.subr.bf16.mxu0 %v4691_v35  ;;  %v4795_v11 = vpack.c.bf16 %v1772_v24, %v1763_v13  ;;  %v1771_v35 = vld [vmem:[%s7421_s3 + $0x468] sm:$0xff]  ;;  %v1796_v13 = vld [vmem:[%s7421_s3 + $0x530] sm:$0xff]  ;;  %v1805_v24 = vld [vmem:[%s7421_s3 + $0x578] sm:$0xff] }
 0x366   : > { %4788 = vmatprep.subr.bf16.mxu1 %v4787_v44  ;;  %v1790_v44 = vld [vmem:[%s7421_s3 + $0x500] sm:$0xff]  ;;  %v4797_v39 = vpack.c.bf16 %v1771_v35, %v1762_v5  ;;  %v1817_v5 = vld [vmem:[%s7421_s3 + $0x5d8] sm:$0xff]  ;;  %v4709_v35 = vpack.c.bf16 %v1805_v24, %v1796_v13  ;;  %v1851_v13 = vld [vmem:[%s7421_s3 + $0x6e8] sm:$0xff] }
 0x367   : > { %v1860_v24 = vld [vmem:[%s7421_s3 + $0x730] sm:$0xff] }
 0x368   : > { %4694 = vmatpush1.bf16.msra.mxu0 %v4693_v38  ;;  %v1780_v38 = vld [vmem:[%s7421_s3 + $0x4b0] sm:$0xff]  ;;  %v4719_v12 = vpack.c.bf16 %v1860_v24, %v1851_v13 }
 0x369   : > { %4790 = vmatpush1.bf16.msra.mxu1 %v4789_v40  ;;  %4696 = vmatprep.subr.bf16.mxu0 %v4695_v29  ;;  %v4799_v40 = vpack.c.bf16 %v1790_v44, %v1781_v55  ;;  %v1789_v29 = vld [vmem:[%s7421_s3 + $0x4f8] sm:$0xff]  ;;  %v1814_v55 = vld [vmem:[%s7421_s3 + $0x5c0] sm:$0xff]  ;;  %v1823_v44 = vld [vmem:[%s7421_s3 + $0x608] sm:$0xff] }
 0x36a   : > { %4792 = vmatprep.subr.bf16.mxu1 %v4791_v49  ;;  %v1808_v49 = vld [vmem:[%s7421_s3 + $0x590] sm:$0xff]  ;;  %v4801_v51 = vpack.c.bf16 %v1789_v29, %v1780_v38  ;;  %v1835_v38 = vld [vmem:[%s7421_s3 + $0x668] sm:$0xff]  ;;  %v4713_v29 = vpack.c.bf16 %v1823_v44, %v1814_v55  ;;  %v1869_v55 = vld [vmem:[%s7421_s3 + $0x778] sm:$0xff] }
 0x36b   : > { %v1878_v44 = vld [vmem:[%s7421_s3 + $0x7c0] sm:$0xff] }
 0x36c   : > { %4698 = vmatpush1.bf16.msra.mxu0 %v4697_v31  ;;  %v1798_v31 = vld [vmem:[%s7421_s3 + $0x540] sm:$0xff]  ;;  %v4723_v33 = vpack.c.bf16 %v1878_v44, %v1869_v55 }
 0x36d   : > { %4794 = vmatpush1.bf16.msra.mxu1 %v4793_v7  ;;  %4700 = vmatprep.subr.bf16.mxu0 %v4699_v8  ;;  %v4803_v7 = vpack.c.bf16 %v1808_v49, %v1799_v20  ;;  %v1807_v8 = vld [vmem:[%s7421_s3 + $0x588] sm:$0xff]  ;;  %v1832_v20 = vld [vmem:[%s7421_s3 + $0x650] sm:$0xff]  ;;  %v1841_v49 = vld [vmem:[%s7421_s3 + $0x698] sm:$0xff] }
 0x36e   : > { %4796 = vmatprep.subr.bf16.mxu1 %v4795_v11  ;;  %v1826_v11 = vld [vmem:[%s7421_s3 + $0x620] sm:$0xff]  ;;  %v4805_v43 = vpack.c.bf16 %v1807_v8, %v1798_v31  ;;  %v1853_v31 = vld [vmem:[%s7421_s3 + $0x6f8] sm:$0xff]  ;;  %v4717_v8 = vpack.c.bf16 %v1841_v49, %v1832_v20  ;;  %v1887_v20 = vld [vmem:[%s7421_s3 + $0x808] sm:$0xff] }
 0x36f   : > { %v1896_v49 = vld [vmem:[%s7421_s3 + $0x850] sm:$0xff] }
 0x370   : > { %4702 = vmatpush1.bf16.msra.mxu0 %v4701_v6  ;;  %v1816_v6 = vld [vmem:[%s7421_s3 + $0x5d0] sm:$0xff]  ;;  %v4727_v24 = vpack.c.bf16 %v1896_v49, %v1887_v20 }
 0x371   : > { %4798 = vmatpush1.bf16.msra.mxu1 %v4797_v39  ;;  %4704 = vmatprep.subr.bf16.mxu0 %v4703_v16  ;;  %v4807_v39 = vpack.c.bf16 %v1826_v11, %v1817_v5  ;;  %v1825_v16 = vld [vmem:[%s7421_s3 + $0x618] sm:$0xff]  ;;  %v1850_v5 = vld [vmem:[%s7421_s3 + $0x6e0] sm:$0xff]  ;;  %v1859_v11 = vld [vmem:[%s7421_s3 + $0x728] sm:$0xff] }
 0x372   : > { %4800 = vmatprep.subr.bf16.mxu1 %v4799_v40  ;;  %v1844_v40 = vld [vmem:[%s7421_s3 + $0x6b0] sm:$0xff]  ;;  %v4809_v48 = vpack.c.bf16 %v1825_v16, %v1816_v6  ;;  %v1871_v6 = vld [vmem:[%s7421_s3 + $0x788] sm:$0xff]  ;;  %v4721_v16 = vpack.c.bf16 %v1859_v11, %v1850_v5  ;;  %v1905_v5 = vld [vmem:[%s7421_s3 + $0x898] sm:$0xff] }
 0x373   : > { %v1914_v11 = vld [vmem:[%s7421_s3 + $0x8e0] sm:$0xff] }
 0x374   : > { %4706 = vmatpush1.bf16.msra.mxu0 %v4705_v42  ;;  %v1834_v42 = vld [vmem:[%s7421_s3 + $0x660] sm:$0xff]  ;;  %v4731_v44 = vpack.c.bf16 %v1914_v11, %v1905_v5 }
 0x375   : > { %4802 = vmatpush1.bf16.msra.mxu1 %v4801_v51  ;;  %4708 = vmatprep.subr.bf16.mxu0 %v4707_v53  ;;  %v4811_v51 = vpack.c.bf16 %v1844_v40, %v1835_v38  ;;  %v1843_v53 = vld [vmem:[%s7421_s3 + $0x6a8] sm:$0xff]  ;;  %v1868_v38 = vld [vmem:[%s7421_s3 + $0x770] sm:$0xff]  ;;  %v1877_v40 = vld [vmem:[%s7421_s3 + $0x7b8] sm:$0xff] }
 0x376   : > { %4804 = vmatprep.subr.bf16.mxu1 %v4803_v7  ;;  %v1862_v7 = vld [vmem:[%s7421_s3 + $0x740] sm:$0xff]  ;;  %v4813_v17 = vpack.c.bf16 %v1843_v53, %v1834_v42  ;;  %v1889_v42 = vld [vmem:[%s7421_s3 + $0x818] sm:$0xff]  ;;  %v4725_v53 = vpack.c.bf16 %v1877_v40, %v1868_v38  ;;  %v1923_v38 = vld [vmem:[%s7421_s3 + $0x928] sm:$0xff] }
 0x377   : > { %v1932_v40 = vld [vmem:[%s7421_s3 + $0x970] sm:$0xff] }
 0x378   : > { %4710 = vmatpush1.bf16.msra.mxu0 %v4709_v35  ;;  %v1852_v35 = vld [vmem:[%s7421_s3 + $0x6f0] sm:$0xff]  ;;  %v4735_v49 = vpack.c.bf16 %v1932_v40, %v1923_v38 }
 0x379   : > { %4806 = vmatpush1.bf16.msra.mxu1 %v4805_v43  ;;  %4712 = vmatprep.subr.bf16.mxu0 %v4711_v15  ;;  %v4815_v43 = vpack.c.bf16 %v1862_v7, %v1853_v31  ;;  %v1861_v15 = vld [vmem:[%s7421_s3 + $0x738] sm:$0xff]  ;;  %v1886_v31 = vld [vmem:[%s7421_s3 + $0x800] sm:$0xff]  ;;  %v1895_v7 = vld [vmem:[%s7421_s3 + $0x848] sm:$0xff] }
 0x37a   : > { %4808 = vmatprep.subr.bf16.mxu1 %v4807_v39  ;;  %v1880_v39 = vld [vmem:[%s7421_s3 + $0x7d0] sm:$0xff]  ;;  %v4817_v22 = vpack.c.bf16 %v1861_v15, %v1852_v35  ;;  %v1907_v35 = vld [vmem:[%s7421_s3 + $0x8a8] sm:$0xff]  ;;  %v4729_v15 = vpack.c.bf16 %v1895_v7, %v1886_v31  ;;  %v1941_v31 = vld [vmem:[%s7421_s3 + $0x9b8] sm:$0xff] }
 0x37b   : > { %v1950_v7 = vld [vmem:[%s7421_s3 + $0xa00] sm:$0xff] }
 0x37c   : > { %4714 = vmatpush1.bf16.msra.mxu0 %v4713_v29  ;;  %v1870_v29 = vld [vmem:[%s7421_s3 + $0x780] sm:$0xff]  ;;  %v4739_v11 = vpack.c.bf16 %v1950_v7, %v1941_v31 }
 0x37d   : > { %4810 = vmatpush1.bf16.msra.mxu1 %v4809_v48  ;;  %4716 = vmatprep.subr.bf16.mxu0 %v4715_v25  ;;  %v4819_v48 = vpack.c.bf16 %v1880_v39, %v1871_v6  ;;  %v1879_v25 = vld [vmem:[%s7421_s3 + $0x7c8] sm:$0xff]  ;;  %v1904_v6 = vld [vmem:[%s7421_s3 + $0x890] sm:$0xff]  ;;  %v1913_v39 = vld [vmem:[%s7421_s3 + $0x8d8] sm:$0xff] }
 0x37e   : > { %4812 = vmatprep.subr.bf16.mxu1 %v4811_v51  ;;  %v1898_v51 = vld [vmem:[%s7421_s3 + $0x860] sm:$0xff]  ;;  %v4821_v13 = vpack.c.bf16 %v1879_v25, %v1870_v29  ;;  %v1925_v29 = vld [vmem:[%s7421_s3 + $0x938] sm:$0xff]  ;;  %v4733_v25 = vpack.c.bf16 %v1913_v39, %v1904_v6  ;;  %v1959_v6 = vld [vmem:[%s7421_s3 + $0xa48] sm:$0xff] }
 0x37f   : > { %v1968_v39 = vld [vmem:[%s7421_s3 + $0xa90] sm:$0xff] }
 0x380   : > { %4718 = vmatpush1.bf16.msra.mxu0 %v4717_v8  ;;  %v1888_v8 = vld [vmem:[%s7421_s3 + $0x810] sm:$0xff]  ;;  %v4743_v40 = vpack.c.bf16 %v1968_v39, %v1959_v6 }
 0x381   : > { %4814 = vmatpush1.bf16.msra.mxu1 %v4813_v17  ;;  %4720 = vmatprep.subr.bf16.mxu0 %v4719_v12  ;;  %v4823_v17 = vpack.c.bf16 %v1898_v51, %v1889_v42  ;;  %v1897_v12 = vld [vmem:[%s7421_s3 + $0x858] sm:$0xff]  ;;  %v1922_v51 = vld [vmem:[%s7421_s3 + $0x920] sm:$0xff] }
 0x382   : > { %4816 = vmatprep.subr.bf16.mxu1 %v4815_v43  ;;  %v1916_v43 = vld [vmem:[%s7421_s3 + $0x8f0] sm:$0xff]  ;;  %v4825_v55 = vpack.c.bf16 %v1897_v12, %v1888_v8  ;;  %v1943_v8 = vld [vmem:[%s7421_s3 + $0x9c8] sm:$0xff] }
 0x384   : > { %4722 = vmatpush1.bf16.msra.mxu0 %v4721_v16  ;;  %v1906_v16 = vld [vmem:[%s7421_s3 + $0x8a0] sm:$0xff] }
 0x385   : > { %4818 = vmatpush1.bf16.msra.mxu1 %v4817_v22  ;;  %4724 = vmatprep.subr.bf16.mxu0 %v4723_v33  ;;  %v4827_v22 = vpack.c.bf16 %v1916_v43, %v1907_v35  ;;  %v1915_v33 = vld [vmem:[%s7421_s3 + $0x8e8] sm:$0xff]  ;;  %v1940_v35 = vld [vmem:[%s7421_s3 + $0x9b0] sm:$0xff]  ;;  %v1949_v43 = vld [vmem:[%s7421_s3 + $0x9f8] sm:$0xff] }
 0x386   : > { %4820 = vmatprep.subr.bf16.mxu1 %v4819_v48  ;;  %v1934_v48 = vld [vmem:[%s7421_s3 + $0x980] sm:$0xff]  ;;  %v4829_v20 = vpack.c.bf16 %v1915_v33, %v1906_v16  ;;  %v1961_v16 = vld [vmem:[%s7421_s3 + $0xa58] sm:$0xff]  ;;  %v4741_v33 = vpack.c.bf16 %v1949_v43, %v1940_v35  ;;  %v1995_v35 = vld [vmem:[%s7421_s3 + $0xb68] sm:$0xff] }
 0x387   : > { %v4831_v42 = vpack.c.bf16 %v1934_v48, %v1925_v29  ;;  %v1958_v29 = vld [vmem:[%s7421_s3 + $0xa40] sm:$0xff]  ;;  %v1967_v48 = vld [vmem:[%s7421_s3 + $0xa88] sm:$0xff]  ;;  %v2004_v43 = vld [vmem:[%s7421_s3 + $0xbb0] sm:$0xff] }
 0x388   : > { %4726 = vmatpush1.bf16.msra.mxu0 %v4725_v53  ;;  %v1931_v53 = vld [vmem:[%s7421_s3 + $0x968] sm:$0xff]  ;;  %v4751_v39 = vpack.c.bf16 %v2004_v43, %v1995_v35 }
 0x389   : > { %4822 = vmatpush1.bf16.msra.mxu1 %v4821_v13  ;;  %4728 = vmatprep.subr.bf16.mxu0 %v4727_v24  ;;  %v1924_v13 = vld [vmem:[%s7421_s3 + $0x930] sm:$0xff]  ;;  %v1933_v24 = vld [vmem:[%s7421_s3 + $0x978] sm:$0xff]  ;;  %v4737_v12 = vpack.c.bf16 %v1931_v53, %v1922_v51  ;;  %v1986_v51 = vld [vmem:[%s7421_s3 + $0xb20] sm:$0xff] }
 0x38a   : > { %4824 = vmatprep.subr.bf16.mxu1 %v4823_v17  ;;  %v1952_v17 = vld [vmem:[%s7421_s3 + $0xa10] sm:$0xff]  ;;  %v4833_v5 = vpack.c.bf16 %v1933_v24, %v1924_v13  ;;  %v1979_v53 = vld [vmem:[%s7421_s3 + $0xae8] sm:$0xff]  ;;  %v4745_v24 = vpack.c.bf16 %v1967_v48, %v1958_v29  ;;  %v2013_v29 = vld [vmem:[%s7421_s3 + $0xbf8] sm:$0xff] }
 0x38b   : > { %v1988_v13 = vld [vmem:[%s7421_s3 + $0xb30] sm:$0xff]  ;;  %v2022_v48 = vld [vmem:[%s7421_s3 + $0xc40] sm:$0xff] }
 0x38c   : > { %4730 = vmatpush1.bf16.msra.mxu0 %v4729_v15  ;;  %v1942_v15 = vld [vmem:[%s7421_s3 + $0x9c0] sm:$0xff] }
 0x38d   : > { %4826 = vmatpush1.bf16.msra.mxu1 %v4825_v55  ;;  %4732 = vmatprep.subr.bf16.mxu0 %v4731_v44  ;;  %v4835_v55 = vpack.c.bf16 %v1952_v17, %v1943_v8  ;;  %v1951_v44 = vld [vmem:[%s7421_s3 + $0xa08] sm:$0xff]  ;;  %v1976_v8 = vld [vmem:[%s7421_s3 + $0xad0] sm:$0xff]  ;;  %v1985_v17 = vld [vmem:[%s7421_s3 + $0xb18] sm:$0xff] }
 0x38e   : > { %4828 = vmatprep.subr.bf16.mxu1 %v4827_v22  ;;  %v1970_v22 = vld [vmem:[%s7421_s3 + $0xaa0] sm:$0xff]  ;;  %v4837_v38 = vpack.c.bf16 %v1951_v44, %v1942_v15  ;;  %v1997_v15 = vld [vmem:[%s7421_s3 + $0xb78] sm:$0xff]  ;;  %v4749_v44 = vpack.c.bf16 %v1985_v17, %v1976_v8  ;;  %v2031_v8 = vld [vmem:[%s7421_s3 + $0xc88] sm:$0xff] }
 0x38f   : > { %v2040_v17 = vld [vmem:[%s7421_s3 + $0xcd0] sm:$0xff] }
 0x390   : > { %4734 = vmatpush1.bf16.msra.mxu0 %v4733_v25  ;;  %v1960_v25 = vld [vmem:[%s7421_s3 + $0xa50] sm:$0xff]  ;;  %v4759_v43 = vpack.c.bf16 %v2040_v17, %v2031_v8 }
 0x391   : > { %4830 = vmatpush1.bf16.msra.mxu1 %v4829_v20  ;;  %4736 = vmatprep.subr.bf16.mxu0 %v4735_v49  ;;  %v4839_v20 = vpack.c.bf16 %v1970_v22, %v1961_v16  ;;  %v1969_v49 = vld [vmem:[%s7421_s3 + $0xa98] sm:$0xff]  ;;  %v1994_v16 = vld [vmem:[%s7421_s3 + $0xb60] sm:$0xff]  ;;  %v2003_v22 = vld [vmem:[%s7421_s3 + $0xba8] sm:$0xff] }
 0x392   : > { %4832 = vmatprep.subr.bf16.mxu1 %v4831_v42  ;;  %v1977_v42 = vld [vmem:[%s7421_s3 + $0xad8] sm:$0xff]  ;;  %v4841_v31 = vpack.c.bf16 %v1969_v49, %v1960_v25  ;;  %v2015_v25 = vld [vmem:[%s7421_s3 + $0xc08] sm:$0xff]  ;;  %v4753_v49 = vpack.c.bf16 %v2003_v22, %v1994_v16  ;;  %v2058_v22 = vld [vmem:[%s7421_s3 + $0xd60] sm:$0xff] }
 0x393   : > { %2435 = vmatmul.mubr.f32.vlgmr.msra.gmra.mrb[12].mxu0 %v6321_v34  ;;  %v4747_v7 = vpack.c.bf16 %v1986_v51, %v1977_v42  ;;  %v4755_v51 = vpack.c.bf16 %v2022_v48, %v2013_v29  ;;  %v2049_v16 = vld [vmem:[%s7421_s3 + $0xd18] sm:$0xff] }
 0x394   : > { %2589 = vmatmul.mubr.f32.vlgmr.msra.gmra.mrb[10].mxu1 %v6321_v34  ;;  %2440 = vmatprep.mubr.f32.mxu0 %v6345_v1  ;;  %v4763_v48 = vpack.c.bf16 %v2058_v22, %v2049_v16 }
 0x395   : > { %4738 = vmatpush1.bf16.msra.mxu0 %v4737_v12  ;;  %2594 = vmatprep.mubr.f32.mxu1 %v6345_v1  ;;  %v1978_v12 = vld [vmem:[%s7421_s3 + $0xae0] sm:$0xff] }
 0x396   : > { %4834 = vmatpush1.bf16.msra.mxu1 %v4833_v5  ;;  %4740 = vmatprep.subr.bf16.mxu0 %v4739_v11  ;;  %v4843_v5 = vpack.c.bf16 %v1988_v13, %v1979_v53  ;;  %v1987_v11 = vld [vmem:[%s7421_s3 + $0xb28] sm:$0xff]  ;;  %v2012_v53 = vld [vmem:[%s7421_s3 + $0xbf0] sm:$0xff]  ;;  %v2021_v13 = vld [vmem:[%s7421_s3 + $0xc38] sm:$0xff] }
 0x397   : > { %2441 = vmatmul.mubr.f32.gmra.mrb[14].mxu0 %v6355_v21  ;;  %4836 = vmatprep.subr.bf16.mxu1 %v4835_v55  ;;  %v2006_v55 = vld [vmem:[%s7421_s3 + $0xbc0] sm:$0xff]  ;;  %v4845_v6 = vpack.c.bf16 %v1987_v11, %v1978_v12  ;;  %v2033_v12 = vld [vmem:[%s7421_s3 + $0xc98] sm:$0xff]  ;;  %v4757_v11 = vpack.c.bf16 %v2021_v13, %v2012_v53  ;;  %v1791_v13 = vld [vmem:[%s7421_s3 + $0x508] sm:$0xff] }
 0x398   : > { %2595 = vmatmul.mubr.f32.gmra.mrb[12].mxu1 %v6355_v21  ;;  %2511 = vmatprep.mubr.f32.mxu0 %v7434_v3  ;;  %v1782_v53 = vld [vmem:[%s7421_s3 + $0x4c0] sm:$0xff] }
 0x399   : > { %4742 = vmatpush1.bf16.msra.mxu0 %v4741_v33  ;;  %2665 = vmatprep.mubr.f32.mxu1 %v7434_v3  ;;  %v1996_v33 = vld [vmem:[%s7421_s3 + $0xb70] sm:$0xff]  ;;  %v4863_v17 = vpack.c.bf16 %v1791_v13, %v1782_v53 }
 0x39a   : > { %4838 = vmatpush1.bf16.msra.mxu1 %v4837_v38  ;;  %4744 = vmatprep.subr.bf16.mxu0 %v4743_v40  ;;  %v4847_v38 = vpack.c.bf16 %v2006_v55, %v1997_v15  ;;  %v2005_v40 = vld [vmem:[%s7421_s3 + $0xbb8] sm:$0xff]  ;;  %v2030_v15 = vld [vmem:[%s7421_s3 + $0xc80] sm:$0xff]  ;;  %v2039_v55 = vld [vmem:[%s7421_s3 + $0xcc8] sm:$0xff] }
 0x39b   : > { %4840 = vmatprep.subr.bf16.mxu1 %v4839_v20  ;;  %v2024_v20 = vld [vmem:[%s7421_s3 + $0xc50] sm:$0xff]  ;;  %v4849_v42 = vpack.c.bf16 %v2005_v40, %v1996_v33  ;;  %v2051_v33 = vld [vmem:[%s7421_s3 + $0xd28] sm:$0xff]  ;;  %v4761_v40 = vpack.c.bf16 %v2039_v55, %v2030_v15 }
 0x39c   : > { %v1944_v55 = vld [vmem:[%s7421_s3 + $0x9d0] sm:$0xff] }
 0x39d   : > { %4746 = vmatpush1.bf16.msra.mxu0 %v4745_v24  ;;  %v2014_v24 = vld [vmem:[%s7421_s3 + $0xc00] sm:$0xff]  ;;  %v1980_v13 = vld [vmem:[%s7421_s3 + $0xaf0] sm:$0xff] }
 0x39e   : > { %4842 = vmatpush1.bf16.msra.mxu1 %v4841_v31  ;;  %4748 = vmatprep.subr.bf16.mxu0 %v4747_v7  ;;  %v4851_v31 = vpack.c.bf16 %v2024_v20, %v2015_v25  ;;  %v2023_v7 = vld [vmem:[%s7421_s3 + $0xc48] sm:$0xff]  ;;  %v2048_v25 = vld [vmem:[%s7421_s3 + $0xd10] sm:$0xff]  ;;  %v2057_v20 = vld [vmem:[%s7421_s3 + $0xd58] sm:$0xff] }
 0x39f   : > { %4844 = vmatprep.subr.bf16.mxu1 %v4843_v5  ;;  %v2042_v5 = vld [vmem:[%s7421_s3 + $0xce0] sm:$0xff]  ;;  %v4853_v35 = vpack.c.bf16 %v2023_v7, %v2014_v24  ;;  %v4765_v7 = vpack.c.bf16 %v2057_v20, %v2048_v25  ;;  %v1683_v20 = vld [vmem:[%s7421_s3 + $0x1a8] sm:$0xff] }
 0x3a0   : > { %v1926_v24 = vld [vmem:[%s7421_s3 + $0x940] sm:$0xff] }
 0x3a1   : > { %4750 = vmatpush1.bf16.msra.mxu0 %v4749_v44  ;;  %v2032_v44 = vld [vmem:[%s7421_s3 + $0xc90] sm:$0xff]  ;;  %v1674_v25 = vld [vmem:[%s7421_s3 + $0x160] sm:$0xff] }
 0x3a2   : > { %4846 = vmatpush1.bf16.msra.mxu1 %v4845_v6  ;;  %4752 = vmatprep.subr.bf16.mxu0 %v4751_v39  ;;  %v4855_v6 = vpack.c.bf16 %v2042_v5, %v2033_v12  ;;  %v2041_v39 = vld [vmem:[%s7421_s3 + $0xcd8] sm:$0xff]  ;;  %v1638_v12 = vld [vmem:[%s7421_s3 + $0x40] sm:$0xff]  ;;  %v1647_v5 = vld [vmem:[%s7421_s3 + $0x88] sm:$0xff] }
 0x3a3   : > { %4848 = vmatprep.subr.bf16.mxu1 %v4847_v38  ;;  %v2060_v38 = vld [vmem:[%s7421_s3 + $0xd70] sm:$0xff]  ;;  %v4857_v29 = vpack.c.bf16 %v2041_v39, %v2032_v44  ;;  %v4865_v15 = vpack.c.bf16 %v1647_v5, %v1638_v12  ;;  %v1953_v44 = vld [vmem:[%s7421_s3 + $0xa18] sm:$0xff]  ;;  %v1854_v5 = vld [vmem:[%s7421_s3 + $0x700] sm:$0xff] }
 0x3a4   : > { %v1665_v39 = vld [vmem:[%s7421_s3 + $0x118] sm:$0xff]  ;;  %v4899_v22 = vpack.c.bf16 %v1953_v44, %v1944_v55  ;;  %v1719_v55 = vld [vmem:[%s7421_s3 + $0x2c8] sm:$0xff] }
 0x3a5   : > { %4754 = vmatpush1.bf16.msra.mxu0 %v4753_v49  ;;  %v2050_v49 = vld [vmem:[%s7421_s3 + $0xd20] sm:$0xff] }
 0x3a6   : > { %4850 = vmatpush1.bf16.msra.mxu1 %v4849_v42  ;;  %4756 = vmatprep.subr.bf16.mxu0 %v4755_v51  ;;  %v4859_v42 = vpack.c.bf16 %v2060_v38, %v2051_v33  ;;  %v2059_v51 = vld [vmem:[%s7421_s3 + $0xd68] sm:$0xff]  ;;  %v1818_v33 = vld [vmem:[%s7421_s3 + $0x5e0] sm:$0xff] }
 0x3a7   : > { %4852 = vmatprep.subr.bf16.mxu1 %v4851_v31  ;;  %v1935_v31 = vld [vmem:[%s7421_s3 + $0x988] sm:$0xff]  ;;  %v4861_v8 = vpack.c.bf16 %v2059_v51, %v2050_v49  ;;  %v1845_v51 = vld [vmem:[%s7421_s3 + $0x6b8] sm:$0xff] }
 0x3a8   : > { %v1827_v38 = vld [vmem:[%s7421_s3 + $0x628] sm:$0xff] }
 0x3a9   : > { %4758 = vmatpush1.bf16.msra.mxu0 %v4757_v11  ;;  %v4895_v11 = vpack.c.bf16 %v1935_v31, %v1926_v24  ;;  %v4871_v49 = vpack.c.bf16 %v1827_v38, %v1818_v33  ;;  %v1989_v24 = vld [vmem:[%s7421_s3 + $0xb38] sm:$0xff]  ;;  %v4873_v31 = vpack.c.bf16 %v1683_v20, %v1674_v25  ;;  %v1890_v25 = vld [vmem:[%s7421_s3 + $0x820] sm:$0xff]  ;;  %v1899_v20 = vld [vmem:[%s7421_s3 + $0x868] sm:$0xff] }
 0x3aa   : > { %4854 = vmatpush1.bf16.msra.mxu1 %v4853_v35  ;;  %4760 = vmatprep.subr.bf16.mxu0 %v4759_v43  ;;  %v1800_v35 = vld [vmem:[%s7421_s3 + $0x550] sm:$0xff]  ;;  %v1809_v43 = vld [vmem:[%s7421_s3 + $0x598] sm:$0xff]  ;;  %v4907_v12 = vpack.c.bf16 %v1989_v24, %v1980_v13  ;;  %v1746_v13 = vld [vmem:[%s7421_s3 + $0x3a0] sm:$0xff] }
 0x3ab   : > { %4856 = vmatprep.subr.bf16.mxu1 %v4855_v6  ;;  %v1656_v6 = vld [vmem:[%s7421_s3 + $0xd0] sm:$0xff]  ;;  %v4867_v16 = vpack.c.bf16 %v1809_v43, %v1800_v35  ;;  %v2007_v35 = vld [vmem:[%s7421_s3 + $0xbc8] sm:$0xff] }
 0x3ac   : > { %v1755_v24 = vld [vmem:[%s7421_s3 + $0x3e8] sm:$0xff] }
 0x3ad   : > { %4762 = vmatpush1.bf16.msra.mxu0 %v4761_v40  ;;  %v4869_v40 = vpack.c.bf16 %v1665_v39, %v1656_v6  ;;  %v1872_v6 = vld [vmem:[%s7421_s3 + $0x790] sm:$0xff]  ;;  %v1881_v39 = vld [vmem:[%s7421_s3 + $0x7d8] sm:$0xff] }
 0x3ae   : > { %4858 = vmatpush1.bf16.msra.mxu1 %v4857_v29  ;;  %4764 = vmatprep.subr.bf16.mxu0 %v4763_v48  ;;  %v1962_v29 = vld [vmem:[%s7421_s3 + $0xa60] sm:$0xff]  ;;  %v1971_v48 = vld [vmem:[%s7421_s3 + $0xaa8] sm:$0xff]  ;;  %v4883_v38 = vpack.c.bf16 %v1881_v39, %v1872_v6 }
 0x3af   : > { %4860 = vmatprep.subr.bf16.mxu1 %v4859_v42  ;;  %v1836_v42 = vld [vmem:[%s7421_s3 + $0x670] sm:$0xff]  ;;  %v4903_v53 = vpack.c.bf16 %v1971_v48, %v1962_v29  ;;  %v1737_v29 = vld [vmem:[%s7421_s3 + $0x358] sm:$0xff] }
 0x3b1   : > { %4766 = vmatpush1.bf16.msra.mxu0 %v4765_v7  ;;  %v4875_v7 = vpack.c.bf16 %v1845_v51, %v1836_v42  ;;  %v2043_v42 = vld [vmem:[%s7421_s3 + $0xce8] sm:$0xff] }
 0x3b2   : > { %4862 = vmatpush1.bf16.msra.mxu1 %v4861_v8  ;;  %4864 = vmatprep.subr.bf16.mxu0 %v4863_v17  ;;  %v1692_v8 = vld [vmem:[%s7421_s3 + $0x1f0] sm:$0xff]  ;;  %v1701_v17 = vld [vmem:[%s7421_s3 + $0x238] sm:$0xff] }
 0x3b3   : > { %4896 = vmatprep.subr.bf16.mxu1 %v4895_v11 }
 0x3b4   : > { %2512 = vmatmul.mubr.f32.vlgmr.msra.gmra.mrb[12].mxu0 %v6531_v30 }
 0x3b5   : > { %2666 = vmatmul.mubr.f32.vlgmr.msra.gmra.mrb[10].mxu1 %v6531_v30  ;;  %4866 = vmatpush3.bf16.msra.mxu0 %v4865_v15  ;;  %v1710_v15 = vld [vmem:[%s7421_s3 + $0x280] sm:$0xff] }
 0x3b6   : > { %4898 = vmatpush3.bf16.msra.mxu1 %v4895_v11  ;;  %2517 = vmatprep.mubr.f32.mxu0 %v7434_v3  ;;  %v1998_v11 = vld [vmem:[%s7421_s3 + $0xb80] sm:$0xff]  ;;  %v4881_v33 = vpack.c.bf16 %v1719_v55, %v1710_v15 }
 0x3b7   : > { %2671 = vmatprep.mubr.f32.mxu1 %v7434_v3  ;;  %4868 = vmatprep.subr.bf16.mxu0 %v4867_v16  ;;  %v4911_v44 = vpack.c.bf16 %v2007_v35, %v1998_v11  ;;  %v2016_v16 = vld [vmem:[%s7421_s3 + $0xc10] sm:$0xff]  ;;  %v1773_v35 = vld [vmem:[%s7421_s3 + $0x478] sm:$0xff]  ;;  %v2828_v15 = vld [vmem:[%s7422_s4] sm:$0xff] }
 0x3b8   : > { %2518 = vmatmul.mubr.f32.gmra.mrb[14].mxu0 %v6561_v58  ;;  %4900 = vmatprep.subr.bf16.mxu1 %v4899_v22  ;;  %v1764_v11 = vld [vmem:[%s7421_s3 + $0x430] sm:$0xff] }
 0x3b9   : > { %2672 = vmatmul.mubr.f32.gmra.mrb[12].mxu1 %v6561_v58  ;;  %4870 = vmatpush3.bf16.msra.mxu0 %v4869_v40  ;;  %v1728_v40 = vld [vmem:[%s7421_s3 + $0x310] sm:$0xff] }
 0x3ba   : > { %2742 = vmatprep.mubr.f32.mxu0 %v6313_v26  ;;  %4902 = vmatpush3.bf16.msra.mxu1 %v4899_v22  ;;  %v1863_v26 = vld [vmem:[%s7421_s3 + $0x748] sm:$0xff]  ;;  %v2025_v22 = vld [vmem:[%s7421_s3 + $0xc58] sm:$0xff]  ;;  %v4885_v51 = vpack.c.bf16 %v1737_v29, %v1728_v40  ;;  %v3837_v40 = vld [vmem:[%s7422_s4 + $0x10] sm:$0xff] }
 0x3bb   : > { %4222 = vmatprep.mubr.f32.mxu1 %v6531_v30  ;;  %4872 = vmatprep.subr.bf16.mxu0 %v4871_v49  ;;  %v4877_v30 = vpack.c.bf16 %v1701_v17, %v1692_v8  ;;  %v4879_v43 = vpack.c.bf16 %v1863_v26, %v1854_v5  ;;  %v4915_v48 = vpack.c.bf16 %v2025_v22, %v2016_v16  ;;  %v2034_v49 = vld [vmem:[%s7421_s3 + $0xca0] sm:$0xff]  ;;  %v1917_v8 = vld [vmem:[%s7421_s3 + $0x8f8] sm:$0xff]  ;;  %v2052_v17 = vld [vmem:[%s7421_s3 + $0xd30] sm:$0xff] }
 0x3bc   : > { %4904 = vmatprep.subr.bf16.mxu1 %v4903_v53  ;;  %v4889_v5 = vpack.c.bf16 %v1755_v24, %v1746_v13 }
 0x3bd   : > { %4874 = vmatpush3.bf16.msra.mxu0 %v4873_v31  ;;  %v4919_v31 = vpack.c.bf16 %v2043_v42, %v2034_v49 }
 0x3be   : > { %4906 = vmatpush3.bf16.msra.mxu1 %v4903_v53  ;;  %4876 = vmatprep.subr.bf16.mxu0 %v4875_v7  ;;  %v4887_v53 = vpack.c.bf16 %v1899_v20, %v1890_v25  ;;  %v1908_v7 = vld [vmem:[%s7421_s3 + $0x8b0] sm:$0xff] }
 0x3bf   : > { %4908 = vmatprep.subr.bf16.mxu1 %v4907_v12  ;;  %v4891_v26 = vpack.c.bf16 %v1917_v8, %v1908_v7 }
 0x3c1   : > { %4878 = vmatpush3.bf16.msra.mxu0 %v4877_v30 }
 0x3c2   : > { %4910 = vmatpush3.bf16.msra.mxu1 %v4907_v12  ;;  %4880 = vmatprep.subr.bf16.mxu0 %v4879_v43  ;;  %v2061_v12 = vld [vmem:[%s7421_s3 + $0xd78] sm:$0xff]  ;;  %v4893_v43 = vpack.c.bf16 %v1773_v35, %v1764_v11 }
 0x3c3   : > { %4912 = vmatprep.subr.bf16.mxu1 %v4911_v44  ;;  %v4923_v30 = vpack.c.bf16 %v2061_v12, %v2052_v17 }
 0x3c5   : > { %4882 = vmatpush3.bf16.msra.mxu0 %v4881_v33 }
 0x3c6   : > { %4914 = vmatpush3.bf16.msra.mxu1 %v4911_v44  ;;  %4884 = vmatprep.subr.bf16.mxu0 %v4883_v38 }
 0x3c7   : > { %4916 = vmatprep.subr.bf16.mxu1 %v4915_v48 }
 0x3c9   : > { %4886 = vmatpush3.bf16.msra.mxu0 %v4885_v51 }
 0x3ca   : > { %4918 = vmatpush3.bf16.msra.mxu1 %v4915_v48  ;;  %4888 = vmatprep.subr.bf16.mxu0 %v4887_v53 }
 0x3cb   : > { %4920 = vmatprep.subr.bf16.mxu1 %v4919_v31 }
 0x3cd   : > { %4890 = vmatpush3.bf16.msra.mxu0 %v4889_v5 }
 0x3ce   : > { %4922 = vmatpush3.bf16.msra.mxu1 %v4919_v31  ;;  %4892 = vmatprep.subr.bf16.mxu0 %v4891_v26  ;;  %v3838_v31 = vld [vmem:[%s7422_s4 + $0x18] sm:$0xff] }
 0x3cf   : > { %4924 = vmatprep.subr.bf16.mxu1 %v4923_v30 }
 0x3d1   : > { %4894 = vmatpush3.bf16.msra.mxu0 %v4893_v43 }
 0x3d2   : > { %4926 = vmatpush3.bf16.msra.mxu1 %v4923_v30 }
 0x3d4   : > { %2743 = vmatmul.mubr.f32.vlgmr.msra.gmra.mrb[16].mxu0 %v6321_v34 }
 0x3d5   : > { %4223 = vmatmul.mubr.f32.vlgmr.msra.gmra.mrb[14].mxu1 %v6561_v58  ;;  %2747 = vmatprep.mubr.f32.mxu0 %v6345_v1 }
 0x3d6   : > { %2901 = vmatprep.mubr.f32.mxu1 %v7434_v3 }
 0x3d8   : > { %2748 = vmatmul.mubr.f32.gmra.mrb[18].mxu0 %v6355_v21  ;;  %v2829_v21 = vld [vmem:[%s7422_s4 + $0x8] sm:$0xff] }
 0x3d9   : > { %4229 = vmatprep.mubr.msk.f32.mxu0 %vm2830_vm4, %v2828_v15 }
 0x426   : > { %v2205_v55 = vpop.f32.mrb[8].mxu0  ;;  %v2359_v44 = vpop.f32.mrb[6].mxu1 }
 0x427   : > { %v2207_v6 = vpop.f32.mrb[9].mxu0  ;;  %v7252_v39 = vpop.f32.mrb[7].mxu1 }
 0x42a   : > { %v2211_v34 = vpop.f32.mrb[10].mxu0  ;;  %v2365_v58 = vpop.f32.mrb[8].mxu1 }
 0x42b   : > { %v4929_v16 = vpack.c.bf16 %v2211_v34, %v2205_v55  ;;  %v4931_v1 = vpack.c.bf16 %v2365_v58, %v2359_v44  ;;  %v2213_v22 = vpop.f32.mrb[11].mxu0  ;;  %v7254_v33 = vpop.f32.mrb[9].mxu1 }
 0x42c   : > { %v4927_v38 = vpack.c.bf16 %v2213_v22, %v2207_v6 }
 0x42d   : > { %4932 = vmatprep.subr.bf16.mxu0 %v4931_v1 }
 0x42e   : > { %4928 = vmatprep.subr.bf16.mxu1 %v4927_v38  ;;  %4934 = vmatpush3.bf16.msra.mxu0 %v4931_v1 }
 0x42f   : > { %4930 = vmatpush1.bf16.msra.mxu1 %v4929_v16 }
 0x431   : > { %4230 = vmatmul.mubr.msk.f32.vlgmr.msra.gmra.mrb[20].mxu0 %vm2830_vm4, %v2829_v21 }
 0x432   : > { %3833 = vmatmul.mubr.msk.f32.vlgmr.msra.gmra.mrb[16].mxu1 %vm2830_vm4, %v2828_v15  ;;  %3062 = vmatprep.mubr.f32.mxu0 %v7434_v3 }
 0x433   : > { %2907 = vmatprep.mubr.f32.mxu1 %v7434_v3 }
 0x436   : > { %3834 = vmatmul.mubr.msk.f32.gmra.mrb[18].mxu1 %vm2830_vm4, %v2829_v21 }
 0x437   : > { %4236 = vmatprep.mubr.msk.f32.mxu1 %vm2830_vm4, %v3837_v40 }
 0x487   : > { %v7268_v29 = vpop.f32.mrb[12].mxu0 }
 0x488   : > { %v2667_v48 = vpop.f32.mrb[10].mxu1  ;;  %v7270_v25 = vpop.f32.mrb[13].mxu0 }
 0x489   : > { %v2669_v20 = vpop.f32.mrb[11].mxu1 }
 0x48b   : > { %v7272_v49 = vpop.f32.mrb[14].mxu0 }
 0x48c   : > { %v2673_v42 = vpop.f32.mrb[12].mxu1  ;;  %v2521_v51 = vpop.f32.mrb[15].mxu0 }
 0x48d   : > { %v4937_v53 = vpack.c.bf16 %v2673_v42, %v2667_v48  ;;  %v2675_v13 = vpop.f32.mrb[13].mxu1 }
 0x48e   : > { %v4935_v24 = vpack.c.bf16 %v2675_v13, %v2669_v20 }
 0x490   : > { %4936 = vmatprep.subr.bf16.mxu0 %v4935_v24 }
 0x491   : > { %4938 = vmatpush1.bf16.msra.mxu0 %v4937_v53 }
 0x492   : > { %4944 = vmatprep.subr.bf16.mxu0 %v5542_v45 }
 0x494   : > { %3839 = vmatmul.mubr.msk.f32.vlgmr.msra.gmra.mrb[22].mxu0 %vm2830_vm4, %v3837_v40 }
 0x495   : > { %3068 = vmatprep.mubr.f32.mxu0 %v7434_v3  ;;  %4946 = vmatpush3.bf16.msra.mxu0 %v5566_v54 }
 0x496   : > { %4948 = vmatprep.subr.bf16.mxu0 %v5572_v57 }
 0x498   : > { %3840 = vmatmul.mubr.msk.f32.gmra.mrb[24].mxu0 %vm2830_vm4, %v3838_v31 }
 0x499   : > { %4950 = vmatpush3.bf16.msra.mxu0 %v5588_v61 }
 0x49a   : > { %4952 = vmatprep.subr.bf16.mxu0 %v5615_v4 }
 0x49d   : > { %4954 = vmatpush3.bf16.msra.mxu0 %v5628_v10 }
 0x49e   : > { %4956 = vmatprep.subr.bf16.mxu0 %v5643_v14 }
 0x4a1   : > { %4958 = vmatpush3.bf16.msra.mxu0 %v5656_v19 }
 0x4a2   : > { %4960 = vmatprep.subr.bf16.mxu0 %v5671_v23 }
 0x4a5   : > { %4962 = vmatpush3.bf16.msra.mxu0 %v5684_v28  ;;  %v5093_v28 = vld [vmem:[%s7428_s10 + $0x8] sm:$0xff] }
 0x4a6   : > { %4964 = vmatprep.subr.bf16.mxu0 %v5699_v32  ;;  %v7435_v32 = vmov 0.0|0.0  }
 0x4a7   : > { %v3983_v45 = vpop.f32.mrb[16].mxu0 }
 0x4a8   : > { %v4224_v54 = vpop.f32.mrb[14].mxu1  ;;  %v3984_v57 = vpop.f32.mrb[17].mxu0 }
 0x4a9   : > { %v3985_v7 = vadd.f32 %v3984_v57, %v3983_v45  ;;  %v2819_v8 = vpop.f32.mrb[15].mxu1  ;;  %4966 = vmatpush3.bf16.msra.mxu0 %v5712_v37 }
 0x4aa   : > { %4968 = vmatprep.subr.bf16.mxu0 %v5727_v41 }
 0x4ab   : > { %v2820_v61 = vadd.f32 %v3985_v7, %v2819_v8  ;;  %v3986_v4 = vpop.f32.mrb[18].mxu0 }
 0x4ac   : > { %v3987_v10 = vpop.f32.mrb[19].mxu0 }
 0x4ad   : > { %v3988_v14 = vadd.f32 %v3987_v10, %v3986_v4  ;;  %4970 = vmatpush3.bf16.msra.mxu0 %v5740_v47 }
 0x4ae   : > { %4972 = vmatprep.subr.bf16.mxu0 %v5753_v50 }
 0x4af   : > { %v2825_v19 = vadd.f32 %v4224_v54, %v3988_v14 }
 0x4b1   : > { %v4939_v23 = vpack.c.bf16 %v2825_v19, %v2820_v61  ;;  %4974 = vmatpush3.bf16.msra.mxu0 %v5762_v56  ;;  %v3843_v56 = vld [vmem:[%s7423_s5 + $0x1] ss:$2 sm:$0x7] }
 0x4b2   : > { %3395 = vmatprep.subr.mxu0 %v5093_v28  ;;  %v3162_v5 = vrot.slane %v3843_v56, %v5769_v62  ;;  %v3166_v35 = vrot.slane %v3843_v56, %v5778_v2 }
 0x4b3   : > { %4940 = vmatprep.subr.bf16.mxu1 %v4939_v23 }
 0x4b4   : > { %4942 = vmatpush3.bf16.msra.mxu1 %v4939_v23 }
 0x4b5   : > { %4975 = vmatprep.subr.bf16.mxu1 %v7435_v32 }
 0x4b7   : > { %4237 = vmatmul.mubr.msk.f32.vlgmr.msra.gmra.mrb[20].mxu1 %vm2830_vm4, %v3838_v31 }
 0x4b8   : > { %4977 = vmatpush3.bf16.msra.mxu1 %v5560_v52  ;;  %4271 = vmatprep.mubr.msk.f32.mxu1 %vm5106_vm1, %v7434_v3 }
 0x4b9   : > { %4978 = vmatprep.subr.bf16.mxu1 %v7435_v32 }
 0x4bc   : > { %4980 = vmatpush3.bf16.msra.mxu1 %v5585_v60 }
 0x4bd   : > { %4981 = vmatprep.subr.bf16.mxu1 %v7435_v32 }
 0x4c0   : > { %4983 = vmatpush3.bf16.msra.mxu1 %v5600_v0 }
 0x4c1   : > { %4984 = vmatprep.subr.bf16.mxu1 %v7435_v32 }
 0x4c4   : > { %4986 = vmatpush3.bf16.msra.mxu1 %v5626_v9 }
 0x4c5   : > { %4987 = vmatprep.subr.bf16.mxu1 %v7435_v32 }
 0x4c8   : > { %4989 = vmatpush3.bf16.msra.mxu1 %v5654_v18 }
 0x4c9   : > { %4990 = vmatprep.subr.bf16.mxu1 %v7435_v32 }
 0x4cc   : > { %4992 = vmatpush3.bf16.msra.mxu1 %v5682_v27 }
 0x4cd   : > { %4993 = vmatprep.subr.bf16.mxu1 %v7435_v32 }
 0x4d0   : > { %4995 = vmatpush3.bf16.msra.mxu1 %v5710_v36 }
 0x4d1   : > { %4996 = vmatprep.subr.bf16.mxu1 %v7435_v32 }
 0x4d4   : > { %4998 = vmatpush3.bf16.msra.mxu1 %v5738_v46 }
 0x4d5   : > { %4274 = vmatprep.subr.mxu1 %v7434_v3 }
 0x504   : > { %v4231_v52 = vpop.f32.mrb[20].mxu0 }
 0x505   : > { %v7319_v60 = vadd.f32 %v4231_v52, %v2521_v51  ;;  %v2903_v0 = vpop.f32.mrb[16].mxu1  ;;  %v2980_v9 = vpop.f32.mrb[21].mxu0 }
 0x506   : > { %v2904_v18 = vadd.f32 %v2903_v0, %v7252_v39  ;;  %v7323_v37 = vadd.f32 %v2980_v9, %v7270_v25  ;;  %v2905_v27 = vpop.f32.mrb[17].mxu1  ;;  %v5094_v9 = vld [vmem:[%s7428_s10] sm:$0xff] }
 0x507   : > { %v2906_v41 = vadd.f32 %v2905_v27, %v7268_v29 }
 0x509   : > { %v2909_v36 = vpop.f32.mrb[18].mxu1 }
 0x50a   : > { %v2910_v47 = vadd.f32 %v2909_v36, %v7254_v33  ;;  %v2911_v50 = vpop.f32.mrb[19].mxu1 }
 0x50b   : > { %v2912_v46 = vadd.f32 %v2911_v50, %v7272_v49 }
 0x567   : > { %v3064_v17 = vpop.f32.mrb[22].mxu0 }
 0x568   : > { %v3150_v12 = vadd.f32 %v3064_v17, %v2904_v18  ;;  %v3066_v26 = vpop.f32.mrb[23].mxu0  ;;  %v3170_v18 = vrot.slane %v3843_v56, %v5772_v63 }
 0x569   : > { %v3151_v11 = vadd.f32 %v3066_v26, %v2906_v41 }
 0x56a   : > { %v7333_v43 = vadd.f32 %v3162_v5, %v3150_v12 }
 0x56b   : > { %v3070_v30 = vpop.f32.mrb[24].mxu0  ;;  %v7335_v44 = vadd.f32 %v3166_v35, %v3151_v11 }
 0x56c   : > { %v3153_v15 = vadd.f32 %v3070_v30, %v2910_v47  ;;  %v3072_v55 = vpop.f32.mrb[25].mxu0  ;;  %v3204_v58 = vmul.f32 %v7333_v43, %v7333_v43 }
 0x56d   : > { %v3154_v6 = vadd.f32 %v3072_v55, %v2912_v46  ;;  %v3205_v22 = vmul.f32 %v7335_v44, %v7335_v44 }
 0x56e   : > { %v7337_v39 = vadd.f32 %v3162_v5, %v3153_v15 }
 0x56f   : > { %v7339_v34 = vadd.f32 %v3166_v35, %v3154_v6 }
 0x570   : > { %v3183_v16 = vadd.f32 %v7337_v39, %v7333_v43  ;;  %v3207_v1 = vmul.f32 %v7337_v39, %v7337_v39 }
 0x571   : > { %v3190_v33 = vadd.f32 %v7339_v34, %v7335_v44  ;;  %v3208_v38 = vmul.f32 %v7339_v34, %v7339_v34 }
 0x572   : > { %v3184_v21 = vrot.slane %v3183_v16, 4  ;;  %v3210_v40 = vadd.f32 %v3207_v1, %v3204_v58 }
 0x573   : > { %v3191_v29 = vrot.slane %v3190_v33, 4  ;;  %v3217_v48 = vadd.f32 %v3208_v38, %v3205_v22 }
 0x574   : > { %v3185_v25 = vadd.f32 %v3184_v21, %v3183_v16  ;;  %v3211_v20 = vrot.slane %v3210_v40, 4 }
 0x575   : > { %v3192_v49 = vadd.f32 %v3191_v29, %v3190_v33  ;;  %v3218_v42 = vrot.slane %v3217_v48, 4  ;;  %v5095_v33 = vld [vmem:[%s7428_s10 + $0x10] sm:$0xff] }
 0x576   : > { %v3186_v51 = vrot.slane %v3185_v25, 2  ;;  %v3212_v53 = vadd.f32 %v3211_v20, %v3210_v40 }
 0x577   : > { %v3193_v13 = vrot.slane %v3192_v49, 2  ;;  %v3219_v24 = vadd.f32 %v3218_v42, %v3217_v48 }
 0x578   : > { %v3187_v31 = vadd.f32 %v3186_v51, %v3185_v25  ;;  %v3213_v45 = vrot.slane %v3212_v53, 2 }
 0x579   : > { %v3194_v54 = vadd.f32 %v3193_v13, %v3192_v49  ;;  %v3220_v57 = vrot.slane %v3219_v24, 2 }
 0x57a   : > { %v3214_v7 = vadd.f32 %v3213_v45, %v3212_v53  ;;  %v3188_v4 = vrot.slane %v3187_v31, 1 }
 0x57b   : > { %v3195_v8 = vrot.slane %v3194_v54, 1  ;;  %v3221_v61 = vadd.f32 %v3220_v57, %v3219_v24  ;;  %v3844_v57 = vld [vmem:[%s7425_s7 + $0x1] ss:$2 sm:$0x7] }
 0x57c   : > { %v3215_v10 = vrot.slane %v3214_v7, 1  ;;  %v3189_v32 = vadd.f32 %v3188_v4, %v3187_v31  ;;  %v3598_v59 = vrot.slane %v3844_v57, %v5769_v62 }
 0x57d   : > { %v3222_v14 = vrot.slane %v3221_v61, 1  ;;  %v3196_v23 = vadd.f32 %v3195_v8, %v3194_v54  ;;  %v3180_v54 = vld [vmem:[%s7425_s7] ss:$2 sm:$0x7] }
 0x57e   : > { %v3216_v19 = vadd.f32 %v3215_v10, %v3214_v7  ;;  %v3576_v8 = vrot.slane %v3180_v54, %v5769_v62 }
 0x57f   : > { %v3223_v28 = vadd.f32 %v3222_v14, %v3221_v61  ;;  %v3584_v14 = vrot.slane %v3180_v54, %v5772_v63 }
 0x580   : > { %v3231_v0 = vsel %vm1080_vm2, %v3189_v32, %v3216_v19 }
 0x581   : > { %v3232_v52 = vsel %vm1080_vm2, %v3196_v23, %v3223_v28 }
 0x582   : > { %3298 = vmatprep.mubr.f32.mxu0 %v3232_v52  ;;  %v3606_v52 = vrot.slane %v3844_v57, %v5772_v63 }
 0x583   : > { %3299 = vmatmul.mubr.f32.vlgmr.msra.gmra.mrb[26].mxu0 %v3231_v0 }
 0x584   : > { %3396 = vmatpush1.msra.mxu0 %v5094_v9  ;;  %3459 = vmatprep.mubr.f32.mxu0 %v7434_v3 }
 0x58a   : > { %v4238_v27 = vpop.f32.mrb[20].mxu1 }
 0x58b   : > { %v3155_v41 = vadd.f32 %v4238_v27, %v7319_v60  ;;  %v3141_v36 = vpop.f32.mrb[21].mxu1 }
 0x58c   : > { %v3152_v47 = vadd.f32 %v3141_v36, %v7323_v37 }
 0x58d   : > { %v7364_v50 = vadd.f32 %v3170_v18, %v3155_v41 }
 0x58e   : > { %v7366_v46 = vadd.f32 %v3170_v18, %v3152_v47 }
 0x58f   : > { %v3209_v17 = vmul.f32 %v7364_v50, %v7364_v50 }
 0x590   : > { %v3197_v12 = vadd.f32 %v7364_v50, %v7366_v46  ;;  %v3206_v5 = vmul.f32 %v7366_v46, %v7366_v46 }
 0x592   : > { %v3198_v56 = vrot.slane %v3197_v12, 4  ;;  %v3224_v26 = vadd.f32 %v3209_v17, %v3206_v5 }
 0x594   : > { %v3199_v11 = vadd.f32 %v3198_v56, %v3197_v12  ;;  %v3225_v60 = vrot.slane %v3224_v26, 4  ;;  %v3580_v12 = vrot.slane %v3180_v54, %v5778_v2 }
 0x596   : > { %v3200_v35 = vrot.slane %v3199_v11, 2  ;;  %v3226_v30 = vadd.f32 %v3225_v60, %v3224_v26 }
 0x598   : > { %v3201_v37 = vadd.f32 %v3200_v35, %v3199_v11  ;;  %v3227_v15 = vrot.slane %v3226_v30, 2 }
 0x59a   : > { %v3202_v55 = vrot.slane %v3201_v37, 1  ;;  %v3228_v6 = vadd.f32 %v3227_v15, %v3226_v30 }
 0x59c   : > { %v3229_v58 = vrot.slane %v3228_v6, 1  ;;  %v3203_v16 = vadd.f32 %v3202_v55, %v3201_v37 }
 0x59e   : > { %v3230_v1 = vadd.f32 %v3229_v58, %v3228_v6 }
 0x5a0   : > { %v3233_v22 = vsel %vm1080_vm2, %v3203_v16, %v3230_v1 }
 0x5a1   : > { %4272 = vmatmul.mubr.f32.vlgmr.msra.gmra.mrb[22].mxu1 %v3233_v22 }
 0x5a2   : > { %4275 = vmatpush3.msra.mxu1 %v5095_v33  ;;  %4276 = vmatprep.mubr.msk.f32.mxu1 %vm5106_vm1, %v7434_v3 }
 0x656   : > { %v4047_v38 = vpop.f32.mrb[26].mxu0 }
 0x657   : > { %v4048_v21 = vpop.f32.mrb[27].mxu0 }
 0x658   : > { %v4049_v40 = vadd.f32 %v4048_v21, %v4047_v38 }
 0x674   : > { %v3370_v29 = vpop.f32.mrb[22].mxu1 }
 0x675   : > { %v3371_v48 = vadd.f32 %v4049_v40, %v3370_v29  ;;  %v4273_v25 = vpop.f32.mrb[23].mxu1 }
 0x677   : > { %v3374_v20 = vmul.f32 0.001953125, %v3371_v48 }
 0x679   : > { %v3375_v49 = vmul.f32 %v3374_v20, %v3374_v20  ;;  %v3386_v31 = vrot.slane %v3374_v20, %v5769_v62 }
 0x67b   : > { %v3377_v42 = vrot.slane %v3375_v49, 7 }
 0x67d   : > { %v3379_v51 = vsub.f32 %v3374_v20, %v3377_v42 }
 0x67f   : > { %v3380_v53 = vmax.f32 %v3379_v51, 0.0 }
 0x681   : > { %v3381_v13 = vadd.f32 1e-05, %v3380_v53 }
 0x683   : > { %5067 = vrsqrt.f32 %v3381_v13 }
 0x68d   : > { %v5068_v24 = vpop.eup %5067 }
 0x68e   : > { %v3390_v45 = vrot.slane %v5068_v24, %v5778_v2 }
 0x690   : > { %v3391_v3 = vsel %vm1080_vm2, %v3386_v31, %v3390_v45 }
 0x691   : > { %3845 = vmatmul.mubr.msk.f32.vlgmr.msra.gmra.mrb[28].mxu0 %vm1293_vm3, %v3391_v3  ;;  %4277 = vmatmul.mubr.msk.f32.vlgmr.msra.gmra.mrb[24].mxu1 %vm1293_vm3, %v3391_v3 }
 0x764   : > { %v3461_v7 = vpop.f32.mrb[28].mxu0  ;;  %v3532_v61 = vpop.f32.mrb[24].mxu1 }
 0x765   : > { %v3539_v4 = vrot.slane %v3461_v7, %v5769_v62  ;;  %v3547_v10 = vrot.slane %v3532_v61, %v5769_v62  ;;  %v3463_v19 = vpop.f32.mrb[29].mxu0  ;;  %v4278_v23 = vpop.f32.mrb[25].mxu1  ;;  %v3557_v28 = vrot.slane %v3461_v7, %v5778_v2  ;;  %v3565_v32 = vrot.slane %v3532_v61, %v5778_v2 }
 0x766   : > { %v3543_v0 = vrot.slane %v3463_v19, %v5769_v62  ;;  %v3561_v17 = vrot.slane %v3463_v19, %v5778_v2 }
 0x767   : > { %v3548_v9 = vsub.f32 %v7333_v43, %v3539_v4  ;;  %v3551_v18 = vsub.f32 %v7337_v39, %v3539_v4  ;;  %v3550_v27 = vsub.f32 %v7366_v46, %v3547_v10  ;;  %v3553_v41 = vsub.f32 %v7364_v50, %v3547_v10 }
 0x768   : > { %v3549_v36 = vsub.f32 %v7335_v44, %v3543_v0  ;;  %v3552_v47 = vsub.f32 %v7339_v34, %v3543_v0  ;;  %v3602_v39 = vrot.slane %v3844_v57, %v5778_v2 }
 0x769   : > { %v3566_v5 = vmul.f32 %v3557_v28, %v3548_v9  ;;  %v3569_v63 = vmul.f32 %v3557_v28, %v3551_v18  ;;  %v3568_v56 = vmul.f32 %v3565_v32, %v3550_v27  ;;  %v3571_v62 = vmul.f32 %v3565_v32, %v3553_v41 }
 0x76a   : > { %v3567_v26 = vmul.f32 %v3561_v17, %v3549_v36  ;;  %v3570_v43 = vmul.f32 %v3561_v17, %v3552_v47 }
 0x76b   : > { %v3588_v11 = vmul.f32 %v3576_v8, %v3566_v5  ;;  %v3591_v46 = vmul.f32 %v3576_v8, %v3569_v63  ;;  %v3590_v60 = vmul.f32 %v3584_v14, %v3568_v56  ;;  %v3593_v50 = vmul.f32 %v3584_v14, %v3571_v62 }
 0x76c   : > { %v3589_v35 = vmul.f32 %v3580_v12, %v3567_v26  ;;  %v3592_v44 = vmul.f32 %v3580_v12, %v3570_v43 }
 0x76d   : > { %v3610_v30 = vadd.f32 %v3598_v59, %v3588_v11  ;;  %v3613_v34 = vadd.f32 %v3598_v59, %v3591_v46  ;;  %v3612_v37 = vadd.f32 %v3606_v52, %v3590_v60  ;;  %v3615_v15 = vadd.f32 %v3606_v52, %v3593_v50 }
 0x76e   : > { %v3611_v55 = vadd.f32 %v3602_v39, %v3589_v35  ;;  %v3614_v6 = vadd.f32 %v3602_v39, %v3592_v44 }
 0x76f   : > { %v3847_v58 = vmul.f32 -1.442695, %v3610_v30  ;;  %v3850_v16 = vmul.f32 -1.442695, %v3613_v34  ;;  %v3849_v1 = vmul.f32 -1.442695, %v3612_v37 }
 0x770   : > { %v3852_v22 = vmul.f32 -1.442695, %v3615_v15  ;;  %v3848_v33 = vmul.f32 -1.442695, %v3611_v55  ;;  %v3851_v2 = vmul.f32 -1.442695, %v3614_v6 }
 0x771   : > { %5069 = vpow2.f32 %v3847_v58 }
 0x772   : > { %5071 = vpow2.f32 %v3850_v16 }
 0x773   : > { %5073 = vpow2.f32 %v3849_v1 }
 0x774   : > { %5075 = vpow2.f32 %v3852_v22 }
 0x775   : > { %5077 = vpow2.f32 %v3848_v33 }
 0x776   : > { %5079 = vpow2.f32 %v3851_v2 }
 0x77b   : > { %v5070_v38 = vpop.eup %5069 }
 0x77c   : > { %v5072_v21 = vpop.eup %5071  ;;  %v3634_v40 = vadd.f32 1.0, %v5070_v38 }
 0x77d   : > { %v5074_v29 = vpop.eup %5073  ;;  %v3637_v48 = vadd.f32 1.0, %v5072_v21 }
 0x77e   : > { %v5076_v25 = vpop.eup %5075  ;;  %5081 = vrcp.f32 %v3634_v40  ;;  %v3636_v20 = vadd.f32 1.0, %v5074_v29 }
 0x77f   : > { %v5078_v49 = vpop.eup %5077  ;;  %5083 = vrcp.f32 %v3637_v48  ;;  %v3639_v42 = vadd.f32 1.0, %v5076_v25 }
 0x780   : > { %v5080_v51 = vpop.eup %5079  ;;  %5085 = vrcp.f32 %v3636_v20  ;;  %v3635_v53 = vadd.f32 1.0, %v5078_v49 }
 0x781   : > { %5087 = vrcp.f32 %v3639_v42  ;;  %v3638_v13 = vadd.f32 1.0, %v5080_v51 }
 0x782   : > { %5089 = vrcp.f32 %v3635_v53 }
 0x783   : > { %5091 = vrcp.f32 %v3638_v13 }
 0x788   : > { %v5082_v24 = vpop.eup %5081 }
 0x789   : > { %v5084_v31 = vpop.eup %5083  ;;  %v3652_v45 = vmul.f32 %v5082_v24, %v3610_v30 }
 0x78a   : > { %v5086_v3 = vpop.eup %5085  ;;  %v3655_v54 = vmul.f32 %v5084_v31, %v3613_v34 }
 0x78b   : > { %v5088_v57 = vpop.eup %5087  ;;  %3658 = vst [vmem:[%s406_s28] sm:$0xff] %v3652_v45  ;;  %v3654_v7 = vmul.f32 %v5086_v3, %v3612_v37 }
 0x78c   : > { %v5090_v8 = vpop.eup %5089  ;;  %3661 = vst [vmem:[%s406_s28 + $0x18] sm:$0xff] %v3655_v54  ;;  %v3657_v61 = vmul.f32 %v5088_v57, %v3615_v15 }
 0x78d   : > { %v5092_v4 = vpop.eup %5091  ;;  %3660 = vst [vmem:[%s406_s28 + $0x10] sm:$0xff] %v3654_v7  ;;  %v3653_v59 = vmul.f32 %v5090_v8, %v3611_v55 }
 0x78e   : > { %3663 = vst [vmem:[%s406_s28 + $0x28] sm:$0xff] %v3657_v61  ;;  %v3656_v10 = vmul.f32 %v5092_v4, %v3614_v6 }
 0x78f   : > { %3659 = vst [vmem:[%s406_s28 + $0x8] sm:$0xff] %v3653_v59 }
 0x790   : > { %3662 = vst [vmem:[%s406_s28 + $0x20] sm:$0xff] %v3656_v10 }
 0x791 PF: > { %s21_s17 = sadd.s32 1, %s5102_s17  }
 0x792   : > { %p18_p4 = scmp.ge.s32.totalorder %s21_s17, 4  }
 0x794   :  { %20 = sbr.rel (!%p18_p4) target bundleno = 1 (0x1), region = 104 }

</bundles_post_ra>
